<compile_context>
chip_gen: v7x
topology: tpu7x:2x2x1
jax: 0.10.0
libtpu: 0.0.40
codegen_flags: <defaults>
</compile_context>

<pallas_src>
import numpy as np
import jax
import jax.numpy as jnp
from jax import lax
from jax.experimental import pallas as pl
from jax.experimental.pallas import tpu as pltpu


def _make_search_kernel(N, D, pos_params, neg_params, S_pad):
    """Kernel with all candidate shifts statically unrolled.

    pos_params / neg_params: tuples of (int_step k, alpha, 1/(N-k)) — Python
    constants baked into the kernel body.
    """
    S_pos = len(pos_params)

    def kernel(q2_ref, p2_ref, out_ref):
        # lane index for scattering each candidate's scalar into the output row
        lane = lax.broadcasted_iota(jnp.int32, (1, S_pad), 1)
        # row index for masking the last k rows of each candidate
        row = lax.broadcasted_iota(jnp.int32, (N, 1), 0)

        # un-shifted operands are the first N rows of the doubled buffers
        y_p = p2_ref[0:N, :]   # compare target for positive steps
        y_q = q2_ref[0:N, :]   # compare target for negative steps

        acc = jnp.zeros((1, S_pad), jnp.float32)

        def candidate(x2_ref, y, k, alpha, inv_n):
            # shifted[i] = alpha * X[(i+k) % N] + (1-alpha) * X[(i+k+1) % N]
            a = x2_ref[k:k + N, :]           # roll(X, -k)      (static slice)
            b = x2_ref[k + 1:k + 1 + N, :]   # roll(X, -k-1)    (static slice)
            diff = alpha * a + (1.0 - alpha) * b - y
            row_norm = jnp.sqrt(jnp.sum(diff * diff, axis=-1, keepdims=True))
            masked = jnp.where(row < (N - k), row_norm, 0.0)
            return jnp.sum(masked) * inv_n

        # positive steps: shift D_q, compare against D_p
        for s, (k, alpha, inv_n) in enumerate(pos_params):
            val = candidate(q2_ref, y_p, k, alpha, inv_n)
            acc = jnp.where(lane == s, val, acc)

        # negative steps: shift D_p, compare against D_q (norm is sign-invariant)
        for j, (k, alpha, inv_n) in enumerate(neg_params):
            val = candidate(p2_ref, y_q, k, alpha, inv_n)
            acc = jnp.where(lane == (S_pos + j), val, acc)

        out_ref[...] = acc   # single lane-dense (1, S_pad) store

    return kernel


def xy_searcher_forward(D_q, D_p, max_step=60, step_size=1):
    """Pallas version of XYSearcher.forward: returns (optimal_step, min_distance)."""
    D_q = jnp.asarray(D_q, jnp.float32)
    D_p = jnp.asarray(D_p, jnp.float32)
    N, D = D_q.shape

    pos_steps = np.arange(0, max_step, step_size)
    neg_steps = np.arange(1, max_step + 1, step_size)

    def make_params(vals):
        out = []
        for v in vals:
            v = float(abs(v))
            k = int(v)
            out.append((k, float(v - k), float(1.0 / (N - k))))
        return tuple(out)

    pos_params = make_params(pos_steps)
    neg_params = make_params(neg_steps)
    S_total = len(pos_params) + len(neg_params)
    S_pad = max(128, ((S_total + 127) // 128) * 128)   # lane-dense output width

    max_k = max(k for k, _, _ in (pos_params + neg_params))
    assert max_k <= N - 1, "max_step must be < number of rows N"

    kernel = _make_search_kernel(N, D, pos_params, neg_params, S_pad)
    vmem = pl.BlockSpec(memory_space=pltpu.MemorySpace.VMEM)

    @jax.jit
    def search(Q, P):
        Q2 = jnp.concatenate([Q, Q], axis=0)   # (2N, D): roll -> static slice
        P2 = jnp.concatenate([P, P], axis=0)
        dist_row = pl.pallas_call(
            kernel,
            out_shape=jax.ShapeDtypeStruct((1, S_pad), jnp.float32),
            in_specs=[vmem, vmem],
            out_specs=vmem,
        )(Q2, P2)
        dists = dist_row[0, :S_total]
        return jnp.argmin(dists), jnp.min(dists)

    idx, min_dist = search(D_q, D_p)
    jax.block_until_ready((idx, min_dist))

    steps = list(pos_steps) + [-s for s in neg_steps]
    return steps[int(idx)], float(min_dist)


def _reference_forward(D_q, D_p, max_step, step_size):
    """Pure-numpy replica of the PyTorch module (for verification)."""
    def calc(fq, fp):
        return float(np.linalg.norm(fq - fp, axis=-1).mean())

    def shift(Dq, Dp, step):
        N = Dq.shape[0]
        if step >= 0:
            k = int(step); a = step - k
            sh = a * np.roll(Dq, -k, 0) + (1 - a) * np.roll(Dq, -k - 1, 0)
            return calc(sh[:N - k], Dp[:N - k])
        step = abs(step); k = int(step); a = step - k
        sh = a * np.roll(Dp, -k, 0) + (1 - a) * np.roll(Dp, -k - 1, 0)
        return calc(Dq[:N - k], sh[:N - k])

    distances, steps = [], []
    for s in np.arange(0, max_step, step_size):
        distances.append(shift(D_q, D_p, s)); steps.append(s)
    for s in np.arange(1, max_step + 1, step_size):
        distances.append(shift(D_q, D_p, -s)); steps.append(-s)
    return steps[int(np.argmin(distances))], float(np.min(distances))


if __name__ == "__main__":
    # XYSearcher has no learnable parameters (empty __init__) — nothing to init.
    key = jax.random.PRNGKey(0)
    kq, kp = jax.random.split(key)
    N, D = 64, 32                      # small (N, D) feature sequences
    max_step, step_size = 6, 0.5       # exercises fractional (alpha != 0) shifts

    D_q = jax.random.normal(kq, (N, D), dtype=jnp.float32)
    # make D_p a noisy shifted copy of D_q so the search has a clear optimum
    D_p = jnp.roll(D_q, -3, axis=0) + 0.05 * jax.random.normal(kp, (N, D),
                                                               dtype=jnp.float32)

    step_opt, min_dist = xy_searcher_forward(D_q, D_p, max_step=max_step,
                                             step_size=step_size)

    step_ref, dist_ref = _reference_forward(np.asarray(D_q), np.asarray(D_p),
                                            max_step, step_size)
    assert float(step_opt) == float(step_ref), (step_opt, step_ref)
    np.testing.assert_allclose(min_dist, dist_ref, rtol=1e-3, atol=1e-4)

    print("KERNEL_OK")
</pallas_src>

<mosaic_0001>
module attributes {stable_mosaic.version = 11 : i64} {
  func.func @kernel(%arg0: memref<128x32xf32, #tpu.memory_space<vmem>>, %arg1: memref<128x32xf32, #tpu.memory_space<vmem>>, %arg2: memref<1x128xf32, #tpu.memory_space<vmem>>) attributes {dimension_semantics = [], scalar_prefetch = 0 : i64, scratch_operands = 0 : i64, tpu.core_type = #tpu.core_type<tc>} {
    %0 = tpu.iota {dimensions = array<i32: 1>} : vector<1x128xi32>
    %1 = tpu.iota {dimensions = array<i32: 0>} : vector<64x1xi32>
    %c0 = arith.constant 0 : index
    %c0_0 = arith.constant 0 : index
    %2 = vector.load %arg1[%c0, %c0_0] : memref<128x32xf32, #tpu.memory_space<vmem>>, vector<64x32xf32>
    %c0_1 = arith.constant 0 : index
    %c0_2 = arith.constant 0 : index
    %3 = vector.load %arg0[%c0_1, %c0_2] : memref<128x32xf32, #tpu.memory_space<vmem>>, vector<64x32xf32>
    %cst = arith.constant 0.000000e+00 : f32
    %4 = vector.broadcast %cst : f32 to vector<1x128xf32>
    %c0_3 = arith.constant 0 : index
    %c0_4 = arith.constant 0 : index
    %5 = vector.load %arg0[%c0_3, %c0_4] : memref<128x32xf32, #tpu.memory_space<vmem>>, vector<64x32xf32>
    %c1 = arith.constant 1 : index
    %c0_5 = arith.constant 0 : index
    %6 = vector.load %arg0[%c1, %c0_5] : memref<128x32xf32, #tpu.memory_space<vmem>>, vector<64x32xf32>
    %cst_6 = arith.constant 0.000000e+00 : f32
    %7 = vector.broadcast %cst_6 : f32 to vector<64x32xf32>
    %8 = arith.mulf %7, %5 : vector<64x32xf32>
    %cst_7 = arith.constant 1.000000e+00 : f32
    %9 = vector.broadcast %cst_7 : f32 to vector<64x32xf32>
    %10 = arith.mulf %9, %6 : vector<64x32xf32>
    %11 = arith.addf %8, %10 : vector<64x32xf32>
    %12 = arith.subf %11, %2 : vector<64x32xf32>
    %13 = arith.mulf %12, %12 : vector<64x32xf32>
    %cst_8 = arith.constant dense<0.000000e+00> : vector<64xf32>
    %14 = vector.multi_reduction <add>, %13, %cst_8 [1] : vector<64x32xf32> to vector<64xf32>
    %15 = vector.shape_cast %14 : vector<64xf32> to vector<64x1xf32>
    %16 = math.sqrt %15 : vector<64x1xf32>
    %c64_i32 = arith.constant 64 : i32
    %17 = vector.broadcast %c64_i32 : i32 to vector<64x1xi32>
    %18 = arith.cmpi slt, %1, %17 : vector<64x1xi32>
    %cst_9 = arith.constant 0.000000e+00 : f32
    %19 = vector.broadcast %cst_9 : f32 to vector<64x1xf32>
    %20 = arith.select %18, %16, %19 : vector<64x1xi1>, vector<64x1xf32>
    %21 = vector.shape_cast %20 : vector<64x1xf32> to vector<1x64x1xf32>
    %cst_10 = arith.constant dense<0.000000e+00> : vector<1xf32>
    %22 = vector.multi_reduction <add>, %21, %cst_10 [1, 2] : vector<1x64x1xf32> to vector<1xf32>
    %23 = vector.shape_cast %22 : vector<1xf32> to vector<1x1x1xf32>
    %24 = vector.extract %23[0, 0, 0] : f32 from vector<1x1x1xf32>
    %cst_11 = arith.constant 1.562500e-02 : f32
    %25 = arith.mulf %24, %cst_11 : f32
    %c0_i32 = arith.constant 0 : i32
    %26 = vector.broadcast %c0_i32 : i32 to vector<1x128xi32>
    %27 = arith.cmpi eq, %0, %26 : vector<1x128xi32>
    %28 = vector.broadcast %25 : f32 to vector<1x128xf32>
    %29 = arith.select %27, %28, %4 : vector<1x128xi1>, vector<1x128xf32>
    %c0_12 = arith.constant 0 : index
    %c0_13 = arith.constant 0 : index
    %30 = vector.load %arg0[%c0_12, %c0_13] : memref<128x32xf32, #tpu.memory_space<vmem>>, vector<64x32xf32>
    %c1_14 = arith.constant 1 : index
    %c0_15 = arith.constant 0 : index
    %31 = vector.load %arg0[%c1_14, %c0_15] : memref<128x32xf32, #tpu.memory_space<vmem>>, vector<64x32xf32>
    %cst_16 = arith.constant 5.000000e-01 : f32
    %32 = vector.broadcast %cst_16 : f32 to vector<64x32xf32>
    %33 = arith.mulf %32, %30 : vector<64x32xf32>
    %cst_17 = arith.constant 5.000000e-01 : f32
    %34 = vector.broadcast %cst_17 : f32 to vector<64x32xf32>
    %35 = arith.mulf %34, %31 : vector<64x32xf32>
    %36 = arith.addf %33, %35 : vector<64x32xf32>
    %37 = arith.subf %36, %2 : vector<64x32xf32>
    %38 = arith.mulf %37, %37 : vector<64x32xf32>
    %cst_18 = arith.constant dense<0.000000e+00> : vector<64xf32>
    %39 = vector.multi_reduction <add>, %38, %cst_18 [1] : vector<64x32xf32> to vector<64xf32>
    %40 = vector.shape_cast %39 : vector<64xf32> to vector<64x1xf32>
    %41 = math.sqrt %40 : vector<64x1xf32>
    %c64_i32_19 = arith.constant 64 : i32
    %42 = vector.broadcast %c64_i32_19 : i32 to vector<64x1xi32>
    %43 = arith.cmpi slt, %1, %42 : vector<64x1xi32>
    %cst_20 = arith.constant 0.000000e+00 : f32
    %44 = vector.broadcast %cst_20 : f32 to vector<64x1xf32>
    %45 = arith.select %43, %41, %44 : vector<64x1xi1>, vector<64x1xf32>
    %46 = vector.shape_cast %45 : vector<64x1xf32> to vector<1x64x1xf32>
    %cst_21 = arith.constant dense<0.000000e+00> : vector<1xf32>
    %47 = vector.multi_reduction <add>, %46, %cst_21 [1, 2] : vector<1x64x1xf32> to vector<1xf32>
    %48 = vector.shape_cast %47 : vector<1xf32> to vector<1x1x1xf32>
    %49 = vector.extract %48[0, 0, 0] : f32 from vector<1x1x1xf32>
    %cst_22 = arith.constant 1.562500e-02 : f32
    %50 = arith.mulf %49, %cst_22 : f32
    %c1_i32 = arith.constant 1 : i32
    %51 = vector.broadcast %c1_i32 : i32 to vector<1x128xi32>
    %52 = arith.cmpi eq, %0, %51 : vector<1x128xi32>
    %53 = vector.broadcast %50 : f32 to vector<1x128xf32>
    %54 = arith.select %52, %53, %29 : vector<1x128xi1>, vector<1x128xf32>
    %c1_23 = arith.constant 1 : index
    %c0_24 = arith.constant 0 : index
    %55 = vector.load %arg0[%c1_23, %c0_24] : memref<128x32xf32, #tpu.memory_space<vmem>>, vector<64x32xf32>
    %c2 = arith.constant 2 : index
    %c0_25 = arith.constant 0 : index
    %56 = vector.load %arg0[%c2, %c0_25] : memref<128x32xf32, #tpu.memory_space<vmem>>, vector<64x32xf32>
    %cst_26 = arith.constant 0.000000e+00 : f32
    %57 = vector.broadcast %cst_26 : f32 to vector<64x32xf32>
    %58 = arith.mulf %57, %55 : vector<64x32xf32>
    %cst_27 = arith.constant 1.000000e+00 : f32
    %59 = vector.broadcast %cst_27 : f32 to vector<64x32xf32>
    %60 = arith.mulf %59, %56 : vector<64x32xf32>
    %61 = arith.addf %58, %60 : vector<64x32xf32>
    %62 = arith.subf %61, %2 : vector<64x32xf32>
    %63 = arith.mulf %62, %62 : vector<64x32xf32>
    %cst_28 = arith.constant dense<0.000000e+00> : vector<64xf32>
    %64 = vector.multi_reduction <add>, %63, %cst_28 [1] : vector<64x32xf32> to vector<64xf32>
    %65 = vector.shape_cast %64 : vector<64xf32> to vector<64x1xf32>
    %66 = math.sqrt %65 : vector<64x1xf32>
    %c63_i32 = arith.constant 63 : i32
    %67 = vector.broadcast %c63_i32 : i32 to vector<64x1xi32>
    %68 = arith.cmpi slt, %1, %67 : vector<64x1xi32>
    %cst_29 = arith.constant 0.000000e+00 : f32
    %69 = vector.broadcast %cst_29 : f32 to vector<64x1xf32>
    %70 = arith.select %68, %66, %69 : vector<64x1xi1>, vector<64x1xf32>
    %71 = vector.shape_cast %70 : vector<64x1xf32> to vector<1x64x1xf32>
    %cst_30 = arith.constant dense<0.000000e+00> : vector<1xf32>
    %72 = vector.multi_reduction <add>, %71, %cst_30 [1, 2] : vector<1x64x1xf32> to vector<1xf32>
    %73 = vector.shape_cast %72 : vector<1xf32> to vector<1x1x1xf32>
    %74 = vector.extract %73[0, 0, 0] : f32 from vector<1x1x1xf32>
    %cst_31 = arith.constant 0.0158730168 : f32
    %75 = arith.mulf %74, %cst_31 : f32
    %c2_i32 = arith.constant 2 : i32
    %76 = vector.broadcast %c2_i32 : i32 to vector<1x128xi32>
    %77 = arith.cmpi eq, %0, %76 : vector<1x128xi32>
    %78 = vector.broadcast %75 : f32 to vector<1x128xf32>
    %79 = arith.select %77, %78, %54 : vector<1x128xi1>, vector<1x128xf32>
    %c1_32 = arith.constant 1 : index
    %c0_33 = arith.constant 0 : index
    %80 = vector.load %arg0[%c1_32, %c0_33] : memref<128x32xf32, #tpu.memory_space<vmem>>, vector<64x32xf32>
    %c2_34 = arith.constant 2 : index
    %c0_35 = arith.constant 0 : index
    %81 = vector.load %arg0[%c2_34, %c0_35] : memref<128x32xf32, #tpu.memory_space<vmem>>, vector<64x32xf32>
    %cst_36 = arith.constant 5.000000e-01 : f32
    %82 = vector.broadcast %cst_36 : f32 to vector<64x32xf32>
    %83 = arith.mulf %82, %80 : vector<64x32xf32>
    %cst_37 = arith.constant 5.000000e-01 : f32
    %84 = vector.broadcast %cst_37 : f32 to vector<64x32xf32>
    %85 = arith.mulf %84, %81 : vector<64x32xf32>
    %86 = arith.addf %83, %85 : vector<64x32xf32>
    %87 = arith.subf %86, %2 : vector<64x32xf32>
    %88 = arith.mulf %87, %87 : vector<64x32xf32>
    %cst_38 = arith.constant dense<0.000000e+00> : vector<64xf32>
    %89 = vector.multi_reduction <add>, %88, %cst_38 [1] : vector<64x32xf32> to vector<64xf32>
    %90 = vector.shape_cast %89 : vector<64xf32> to vector<64x1xf32>
    %91 = math.sqrt %90 : vector<64x1xf32>
    %c63_i32_39 = arith.constant 63 : i32
    %92 = vector.broadcast %c63_i32_39 : i32 to vector<64x1xi32>
    %93 = arith.cmpi slt, %1, %92 : vector<64x1xi32>
    %cst_40 = arith.constant 0.000000e+00 : f32
    %94 = vector.broadcast %cst_40 : f32 to vector<64x1xf32>
    %95 = arith.select %93, %91, %94 : vector<64x1xi1>, vector<64x1xf32>
    %96 = vector.shape_cast %95 : vector<64x1xf32> to vector<1x64x1xf32>
    %cst_41 = arith.constant dense<0.000000e+00> : vector<1xf32>
    %97 = vector.multi_reduction <add>, %96, %cst_41 [1, 2] : vector<1x64x1xf32> to vector<1xf32>
    %98 = vector.shape_cast %97 : vector<1xf32> to vector<1x1x1xf32>
    %99 = vector.extract %98[0, 0, 0] : f32 from vector<1x1x1xf32>
    %cst_42 = arith.constant 0.0158730168 : f32
    %100 = arith.mulf %99, %cst_42 : f32
    %c3_i32 = arith.constant 3 : i32
    %101 = vector.broadcast %c3_i32 : i32 to vector<1x128xi32>
    %102 = arith.cmpi eq, %0, %101 : vector<1x128xi32>
    %103 = vector.broadcast %100 : f32 to vector<1x128xf32>
    %104 = arith.select %102, %103, %79 : vector<1x128xi1>, vector<1x128xf32>
    %c2_43 = arith.constant 2 : index
    %c0_44 = arith.constant 0 : index
    %105 = vector.load %arg0[%c2_43, %c0_44] : memref<128x32xf32, #tpu.memory_space<vmem>>, vector<64x32xf32>
    %c3 = arith.constant 3 : index
    %c0_45 = arith.constant 0 : index
    %106 = vector.load %arg0[%c3, %c0_45] : memref<128x32xf32, #tpu.memory_space<vmem>>, vector<64x32xf32>
    %cst_46 = arith.constant 0.000000e+00 : f32
    %107 = vector.broadcast %cst_46 : f32 to vector<64x32xf32>
    %108 = arith.mulf %107, %105 : vector<64x32xf32>
    %cst_47 = arith.constant 1.000000e+00 : f32
    %109 = vector.broadcast %cst_47 : f32 to vector<64x32xf32>
    %110 = arith.mulf %109, %106 : vector<64x32xf32>
    %111 = arith.addf %108, %110 : vector<64x32xf32>
    %112 = arith.subf %111, %2 : vector<64x32xf32>
    %113 = arith.mulf %112, %112 : vector<64x32xf32>
    %cst_48 = arith.constant dense<0.000000e+00> : vector<64xf32>
    %114 = vector.multi_reduction <add>, %113, %cst_48 [1] : vector<64x32xf32> to vector<64xf32>
    %115 = vector.shape_cast %114 : vector<64xf32> to vector<64x1xf32>
    %116 = math.sqrt %115 : vector<64x1xf32>
    %c62_i32 = arith.constant 62 : i32
    %117 = vector.broadcast %c62_i32 : i32 to vector<64x1xi32>
    %118 = arith.cmpi slt, %1, %117 : vector<64x1xi32>
    %cst_49 = arith.constant 0.000000e+00 : f32
    %119 = vector.broadcast %cst_49 : f32 to vector<64x1xf32>
    %120 = arith.select %118, %116, %119 : vector<64x1xi1>, vector<64x1xf32>
    %121 = vector.shape_cast %120 : vector<64x1xf32> to vector<1x64x1xf32>
    %cst_50 = arith.constant dense<0.000000e+00> : vector<1xf32>
    %122 = vector.multi_reduction <add>, %121, %cst_50 [1, 2] : vector<1x64x1xf32> to vector<1xf32>
    %123 = vector.shape_cast %122 : vector<1xf32> to vector<1x1x1xf32>
    %124 = vector.extract %123[0, 0, 0] : f32 from vector<1x1x1xf32>
    %cst_51 = arith.constant 0.0161290318 : f32
    %125 = arith.mulf %124, %cst_51 : f32
    %c4_i32 = arith.constant 4 : i32
    %126 = vector.broadcast %c4_i32 : i32 to vector<1x128xi32>
    %127 = arith.cmpi eq, %0, %126 : vector<1x128xi32>
    %128 = vector.broadcast %125 : f32 to vector<1x128xf32>
    %129 = arith.select %127, %128, %104 : vector<1x128xi1>, vector<1x128xf32>
    %c2_52 = arith.constant 2 : index
    %c0_53 = arith.constant 0 : index
    %130 = vector.load %arg0[%c2_52, %c0_53] : memref<128x32xf32, #tpu.memory_space<vmem>>, vector<64x32xf32>
    %c3_54 = arith.constant 3 : index
    %c0_55 = arith.constant 0 : index
    %131 = vector.load %arg0[%c3_54, %c0_55] : memref<128x32xf32, #tpu.memory_space<vmem>>, vector<64x32xf32>
    %cst_56 = arith.constant 5.000000e-01 : f32
    %132 = vector.broadcast %cst_56 : f32 to vector<64x32xf32>
    %133 = arith.mulf %132, %130 : vector<64x32xf32>
    %cst_57 = arith.constant 5.000000e-01 : f32
    %134 = vector.broadcast %cst_57 : f32 to vector<64x32xf32>
    %135 = arith.mulf %134, %131 : vector<64x32xf32>
    %136 = arith.addf %133, %135 : vector<64x32xf32>
    %137 = arith.subf %136, %2 : vector<64x32xf32>
    %138 = arith.mulf %137, %137 : vector<64x32xf32>
    %cst_58 = arith.constant dense<0.000000e+00> : vector<64xf32>
    %139 = vector.multi_reduction <add>, %138, %cst_58 [1] : vector<64x32xf32> to vector<64xf32>
    %140 = vector.shape_cast %139 : vector<64xf32> to vector<64x1xf32>
    %141 = math.sqrt %140 : vector<64x1xf32>
    %c62_i32_59 = arith.constant 62 : i32
    %142 = vector.broadcast %c62_i32_59 : i32 to vector<64x1xi32>
    %143 = arith.cmpi slt, %1, %142 : vector<64x1xi32>
    %cst_60 = arith.constant 0.000000e+00 : f32
    %144 = vector.broadcast %cst_60 : f32 to vector<64x1xf32>
    %145 = arith.select %143, %141, %144 : vector<64x1xi1>, vector<64x1xf32>
    %146 = vector.shape_cast %145 : vector<64x1xf32> to vector<1x64x1xf32>
    %cst_61 = arith.constant dense<0.000000e+00> : vector<1xf32>
    %147 = vector.multi_reduction <add>, %146, %cst_61 [1, 2] : vector<1x64x1xf32> to vector<1xf32>
    %148 = vector.shape_cast %147 : vector<1xf32> to vector<1x1x1xf32>
    %149 = vector.extract %148[0, 0, 0] : f32 from vector<1x1x1xf32>
    %cst_62 = arith.constant 0.0161290318 : f32
    %150 = arith.mulf %149, %cst_62 : f32
    %c5_i32 = arith.constant 5 : i32
    %151 = vector.broadcast %c5_i32 : i32 to vector<1x128xi32>
    %152 = arith.cmpi eq, %0, %151 : vector<1x128xi32>
    %153 = vector.broadcast %150 : f32 to vector<1x128xf32>
    %154 = arith.select %152, %153, %129 : vector<1x128xi1>, vector<1x128xf32>
    %c3_63 = arith.constant 3 : index
    %c0_64 = arith.constant 0 : index
    %155 = vector.load %arg0[%c3_63, %c0_64] : memref<128x32xf32, #tpu.memory_space<vmem>>, vector<64x32xf32>
    %c4 = arith.constant 4 : index
    %c0_65 = arith.constant 0 : index
    %156 = vector.load %arg0[%c4, %c0_65] : memref<128x32xf32, #tpu.memory_space<vmem>>, vector<64x32xf32>
    %cst_66 = arith.constant 0.000000e+00 : f32
    %157 = vector.broadcast %cst_66 : f32 to vector<64x32xf32>
    %158 = arith.mulf %157, %155 : vector<64x32xf32>
    %cst_67 = arith.constant 1.000000e+00 : f32
    %159 = vector.broadcast %cst_67 : f32 to vector<64x32xf32>
    %160 = arith.mulf %159, %156 : vector<64x32xf32>
    %161 = arith.addf %158, %160 : vector<64x32xf32>
    %162 = arith.subf %161, %2 : vector<64x32xf32>
    %163 = arith.mulf %162, %162 : vector<64x32xf32>
    %cst_68 = arith.constant dense<0.000000e+00> : vector<64xf32>
    %164 = vector.multi_reduction <add>, %163, %cst_68 [1] : vector<64x32xf32> to vector<64xf32>
    %165 = vector.shape_cast %164 : vector<64xf32> to vector<64x1xf32>
    %166 = math.sqrt %165 : vector<64x1xf32>
    %c61_i32 = arith.constant 61 : i32
    %167 = vector.broadcast %c61_i32 : i32 to vector<64x1xi32>
    %168 = arith.cmpi slt, %1, %167 : vector<64x1xi32>
    %cst_69 = arith.constant 0.000000e+00 : f32
    %169 = vector.broadcast %cst_69 : f32 to vector<64x1xf32>
    %170 = arith.select %168, %166, %169 : vector<64x1xi1>, vector<64x1xf32>
    %171 = vector.shape_cast %170 : vector<64x1xf32> to vector<1x64x1xf32>
    %cst_70 = arith.constant dense<0.000000e+00> : vector<1xf32>
    %172 = vector.multi_reduction <add>, %171, %cst_70 [1, 2] : vector<1x64x1xf32> to vector<1xf32>
    %173 = vector.shape_cast %172 : vector<1xf32> to vector<1x1x1xf32>
    %174 = vector.extract %173[0, 0, 0] : f32 from vector<1x1x1xf32>
    %cst_71 = arith.constant 0.0163934417 : f32
    %175 = arith.mulf %174, %cst_71 : f32
    %c6_i32 = arith.constant 6 : i32
    %176 = vector.broadcast %c6_i32 : i32 to vector<1x128xi32>
    %177 = arith.cmpi eq, %0, %176 : vector<1x128xi32>
    %178 = vector.broadcast %175 : f32 to vector<1x128xf32>
    %179 = arith.select %177, %178, %154 : vector<1x128xi1>, vector<1x128xf32>
    %c3_72 = arith.constant 3 : index
    %c0_73 = arith.constant 0 : index
    %180 = vector.load %arg0[%c3_72, %c0_73] : memref<128x32xf32, #tpu.memory_space<vmem>>, vector<64x32xf32>
    %c4_74 = arith.constant 4 : index
    %c0_75 = arith.constant 0 : index
    %181 = vector.load %arg0[%c4_74, %c0_75] : memref<128x32xf32, #tpu.memory_space<vmem>>, vector<64x32xf32>
    %cst_76 = arith.constant 5.000000e-01 : f32
    %182 = vector.broadcast %cst_76 : f32 to vector<64x32xf32>
    %183 = arith.mulf %182, %180 : vector<64x32xf32>
    %cst_77 = arith.constant 5.000000e-01 : f32
    %184 = vector.broadcast %cst_77 : f32 to vector<64x32xf32>
    %185 = arith.mulf %184, %181 : vector<64x32xf32>
    %186 = arith.addf %183, %185 : vector<64x32xf32>
    %187 = arith.subf %186, %2 : vector<64x32xf32>
    %188 = arith.mulf %187, %187 : vector<64x32xf32>
    %cst_78 = arith.constant dense<0.000000e+00> : vector<64xf32>
    %189 = vector.multi_reduction <add>, %188, %cst_78 [1] : vector<64x32xf32> to vector<64xf32>
    %190 = vector.shape_cast %189 : vector<64xf32> to vector<64x1xf32>
    %191 = math.sqrt %190 : vector<64x1xf32>
    %c61_i32_79 = arith.constant 61 : i32
    %192 = vector.broadcast %c61_i32_79 : i32 to vector<64x1xi32>
    %193 = arith.cmpi slt, %1, %192 : vector<64x1xi32>
    %cst_80 = arith.constant 0.000000e+00 : f32
    %194 = vector.broadcast %cst_80 : f32 to vector<64x1xf32>
    %195 = arith.select %193, %191, %194 : vector<64x1xi1>, vector<64x1xf32>
    %196 = vector.shape_cast %195 : vector<64x1xf32> to vector<1x64x1xf32>
    %cst_81 = arith.constant dense<0.000000e+00> : vector<1xf32>
    %197 = vector.multi_reduction <add>, %196, %cst_81 [1, 2] : vector<1x64x1xf32> to vector<1xf32>
    %198 = vector.shape_cast %197 : vector<1xf32> to vector<1x1x1xf32>
    %199 = vector.extract %198[0, 0, 0] : f32 from vector<1x1x1xf32>
    %cst_82 = arith.constant 0.0163934417 : f32
    %200 = arith.mulf %199, %cst_82 : f32
    %c7_i32 = arith.constant 7 : i32
    %201 = vector.broadcast %c7_i32 : i32 to vector<1x128xi32>
    %202 = arith.cmpi eq, %0, %201 : vector<1x128xi32>
    %203 = vector.broadcast %200 : f32 to vector<1x128xf32>
    %204 = arith.select %202, %203, %179 : vector<1x128xi1>, vector<1x128xf32>
    %c4_83 = arith.constant 4 : index
    %c0_84 = arith.constant 0 : index
    %205 = vector.load %arg0[%c4_83, %c0_84] : memref<128x32xf32, #tpu.memory_space<vmem>>, vector<64x32xf32>
    %c5 = arith.constant 5 : index
    %c0_85 = arith.constant 0 : index
    %206 = vector.load %arg0[%c5, %c0_85] : memref<128x32xf32, #tpu.memory_space<vmem>>, vector<64x32xf32>
    %cst_86 = arith.constant 0.000000e+00 : f32
    %207 = vector.broadcast %cst_86 : f32 to vector<64x32xf32>
    %208 = arith.mulf %207, %205 : vector<64x32xf32>
    %cst_87 = arith.constant 1.000000e+00 : f32
    %209 = vector.broadcast %cst_87 : f32 to vector<64x32xf32>
    %210 = arith.mulf %209, %206 : vector<64x32xf32>
    %211 = arith.addf %208, %210 : vector<64x32xf32>
    %212 = arith.subf %211, %2 : vector<64x32xf32>
    %213 = arith.mulf %212, %212 : vector<64x32xf32>
    %cst_88 = arith.constant dense<0.000000e+00> : vector<64xf32>
    %214 = vector.multi_reduction <add>, %213, %cst_88 [1] : vector<64x32xf32> to vector<64xf32>
    %215 = vector.shape_cast %214 : vector<64xf32> to vector<64x1xf32>
    %216 = math.sqrt %215 : vector<64x1xf32>
    %c60_i32 = arith.constant 60 : i32
    %217 = vector.broadcast %c60_i32 : i32 to vector<64x1xi32>
    %218 = arith.cmpi slt, %1, %217 : vector<64x1xi32>
    %cst_89 = arith.constant 0.000000e+00 : f32
    %219 = vector.broadcast %cst_89 : f32 to vector<64x1xf32>
    %220 = arith.select %218, %216, %219 : vector<64x1xi1>, vector<64x1xf32>
    %221 = vector.shape_cast %220 : vector<64x1xf32> to vector<1x64x1xf32>
    %cst_90 = arith.constant dense<0.000000e+00> : vector<1xf32>
    %222 = vector.multi_reduction <add>, %221, %cst_90 [1, 2] : vector<1x64x1xf32> to vector<1xf32>
    %223 = vector.shape_cast %222 : vector<1xf32> to vector<1x1x1xf32>
    %224 = vector.extract %223[0, 0, 0] : f32 from vector<1x1x1xf32>
    %cst_91 = arith.constant 0.0166666675 : f32
    %225 = arith.mulf %224, %cst_91 : f32
    %c8_i32 = arith.constant 8 : i32
    %226 = vector.broadcast %c8_i32 : i32 to vector<1x128xi32>
    %227 = arith.cmpi eq, %0, %226 : vector<1x128xi32>
    %228 = vector.broadcast %225 : f32 to vector<1x128xf32>
    %229 = arith.select %227, %228, %204 : vector<1x128xi1>, vector<1x128xf32>
    %c4_92 = arith.constant 4 : index
    %c0_93 = arith.constant 0 : index
    %230 = vector.load %arg0[%c4_92, %c0_93] : memref<128x32xf32, #tpu.memory_space<vmem>>, vector<64x32xf32>
    %c5_94 = arith.constant 5 : index
    %c0_95 = arith.constant 0 : index
    %231 = vector.load %arg0[%c5_94, %c0_95] : memref<128x32xf32, #tpu.memory_space<vmem>>, vector<64x32xf32>
    %cst_96 = arith.constant 5.000000e-01 : f32
    %232 = vector.broadcast %cst_96 : f32 to vector<64x32xf32>
    %233 = arith.mulf %232, %230 : vector<64x32xf32>
    %cst_97 = arith.constant 5.000000e-01 : f32
    %234 = vector.broadcast %cst_97 : f32 to vector<64x32xf32>
    %235 = arith.mulf %234, %231 : vector<64x32xf32>
    %236 = arith.addf %233, %235 : vector<64x32xf32>
    %237 = arith.subf %236, %2 : vector<64x32xf32>
    %238 = arith.mulf %237, %237 : vector<64x32xf32>
    %cst_98 = arith.constant dense<0.000000e+00> : vector<64xf32>
    %239 = vector.multi_reduction <add>, %238, %cst_98 [1] : vector<64x32xf32> to vector<64xf32>
    %240 = vector.shape_cast %239 : vector<64xf32> to vector<64x1xf32>
    %241 = math.sqrt %240 : vector<64x1xf32>
    %c60_i32_99 = arith.constant 60 : i32
    %242 = vector.broadcast %c60_i32_99 : i32 to vector<64x1xi32>
    %243 = arith.cmpi slt, %1, %242 : vector<64x1xi32>
    %cst_100 = arith.constant 0.000000e+00 : f32
    %244 = vector.broadcast %cst_100 : f32 to vector<64x1xf32>
    %245 = arith.select %243, %241, %244 : vector<64x1xi1>, vector<64x1xf32>
    %246 = vector.shape_cast %245 : vector<64x1xf32> to vector<1x64x1xf32>
    %cst_101 = arith.constant dense<0.000000e+00> : vector<1xf32>
    %247 = vector.multi_reduction <add>, %246, %cst_101 [1, 2] : vector<1x64x1xf32> to vector<1xf32>
    %248 = vector.shape_cast %247 : vector<1xf32> to vector<1x1x1xf32>
    %249 = vector.extract %248[0, 0, 0] : f32 from vector<1x1x1xf32>
    %cst_102 = arith.constant 0.0166666675 : f32
    %250 = arith.mulf %249, %cst_102 : f32
    %c9_i32 = arith.constant 9 : i32
    %251 = vector.broadcast %c9_i32 : i32 to vector<1x128xi32>
    %252 = arith.cmpi eq, %0, %251 : vector<1x128xi32>
    %253 = vector.broadcast %250 : f32 to vector<1x128xf32>
    %254 = arith.select %252, %253, %229 : vector<1x128xi1>, vector<1x128xf32>
    %c5_103 = arith.constant 5 : index
    %c0_104 = arith.constant 0 : index
    %255 = vector.load %arg0[%c5_103, %c0_104] : memref<128x32xf32, #tpu.memory_space<vmem>>, vector<64x32xf32>
    %c6 = arith.constant 6 : index
    %c0_105 = arith.constant 0 : index
    %256 = vector.load %arg0[%c6, %c0_105] : memref<128x32xf32, #tpu.memory_space<vmem>>, vector<64x32xf32>
    %cst_106 = arith.constant 0.000000e+00 : f32
    %257 = vector.broadcast %cst_106 : f32 to vector<64x32xf32>
    %258 = arith.mulf %257, %255 : vector<64x32xf32>
    %cst_107 = arith.constant 1.000000e+00 : f32
    %259 = vector.broadcast %cst_107 : f32 to vector<64x32xf32>
    %260 = arith.mulf %259, %256 : vector<64x32xf32>
    %261 = arith.addf %258, %260 : vector<64x32xf32>
    %262 = arith.subf %261, %2 : vector<64x32xf32>
    %263 = arith.mulf %262, %262 : vector<64x32xf32>
    %cst_108 = arith.constant dense<0.000000e+00> : vector<64xf32>
    %264 = vector.multi_reduction <add>, %263, %cst_108 [1] : vector<64x32xf32> to vector<64xf32>
    %265 = vector.shape_cast %264 : vector<64xf32> to vector<64x1xf32>
    %266 = math.sqrt %265 : vector<64x1xf32>
    %c59_i32 = arith.constant 59 : i32
    %267 = vector.broadcast %c59_i32 : i32 to vector<64x1xi32>
    %268 = arith.cmpi slt, %1, %267 : vector<64x1xi32>
    %cst_109 = arith.constant 0.000000e+00 : f32
    %269 = vector.broadcast %cst_109 : f32 to vector<64x1xf32>
    %270 = arith.select %268, %266, %269 : vector<64x1xi1>, vector<64x1xf32>
    %271 = vector.shape_cast %270 : vector<64x1xf32> to vector<1x64x1xf32>
    %cst_110 = arith.constant dense<0.000000e+00> : vector<1xf32>
    %272 = vector.multi_reduction <add>, %271, %cst_110 [1, 2] : vector<1x64x1xf32> to vector<1xf32>
    %273 = vector.shape_cast %272 : vector<1xf32> to vector<1x1x1xf32>
    %274 = vector.extract %273[0, 0, 0] : f32 from vector<1x1x1xf32>
    %cst_111 = arith.constant 0.0169491526 : f32
    %275 = arith.mulf %274, %cst_111 : f32
    %c10_i32 = arith.constant 10 : i32
    %276 = vector.broadcast %c10_i32 : i32 to vector<1x128xi32>
    %277 = arith.cmpi eq, %0, %276 : vector<1x128xi32>
    %278 = vector.broadcast %275 : f32 to vector<1x128xf32>
    %279 = arith.select %277, %278, %254 : vector<1x128xi1>, vector<1x128xf32>
    %c5_112 = arith.constant 5 : index
    %c0_113 = arith.constant 0 : index
    %280 = vector.load %arg0[%c5_112, %c0_113] : memref<128x32xf32, #tpu.memory_space<vmem>>, vector<64x32xf32>
    %c6_114 = arith.constant 6 : index
    %c0_115 = arith.constant 0 : index
    %281 = vector.load %arg0[%c6_114, %c0_115] : memref<128x32xf32, #tpu.memory_space<vmem>>, vector<64x32xf32>
    %cst_116 = arith.constant 5.000000e-01 : f32
    %282 = vector.broadcast %cst_116 : f32 to vector<64x32xf32>
    %283 = arith.mulf %282, %280 : vector<64x32xf32>
    %cst_117 = arith.constant 5.000000e-01 : f32
    %284 = vector.broadcast %cst_117 : f32 to vector<64x32xf32>
    %285 = arith.mulf %284, %281 : vector<64x32xf32>
    %286 = arith.addf %283, %285 : vector<64x32xf32>
    %287 = arith.subf %286, %2 : vector<64x32xf32>
    %288 = arith.mulf %287, %287 : vector<64x32xf32>
    %cst_118 = arith.constant dense<0.000000e+00> : vector<64xf32>
    %289 = vector.multi_reduction <add>, %288, %cst_118 [1] : vector<64x32xf32> to vector<64xf32>
    %290 = vector.shape_cast %289 : vector<64xf32> to vector<64x1xf32>
    %291 = math.sqrt %290 : vector<64x1xf32>
    %c59_i32_119 = arith.constant 59 : i32
    %292 = vector.broadcast %c59_i32_119 : i32 to vector<64x1xi32>
    %293 = arith.cmpi slt, %1, %292 : vector<64x1xi32>
    %cst_120 = arith.constant 0.000000e+00 : f32
    %294 = vector.broadcast %cst_120 : f32 to vector<64x1xf32>
    %295 = arith.select %293, %291, %294 : vector<64x1xi1>, vector<64x1xf32>
    %296 = vector.shape_cast %295 : vector<64x1xf32> to vector<1x64x1xf32>
    %cst_121 = arith.constant dense<0.000000e+00> : vector<1xf32>
    %297 = vector.multi_reduction <add>, %296, %cst_121 [1, 2] : vector<1x64x1xf32> to vector<1xf32>
    %298 = vector.shape_cast %297 : vector<1xf32> to vector<1x1x1xf32>
    %299 = vector.extract %298[0, 0, 0] : f32 from vector<1x1x1xf32>
    %cst_122 = arith.constant 0.0169491526 : f32
    %300 = arith.mulf %299, %cst_122 : f32
    %c11_i32 = arith.constant 11 : i32
    %301 = vector.broadcast %c11_i32 : i32 to vector<1x128xi32>
    %302 = arith.cmpi eq, %0, %301 : vector<1x128xi32>
    %303 = vector.broadcast %300 : f32 to vector<1x128xf32>
    %304 = arith.select %302, %303, %279 : vector<1x128xi1>, vector<1x128xf32>
    %c1_123 = arith.constant 1 : index
    %c0_124 = arith.constant 0 : index
    %305 = vector.load %arg1[%c1_123, %c0_124] : memref<128x32xf32, #tpu.memory_space<vmem>>, vector<64x32xf32>
    %c2_125 = arith.constant 2 : index
    %c0_126 = arith.constant 0 : index
    %306 = vector.load %arg1[%c2_125, %c0_126] : memref<128x32xf32, #tpu.memory_space<vmem>>, vector<64x32xf32>
    %cst_127 = arith.constant 0.000000e+00 : f32
    %307 = vector.broadcast %cst_127 : f32 to vector<64x32xf32>
    %308 = arith.mulf %307, %305 : vector<64x32xf32>
    %cst_128 = arith.constant 1.000000e+00 : f32
    %309 = vector.broadcast %cst_128 : f32 to vector<64x32xf32>
    %310 = arith.mulf %309, %306 : vector<64x32xf32>
    %311 = arith.addf %308, %310 : vector<64x32xf32>
    %312 = arith.subf %311, %3 : vector<64x32xf32>
    %313 = arith.mulf %312, %312 : vector<64x32xf32>
    %cst_129 = arith.constant dense<0.000000e+00> : vector<64xf32>
    %314 = vector.multi_reduction <add>, %313, %cst_129 [1] : vector<64x32xf32> to vector<64xf32>
    %315 = vector.shape_cast %314 : vector<64xf32> to vector<64x1xf32>
    %316 = math.sqrt %315 : vector<64x1xf32>
    %c63_i32_130 = arith.constant 63 : i32
    %317 = vector.broadcast %c63_i32_130 : i32 to vector<64x1xi32>
    %318 = arith.cmpi slt, %1, %317 : vector<64x1xi32>
    %cst_131 = arith.constant 0.000000e+00 : f32
    %319 = vector.broadcast %cst_131 : f32 to vector<64x1xf32>
    %320 = arith.select %318, %316, %319 : vector<64x1xi1>, vector<64x1xf32>
    %321 = vector.shape_cast %320 : vector<64x1xf32> to vector<1x64x1xf32>
    %cst_132 = arith.constant dense<0.000000e+00> : vector<1xf32>
    %322 = vector.multi_reduction <add>, %321, %cst_132 [1, 2] : vector<1x64x1xf32> to vector<1xf32>
    %323 = vector.shape_cast %322 : vector<1xf32> to vector<1x1x1xf32>
    %324 = vector.extract %323[0, 0, 0] : f32 from vector<1x1x1xf32>
    %cst_133 = arith.constant 0.0158730168 : f32
    %325 = arith.mulf %324, %cst_133 : f32
    %c12_i32 = arith.constant 12 : i32
    %326 = vector.broadcast %c12_i32 : i32 to vector<1x128xi32>
    %327 = arith.cmpi eq, %0, %326 : vector<1x128xi32>
    %328 = vector.broadcast %325 : f32 to vector<1x128xf32>
    %329 = arith.select %327, %328, %304 : vector<1x128xi1>, vector<1x128xf32>
    %c1_134 = arith.constant 1 : index
    %c0_135 = arith.constant 0 : index
    %330 = vector.load %arg1[%c1_134, %c0_135] : memref<128x32xf32, #tpu.memory_space<vmem>>, vector<64x32xf32>
    %c2_136 = arith.constant 2 : index
    %c0_137 = arith.constant 0 : index
    %331 = vector.load %arg1[%c2_136, %c0_137] : memref<128x32xf32, #tpu.memory_space<vmem>>, vector<64x32xf32>
    %cst_138 = arith.constant 5.000000e-01 : f32
    %332 = vector.broadcast %cst_138 : f32 to vector<64x32xf32>
    %333 = arith.mulf %332, %330 : vector<64x32xf32>
    %cst_139 = arith.constant 5.000000e-01 : f32
    %334 = vector.broadcast %cst_139 : f32 to vector<64x32xf32>
    %335 = arith.mulf %334, %331 : vector<64x32xf32>
    %336 = arith.addf %333, %335 : vector<64x32xf32>
    %337 = arith.subf %336, %3 : vector<64x32xf32>
    %338 = arith.mulf %337, %337 : vector<64x32xf32>
    %cst_140 = arith.constant dense<0.000000e+00> : vector<64xf32>
    %339 = vector.multi_reduction <add>, %338, %cst_140 [1] : vector<64x32xf32> to vector<64xf32>
    %340 = vector.shape_cast %339 : vector<64xf32> to vector<64x1xf32>
    %341 = math.sqrt %340 : vector<64x1xf32>
    %c63_i32_141 = arith.constant 63 : i32
    %342 = vector.broadcast %c63_i32_141 : i32 to vector<64x1xi32>
    %343 = arith.cmpi slt, %1, %342 : vector<64x1xi32>
    %cst_142 = arith.constant 0.000000e+00 : f32
    %344 = vector.broadcast %cst_142 : f32 to vector<64x1xf32>
    %345 = arith.select %343, %341, %344 : vector<64x1xi1>, vector<64x1xf32>
    %346 = vector.shape_cast %345 : vector<64x1xf32> to vector<1x64x1xf32>
    %cst_143 = arith.constant dense<0.000000e+00> : vector<1xf32>
    %347 = vector.multi_reduction <add>, %346, %cst_143 [1, 2] : vector<1x64x1xf32> to vector<1xf32>
    %348 = vector.shape_cast %347 : vector<1xf32> to vector<1x1x1xf32>
    %349 = vector.extract %348[0, 0, 0] : f32 from vector<1x1x1xf32>
    %cst_144 = arith.constant 0.0158730168 : f32
    %350 = arith.mulf %349, %cst_144 : f32
    %c13_i32 = arith.constant 13 : i32
    %351 = vector.broadcast %c13_i32 : i32 to vector<1x128xi32>
    %352 = arith.cmpi eq, %0, %351 : vector<1x128xi32>
    %353 = vector.broadcast %350 : f32 to vector<1x128xf32>
    %354 = arith.select %352, %353, %329 : vector<1x128xi1>, vector<1x128xf32>
    %c2_145 = arith.constant 2 : index
    %c0_146 = arith.constant 0 : index
    %355 = vector.load %arg1[%c2_145, %c0_146] : memref<128x32xf32, #tpu.memory_space<vmem>>, vector<64x32xf32>
    %c3_147 = arith.constant 3 : index
    %c0_148 = arith.constant 0 : index
    %356 = vector.load %arg1[%c3_147, %c0_148] : memref<128x32xf32, #tpu.memory_space<vmem>>, vector<64x32xf32>
    %cst_149 = arith.constant 0.000000e+00 : f32
    %357 = vector.broadcast %cst_149 : f32 to vector<64x32xf32>
    %358 = arith.mulf %357, %355 : vector<64x32xf32>
    %cst_150 = arith.constant 1.000000e+00 : f32
    %359 = vector.broadcast %cst_150 : f32 to vector<64x32xf32>
    %360 = arith.mulf %359, %356 : vector<64x32xf32>
    %361 = arith.addf %358, %360 : vector<64x32xf32>
    %362 = arith.subf %361, %3 : vector<64x32xf32>
    %363 = arith.mulf %362, %362 : vector<64x32xf32>
    %cst_151 = arith.constant dense<0.000000e+00> : vector<64xf32>
    %364 = vector.multi_reduction <add>, %363, %cst_151 [1] : vector<64x32xf32> to vector<64xf32>
    %365 = vector.shape_cast %364 : vector<64xf32> to vector<64x1xf32>
    %366 = math.sqrt %365 : vector<64x1xf32>
    %c62_i32_152 = arith.constant 62 : i32
    %367 = vector.broadcast %c62_i32_152 : i32 to vector<64x1xi32>
    %368 = arith.cmpi slt, %1, %367 : vector<64x1xi32>
    %cst_153 = arith.constant 0.000000e+00 : f32
    %369 = vector.broadcast %cst_153 : f32 to vector<64x1xf32>
    %370 = arith.select %368, %366, %369 : vector<64x1xi1>, vector<64x1xf32>
    %371 = vector.shape_cast %370 : vector<64x1xf32> to vector<1x64x1xf32>
    %cst_154 = arith.constant dense<0.000000e+00> : vector<1xf32>
    %372 = vector.multi_reduction <add>, %371, %cst_154 [1, 2] : vector<1x64x1xf32> to vector<1xf32>
    %373 = vector.shape_cast %372 : vector<1xf32> to vector<1x1x1xf32>
    %374 = vector.extract %373[0, 0, 0] : f32 from vector<1x1x1xf32>
    %cst_155 = arith.constant 0.0161290318 : f32
    %375 = arith.mulf %374, %cst_155 : f32
    %c14_i32 = arith.constant 14 : i32
    %376 = vector.broadcast %c14_i32 : i32 to vector<1x128xi32>
    %377 = arith.cmpi eq, %0, %376 : vector<1x128xi32>
    %378 = vector.broadcast %375 : f32 to vector<1x128xf32>
    %379 = arith.select %377, %378, %354 : vector<1x128xi1>, vector<1x128xf32>
    %c2_156 = arith.constant 2 : index
    %c0_157 = arith.constant 0 : index
    %380 = vector.load %arg1[%c2_156, %c0_157] : memref<128x32xf32, #tpu.memory_space<vmem>>, vector<64x32xf32>
    %c3_158 = arith.constant 3 : index
    %c0_159 = arith.constant 0 : index
    %381 = vector.load %arg1[%c3_158, %c0_159] : memref<128x32xf32, #tpu.memory_space<vmem>>, vector<64x32xf32>
    %cst_160 = arith.constant 5.000000e-01 : f32
    %382 = vector.broadcast %cst_160 : f32 to vector<64x32xf32>
    %383 = arith.mulf %382, %380 : vector<64x32xf32>
    %cst_161 = arith.constant 5.000000e-01 : f32
    %384 = vector.broadcast %cst_161 : f32 to vector<64x32xf32>
    %385 = arith.mulf %384, %381 : vector<64x32xf32>
    %386 = arith.addf %383, %385 : vector<64x32xf32>
    %387 = arith.subf %386, %3 : vector<64x32xf32>
    %388 = arith.mulf %387, %387 : vector<64x32xf32>
    %cst_162 = arith.constant dense<0.000000e+00> : vector<64xf32>
    %389 = vector.multi_reduction <add>, %388, %cst_162 [1] : vector<64x32xf32> to vector<64xf32>
    %390 = vector.shape_cast %389 : vector<64xf32> to vector<64x1xf32>
    %391 = math.sqrt %390 : vector<64x1xf32>
    %c62_i32_163 = arith.constant 62 : i32
    %392 = vector.broadcast %c62_i32_163 : i32 to vector<64x1xi32>
    %393 = arith.cmpi slt, %1, %392 : vector<64x1xi32>
    %cst_164 = arith.constant 0.000000e+00 : f32
    %394 = vector.broadcast %cst_164 : f32 to vector<64x1xf32>
    %395 = arith.select %393, %391, %394 : vector<64x1xi1>, vector<64x1xf32>
    %396 = vector.shape_cast %395 : vector<64x1xf32> to vector<1x64x1xf32>
    %cst_165 = arith.constant dense<0.000000e+00> : vector<1xf32>
    %397 = vector.multi_reduction <add>, %396, %cst_165 [1, 2] : vector<1x64x1xf32> to vector<1xf32>
    %398 = vector.shape_cast %397 : vector<1xf32> to vector<1x1x1xf32>
    %399 = vector.extract %398[0, 0, 0] : f32 from vector<1x1x1xf32>
    %cst_166 = arith.constant 0.0161290318 : f32
    %400 = arith.mulf %399, %cst_166 : f32
    %c15_i32 = arith.constant 15 : i32
    %401 = vector.broadcast %c15_i32 : i32 to vector<1x128xi32>
    %402 = arith.cmpi eq, %0, %401 : vector<1x128xi32>
    %403 = vector.broadcast %400 : f32 to vector<1x128xf32>
    %404 = arith.select %402, %403, %379 : vector<1x128xi1>, vector<1x128xf32>
    %c3_167 = arith.constant 3 : index
    %c0_168 = arith.constant 0 : index
    %405 = vector.load %arg1[%c3_167, %c0_168] : memref<128x32xf32, #tpu.memory_space<vmem>>, vector<64x32xf32>
    %c4_169 = arith.constant 4 : index
    %c0_170 = arith.constant 0 : index
    %406 = vector.load %arg1[%c4_169, %c0_170] : memref<128x32xf32, #tpu.memory_space<vmem>>, vector<64x32xf32>
    %cst_171 = arith.constant 0.000000e+00 : f32
    %407 = vector.broadcast %cst_171 : f32 to vector<64x32xf32>
    %408 = arith.mulf %407, %405 : vector<64x32xf32>
    %cst_172 = arith.constant 1.000000e+00 : f32
    %409 = vector.broadcast %cst_172 : f32 to vector<64x32xf32>
    %410 = arith.mulf %409, %406 : vector<64x32xf32>
    %411 = arith.addf %408, %410 : vector<64x32xf32>
    %412 = arith.subf %411, %3 : vector<64x32xf32>
    %413 = arith.mulf %412, %412 : vector<64x32xf32>
    %cst_173 = arith.constant dense<0.000000e+00> : vector<64xf32>
    %414 = vector.multi_reduction <add>, %413, %cst_173 [1] : vector<64x32xf32> to vector<64xf32>
    %415 = vector.shape_cast %414 : vector<64xf32> to vector<64x1xf32>
    %416 = math.sqrt %415 : vector<64x1xf32>
    %c61_i32_174 = arith.constant 61 : i32
    %417 = vector.broadcast %c61_i32_174 : i32 to vector<64x1xi32>
    %418 = arith.cmpi slt, %1, %417 : vector<64x1xi32>
    %cst_175 = arith.constant 0.000000e+00 : f32
    %419 = vector.broadcast %cst_175 : f32 to vector<64x1xf32>
    %420 = arith.select %418, %416, %419 : vector<64x1xi1>, vector<64x1xf32>
    %421 = vector.shape_cast %420 : vector<64x1xf32> to vector<1x64x1xf32>
    %cst_176 = arith.constant dense<0.000000e+00> : vector<1xf32>
    %422 = vector.multi_reduction <add>, %421, %cst_176 [1, 2] : vector<1x64x1xf32> to vector<1xf32>
    %423 = vector.shape_cast %422 : vector<1xf32> to vector<1x1x1xf32>
    %424 = vector.extract %423[0, 0, 0] : f32 from vector<1x1x1xf32>
    %cst_177 = arith.constant 0.0163934417 : f32
    %425 = arith.mulf %424, %cst_177 : f32
    %c16_i32 = arith.constant 16 : i32
    %426 = vector.broadcast %c16_i32 : i32 to vector<1x128xi32>
    %427 = arith.cmpi eq, %0, %426 : vector<1x128xi32>
    %428 = vector.broadcast %425 : f32 to vector<1x128xf32>
    %429 = arith.select %427, %428, %404 : vector<1x128xi1>, vector<1x128xf32>
    %c3_178 = arith.constant 3 : index
    %c0_179 = arith.constant 0 : index
    %430 = vector.load %arg1[%c3_178, %c0_179] : memref<128x32xf32, #tpu.memory_space<vmem>>, vector<64x32xf32>
    %c4_180 = arith.constant 4 : index
    %c0_181 = arith.constant 0 : index
    %431 = vector.load %arg1[%c4_180, %c0_181] : memref<128x32xf32, #tpu.memory_space<vmem>>, vector<64x32xf32>
    %cst_182 = arith.constant 5.000000e-01 : f32
    %432 = vector.broadcast %cst_182 : f32 to vector<64x32xf32>
    %433 = arith.mulf %432, %430 : vector<64x32xf32>
    %cst_183 = arith.constant 5.000000e-01 : f32
    %434 = vector.broadcast %cst_183 : f32 to vector<64x32xf32>
    %435 = arith.mulf %434, %431 : vector<64x32xf32>
    %436 = arith.addf %433, %435 : vector<64x32xf32>
    %437 = arith.subf %436, %3 : vector<64x32xf32>
    %438 = arith.mulf %437, %437 : vector<64x32xf32>
    %cst_184 = arith.constant dense<0.000000e+00> : vector<64xf32>
    %439 = vector.multi_reduction <add>, %438, %cst_184 [1] : vector<64x32xf32> to vector<64xf32>
    %440 = vector.shape_cast %439 : vector<64xf32> to vector<64x1xf32>
    %441 = math.sqrt %440 : vector<64x1xf32>
    %c61_i32_185 = arith.constant 61 : i32
    %442 = vector.broadcast %c61_i32_185 : i32 to vector<64x1xi32>
    %443 = arith.cmpi slt, %1, %442 : vector<64x1xi32>
    %cst_186 = arith.constant 0.000000e+00 : f32
    %444 = vector.broadcast %cst_186 : f32 to vector<64x1xf32>
    %445 = arith.select %443, %441, %444 : vector<64x1xi1>, vector<64x1xf32>
    %446 = vector.shape_cast %445 : vector<64x1xf32> to vector<1x64x1xf32>
    %cst_187 = arith.constant dense<0.000000e+00> : vector<1xf32>
    %447 = vector.multi_reduction <add>, %446, %cst_187 [1, 2] : vector<1x64x1xf32> to vector<1xf32>
    %448 = vector.shape_cast %447 : vector<1xf32> to vector<1x1x1xf32>
    %449 = vector.extract %448[0, 0, 0] : f32 from vector<1x1x1xf32>
    %cst_188 = arith.constant 0.0163934417 : f32
    %450 = arith.mulf %449, %cst_188 : f32
    %c17_i32 = arith.constant 17 : i32
    %451 = vector.broadcast %c17_i32 : i32 to vector<1x128xi32>
    %452 = arith.cmpi eq, %0, %451 : vector<1x128xi32>
    %453 = vector.broadcast %450 : f32 to vector<1x128xf32>
    %454 = arith.select %452, %453, %429 : vector<1x128xi1>, vector<1x128xf32>
    %c4_189 = arith.constant 4 : index
    %c0_190 = arith.constant 0 : index
    %455 = vector.load %arg1[%c4_189, %c0_190] : memref<128x32xf32, #tpu.memory_space<vmem>>, vector<64x32xf32>
    %c5_191 = arith.constant 5 : index
    %c0_192 = arith.constant 0 : index
    %456 = vector.load %arg1[%c5_191, %c0_192] : memref<128x32xf32, #tpu.memory_space<vmem>>, vector<64x32xf32>
    %cst_193 = arith.constant 0.000000e+00 : f32
    %457 = vector.broadcast %cst_193 : f32 to vector<64x32xf32>
    %458 = arith.mulf %457, %455 : vector<64x32xf32>
    %cst_194 = arith.constant 1.000000e+00 : f32
    %459 = vector.broadcast %cst_194 : f32 to vector<64x32xf32>
    %460 = arith.mulf %459, %456 : vector<64x32xf32>
    %461 = arith.addf %458, %460 : vector<64x32xf32>
    %462 = arith.subf %461, %3 : vector<64x32xf32>
    %463 = arith.mulf %462, %462 : vector<64x32xf32>
    %cst_195 = arith.constant dense<0.000000e+00> : vector<64xf32>
    %464 = vector.multi_reduction <add>, %463, %cst_195 [1] : vector<64x32xf32> to vector<64xf32>
    %465 = vector.shape_cast %464 : vector<64xf32> to vector<64x1xf32>
    %466 = math.sqrt %465 : vector<64x1xf32>
    %c60_i32_196 = arith.constant 60 : i32
    %467 = vector.broadcast %c60_i32_196 : i32 to vector<64x1xi32>
    %468 = arith.cmpi slt, %1, %467 : vector<64x1xi32>
    %cst_197 = arith.constant 0.000000e+00 : f32
    %469 = vector.broadcast %cst_197 : f32 to vector<64x1xf32>
    %470 = arith.select %468, %466, %469 : vector<64x1xi1>, vector<64x1xf32>
    %471 = vector.shape_cast %470 : vector<64x1xf32> to vector<1x64x1xf32>
    %cst_198 = arith.constant dense<0.000000e+00> : vector<1xf32>
    %472 = vector.multi_reduction <add>, %471, %cst_198 [1, 2] : vector<1x64x1xf32> to vector<1xf32>
    %473 = vector.shape_cast %472 : vector<1xf32> to vector<1x1x1xf32>
    %474 = vector.extract %473[0, 0, 0] : f32 from vector<1x1x1xf32>
    %cst_199 = arith.constant 0.0166666675 : f32
    %475 = arith.mulf %474, %cst_199 : f32
    %c18_i32 = arith.constant 18 : i32
    %476 = vector.broadcast %c18_i32 : i32 to vector<1x128xi32>
    %477 = arith.cmpi eq, %0, %476 : vector<1x128xi32>
    %478 = vector.broadcast %475 : f32 to vector<1x128xf32>
    %479 = arith.select %477, %478, %454 : vector<1x128xi1>, vector<1x128xf32>
    %c4_200 = arith.constant 4 : index
    %c0_201 = arith.constant 0 : index
    %480 = vector.load %arg1[%c4_200, %c0_201] : memref<128x32xf32, #tpu.memory_space<vmem>>, vector<64x32xf32>
    %c5_202 = arith.constant 5 : index
    %c0_203 = arith.constant 0 : index
    %481 = vector.load %arg1[%c5_202, %c0_203] : memref<128x32xf32, #tpu.memory_space<vmem>>, vector<64x32xf32>
    %cst_204 = arith.constant 5.000000e-01 : f32
    %482 = vector.broadcast %cst_204 : f32 to vector<64x32xf32>
    %483 = arith.mulf %482, %480 : vector<64x32xf32>
    %cst_205 = arith.constant 5.000000e-01 : f32
    %484 = vector.broadcast %cst_205 : f32 to vector<64x32xf32>
    %485 = arith.mulf %484, %481 : vector<64x32xf32>
    %486 = arith.addf %483, %485 : vector<64x32xf32>
    %487 = arith.subf %486, %3 : vector<64x32xf32>
    %488 = arith.mulf %487, %487 : vector<64x32xf32>
    %cst_206 = arith.constant dense<0.000000e+00> : vector<64xf32>
    %489 = vector.multi_reduction <add>, %488, %cst_206 [1] : vector<64x32xf32> to vector<64xf32>
    %490 = vector.shape_cast %489 : vector<64xf32> to vector<64x1xf32>
    %491 = math.sqrt %490 : vector<64x1xf32>
    %c60_i32_207 = arith.constant 60 : i32
    %492 = vector.broadcast %c60_i32_207 : i32 to vector<64x1xi32>
    %493 = arith.cmpi slt, %1, %492 : vector<64x1xi32>
    %cst_208 = arith.constant 0.000000e+00 : f32
    %494 = vector.broadcast %cst_208 : f32 to vector<64x1xf32>
    %495 = arith.select %493, %491, %494 : vector<64x1xi1>, vector<64x1xf32>
    %496 = vector.shape_cast %495 : vector<64x1xf32> to vector<1x64x1xf32>
    %cst_209 = arith.constant dense<0.000000e+00> : vector<1xf32>
    %497 = vector.multi_reduction <add>, %496, %cst_209 [1, 2] : vector<1x64x1xf32> to vector<1xf32>
    %498 = vector.shape_cast %497 : vector<1xf32> to vector<1x1x1xf32>
    %499 = vector.extract %498[0, 0, 0] : f32 from vector<1x1x1xf32>
    %cst_210 = arith.constant 0.0166666675 : f32
    %500 = arith.mulf %499, %cst_210 : f32
    %c19_i32 = arith.constant 19 : i32
    %501 = vector.broadcast %c19_i32 : i32 to vector<1x128xi32>
    %502 = arith.cmpi eq, %0, %501 : vector<1x128xi32>
    %503 = vector.broadcast %500 : f32 to vector<1x128xf32>
    %504 = arith.select %502, %503, %479 : vector<1x128xi1>, vector<1x128xf32>
    %c5_211 = arith.constant 5 : index
    %c0_212 = arith.constant 0 : index
    %505 = vector.load %arg1[%c5_211, %c0_212] : memref<128x32xf32, #tpu.memory_space<vmem>>, vector<64x32xf32>
    %c6_213 = arith.constant 6 : index
    %c0_214 = arith.constant 0 : index
    %506 = vector.load %arg1[%c6_213, %c0_214] : memref<128x32xf32, #tpu.memory_space<vmem>>, vector<64x32xf32>
    %cst_215 = arith.constant 0.000000e+00 : f32
    %507 = vector.broadcast %cst_215 : f32 to vector<64x32xf32>
    %508 = arith.mulf %507, %505 : vector<64x32xf32>
    %cst_216 = arith.constant 1.000000e+00 : f32
    %509 = vector.broadcast %cst_216 : f32 to vector<64x32xf32>
    %510 = arith.mulf %509, %506 : vector<64x32xf32>
    %511 = arith.addf %508, %510 : vector<64x32xf32>
    %512 = arith.subf %511, %3 : vector<64x32xf32>
    %513 = arith.mulf %512, %512 : vector<64x32xf32>
    %cst_217 = arith.constant dense<0.000000e+00> : vector<64xf32>
    %514 = vector.multi_reduction <add>, %513, %cst_217 [1] : vector<64x32xf32> to vector<64xf32>
    %515 = vector.shape_cast %514 : vector<64xf32> to vector<64x1xf32>
    %516 = math.sqrt %515 : vector<64x1xf32>
    %c59_i32_218 = arith.constant 59 : i32
    %517 = vector.broadcast %c59_i32_218 : i32 to vector<64x1xi32>
    %518 = arith.cmpi slt, %1, %517 : vector<64x1xi32>
    %cst_219 = arith.constant 0.000000e+00 : f32
    %519 = vector.broadcast %cst_219 : f32 to vector<64x1xf32>
    %520 = arith.select %518, %516, %519 : vector<64x1xi1>, vector<64x1xf32>
    %521 = vector.shape_cast %520 : vector<64x1xf32> to vector<1x64x1xf32>
    %cst_220 = arith.constant dense<0.000000e+00> : vector<1xf32>
    %522 = vector.multi_reduction <add>, %521, %cst_220 [1, 2] : vector<1x64x1xf32> to vector<1xf32>
    %523 = vector.shape_cast %522 : vector<1xf32> to vector<1x1x1xf32>
    %524 = vector.extract %523[0, 0, 0] : f32 from vector<1x1x1xf32>
    %cst_221 = arith.constant 0.0169491526 : f32
    %525 = arith.mulf %524, %cst_221 : f32
    %c20_i32 = arith.constant 20 : i32
    %526 = vector.broadcast %c20_i32 : i32 to vector<1x128xi32>
    %527 = arith.cmpi eq, %0, %526 : vector<1x128xi32>
    %528 = vector.broadcast %525 : f32 to vector<1x128xf32>
    %529 = arith.select %527, %528, %504 : vector<1x128xi1>, vector<1x128xf32>
    %c5_222 = arith.constant 5 : index
    %c0_223 = arith.constant 0 : index
    %530 = vector.load %arg1[%c5_222, %c0_223] : memref<128x32xf32, #tpu.memory_space<vmem>>, vector<64x32xf32>
    %c6_224 = arith.constant 6 : index
    %c0_225 = arith.constant 0 : index
    %531 = vector.load %arg1[%c6_224, %c0_225] : memref<128x32xf32, #tpu.memory_space<vmem>>, vector<64x32xf32>
    %cst_226 = arith.constant 5.000000e-01 : f32
    %532 = vector.broadcast %cst_226 : f32 to vector<64x32xf32>
    %533 = arith.mulf %532, %530 : vector<64x32xf32>
    %cst_227 = arith.constant 5.000000e-01 : f32
    %534 = vector.broadcast %cst_227 : f32 to vector<64x32xf32>
    %535 = arith.mulf %534, %531 : vector<64x32xf32>
    %536 = arith.addf %533, %535 : vector<64x32xf32>
    %537 = arith.subf %536, %3 : vector<64x32xf32>
    %538 = arith.mulf %537, %537 : vector<64x32xf32>
    %cst_228 = arith.constant dense<0.000000e+00> : vector<64xf32>
    %539 = vector.multi_reduction <add>, %538, %cst_228 [1] : vector<64x32xf32> to vector<64xf32>
    %540 = vector.shape_cast %539 : vector<64xf32> to vector<64x1xf32>
    %541 = math.sqrt %540 : vector<64x1xf32>
    %c59_i32_229 = arith.constant 59 : i32
    %542 = vector.broadcast %c59_i32_229 : i32 to vector<64x1xi32>
    %543 = arith.cmpi slt, %1, %542 : vector<64x1xi32>
    %cst_230 = arith.constant 0.000000e+00 : f32
    %544 = vector.broadcast %cst_230 : f32 to vector<64x1xf32>
    %545 = arith.select %543, %541, %544 : vector<64x1xi1>, vector<64x1xf32>
    %546 = vector.shape_cast %545 : vector<64x1xf32> to vector<1x64x1xf32>
    %cst_231 = arith.constant dense<0.000000e+00> : vector<1xf32>
    %547 = vector.multi_reduction <add>, %546, %cst_231 [1, 2] : vector<1x64x1xf32> to vector<1xf32>
    %548 = vector.shape_cast %547 : vector<1xf32> to vector<1x1x1xf32>
    %549 = vector.extract %548[0, 0, 0] : f32 from vector<1x1x1xf32>
    %cst_232 = arith.constant 0.0169491526 : f32
    %550 = arith.mulf %549, %cst_232 : f32
    %c21_i32 = arith.constant 21 : i32
    %551 = vector.broadcast %c21_i32 : i32 to vector<1x128xi32>
    %552 = arith.cmpi eq, %0, %551 : vector<1x128xi32>
    %553 = vector.broadcast %550 : f32 to vector<1x128xf32>
    %554 = arith.select %552, %553, %529 : vector<1x128xi1>, vector<1x128xf32>
    %c6_233 = arith.constant 6 : index
    %c0_234 = arith.constant 0 : index
    %555 = vector.load %arg1[%c6_233, %c0_234] : memref<128x32xf32, #tpu.memory_space<vmem>>, vector<64x32xf32>
    %c7 = arith.constant 7 : index
    %c0_235 = arith.constant 0 : index
    %556 = vector.load %arg1[%c7, %c0_235] : memref<128x32xf32, #tpu.memory_space<vmem>>, vector<64x32xf32>
    %cst_236 = arith.constant 0.000000e+00 : f32
    %557 = vector.broadcast %cst_236 : f32 to vector<64x32xf32>
    %558 = arith.mulf %557, %555 : vector<64x32xf32>
    %cst_237 = arith.constant 1.000000e+00 : f32
    %559 = vector.broadcast %cst_237 : f32 to vector<64x32xf32>
    %560 = arith.mulf %559, %556 : vector<64x32xf32>
    %561 = arith.addf %558, %560 : vector<64x32xf32>
    %562 = arith.subf %561, %3 : vector<64x32xf32>
    %563 = arith.mulf %562, %562 : vector<64x32xf32>
    %cst_238 = arith.constant dense<0.000000e+00> : vector<64xf32>
    %564 = vector.multi_reduction <add>, %563, %cst_238 [1] : vector<64x32xf32> to vector<64xf32>
    %565 = vector.shape_cast %564 : vector<64xf32> to vector<64x1xf32>
    %566 = math.sqrt %565 : vector<64x1xf32>
    %c58_i32 = arith.constant 58 : i32
    %567 = vector.broadcast %c58_i32 : i32 to vector<64x1xi32>
    %568 = arith.cmpi slt, %1, %567 : vector<64x1xi32>
    %cst_239 = arith.constant 0.000000e+00 : f32
    %569 = vector.broadcast %cst_239 : f32 to vector<64x1xf32>
    %570 = arith.select %568, %566, %569 : vector<64x1xi1>, vector<64x1xf32>
    %571 = vector.shape_cast %570 : vector<64x1xf32> to vector<1x64x1xf32>
    %cst_240 = arith.constant dense<0.000000e+00> : vector<1xf32>
    %572 = vector.multi_reduction <add>, %571, %cst_240 [1, 2] : vector<1x64x1xf32> to vector<1xf32>
    %573 = vector.shape_cast %572 : vector<1xf32> to vector<1x1x1xf32>
    %574 = vector.extract %573[0, 0, 0] : f32 from vector<1x1x1xf32>
    %cst_241 = arith.constant 0.0172413792 : f32
    %575 = arith.mulf %574, %cst_241 : f32
    %c22_i32 = arith.constant 22 : i32
    %576 = vector.broadcast %c22_i32 : i32 to vector<1x128xi32>
    %577 = arith.cmpi eq, %0, %576 : vector<1x128xi32>
    %578 = vector.broadcast %575 : f32 to vector<1x128xf32>
    %579 = arith.select %577, %578, %554 : vector<1x128xi1>, vector<1x128xf32>
    %c6_242 = arith.constant 6 : index
    %c0_243 = arith.constant 0 : index
    %580 = vector.load %arg1[%c6_242, %c0_243] : memref<128x32xf32, #tpu.memory_space<vmem>>, vector<64x32xf32>
    %c7_244 = arith.constant 7 : index
    %c0_245 = arith.constant 0 : index
    %581 = vector.load %arg1[%c7_244, %c0_245] : memref<128x32xf32, #tpu.memory_space<vmem>>, vector<64x32xf32>
    %cst_246 = arith.constant 5.000000e-01 : f32
    %582 = vector.broadcast %cst_246 : f32 to vector<64x32xf32>
    %583 = arith.mulf %582, %580 : vector<64x32xf32>
    %cst_247 = arith.constant 5.000000e-01 : f32
    %584 = vector.broadcast %cst_247 : f32 to vector<64x32xf32>
    %585 = arith.mulf %584, %581 : vector<64x32xf32>
    %586 = arith.addf %583, %585 : vector<64x32xf32>
    %587 = arith.subf %586, %3 : vector<64x32xf32>
    %588 = arith.mulf %587, %587 : vector<64x32xf32>
    %cst_248 = arith.constant dense<0.000000e+00> : vector<64xf32>
    %589 = vector.multi_reduction <add>, %588, %cst_248 [1] : vector<64x32xf32> to vector<64xf32>
    %590 = vector.shape_cast %589 : vector<64xf32> to vector<64x1xf32>
    %591 = math.sqrt %590 : vector<64x1xf32>
    %c58_i32_249 = arith.constant 58 : i32
    %592 = vector.broadcast %c58_i32_249 : i32 to vector<64x1xi32>
    %593 = arith.cmpi slt, %1, %592 : vector<64x1xi32>
    %cst_250 = arith.constant 0.000000e+00 : f32
    %594 = vector.broadcast %cst_250 : f32 to vector<64x1xf32>
    %595 = arith.select %593, %591, %594 : vector<64x1xi1>, vector<64x1xf32>
    %596 = vector.shape_cast %595 : vector<64x1xf32> to vector<1x64x1xf32>
    %cst_251 = arith.constant dense<0.000000e+00> : vector<1xf32>
    %597 = vector.multi_reduction <add>, %596, %cst_251 [1, 2] : vector<1x64x1xf32> to vector<1xf32>
    %598 = vector.shape_cast %597 : vector<1xf32> to vector<1x1x1xf32>
    %599 = vector.extract %598[0, 0, 0] : f32 from vector<1x1x1xf32>
    %cst_252 = arith.constant 0.0172413792 : f32
    %600 = arith.mulf %599, %cst_252 : f32
    %c23_i32 = arith.constant 23 : i32
    %601 = vector.broadcast %c23_i32 : i32 to vector<1x128xi32>
    %602 = arith.cmpi eq, %0, %601 : vector<1x128xi32>
    %603 = vector.broadcast %600 : f32 to vector<1x128xf32>
    %604 = arith.select %602, %603, %579 : vector<1x128xi1>, vector<1x128xf32>
    %c0_253 = arith.constant 0 : index
    %c0_254 = arith.constant 0 : index
    %605 = vector.load %arg2[%c0_253, %c0_254] : memref<1x128xf32, #tpu.memory_space<vmem>>, vector<1x128xf32>
    tpu.vector_store %arg2[%c0_253, %c0_254], %604 {strides = array<i32>} : memref<1x128xf32, #tpu.memory_space<vmem>>, vector<1x128xf32>,
    return
  }
}

</mosaic_0001>

<bundles_post_ra>
// kernel: search.1
= control target key start
LH: loop header
LB: loop body
LE: loop exit
PB: predicated region body
PF: predicated region fallthrough
CT: control target
= control target key end

     0   :  { %vm78_vm0 = vcmask 261120   ;;  %vm175_vm1 = vcmask 7168   ;;  %s8624_s0 = inlined_call_operand.vmem [shape: f32[128,32], index: 0, kind: input, shape index: {}]   ;;  %s8625_s1 = inlined_call_operand.vmem [shape: f32[128,32], index: 1, kind: input, shape index: {}]   ;;  %s8626_s2 = inlined_call_operand.vmem [shape: f32[1,128], index: 2, kind: output, shape index: {}]  }
   0x1   :  { %v32_v0 = vld [vmem:[%s8624_s0 + $0x10] sm:$0xff]  ;;  %v30_v3 = vld [vmem:[%s8624_s0] sm:$0xff]  ;;  %v33_v7 = vld [vmem:[%s8624_s0 + $0x18] sm:$0xff] }
   0x2   :  { %v4255_v1 = vld [vmem:[%s8624_s0 + $0x11] sm:$0xff]  ;;  %v48_v2 = vmul.f32 0.0, %v32_v0  ;;  %v4263_v4 = vld [vmem:[%s8624_s0 + $0x1] sm:$0xff]  ;;  %v46_v6 = vmul.f32 0.0, %v30_v3  ;;  %v4276_v8 = vld [vmem:[%s8624_s0 + $0x19] sm:$0xff]  ;;  %v204_v9 = vmul.f32 0.5, %v30_v3 }
   0x3   :  { %v4268_v5 = vld [vmem:[%s8625_s1 + $0x10] sm:$0xff]  ;;  %v4279_v10 = vmul.f32 0.5, %v4263_v4  ;;  %v4285_v12 = vld [vmem:[%s8625_s1] sm:$0xff]  ;;  %v49_v13 = vmul.f32 0.0, %v33_v7  ;;  %v31_v14 = vld [vmem:[%s8624_s0 + $0x8] sm:$0xff]  ;;  %v206_v16 = vmul.f32 0.5, %v32_v0 }
   0x4   :  { %v56_v11 = vadd.f32 %v48_v2, %v4255_v1  ;;  %v4293_v15 = vld [vmem:[%s8624_s0 + $0x9] sm:$0xff]  ;;  %v54_v17 = vadd.f32 %v46_v6, %v4263_v4  ;;  %v4299_v18 = vld [vmem:[%s8625_s1 + $0x18] sm:$0xff]  ;;  %v47_v19 = vmul.f32 0.0, %v31_v14  ;;  %v4311_v23 = vmul.f32 0.5, %v4255_v1  ;;  %v34_v28 = vld [vmem:[%s8624_s0 + $0x20] sm:$0xff] }
   0x5   :  { %v35_v20 = vld [vmem:[%s8624_s0 + $0x28] sm:$0xff]  ;;  %v220_v22 = vadd.f32 %v4279_v10, %v204_v9  ;;  %v57_v25 = vadd.f32 %v49_v13, %v4276_v8  ;;  %v205_v30 = vmul.f32 0.5, %v31_v14  ;;  %v50_v34 = vmul.f32 0.0, %v34_v28  ;;  %v37_v35 = vld [vmem:[%s8624_s0 + $0x38] sm:$0xff]  ;;  %v4351_v41 = vld [vmem:[%s8625_s1 + $0x20] sm:$0xff] }
   0x6   :  { %v4307_v21 = vld [vmem:[%s8624_s0 + $0x29] sm:$0xff]  ;;  %v64_v24 = vsub.f32 %v56_v11, %v4268_v5  ;;  %v51_v27 = vmul.f32 0.0, %v35_v20  ;;  %v4326_v29 = vld [vmem:[%s8624_s0 + $0x21] sm:$0xff]  ;;  %v62_v31 = vsub.f32 %v54_v17, %v4285_v12  ;;  %v55_v32 = vadd.f32 %v47_v19, %v4293_v15  ;;  %v4341_v36 = vld [vmem:[%s8624_s0 + $0x39] sm:$0xff] }
   0x7   :  { %v4318_v26 = vld [vmem:[%s8625_s1 + $0x8] sm:$0xff]  ;;  %v4344_v37 = vmul.f32 0.5, %v4293_v15  ;;  %v65_v39 = vsub.f32 %v57_v25, %v4299_v18  ;;  %v53_v42 = vmul.f32 0.0, %v37_v35  ;;  %v36_v43 = vld [vmem:[%s8624_s0 + $0x30] sm:$0xff]  ;;  %v58_v47 = vadd.f32 %v50_v34, %v4326_v29  ;;  %v4366_v48 = vld [vmem:[%s8625_s1 + $0x38] sm:$0xff] }
   0x8   :  { %v4333_v33 = vld [vmem:[%s8625_s1 + $0x28] sm:$0xff]  ;;  %v72_v38 = vmul.f32 %v64_v24, %v64_v24  ;;  %v59_v40 = vadd.f32 %v51_v27, %v4307_v21  ;;  %v4359_v44 = vld [vmem:[%s8624_s0 + $0x31] sm:$0xff]  ;;  %v70_v45 = vmul.f32 %v62_v31, %v62_v31  ;;  %v63_v46 = vsub.f32 %v55_v32, %v4318_v26 }
   0x9   :  { %v52_v49 = vmul.f32 0.0, %v36_v43  ;;  %v73_v51 = vmul.f32 %v65_v39, %v65_v39  ;;  %v61_v53 = vadd.f32 %v53_v42, %v4341_v36  ;;  %v4374_v54 = vld [vmem:[%s8625_s1 + $0x30] sm:$0xff]  ;;  %v66_v57 = vsub.f32 %v58_v47, %v4351_v41 }
   0xa   :  { %v85_v50 = vsel %vm78_vm0, %v72_v38, 0.0  ;;  %v67_v52 = vsub.f32 %v59_v40, %v4333_v33  ;;  %v79_v55 = vsel %vm78_vm0, %v70_v45, 0.0  ;;  %v71_v56 = vmul.f32 %v63_v46, %v63_v46 }
   0xb   :  { %86 = vadd.xlane.f32.xlu1 %v85_v50  ;;  %v60_v58 = vadd.f32 %v52_v49, %v4359_v44  ;;  %80 = vadd.xlane.f32.xlu0 %v79_v55  ;;  %v88_v59 = vsel %vm78_vm0, %v73_v51, 0.0  ;;  %v69_v61 = vsub.f32 %v61_v53, %v4366_v48  ;;  %v207_v62 = vmul.f32 0.5, %v33_v7 }
   0xc   :  { %v75_v60 = vmul.f32 %v67_v52, %v67_v52  ;;  %v82_v63 = vsel %vm78_vm0, %v71_v56, 0.0  ;;  %v74_v0 = vmul.f32 %v66_v57, %v66_v57  ;;  %v221_v3 = vadd.f32 %v4344_v37, %v205_v30  ;;  %v4418_v52 = vld [vmem:[%s8624_s0 + $0xa] sm:$0xff]  ;;  %v4427_v57 = vld [vmem:[%s8624_s0 + $0x2] sm:$0xff] }
   0xd   :  { %v68_v2 = vsub.f32 %v60_v58, %v4374_v54  ;;  %v222_v6 = vadd.f32 %v4311_v23, %v206_v16  ;;  %v77_v9 = vmul.f32 %v69_v61, %v69_v61  ;;  %v228_v13 = vsub.f32 %v220_v22, %v4285_v12 }
   0xe   :  { %v4387_v14 = vmul.f32 0.5, %v4276_v8  ;;  %v94_v7 = vsel %vm78_vm0, %v75_v60, 0.0  ;;  %v229_v17 = vsub.f32 %v221_v3, %v4318_v26  ;;  %v208_v19 = vmul.f32 0.5, %v34_v28 }
   0xf   :  { %89 = vadd.xlane.f32.xlu1 %v88_v59  ;;  %v76_v11 = vmul.f32 %v68_v2, %v68_v2  ;;  %83 = vadd.xlane.f32.xlu0 %v82_v63  ;;  %v4392_v24 = vmul.f32 0.5, %v4326_v29  ;;  %v91_v25 = vsel %vm78_vm0, %v74_v0, 0.0  ;;  %v209_v27 = vmul.f32 0.5, %v35_v20  ;;  %v4437_v63 = vld [vmem:[%s8624_s0 + $0x1a] sm:$0xff] }
  0x10   :  { %v223_v16 = vadd.f32 %v4387_v14, %v207_v62  ;;  %v4397_v30 = vmul.f32 0.5, %v4307_v21  ;;  %v100_v22 = vsel %vm78_vm0, %v77_v9, 0.0  ;;  %v236_v32 = vmul.f32 %v228_v13, %v228_v13 }
  0x11   :  { %v97_v31 = vsel %vm78_vm0, %v76_v11, 0.0  ;;  %v230_v34 = vsub.f32 %v222_v6, %v4268_v5  ;;  %v237_v28 = vmul.f32 %v229_v17, %v229_v17  ;;  %v224_v38 = vadd.f32 %v4392_v24, %v208_v19  ;;  %v4445_v6 = vld [vmem:[%s8624_s0 + $0x12] sm:$0xff] }
  0x12   :  { %v210_v39 = vmul.f32 0.5, %v36_v43  ;;  %v4404_v40 = vmul.f32 0.5, %v4359_v44  ;;  %v231_v20 = vsub.f32 %v223_v16, %v4299_v18  ;;  %v225_v42 = vadd.f32 %v4397_v30, %v209_v27  ;;  %v4457_v27 = vld [vmem:[%s8624_s0 + $0x2a] sm:$0xff] }
  0x13   :  { %95 = vadd.xlane.f32.xlu1 %v94_v7  ;;  %92 = vadd.xlane.f32.xlu0 %v91_v25  ;;  %v211_v45 = vmul.f32 0.5, %v37_v35  ;;  %v4409_v46 = vmul.f32 0.5, %v4341_v36  ;;  %v244_v47 = vsel %vm78_vm0, %v236_v32, 0.0  ;;  %v369_v49 = vmul.f32 0.0, %v4293_v15 }
  0x14   :  { %v238_v50 = vmul.f32 %v230_v34, %v230_v34  ;;  %v232_v43 = vsub.f32 %v224_v38, %v4351_v41  ;;  %v226_v51 = vadd.f32 %v4404_v40, %v210_v39  ;;  %v368_v35 = vmul.f32 0.0, %v4263_v4 }
  0x15   :  { %v247_v53 = vsel %vm78_vm0, %v237_v28, 0.0  ;;  %v239_v55 = vmul.f32 %v231_v20, %v231_v20  ;;  %v233_v56 = vsub.f32 %v225_v42, %v4333_v33  ;;  %v227_v15 = vadd.f32 %v4409_v46, %v211_v45  ;;  %v4475_v45 = vld [vmem:[%s8624_s0 + $0x3a] sm:$0xff] }
  0x16   :  { %v377_v58 = vadd.f32 %v369_v49, %v4418_v52  ;;  %v371_v59 = vmul.f32 0.0, %v4276_v8  ;;  %v250_v4 = vsel %vm78_vm0, %v238_v50, 0.0  ;;  %v240_v60 = vmul.f32 %v232_v43, %v232_v43  ;;  %v4481_v49 = vld [vmem:[%s8624_s0 + $0x32] sm:$0xff] }
  0x17   :  { %101 = vadd.xlane.f32.xlu1 %v100_v22  ;;  %98 = vadd.xlane.f32.xlu0 %v97_v31  ;;  %v234_v61 = vsub.f32 %v226_v51, %v4374_v54  ;;  %v376_v62 = vadd.f32 %v368_v35, %v4427_v57  ;;  %v253_v0 = vsel %vm78_vm0, %v239_v55, 0.0  ;;  %v241_v2 = vmul.f32 %v233_v56, %v233_v56  ;;  %v4463_v31 = vld [vmem:[%s8624_s0 + $0x22] sm:$0xff] }
  0x18   :  { %v235_v3 = vsub.f32 %v227_v15, %v4366_v48  ;;  %v370_v8 = vmul.f32 0.0, %v4255_v1  ;;  %v385_v9 = vsub.f32 %v377_v58, %v4318_v26  ;;  %v379_v11 = vadd.f32 %v371_v59, %v4437_v63 }
  0x19   :  { %v256_v13 = vsel %vm78_vm0, %v240_v60, 0.0  ;;  %v242_v7 = vmul.f32 %v234_v61, %v234_v61  ;;  %v384_v17 = vsub.f32 %v376_v62, %v4285_v12  ;;  %v373_v19 = vmul.f32 0.0, %v4307_v21 }
  0x1a   :  { %v259_v1 = vsel %vm78_vm0, %v241_v2, 0.0  ;;  %v243_v25 = vmul.f32 %v235_v3, %v235_v3  ;;  %v378_v16 = vadd.f32 %v370_v8, %v4445_v6  ;;  %v372_v22 = vmul.f32 0.0, %v4326_v29 }
  0x1b   :  { %245 = vadd.xlane.f32.xlu1 %v244_v47  ;;  %248 = vadd.xlane.f32.xlu0 %v247_v53  ;;  %v393_v32 = vmul.f32 %v385_v9, %v385_v9  ;;  %v387_v21 = vsub.f32 %v379_v11, %v4299_v18  ;;  %v262_v34 = vsel %vm78_vm0, %v242_v7, 0.0  ;;  %v392_v28 = vmul.f32 %v384_v17, %v384_v17 }
  0x1c   :  { %v381_v38 = vadd.f32 %v373_v19, %v4457_v27  ;;  %v375_v39 = vmul.f32 0.0, %v4341_v36  ;;  %v265_v20 = vsel %vm78_vm0, %v243_v25, 0.0  ;;  %v386_v29 = vsub.f32 %v378_v16, %v4268_v5 }
  0x1d   :  { %v380_v42 = vadd.f32 %v372_v22, %v4463_v31  ;;  %v374_v47 = vmul.f32 0.0, %v4359_v44  ;;  %v395_v36 = vmul.f32 %v387_v21, %v387_v21  ;;  %v4484_v50 = vmul.f32 0.5, %v4427_v57 }
  0x1e   :  { %v403_v43 = vsel %vm78_vm0, %v393_v32, 0.0  ;;  %v389_v51 = vsub.f32 %v381_v38, %v4333_v33  ;;  %v383_v35 = vadd.f32 %v375_v39, %v4475_v45  ;;  %v4490_v53 = vmul.f32 0.5, %v4418_v52 }
  0x1f   :  { %251 = vadd.xlane.f32.xlu1 %v250_v4  ;;  %254 = vadd.xlane.f32.xlu0 %v253_v0  ;;  %v400_v44 = vsel %vm78_vm0, %v392_v28, 0.0  ;;  %v394_v55 = vmul.f32 %v386_v29, %v386_v29  ;;  %v388_v56 = vsub.f32 %v380_v42, %v4351_v41  ;;  %v382_v15 = vadd.f32 %v374_v47, %v4481_v49 }
  0x20   :  { %v532_v58 = vadd.f32 %v4484_v50, %v4279_v10  ;;  %v4498_v59 = vmul.f32 0.5, %v4445_v6  ;;  %v409_v4 = vsel %vm78_vm0, %v395_v36, 0.0  ;;  %v397_v60 = vmul.f32 %v389_v51, %v389_v51  ;;  %v4545_v36 = vld [vmem:[%s8624_s0 + $0xb] sm:$0xff] }
  0x21   :  { %v391_v61 = vsub.f32 %v383_v35, %v4366_v48  ;;  %v533_v62 = vadd.f32 %v4490_v53, %v4344_v37  ;;  %v406_v0 = vsel %vm78_vm0, %v394_v55, 0.0  ;;  %v396_v2 = vmul.f32 %v388_v56, %v388_v56 }
  0x22   :  { %v390_v3 = vsub.f32 %v382_v15, %v4374_v54  ;;  %v4507_v8 = vmul.f32 0.5, %v4437_v63  ;;  %v540_v10 = vsub.f32 %v532_v58, %v4285_v12  ;;  %v534_v9 = vadd.f32 %v4498_v59, %v4311_v23 }
  0x23   :  { %257 = vadd.xlane.f32.xlu1 %v256_v13  ;;  %260 = vadd.xlane.f32.xlu0 %v259_v1  ;;  %v415_v11 = vsel %vm78_vm0, %v397_v60, 0.0  ;;  %v399_v13 = vmul.f32 %v391_v61, %v391_v61  ;;  %v541_v37 = vsub.f32 %v533_v62, %v4318_v26  ;;  %v4515_v7 = vmul.f32 0.5, %v4463_v31  ;;  %v4573_v62 = vld [vmem:[%s8624_s0 + $0x13] sm:$0xff] }
  0x24   :  { %v412_v17 = vsel %vm78_vm0, %v396_v2, 0.0  ;;  %v398_v19 = vmul.f32 %v390_v3, %v390_v3  ;;  %v535_v1 = vadd.f32 %v4507_v8, %v4387_v14  ;;  %v4521_v25 = vmul.f32 0.5, %v4457_v27 }
  0x25   :  { %v548_v23 = vmul.f32 %v540_v10, %v540_v10  ;;  %v542_v16 = vsub.f32 %v534_v9, %v4268_v5  ;;  %v421_v22 = vsel %vm78_vm0, %v399_v13, 0.0  ;;  %v549_v32 = vmul.f32 %v541_v37, %v541_v37 }
  0x26   :  { %v536_v21 = vadd.f32 %v4515_v7, %v4392_v24  ;;  %v418_v28 = vsel %vm78_vm0, %v398_v19, 0.0  ;;  %v543_v14 = vsub.f32 %v535_v1, %v4299_v18  ;;  %v537_v38 = vadd.f32 %v4521_v25, %v4397_v30  ;;  %v4591_v1 = vld [vmem:[%s8624_s0 + $0x23] sm:$0xff] }
  0x27   :  { %263 = vadd.xlane.f32.xlu1 %v262_v34  ;;  %266 = vadd.xlane.f32.xlu0 %v265_v20  ;;  %v4528_v34 = vmul.f32 0.5, %v4481_v49  ;;  %v4535_v39 = vmul.f32 0.5, %v4475_v45  ;;  %v550_v20 = vmul.f32 %v542_v16, %v542_v16  ;;  %v681_v29 = vmul.f32 0.0, %v4418_v52 }
  0x28   :  { %v556_v24 = vsel %vm78_vm0, %v548_v23, 0.0  ;;  %v544_v42 = vsub.f32 %v536_v21, %v4351_v41  ;;  %v680_v30 = vmul.f32 0.0, %v4427_v57  ;;  %v551_v51 = vmul.f32 %v543_v14, %v543_v14 }
  0x29   :  { %v538_v47 = vadd.f32 %v4528_v34, %v4404_v40  ;;  %v545_v52 = vsub.f32 %v537_v38, %v4333_v33  ;;  %v539_v35 = vadd.f32 %v4535_v39, %v4409_v46  ;;  %v689_v40 = vadd.f32 %v681_v29, %v4545_v36  ;;  %v4565_v46 = vld [vmem:[%s8624_s0 + $0x1b] sm:$0xff]  ;;  %v4609_v29 = vld [vmem:[%s8624_s0 + $0x33] sm:$0xff] }
  0x2a   :  { %v683_v55 = vmul.f32 0.0, %v4437_v63  ;;  %v562_v57 = vsel %vm78_vm0, %v550_v20, 0.0  ;;  %v552_v56 = vmul.f32 %v544_v42, %v544_v42  ;;  %v682_v63 = vmul.f32 0.0, %v4445_v6  ;;  %v4603_v38 = vld [vmem:[%s8624_s0 + $0x3b] sm:$0xff] }
  0x2b   :  { %404 = vadd.xlane.f32.xlu1 %v403_v43  ;;  %401 = vadd.xlane.f32.xlu0 %v400_v44  ;;  %v559_v43 = vsel %vm78_vm0, %v549_v32, 0.0  ;;  %v4555_v44 = vld [vmem:[%s8624_s0 + $0x3] sm:$0xff]  ;;  %v546_v15 = vsub.f32 %v538_v47, %v4374_v54  ;;  %v553_v60 = vmul.f32 %v545_v52, %v545_v52  ;;  %v547_v61 = vsub.f32 %v539_v35, %v4366_v48 }
  0x2c   :  { %v688_v58 = vadd.f32 %v680_v30, %v4555_v44  ;;  %v691_v2 = vadd.f32 %v683_v55, %v4565_v46  ;;  %v568_v3 = vsel %vm78_vm0, %v552_v56, 0.0  ;;  %v690_v37 = vadd.f32 %v682_v63, %v4573_v62 }
  0x2d   :  { %v554_v10 = vmul.f32 %v546_v15, %v546_v15  ;;  %v571_v6 = vsel %vm78_vm0, %v553_v60, 0.0  ;;  %v555_v13 = vmul.f32 %v547_v61, %v547_v61  ;;  %v684_v19 = vmul.f32 0.0, %v4463_v31 }
  0x2e   :  { %v696_v9 = vsub.f32 %v688_v58, %v4285_v12  ;;  %v687_v21 = vmul.f32 0.0, %v4475_v45  ;;  %v698_v31 = vsub.f32 %v690_v37, %v4268_v5  ;;  %v686_v20 = vmul.f32 0.0, %v4481_v49 }
  0x2f   :  { %410 = vadd.xlane.f32.xlu1 %v409_v4  ;;  %407 = vadd.xlane.f32.xlu0 %v406_v0  ;;  %v565_v4 = vsel %vm78_vm0, %v551_v51, 0.0  ;;  %v697_v0 = vsub.f32 %v689_v40, %v4318_v26  ;;  %v574_v16 = vsel %vm78_vm0, %v554_v10, 0.0  ;;  %v692_v14 = vadd.f32 %v684_v19, %v4591_v1 }
  0x30   :  { %v695_v30 = vadd.f32 %v687_v21, %v4603_v38  ;;  %v706_v51 = vmul.f32 %v698_v31, %v698_v31  ;;  %v694_v35 = vadd.f32 %v686_v20, %v4609_v29  ;;  %v4626_v55 = vmul.f32 0.5, %v4573_v62 }
  0x31   :  { %v705_v23 = vmul.f32 %v697_v0, %v697_v0  ;;  %v700_v52 = vsub.f32 %v692_v14, %v4351_v41  ;;  %v4635_v63 = vmul.f32 0.5, %v4565_v46  ;;  %v4643_v10 = vmul.f32 0.5, %v4591_v1 }
  0x32   :  { %v703_v15 = vsub.f32 %v695_v30, %v4366_v48  ;;  %v702_v61 = vsub.f32 %v694_v35, %v4374_v54  ;;  %v846_v0 = vadd.f32 %v4626_v55, %v4498_v59  ;;  %v4663_v21 = vmul.f32 0.5, %v4603_v38 }
  0x33   :  { %416 = vadd.xlane.f32.xlu1 %v415_v11  ;;  %413 = vadd.xlane.f32.xlu0 %v412_v17  ;;  %v685_v11 = vmul.f32 0.0, %v4457_v27  ;;  %v4585_v17 = vld [vmem:[%s8624_s0 + $0x2b] sm:$0xff]  ;;  %v699_v27 = vsub.f32 %v691_v2, %v4299_v18  ;;  %v715_v42 = vsel %vm78_vm0, %v705_v23, 0.0  ;;  %v708_v60 = vmul.f32 %v700_v52, %v700_v52 }
  0x34   :  { %v854_v37 = vsub.f32 %v846_v0, %v4268_v5  ;;  %v993_v31 = vmul.f32 0.0, %v4545_v36  ;;  %v851_v30 = vadd.f32 %v4663_v21, %v4535_v39  ;;  %v4693_v39 = vld [vmem:[%s8624_s0 + $0x1c] sm:$0xff] }
  0x35   :  { %v693_v32 = vadd.f32 %v685_v11, %v4585_v17  ;;  %v707_v45 = vmul.f32 %v699_v27, %v699_v27  ;;  %v710_v11 = vmul.f32 %v702_v61, %v702_v61  ;;  %v848_v27 = vadd.f32 %v4643_v10, %v4515_v7 }
  0x37   :  { %422 = vadd.xlane.f32.xlu1 %v421_v22  ;;  %419 = vadd.xlane.f32.xlu0 %v418_v28  ;;  %v704_v22 = vmul.f32 %v696_v9, %v696_v9  ;;  %v577_v28 = vsel %vm78_vm0, %v555_v13, 0.0  ;;  %v701_v47 = vsub.f32 %v693_v32, %v4333_v33  ;;  %v724_v9 = vsel %vm78_vm0, %v708_v60, 0.0 }
  0x38   :  { %v4649_v13 = vmul.f32 0.5, %v4585_v17  ;;  %v856_v14 = vsub.f32 %v848_v27, %v4351_v41  ;;  %v999_v27 = vmul.f32 0.0, %v4603_v38 }
  0x39   :  { %v712_v49 = vsel %vm78_vm0, %v704_v22, 0.0  ;;  %v709_v56 = vmul.f32 %v701_v47, %v701_v47  ;;  %v730_v22 = vsel %vm78_vm0, %v710_v11, 0.0  ;;  %v996_v11 = vmul.f32 0.0, %v4591_v1 }
  0x3a   :  { %v849_v32 = vadd.f32 %v4649_v13, %v4521_v25  ;;  %v992_v25 = vmul.f32 0.0, %v4555_v44  ;;  %v864_v52 = vmul.f32 %v856_v14, %v856_v14 }
  0x3b   :  { %557 = vadd.xlane.f32.xlu1 %v556_v24  ;;  %560 = vadd.xlane.f32.xlu0 %v559_v43  ;;  %v4612_v24 = vmul.f32 0.5, %v4555_v44  ;;  %v4618_v43 = vmul.f32 0.5, %v4545_v36  ;;  %v727_v2 = vsel %vm78_vm0, %v709_v56, 0.0 }
  0x3c   :  { %v857_v36 = vsub.f32 %v849_v32, %v4333_v33  ;;  %v880_v61 = vsel %vm78_vm0, %v864_v52, 0.0  ;;  %v4731_v32 = vld [vmem:[%s8624_s0 + $0x3c] sm:$0xff] }
  0x3d   :  { %v844_v40 = vadd.f32 %v4612_v24, %v4484_v50  ;;  %v845_v58 = vadd.f32 %v4618_v43, %v4490_v53 }
  0x3e   :  { %v865_v56 = vmul.f32 %v857_v36, %v857_v36 }
  0x3f   :  { %563 = vadd.xlane.f32.xlu1 %v562_v57  ;;  %566 = vadd.xlane.f32.xlu0 %v565_v4  ;;  %v721_v57 = vsel %vm78_vm0, %v707_v45, 0.0  ;;  %v718_v4 = vsel %vm78_vm0, %v706_v51, 0.0  ;;  %v852_v50 = vsub.f32 %v844_v40, %v4285_v12  ;;  %v853_v53 = vsub.f32 %v845_v58, %v4318_v26  ;;  %v4673_v45 = vld [vmem:[%s8624_s0 + $0xc] sm:$0xff]  ;;  %v4701_v58 = vld [vmem:[%s8624_s0 + $0x14] sm:$0xff] }
  0x40   :  { %v995_v51 = vmul.f32 0.0, %v4565_v46  ;;  %v994_v46 = vmul.f32 0.0, %v4573_v62  ;;  %v883_v62 = vsel %vm78_vm0, %v865_v56, 0.0 }
  0x41   :  { %v860_v59 = vmul.f32 %v852_v50, %v852_v50  ;;  %v861_v23 = vmul.f32 %v853_v53, %v853_v53 }
  0x42   :  { %v1003_v60 = vadd.f32 %v995_v51, %v4693_v39  ;;  %v1002_v53 = vadd.f32 %v994_v46, %v4701_v58  ;;  %v4754_v51 = vmul.f32 0.5, %v4701_v58  ;;  %v4763_v46 = vmul.f32 0.5, %v4693_v39 }
  0x43   :  { %569 = vadd.xlane.f32.xlu1 %v568_v3  ;;  %572 = vadd.xlane.f32.xlu0 %v571_v6  ;;  %v711_v3 = vmul.f32 %v703_v15, %v703_v15  ;;  %v847_v6 = vadd.f32 %v4635_v63, %v4507_v8  ;;  %v868_v7 = vsel %vm78_vm0, %v860_v59, 0.0  ;;  %v859_v15 = vsub.f32 %v851_v30, %v4366_v48 }
  0x44   :  { %v1010_v1 = vsub.f32 %v1002_v53, %v4268_v5 }
  0x45   :  { %v733_v19 = vsel %vm78_vm0, %v711_v3, 0.0  ;;  %v855_v8 = vsub.f32 %v847_v6, %v4299_v18  ;;  %v867_v3 = vmul.f32 %v859_v15, %v859_v15  ;;  %v4719_v6 = vld [vmem:[%s8624_s0 + $0x24] sm:$0xff] }
  0x47   :  { %575 = vadd.xlane.f32.xlu1 %v574_v16  ;;  %578 = vadd.xlane.f32.xlu0 %v577_v28  ;;  %v4656_v16 = vmul.f32 0.5, %v4609_v29  ;;  %v862_v28 = vmul.f32 %v854_v37, %v854_v37  ;;  %v863_v47 = vmul.f32 %v855_v8, %v855_v8  ;;  %v1004_v8 = vadd.f32 %v996_v11, %v4719_v6 }
  0x49   :  { %v850_v20 = vadd.f32 %v4656_v16, %v4528_v34  ;;  %v1001_v34 = vadd.f32 %v993_v31, %v4673_v45  ;;  %v874_v44 = vsel %vm78_vm0, %v862_v28, 0.0  ;;  %v998_v28 = vmul.f32 0.0, %v4609_v29  ;;  %v4737_v31 = vld [vmem:[%s8624_s0 + $0x34] sm:$0xff] }
  0x4a   :  { %v1012_v36 = vsub.f32 %v1004_v8, %v4351_v41 }
  0x4b   :  { %716 = vadd.xlane.f32.xlu1 %v715_v42  ;;  %713 = vadd.xlane.f32.xlu0 %v712_v49  ;;  %v871_v42 = vsel %vm78_vm0, %v861_v23, 0.0  ;;  %v4683_v49 = vld [vmem:[%s8624_s0 + $0x4] sm:$0xff]  ;;  %v858_v35 = vsub.f32 %v850_v20, %v4374_v54  ;;  %v1006_v30 = vadd.f32 %v998_v28, %v4737_v31 }
  0x4c   :  { %v1000_v40 = vadd.f32 %v992_v25, %v4683_v49  ;;  %v1007_v25 = vadd.f32 %v999_v27, %v4731_v32  ;;  %v1020_v56 = vmul.f32 %v1012_v36, %v1012_v36  ;;  %v4791_v27 = vmul.f32 0.5, %v4731_v32 }
  0x4d   :  { %v866_v50 = vmul.f32 %v858_v35, %v858_v35  ;;  %v1014_v15 = vsub.f32 %v1006_v30, %v4374_v54 }
  0x4e   :  { %v1008_v0 = vsub.f32 %v1000_v40, %v4285_v12  ;;  %v1015_v35 = vsub.f32 %v1007_v25, %v4366_v48  ;;  %v1163_v25 = vadd.f32 %v4791_v27, %v4663_v21  ;;  %v1299_v21 = vld [vmem:[%s8624_s0 + $0x1d] sm:$0xff] }
  0x4f   :  { %722 = vadd.xlane.f32.xlu1 %v721_v57  ;;  %719 = vadd.xlane.f32.xlu0 %v718_v4  ;;  %v877_v57 = vsel %vm78_vm0, %v863_v47, 0.0  ;;  %v1009_v4 = vsub.f32 %v1001_v34, %v4318_v26  ;;  %v886_v37 = vsel %vm78_vm0, %v866_v50, 0.0  ;;  %v1018_v47 = vmul.f32 %v1010_v1, %v1010_v1 }
  0x50   :  { %v4771_v50 = vmul.f32 0.5, %v4719_v6  ;;  %v1305_v1 = vmul.f32 0.0, %v4673_v45 }
  0x51   :  { %v1017_v59 = vmul.f32 %v1009_v4, %v1009_v4  ;;  %v1158_v4 = vadd.f32 %v4754_v51, %v4626_v55 }
  0x53   :  { %728 = vadd.xlane.f32.xlu1 %v727_v2  ;;  %725 = vadd.xlane.f32.xlu0 %v724_v9  ;;  %v997_v2 = vmul.f32 0.0, %v4585_v17  ;;  %v4713_v9 = vld [vmem:[%s8624_s0 + $0x2c] sm:$0xff]  ;;  %v1011_v17 = vsub.f32 %v1003_v60, %v4299_v18  ;;  %v1027_v14 = vsel %vm78_vm0, %v1017_v59, 0.0  ;;  %v1166_v53 = vsub.f32 %v1158_v4, %v4268_v5 }
  0x55   :  { %v1005_v23 = vadd.f32 %v997_v2, %v4713_v9  ;;  %v1019_v38 = vmul.f32 %v1011_v17, %v1011_v17  ;;  %v1022_v2 = vmul.f32 %v1014_v15, %v1014_v15  ;;  %v1160_v17 = vadd.f32 %v4771_v50, %v4643_v10 }
  0x57   :  { %734 = vadd.xlane.f32.xlu1 %v733_v19  ;;  %731 = vadd.xlane.f32.xlu0 %v730_v22  ;;  %v1016_v19 = vmul.f32 %v1008_v0, %v1008_v0  ;;  %v889_v22 = vsel %vm78_vm0, %v867_v3, 0.0  ;;  %v1013_v20 = vsub.f32 %v1005_v23, %v4333_v33  ;;  %v1036_v0 = vsel %vm78_vm0, %v1020_v56, 0.0 }
  0x58   :  { %v4777_v3 = vmul.f32 0.5, %v4713_v9  ;;  %v1168_v8 = vsub.f32 %v1160_v17, %v4351_v41  ;;  %v1311_v17 = vmul.f32 0.0, %v4731_v32 }
  0x59   :  { %v1024_v29 = vsel %vm78_vm0, %v1016_v19, 0.0  ;;  %v1021_v52 = vmul.f32 %v1013_v20, %v1013_v20  ;;  %v1042_v19 = vsel %vm78_vm0, %v1022_v2, 0.0  ;;  %v1308_v2 = vmul.f32 0.0, %v4719_v6 }
  0x5a   :  { %v1161_v23 = vadd.f32 %v4777_v3, %v4649_v13  ;;  %v1304_v13 = vmul.f32 0.0, %v4683_v49  ;;  %v1176_v36 = vmul.f32 %v1168_v8, %v1168_v8 }
  0x5b   :  { %869 = vadd.xlane.f32.xlu1 %v868_v7  ;;  %872 = vadd.xlane.f32.xlu0 %v871_v42  ;;  %v4740_v7 = vmul.f32 0.5, %v4683_v49  ;;  %v4746_v42 = vmul.f32 0.5, %v4673_v45  ;;  %v1039_v60 = vsel %vm78_vm0, %v1021_v52, 0.0 }
  0x5c   :  { %v1169_v45 = vsub.f32 %v1161_v23, %v4333_v33  ;;  %v1192_v15 = vsel %vm78_vm0, %v1176_v36, 0.0  ;;  %v1303_v23 = vld [vmem:[%s8624_s0 + $0x3d] sm:$0xff] }
  0x5d   :  { %v1156_v34 = vadd.f32 %v4740_v7, %v4612_v24  ;;  %v1157_v40 = vadd.f32 %v4746_v42, %v4618_v43 }
  0x5e   :  { %v1177_v52 = vmul.f32 %v1169_v45, %v1169_v45 }
  0x5f   :  { %875 = vadd.xlane.f32.xlu1 %v874_v44  ;;  %878 = vadd.xlane.f32.xlu0 %v877_v57  ;;  %v1033_v44 = vsel %vm78_vm0, %v1019_v38, 0.0  ;;  %v1030_v57 = vsel %vm78_vm0, %v1018_v47, 0.0  ;;  %v1164_v24 = vsub.f32 %v1156_v34, %v4285_v12  ;;  %v1165_v43 = vsub.f32 %v1157_v40, %v4318_v26  ;;  %v4801_v38 = vld [vmem:[%s8624_s0 + $0xd] sm:$0xff] }
  0x60   :  { %v1307_v47 = vmul.f32 0.0, %v4693_v39  ;;  %v1306_v40 = vmul.f32 0.0, %v4701_v58  ;;  %v1298_v39 = vld [vmem:[%s8624_s0 + $0x15] sm:$0xff] }
  0x61   :  { %v1172_v55 = vmul.f32 %v1164_v24, %v1164_v24  ;;  %v1173_v59 = vmul.f32 %v1165_v43, %v1165_v43 }
  0x62   :  { %v1315_v56 = vadd.f32 %v1307_v47, %v1299_v21  ;;  %v1314_v58 = vadd.f32 %v1306_v40, %v1298_v39  ;;  %v4863_v47 = vmul.f32 0.5, %v1298_v39  ;;  %v4871_v40 = vmul.f32 0.5, %v1299_v21 }
  0x63   :  { %881 = vadd.xlane.f32.xlu1 %v880_v61  ;;  %884 = vadd.xlane.f32.xlu0 %v883_v62  ;;  %v1023_v61 = vmul.f32 %v1015_v35, %v1015_v35  ;;  %v1159_v62 = vadd.f32 %v4763_v46, %v4635_v63  ;;  %v1180_v10 = vsel %vm78_vm0, %v1172_v55, 0.0  ;;  %v1171_v35 = vsub.f32 %v1163_v25, %v4366_v48 }
  0x64   :  { %v1470_v39 = vadd.f32 %v4863_v47, %v4754_v51  ;;  %v1471_v21 = vadd.f32 %v4871_v40, %v4763_v46 }
  0x65   :  { %v1045_v11 = vsel %vm78_vm0, %v1023_v61, 0.0  ;;  %v1167_v63 = vsub.f32 %v1159_v62, %v4299_v18  ;;  %v1195_v61 = vsel %vm78_vm0, %v1177_v52, 0.0  ;;  %v1179_v43 = vmul.f32 %v1171_v35, %v1171_v35  ;;  %v1300_v62 = vld [vmem:[%s8624_s0 + $0x25] sm:$0xff] }
  0x66   :  { %v1316_v6 = vadd.f32 %v1308_v2, %v1300_v62  ;;  %v1478_v51 = vsub.f32 %v1470_v39, %v4268_v5 }
  0x67   :  { %887 = vadd.xlane.f32.xlu1 %v886_v37  ;;  %890 = vadd.xlane.f32.xlu0 %v889_v22  ;;  %v4784_v37 = vmul.f32 0.5, %v4737_v31  ;;  %v1174_v22 = vmul.f32 %v1166_v53, %v1166_v53  ;;  %v1175_v20 = vmul.f32 %v1167_v63, %v1167_v63  ;;  %v1323_v53 = vsub.f32 %v1315_v56, %v4299_v18 }
  0x68   :  { %v1322_v63 = vsub.f32 %v1314_v58, %v4268_v5  ;;  %v1324_v45 = vsub.f32 %v1316_v6, %v4351_v41  ;;  %v1486_v5 = vmul.f32 %v1478_v51, %v1478_v51 }
  0x69   :  { %v1162_v28 = vadd.f32 %v4784_v37, %v4656_v16  ;;  %v1313_v16 = vadd.f32 %v1305_v1, %v4801_v38  ;;  %v1186_v49 = vsel %vm78_vm0, %v1174_v22, 0.0  ;;  %v1310_v22 = vmul.f32 0.0, %v4737_v31  ;;  %v1302_v1 = vld [vmem:[%s8624_s0 + $0x35] sm:$0xff] }
  0x6a   :  { %v1332_v52 = vmul.f32 %v1324_v45, %v1324_v45  ;;  %v4889_v58 = vmul.f32 0.5, %v1302_v1 }
  0x6b   :  { %1028 = vadd.xlane.f32.xlu1 %v1027_v14  ;;  %1025 = vadd.xlane.f32.xlu0 %v1024_v29  ;;  %v1183_v14 = vsel %vm78_vm0, %v1173_v59, 0.0  ;;  %v4811_v29 = vld [vmem:[%s8624_s0 + $0x5] sm:$0xff]  ;;  %v1170_v30 = vsub.f32 %v1162_v28, %v4374_v54  ;;  %v1318_v25 = vadd.f32 %v1310_v22, %v1302_v1 }
  0x6c   :  { %v1312_v34 = vadd.f32 %v1304_v13, %v4811_v29  ;;  %v4852_v8 = vmul.f32 0.5, %v4811_v29  ;;  %v1319_v13 = vadd.f32 %v1311_v17, %v1303_v23 }
  0x6d   :  { %v1178_v24 = vmul.f32 %v1170_v30, %v1170_v30  ;;  %v1326_v35 = vsub.f32 %v1318_v25, %v4374_v54 }
  0x6e   :  { %v1320_v4 = vsub.f32 %v1312_v34, %v4285_v12  ;;  %v1327_v30 = vsub.f32 %v1319_v13, %v4366_v48 }
  0x6f   :  { %1034 = vadd.xlane.f32.xlu1 %v1033_v44  ;;  %1031 = vadd.xlane.f32.xlu0 %v1030_v57  ;;  %v1189_v44 = vsel %vm78_vm0, %v1175_v20, 0.0  ;;  %v1321_v57 = vsub.f32 %v1313_v16, %v4318_v26  ;;  %v1330_v20 = vmul.f32 %v1322_v63, %v1322_v63  ;;  %v1468_v16 = vadd.f32 %v4852_v8, %v4740_v7 }
  0x70   :  { %v1335_v56 = vmul.f32 %v1327_v30, %v1327_v30 }
  0x71   :  { %v1329_v55 = vmul.f32 %v1321_v57, %v1321_v57  ;;  %v1476_v7 = vsub.f32 %v1468_v16, %v4285_v12 }
  0x73   :  { %1040 = vadd.xlane.f32.xlu1 %v1039_v60  ;;  %1037 = vadd.xlane.f32.xlu0 %v1036_v0  ;;  %v1309_v60 = vmul.f32 0.0, %v4713_v9  ;;  %v1301_v0 = vld [vmem:[%s8624_s0 + $0x2d] sm:$0xff]  ;;  %v1198_v9 = vsel %vm78_vm0, %v1178_v24, 0.0  ;;  %v1339_v32 = vsel %vm78_vm0, %v1329_v55, 0.0  ;;  %v1348_v24 = vsel %vm78_vm0, %v1332_v52, 0.0 }
  0x74   :  { %v1484_v12 = vmul.f32 %v1476_v7, %v1476_v7  ;;  %v1616_v55 = vmul.f32 0.0, %v4811_v29 }
  0x75   :  { %v1317_v59 = vadd.f32 %v1309_v60, %v1301_v0  ;;  %v4883_v60 = vmul.f32 0.5, %v1301_v0  ;;  %v4895_v0 = vmul.f32 0.5, %v1303_v23  ;;  %v1498_v23 = vsel %vm78_vm0, %v1486_v5, 0.0 }
  0x77   :  { %1046 = vadd.xlane.f32.xlu1 %v1045_v11  ;;  %1043 = vadd.xlane.f32.xlu0 %v1042_v19  ;;  %v1328_v11 = vmul.f32 %v1320_v4, %v1320_v4  ;;  %v1201_v19 = vsel %vm78_vm0, %v1179_v43, 0.0  ;;  %v1325_v28 = vsub.f32 %v1317_v59, %v4333_v33  ;;  %v1334_v4 = vmul.f32 %v1326_v35, %v1326_v35  ;;  %v1608_v59 = vld [vmem:[%s8624_s0 + $0x6] sm:$0xff] }
  0x78   :  { %v1473_v46 = vadd.f32 %v4883_v60, %v4777_v3  ;;  %v1474_v3 = vadd.f32 %v4889_v58, %v4784_v37  ;;  %v1624_v37 = vadd.f32 %v1616_v55, %v1608_v59 }
  0x79   :  { %v1336_v31 = vsel %vm78_vm0, %v1328_v11, 0.0  ;;  %v1333_v36 = vmul.f32 %v1325_v28, %v1325_v28  ;;  %v1354_v2 = vsel %vm78_vm0, %v1334_v4, 0.0  ;;  %v4205_v28 = vld [vmem:[%s8625_s1] sm:$0xff] }
  0x7a   :  { %v1482_v1 = vsub.f32 %v1474_v3, %v4374_v54  ;;  %v1632_v13 = vsub.f32 %v1624_v37, %v4205_v28  ;;  %v4206_v54 = vld [vmem:[%s8625_s1 + $0x8] sm:$0xff] }
  0x7b   :  { %1181 = vadd.xlane.f32.xlu1 %v1180_v10  ;;  %1184 = vadd.xlane.f32.xlu0 %v1183_v14  ;;  %v1331_v10 = vmul.f32 %v1323_v53, %v1323_v53  ;;  %v4857_v14 = vmul.f32 0.5, %v4801_v38  ;;  %v1351_v57 = vsel %vm78_vm0, %v1333_v36, 0.0  ;;  %v1617_v53 = vmul.f32 0.0, %v4801_v38  ;;  %v1609_v38 = vld [vmem:[%s8624_s0 + $0xe] sm:$0xff] }
  0x7c   :  { %v1490_v25 = vmul.f32 %v1482_v1, %v1482_v1  ;;  %v1640_v30 = vmul.f32 %v1632_v13, %v1632_v13 }
  0x7d   :  { %v1469_v34 = vadd.f32 %v4857_v14, %v4746_v42  ;;  %v4878_v42 = vmul.f32 0.5, %v1300_v62  ;;  %v1479_v62 = vsub.f32 %v1471_v21, %v4299_v18  ;;  %v1625_v63 = vadd.f32 %v1617_v53, %v1609_v38 }
  0x7e   :  { %v1510_v35 = vsel %vm78_vm0, %v1490_v25, 0.0  ;;  %v8627_v21 = vlaneseq }
  0x7f   :  { %1187 = vadd.xlane.f32.xlu1 %v1186_v49  ;;  %1190 = vadd.xlane.f32.xlu0 %v1189_v44  ;;  %v1345_v49 = vsel %vm78_vm0, %v1331_v10, 0.0  ;;  %v1342_v44 = vsel %vm78_vm0, %v1330_v20, 0.0  ;;  %v1487_v17 = vmul.f32 %v1479_v62, %v1479_v62 }
  0x83   :  { %1193 = vadd.xlane.f32.xlu1 %v1192_v15  ;;  %1196 = vadd.xlane.f32.xlu0 %v1195_v61  ;;  %v1477_v15 = vsub.f32 %v1469_v34, %v4318_v26  ;;  %v1357_v61 = vsel %vm78_vm0, %v1335_v56, 0.0  ;;  %v1472_v26 = vadd.f32 %v4878_v42, %v4771_v50  ;;  %v1492_v50 = vsel %vm78_vm0, %v1484_v12, 0.0 }
  0x85   :  { %v1485_v43 = vmul.f32 %v1477_v15, %v1477_v15  ;;  %v1480_v18 = vsub.f32 %v1472_v26, %v4351_v41  ;;  %v1475_v41 = vadd.f32 %v4895_v0, %v4791_v27 }
  0x87   :  { %1199 = vadd.xlane.f32.xlu1 %v1198_v9  ;;  %1202 = vadd.xlane.f32.xlu0 %v1201_v19  ;;  %v1495_v11 = vsel %vm78_vm0, %v1485_v43, 0.0  ;;  %v1481_v19 = vsub.f32 %v1473_v46, %v4333_v33  ;;  %v1488_v22 = vmul.f32 %v1480_v18, %v1480_v18  ;;  %v1501_v33 = vsel %vm78_vm0, %v1487_v17, 0.0 }
  0x89   :  { %v1489_v27 = vmul.f32 %v1481_v19, %v1481_v19  ;;  %v1504_v45 = vsel %vm78_vm0, %v1488_v22, 0.0 }
  0x8b   :  { %1340 = vadd.xlane.f32.xlu1 %v1339_v32  ;;  %1337 = vadd.xlane.f32.xlu0 %v1336_v31  ;;  %v1483_v32 = vsub.f32 %v1475_v41, %v4366_v48  ;;  %v1633_v31 = vsub.f32 %v1625_v63, %v4206_v54  ;;  %v1507_v16 = vsel %vm78_vm0, %v1489_v27, 0.0 }
  0x8d   :  { %v1641_v34 = vmul.f32 %v1633_v31, %v1633_v31 }
  0x8f   :  { %1346 = vadd.xlane.f32.xlu1 %v1345_v49  ;;  %1343 = vadd.xlane.f32.xlu0 %v1342_v44  ;;  %v1491_v49 = vmul.f32 %v1483_v32, %v1483_v32  ;;  %v1651_v4 = vsel %vm78_vm0, %v1641_v34, 0.0 }
  0x93   :  { %1352 = vadd.xlane.f32.xlu1 %v1351_v57  ;;  %1349 = vadd.xlane.f32.xlu0 %v1348_v24  ;;  %v1513_v57 = vsel %vm78_vm0, %v1491_v49, 0.0  ;;  %v1648_v24 = vsel %vm78_vm0, %v1640_v30, 0.0  ;;  %v14_v49 = vshrl.u32 %v8627_v21, 7 }
  0x97   :  { %1358 = vadd.xlane.f32.xlu1 %v1357_v61  ;;  %1355 = vadd.xlane.f32.xlu0 %v1354_v2 }
  0x98   :  { %v4899_v9 = vpop.xlane.xlu1 %86  ;;  %v4913_v29 = vpop.xlane.xlu0 %80 }
  0x99   :  { %3821 = vrsqrt.f32 %v4899_v9  ;;  %vm119_vm2 = vcmp.eq.f32.partialorder %v4899_v9, inf  ;;  %vm121_vm3 = vcmp.eq.f32.partialorder %v4899_v9, 0.0  ;;  %v122_v51 = vand.u32 2147483648, %v4899_v9 }
  0x9a   :  { %3823 = vrsqrt.f32 %v4913_v29  ;;  %vm105_vm4 = vcmp.eq.f32.partialorder %v4913_v29, inf  ;;  %vm107_vm5 = vcmp.eq.f32.partialorder %v4913_v29, 0.0  ;;  %v108_v46 = vand.u32 2147483648, %v4913_v29 }
  0x9b   :  { %1493 = vadd.xlane.f32.xlu1 %v1492_v50  ;;  %1496 = vadd.xlane.f32.xlu0 %v1495_v11 }
  0x9c   :  { %v4919_v6 = vpop.xlane.xlu1 %89  ;;  %v4924_v10 = vpop.xlane.xlu0 %83 }
  0x9d   :  { %3825 = vrsqrt.f32 %v4919_v6  ;;  %vm112_vm6 = vcmp.eq.f32.partialorder %v4924_v10, inf  ;;  %v115_v5 = vand.u32 2147483648, %v4924_v10  ;;  %vm114_vm7 = vcmp.eq.f32.partialorder %v4924_v10, 0.0 }
  0x9e   :  { %3827 = vrsqrt.f32 %v4924_v10  ;;  %vm126_vm8 = vcmp.eq.f32.partialorder %v4919_v6, inf  ;;  %v129_v18 = vand.u32 2147483648, %v4919_v6  ;;  %vm128_vm9 = vcmp.eq.f32.partialorder %v4919_v6, 0.0 }
  0x9f   :  { %1499 = vadd.xlane.f32.xlu1 %v1498_v23  ;;  %1502 = vadd.xlane.f32.xlu0 %v1501_v33 }
  0xa0   :  { %v4935_v20 = vpop.xlane.xlu1 %95  ;;  %v4939_v48 = vpop.xlane.xlu0 %92 }
  0xa1   :  { %3829 = vrsqrt.f32 %v4935_v20  ;;  %vm133_vm10 = vcmp.eq.f32.partialorder %v4939_v48, inf  ;;  %vm140_vm11 = vcmp.eq.f32.partialorder %v4935_v20, inf  ;;  %vm135_vm12 = vcmp.eq.f32.partialorder %v4939_v48, 0.0 }
  0xa2   :  { %3831 = vrsqrt.f32 %v4939_v48  ;;  %vm142_vm13 = vcmp.eq.f32.partialorder %v4935_v20, 0.0 }
  0xa3   :  { %v3822_v36 = vpop.eup %3821  ;;  %1505 = vadd.xlane.f32.xlu1 %v1504_v45  ;;  %1508 = vadd.xlane.f32.xlu0 %v1507_v16  ;;  %v143_v45 = vand.u32 2147483648, %v4935_v20 }
  0xa4   :  { %v3824_v44 = vpop.eup %3823  ;;  %v4943_v52 = vpop.xlane.xlu1 %101  ;;  %v118_v15 = vmul.f32 %v3822_v36, %v4899_v9 }
  0xa5   :  { %v104_v7 = vmul.f32 %v3824_v44, %v4913_v29  ;;  %3833 = vrsqrt.f32 %v4943_v52  ;;  %v4948_v39 = vpop.xlane.xlu0 %98  ;;  %vm154_vm15 = vcmp.eq.f32.partialorder %v4943_v52, inf }
  0xa6   :  { %3835 = vrsqrt.f32 %v4948_v39  ;;  %v120_v53 = vsel %vm119_vm2, %v4899_v9, %v118_v15  ;;  %vm147_vm14 = vcmp.eq.f32.partialorder %v4948_v39, inf  ;;  %vm149_vm2 = vcmp.eq.f32.partialorder %v4948_v39, 0.0 }
  0xa7   :  { %v3826_v56 = vpop.eup %3825  ;;  %1511 = vadd.xlane.f32.xlu1 %v1510_v35  ;;  %1514 = vadd.xlane.f32.xlu0 %v1513_v57  ;;  %v106_v43 = vsel %vm105_vm4, %v4913_v29, %v104_v7  ;;  %v123_v63 = vsel %vm121_vm3, %v122_v51, %v120_v53  ;;  %vm156_vm3 = vcmp.eq.f32.partialorder %v4943_v52, 0.0 }
  0xa8   :  { %v3828_v12 = vpop.eup %3827  ;;  %v4959_v61 = vpop.xlane.xlu1 %245  ;;  %v125_v26 = vmul.f32 %v3826_v56, %v4919_v6  ;;  %v109_v59 = vsel %vm107_vm5, %v108_v46, %v106_v43  ;;  %v179_v54 = vsel %vm175_vm1, %v123_v63, 0.0  ;;  %v157_v43 = vand.u32 2147483648, %v4943_v52 }
  0xa9   :  { %v111_v2 = vmul.f32 %v3828_v12, %v4924_v10  ;;  %v4965_v62 = vpop.xlane.xlu0 %248  ;;  %3837 = vrsqrt.f32 %v4959_v61  ;;  %v176_v22 = vsel %vm175_vm1, %v109_v59, 0.0  ;;  %vm270_vm4 = vcmp.eq.f32.partialorder %v4959_v61, inf }
  0xaa   :  { %3839 = vrsqrt.f32 %v4965_v62  ;;  %v127_v41 = vsel %vm126_vm8, %v4919_v6, %v125_v26  ;;  %v136_v6 = vand.u32 2147483648, %v4939_v48  ;;  %vm272_vm5 = vcmp.eq.f32.partialorder %v4959_v61, 0.0 }
  0xab   :  { %v3830_v55 = vpop.eup %3829  ;;  %v113_v50 = vsel %vm112_vm6, %v4924_v10, %v111_v2  ;;  %1652 = vadd.xlane.f32.xlu1 %v1651_v4  ;;  %1649 = vadd.xlane.f32.xlu0 %v1648_v24  ;;  %v130_v9 = vsel %vm128_vm9, %v129_v18, %v127_v41  ;;  %v273_v18 = vand.u32 2147483648, %v4959_v61  ;;  %vm277_vm6 = vcmp.eq.f32.partialorder %v4965_v62, inf }
  0xac   :  { %v3832_v11 = vpop.eup %3831  ;;  %v4979_v3 = vpop.xlane.xlu1 %251  ;;  %v116_v38 = vsel %vm114_vm7, %v115_v5, %v113_v50  ;;  %v139_v37 = vmul.f32 %v3830_v55, %v4935_v20  ;;  %vm279_vm8 = vcmp.eq.f32.partialorder %v4965_v62, 0.0 }
  0xad   :  { %v132_v17 = vmul.f32 %v3832_v11, %v4939_v48  ;;  %3841 = vrsqrt.f32 %v4979_v3  ;;  %v4985_v19 = vpop.xlane.xlu0 %254  ;;  %v177_v1 = vsel %vm175_vm1, %v116_v38, 0.0  ;;  %v5037_v11 = vadd.s32 56, %v14_v49 }
  0xae   :  { %3843 = vrsqrt.f32 %v4985_v19  ;;  %v178_v27 = vadd.f32 %v177_v1, %v176_v22  ;;  %v141_v28 = vsel %vm140_vm11, %v4935_v20, %v139_v37  ;;  %v150_v20 = vand.u32 2147483648, %v4948_v39 }
  0xaf   :  { %v3834_v29 = vpop.eup %3833  ;;  %v134_v23 = vsel %vm133_vm10, %v4939_v48, %v132_v17  ;;  %v181_v48 = vsel %vm175_vm1, %v130_v9, 0.0  ;;  %v144_v34 = vsel %vm142_vm13, %v143_v45, %v141_v28  ;;  %vm284_vm7 = vcmp.eq.f32.partialorder %v4979_v3, inf }
  0xb0   :  { %v3836_v10 = vpop.eup %3835  ;;  %v4998_v33 = vpop.xlane.xlu1 %257  ;;  %v137_v31 = vsel %vm135_vm12, %v136_v6, %v134_v23  ;;  %v153_v25 = vmul.f32 %v3834_v29, %v4943_v52  ;;  %v180_v16 = vadd.f32 %v179_v54, %v178_v27  ;;  %v185_v26 = vsel %vm175_vm1, %v144_v34, 0.0 }
  0xb1   :  { %3845 = vrsqrt.f32 %v4998_v33  ;;  %v5003_v32 = vpop.xlane.xlu0 %260  ;;  %v146_v13 = vmul.f32 %v3836_v10, %v4948_v39  ;;  %v183_v56 = vsel %vm175_vm1, %v137_v31, 0.0  ;;  %v280_v23 = vand.u32 2147483648, %v4965_v62 }
  0xb2   :  { %3847 = vrsqrt.f32 %v5003_v32  ;;  %v182_v35 = vadd.f32 %v181_v48, %v180_v16  ;;  %v155_v15 = vsel %vm154_vm15, %v4943_v52, %v153_v25  ;;  %v287_v27 = vand.u32 2147483648, %v4979_v3 }
  0xb3   :  { %v3838_v36 = vpop.eup %3837  ;;  %v148_v44 = vsel %vm147_vm14, %v4948_v39, %v146_v13  ;;  %v158_v50 = vsel %vm156_vm3, %v157_v43, %v155_v15  ;;  %vm286_vm9 = vcmp.eq.f32.partialorder %v4979_v3, 0.0  ;;  %vm291_vm10 = vcmp.eq.f32.partialorder %v4985_v19, inf }
  0xb4   :  { %v5015_v30 = vpop.xlane.xlu1 %263  ;;  %v3840_v7 = vpop.eup %3839  ;;  %v184_v24 = vadd.f32 %v183_v56, %v182_v35  ;;  %v269_v12 = vmul.f32 %v3838_v36, %v4959_v61  ;;  %v151_v51 = vsel %vm149_vm2, %v150_v20, %v148_v44  ;;  %v189_v63 = vsel %vm175_vm1, %v158_v50, 0.0 }
  0xb5   :  { %3849 = vrsqrt.f32 %v5015_v30  ;;  %v5019_v57 = vpop.xlane.xlu0 %266  ;;  %v276_v2 = vmul.f32 %v3840_v7, %v4965_v62  ;;  %v187_v59 = vsel %vm175_vm1, %v151_v51, 0.0  ;;  %vm298_vm11 = vcmp.eq.f32.partialorder %v4998_v33, inf }
  0xb6   :  { %3851 = vrsqrt.f32 %v5019_v57  ;;  %v186_v39 = vadd.f32 %v185_v26, %v184_v24  ;;  %v271_v52 = vsel %vm270_vm4, %v4959_v61, %v269_v12  ;;  %v294_v61 = vand.u32 2147483648, %v4985_v19 }
  0xb7   :  { %v3842_v4 = vpop.eup %3841  ;;  %v278_v41 = vsel %vm277_vm6, %v4965_v62, %v276_v2  ;;  %v274_v28 = vsel %vm272_vm5, %v273_v18, %v271_v52  ;;  %vm293_vm12 = vcmp.eq.f32.partialorder %v4985_v19, 0.0  ;;  %v301_v35 = vand.u32 2147483648, %v4998_v33 }
  0xb8   :  { %v5031_v46 = vpop.xlane.xlu1 %404  ;;  %v3844_v5 = vpop.eup %3843  ;;  %v283_v55 = vmul.f32 %v3842_v4, %v4979_v3  ;;  %v188_v17 = vadd.f32 %v187_v59, %v186_v39  ;;  %v281_v54 = vsel %vm279_vm8, %v280_v23, %v278_v41  ;;  %v332_v16 = vsel %vm175_vm1, %v274_v28, 0.0 }
  0xb9   :  { %v5035_v53 = vpop.xlane.xlu0 %401  ;;  %v290_v37 = vmul.f32 %v3844_v5, %v4985_v19  ;;  %v333_v34 = vsel %vm175_vm1, %v281_v54, 0.0  ;;  %vm300_vm13 = vcmp.eq.f32.partialorder %v4998_v33, 0.0  ;;  %vm305_vm14 = vcmp.eq.f32.partialorder %v5003_v32, inf }
  0xba   :  { %3853 = vrsqrt.f32 %v5035_v53  ;;  %v285_v22 = vsel %vm284_vm7, %v4979_v3, %v283_v55  ;;  %v190_v10 = vadd.f32 %v189_v63, %v188_v17  ;;  %v334_v7 = vadd.f32 %v333_v34, %v332_v16 }
  0xbb   :  { %v3846_v38 = vpop.eup %3845  ;;  %3855 = vrsqrt.f32 %v5031_v46  ;;  %v288_v62 = vsel %vm286_vm9, %v287_v27, %v285_v22  ;;  %v292_v45 = vsel %vm291_vm10, %v4985_v19, %v290_v37  ;;  %vm307_vm15 = vcmp.eq.f32.partialorder %v5003_v32, 0.0 }
  0xbc   :  { %v5050_v29 = vpop.xlane.xlu1 %410  ;;  %v297_v1 = vmul.f32 %v3846_v38, %v4998_v33  ;;  %v3848_v6 = vpop.eup %3847  ;;  %191 = vadd.xlane.f32.xlu0 %v190_v10  ;;  %v295_v44 = vsel %vm293_vm12, %v294_v61, %v292_v45  ;;  %v335_v20 = vsel %vm175_vm1, %v288_v62, 0.0  ;;  %vm312_vm2 = vcmp.eq.f32.partialorder %v5015_v30, inf }
  0xbd   :  { %v5055_v9 = vpop.xlane.xlu0 %407  ;;  %3857 = vrsqrt.f32 %v5050_v29  ;;  %v304_v49 = vmul.f32 %v3848_v6, %v5003_v32  ;;  %v336_v4 = vadd.f32 %v335_v20, %v334_v7  ;;  %v337_v43 = vsel %vm175_vm1, %v295_v44, 0.0 }
  0xbe   :  { %3859 = vrsqrt.f32 %v5055_v9  ;;  %v299_v3 = vsel %vm298_vm11, %v4998_v33, %v297_v1  ;;  %v308_v26 = vand.u32 2147483648, %v5003_v32  ;;  %v315_v2 = vand.u32 2147483648, %v5015_v30 }
  0xbf   :  { %v3850_v13 = vpop.eup %3849  ;;  %v302_v15 = vsel %vm300_vm13, %v301_v35, %v299_v3  ;;  %v306_v51 = vsel %vm305_vm14, %v5003_v32, %v304_v49  ;;  %v338_v39 = vadd.f32 %v337_v43, %v336_v4  ;;  %vm433_vm3 = vcmp.eq.f32.partialorder %v5031_v46, inf }
  0xc0   :  { %v5066_v31 = vpop.xlane.xlu1 %416  ;;  %v3852_v48 = vpop.eup %3851  ;;  %v311_v36 = vmul.f32 %v3850_v13, %v5015_v30  ;;  %vm314_vm4 = vcmp.eq.f32.partialorder %v5015_v30, 0.0  ;;  %vm319_vm5 = vcmp.eq.f32.partialorder %v5019_v57, inf  ;;  %v339_v50 = vsel %vm175_vm1, %v302_v15, 0.0 }
  0xc1   :  { %v5071_v25 = vpop.xlane.xlu0 %413  ;;  %v318_v24 = vmul.f32 %v3852_v48, %v5019_v57  ;;  %v309_v52 = vsel %vm307_vm15, %v308_v26, %v306_v51  ;;  %vm435_vm6 = vcmp.eq.f32.partialorder %v5031_v46, 0.0  ;;  %vm426_vm7 = vcmp.eq.f32.partialorder %v5035_v53, inf }
  0xc2   :  { %3861 = vrsqrt.f32 %v5071_v25  ;;  %v313_v33 = vsel %vm312_vm2, %v5015_v30, %v311_v36  ;;  %v436_v30 = vand.u32 2147483648, %v5031_v46  ;;  %v322_v63 = vand.u32 2147483648, %v5019_v57 }
  0xc3   :  { %3863 = vrsqrt.f32 %v5066_v31  ;;  %v316_v17 = vsel %vm314_vm4, %v315_v2, %v313_v33  ;;  %v320_v41 = vsel %vm319_vm5, %v5019_v57, %v318_v24  ;;  %vm428_vm8 = vcmp.eq.f32.partialorder %v5035_v53, 0.0 }
  0xc4   :  { %v5082_v19 = vpop.xlane.xlu1 %422  ;;  %v3854_v12 = vpop.eup %3853  ;;  %vm321_vm9 = vcmp.eq.f32.partialorder %v5019_v57, 0.0  ;;  %v340_v32 = vadd.f32 %v339_v50, %v338_v39  ;;  %v429_v1 = vand.u32 2147483648, %v5035_v53  ;;  %v341_v6 = vsel %vm175_vm1, %v309_v52, 0.0 }
  0xc5   :  { %v5089_v56 = vpop.xlane.xlu0 %419  ;;  %3865 = vrsqrt.f32 %v5082_v19  ;;  %v3856_v5 = vpop.eup %3855  ;;  %v425_v59 = vmul.f32 %v3854_v12, %v5035_v53  ;;  %v323_v10 = vsel %vm321_vm9, %v322_v63, %v320_v41  ;;  %v343_v27 = vsel %vm175_vm1, %v316_v17, 0.0 }
  0xc6   :  { %3867 = vrsqrt.f32 %v5089_v56  ;;  %v432_v23 = vmul.f32 %v3856_v5, %v5031_v46  ;;  %v342_v45 = vadd.f32 %v341_v6, %v340_v32  ;;  %vm447_vm10 = vcmp.eq.f32.partialorder %v5050_v29, inf }
  0xc7   :  { %v3858_v18 = vpop.eup %3857  ;;  %v427_v13 = vsel %vm426_vm7, %v5035_v53, %v425_v59  ;;  %v450_v57 = vand.u32 2147483648, %v5050_v29  ;;  %vm440_vm11 = vcmp.eq.f32.partialorder %v5055_v9, inf  ;;  %vm442_vm12 = vcmp.eq.f32.partialorder %v5055_v9, 0.0 }
  0xc8   :  { %v5100_v55 = vpop.xlane.xlu1 %557  ;;  %v3860_v37 = vpop.eup %3859  ;;  %v446_v54 = vmul.f32 %v3858_v18, %v5050_v29  ;;  %v434_v48 = vsel %vm433_vm3, %v5031_v46, %v432_v23  ;;  %v443_v49 = vand.u32 2147483648, %v5055_v9  ;;  %v344_v36 = vadd.f32 %v343_v27, %v342_v45 }
  0xc9   :  { %v5106_v38 = vpop.xlane.xlu0 %560  ;;  %v439_v62 = vmul.f32 %v3860_v37, %v5055_v9  ;;  %3869 = vrsqrt.f32 %v5100_v55  ;;  %v345_v44 = vsel %vm175_vm1, %v323_v10, 0.0  ;;  %v430_v7 = vsel %vm428_vm8, %v429_v1, %v427_v13 }
  0xca   :  { %vm454_vm13 = vcmp.eq.f32.partialorder %v5071_v25, inf  ;;  %3871 = vrsqrt.f32 %v5106_v38  ;;  %v346_v24 = vadd.f32 %v345_v44, %v344_v36  ;;  %v448_v12 = vsel %vm447_vm10, %v5050_v29, %v446_v54 }
  0xcb   :  { %v441_v15 = vsel %vm440_vm11, %v5055_v9, %v439_v62  ;;  %v437_v53 = vsel %vm435_vm6, %v436_v30, %v434_v48  ;;  %vm487_vm14 = vcmp.lt.s32.totalorder %v5037_v11, 63  ;;  %vm449_vm15 = vcmp.eq.f32.partialorder %v5050_v29, 0.0 }
  0xcc   :  { %v3862_v22 = vpop.eup %3861  ;;  %v5121_v28 = vpop.xlane.xlu1 %563  ;;  %347 = vadd.xlane.f32.xlu1 %v346_v24  ;;  %vm456_vm2 = vcmp.eq.f32.partialorder %v5071_v25, 0.0  ;;  %v457_v43 = vand.u32 2147483648, %v5071_v25  ;;  %v444_v46 = vsel %vm442_vm12, %v443_v49, %v441_v15  ;;  %v451_v39 = vsel %vm449_vm15, %v450_v57, %v448_v12 }
  0xcd   :  { %v5126_v61 = vpop.xlane.xlu0 %566  ;;  %v453_v3 = vmul.f32 %v3862_v22, %v5071_v25  ;;  %v3864_v16 = vpop.eup %3863  ;;  %3873 = vrsqrt.f32 %v5121_v28  ;;  %v496_v50 = vsel %vm175_vm1, %v430_v7, 0.0  ;;  %vm461_vm3 = vcmp.eq.f32.partialorder %v5066_v31, inf }
  0xce   :  { %v460_v33 = vmul.f32 %v3864_v16, %v5066_v31  ;;  %3875 = vrsqrt.f32 %v5126_v61  ;;  %vm475_vm4 = vcmp.eq.f32.partialorder %v5082_v19, inf  ;;  %vm463_vm5 = vcmp.eq.f32.partialorder %v5066_v31, 0.0 }
  0xcf   :  { %v3866_v34 = vpop.eup %3865  ;;  %v455_v51 = vsel %vm454_vm13, %v5071_v25, %v453_v3  ;;  %v497_v25 = vsel %vm175_vm1, %v437_v53, 0.0  ;;  %vm468_vm6 = vcmp.eq.f32.partialorder %v5089_v56, inf  ;;  %v499_v17 = vsel %vm175_vm1, %v444_v46, 0.0 }
  0xd0   :  { %v5139_v35 = vpop.xlane.xlu1 %569  ;;  %v3868_v20 = vpop.eup %3867  ;;  %v474_v26 = vmul.f32 %v3866_v34, %v5082_v19  ;;  %v458_v29 = vsel %vm456_vm2, %v457_v43, %v455_v51  ;;  %v462_v59 = vsel %vm461_vm3, %v5066_v31, %v460_v33  ;;  %v498_v9 = vadd.f32 %v497_v25, %v496_v50 }
  0xd1   :  { %v5146_v4 = vpop.xlane.xlu0 %572  ;;  %v467_v5 = vmul.f32 %v3868_v20, %v5089_v56  ;;  %3877 = vrsqrt.f32 %v5139_v35  ;;  %v464_v37 = vand.u32 2147483648, %v5066_v31  ;;  %v478_v63 = vand.u32 2147483648, %v5082_v19 }
  0xd2   :  { %v476_v52 = vsel %vm475_vm4, %v5082_v19, %v474_v26  ;;  %v500_v23 = vadd.f32 %v499_v17, %v498_v9  ;;  %3879 = vrsqrt.f32 %v5146_v4  ;;  %vm470_vm7 = vcmp.eq.f32.partialorder %v5089_v56, 0.0 }
  0xd3   :  { %v469_v30 = vsel %vm468_vm6, %v5089_v56, %v467_v5  ;;  %v471_v22 = vand.u32 2147483648, %v5089_v56  ;;  %vm477_vm8 = vcmp.eq.f32.partialorder %v5082_v19, 0.0  ;;  %v3870_v1 = vpop.eup %3869  ;;  %v501_v6 = vsel %vm175_vm1, %v451_v39, 0.0 }
  0xd4   :  { %v5161_v2 = vpop.xlane.xlu1 %575  ;;  %v479_v10 = vsel %vm477_vm8, %v478_v63, %v476_v52  ;;  %v503_v27 = vsel %vm175_vm1, %v458_v29, 0.0  ;;  %v3872_v13 = vpop.eup %3871  ;;  %v465_v54 = vsel %vm463_vm5, %v464_v37, %v462_v59  ;;  %v502_v45 = vadd.f32 %v501_v6, %v500_v23 }
  0xd5   :  { %v5168_v18 = vpop.xlane.xlu0 %578  ;;  %v472_v62 = vsel %vm470_vm7, %v471_v22, %v469_v30  ;;  %v495_v19 = vsel %vm487_vm14, %v479_v10, 0.0  ;;  %v581_v48 = vmul.f32 %v3870_v1, %v5100_v55  ;;  %v588_v49 = vmul.f32 %v3872_v13, %v5106_v38 }
  0xd6   :  { %3881 = vrsqrt.f32 %v5168_v18  ;;  %v504_v3 = vadd.f32 %v503_v27, %v502_v45  ;;  %v505_v36 = vsel %vm175_vm1, %v465_v54, 0.0  ;;  %v507_v31 = vsel %vm175_vm1, %v472_v62, 0.0 }
  0xd7   :  { %3883 = vrsqrt.f32 %v5161_v2  ;;  %v3874_v57 = vpop.eup %3873  ;;  %vm582_vm9 = vcmp.eq.f32.partialorder %v5100_v55, inf  ;;  %vm584_vm10 = vcmp.eq.f32.partialorder %v5100_v55, 0.0  ;;  %v585_v15 = vand.u32 2147483648, %v5100_v55 }
  0xd8   :  { %v5179_v41 = vpop.xlane.xlu1 %716  ;;  %v3876_v34 = vpop.eup %3875  ;;  %v595_v44 = vmul.f32 %v3874_v57, %v5121_v28  ;;  %v506_v7 = vadd.f32 %v505_v36, %v504_v3  ;;  %vm589_vm11 = vcmp.eq.f32.partialorder %v5106_v38, inf  ;;  %v509_v24 = vsel %vm175_vm1, %v495_v19, 0.0 }
  0xd9   :  { %v5185_v32 = vpop.xlane.xlu0 %713  ;;  %vm591_vm12 = vcmp.eq.f32.partialorder %v5106_v38, 0.0  ;;  %v592_v53 = vand.u32 2147483648, %v5106_v38  ;;  %vm596_vm13 = vcmp.eq.f32.partialorder %v5121_v28, inf  ;;  %v583_v43 = vsel %vm582_vm9, %v5100_v55, %v581_v48 }
  0xda   :  { %v508_v51 = vadd.f32 %v507_v31, %v506_v7  ;;  %v590_v26 = vsel %vm589_vm11, %v5106_v38, %v588_v49  ;;  %v602_v46 = vmul.f32 %v3876_v34, %v5126_v61  ;;  %3885 = vrsqrt.f32 %v5179_v41 }
  0xdb   :  { %v3878_v20 = vpop.eup %3877  ;;  %v597_v5 = vsel %vm596_vm13, %v5121_v28, %v595_v44  ;;  %3887 = vrsqrt.f32 %v5185_v32  ;;  %vm598_vm15 = vcmp.eq.f32.partialorder %v5121_v28, 0.0  ;;  %v599_v59 = vand.u32 2147483648, %v5121_v28 }
  0xdc   :  { %v5196_v56 = vpop.xlane.xlu1 %722  ;;  %v3880_v39 = vpop.eup %3879  ;;  %v609_v50 = vmul.f32 %v3878_v20, %v5139_v35  ;;  %v510_v29 = vadd.f32 %v509_v24, %v508_v51  ;;  %vm603_vm2 = vcmp.eq.f32.partialorder %v5126_v61, inf  ;;  %v606_v17 = vand.u32 2147483648, %v5126_v61 }
  0xdd   :  { %v5200_v16 = vpop.xlane.xlu0 %719  ;;  %3889 = vrsqrt.f32 %v5196_v56  ;;  %v586_v30 = vsel %vm584_vm10, %v585_v15, %v583_v43  ;;  %v593_v28 = vsel %vm591_vm12, %v592_v53, %v590_v26  ;;  %v600_v63 = vsel %vm598_vm15, %v599_v59, %v597_v5 }
  0xde   :  { %511 = vadd.xlane.f32.xlu0 %v510_v29  ;;  %3891 = vrsqrt.f32 %v5200_v16  ;;  %v604_v23 = vsel %vm603_vm2, %v5126_v61, %v602_v46  ;;  %vm610_vm3 = vcmp.eq.f32.partialorder %v5139_v35, inf  ;;  %v616_v22 = vmul.f32 %v3880_v39, %v5146_v4 }
  0xdf   :  { %vm605_vm4 = vcmp.eq.f32.partialorder %v5126_v61, 0.0  ;;  %v611_v1 = vsel %vm610_vm3, %v5139_v35, %v609_v50  ;;  %v613_v10 = vand.u32 2147483648, %v5139_v35  ;;  %v644_v27 = vsel %vm175_vm1, %v586_v30, 0.0 }
  0xe0   :  { %v5212_v12 = vpop.xlane.xlu1 %728  ;;  %v3882_v25 = vpop.eup %3881  ;;  %v645_v13 = vsel %vm175_vm1, %v593_v28, 0.0  ;;  %v607_v61 = vsel %vm605_vm4, %v606_v17, %v604_v23  ;;  %vm612_vm5 = vcmp.eq.f32.partialorder %v5139_v35, 0.0  ;;  %vm617_vm6 = vcmp.eq.f32.partialorder %v5146_v4, inf }
  0xe1   :  { %v5217_v33 = vpop.xlane.xlu0 %725  ;;  %v3884_v52 = vpop.eup %3883  ;;  %v630_v6 = vmul.f32 %v3882_v25, %v5168_v18  ;;  %v614_v62 = vsel %vm612_vm5, %v613_v10, %v611_v1  ;;  %v618_v45 = vsel %vm617_vm6, %v5146_v4, %v616_v22  ;;  %vm619_vm7 = vcmp.eq.f32.partialorder %v5146_v4, 0.0 }
  0xe2   :  { %3893 = vrsqrt.f32 %v5217_v33  ;;  %v623_v38 = vmul.f32 %v3884_v52, %v5161_v2  ;;  %vm631_vm8 = vcmp.eq.f32.partialorder %v5168_v18, inf  ;;  %v620_v57 = vand.u32 2147483648, %v5146_v4 }
  0xe3   :  { %3895 = vrsqrt.f32 %v5212_v12  ;;  %vm624_vm9 = vcmp.eq.f32.partialorder %v5161_v2, inf  ;;  %v632_v19 = vsel %vm631_vm8, %v5168_v18, %v630_v6  ;;  %v646_v3 = vadd.f32 %v645_v13, %v644_v27 }
  0xe4   :  { %v5230_v9 = vpop.xlane.xlu1 %734  ;;  %v3886_v48 = vpop.eup %3885  ;;  %v625_v49 = vsel %vm624_vm9, %v5161_v2, %v623_v38  ;;  %vm626_vm10 = vcmp.eq.f32.partialorder %v5161_v2, 0.0  ;;  %v634_v35 = vand.u32 2147483648, %v5168_v18  ;;  %v647_v36 = vsel %vm175_vm1, %v600_v63, 0.0 }
  0xe5   :  { %v5234_v37 = vpop.xlane.xlu0 %731  ;;  %v3888_v34 = vpop.eup %3887  ;;  %3897 = vrsqrt.f32 %v5230_v9  ;;  %v627_v44 = vand.u32 2147483648, %v5161_v2  ;;  %vm633_vm11 = vcmp.eq.f32.partialorder %v5168_v18, 0.0  ;;  %v648_v7 = vadd.f32 %v647_v36, %v646_v3 }
  0xe6   :  { %3899 = vrsqrt.f32 %v5234_v37  ;;  %v635_v24 = vsel %vm633_vm11, %v634_v35, %v632_v19  ;;  %v649_v53 = vsel %vm175_vm1, %v607_v61, 0.0  ;;  %v651_v51 = vsel %vm175_vm1, %v614_v62, 0.0 }
  0xe7   :  { %v3890_v15 = vpop.eup %3889  ;;  %v621_v26 = vsel %vm619_vm7, %v620_v57, %v618_v45  ;;  %v628_v46 = vsel %vm626_vm10, %v627_v44, %v625_v49  ;;  %v650_v39 = vadd.f32 %v649_v53, %v648_v7  ;;  %vm745_vm12 = vcmp.eq.f32.partialorder %v5179_v41, inf }
  0xe8   :  { %v5248_v55 = vpop.xlane.xlu1 %869  ;;  %v3892_v43 = vpop.eup %3891  ;;  %vm747_vm13 = vcmp.eq.f32.partialorder %v5179_v41, 0.0  ;;  %v748_v18 = vand.u32 2147483648, %v5179_v41  ;;  %v737_v50 = vmul.f32 %v3888_v34, %v5185_v32  ;;  %vm738_vm15 = vcmp.eq.f32.partialorder %v5185_v32, inf }
  0xe9   :  { %v5254_v54 = vpop.xlane.xlu0 %872  ;;  %v643_v4 = vsel %vm487_vm14, %v635_v24, 0.0  ;;  %v652_v29 = vadd.f32 %v651_v51, %v650_v39  ;;  %v744_v59 = vmul.f32 %v3886_v48, %v5179_v41  ;;  %v751_v52 = vmul.f32 %v3892_v43, %v5200_v16 }
  0xea   :  { %v653_v17 = vsel %vm175_vm1, %v621_v26, 0.0  ;;  %v655_v30 = vsel %vm175_vm1, %v628_v46, 0.0  ;;  %vm740_vm2 = vcmp.eq.f32.partialorder %v5185_v32, 0.0  ;;  %v741_v63 = vand.u32 2147483648, %v5185_v32 }
  0xeb   :  { %vm759_vm3 = vcmp.eq.f32.partialorder %v5196_v56, inf  ;;  %v654_v23 = vadd.f32 %v653_v17, %v652_v29  ;;  %v758_v22 = vmul.f32 %v3890_v15, %v5196_v56  ;;  %v762_v1 = vand.u32 2147483648, %v5196_v56 }
  0xec   :  { %v5268_v31 = vpop.xlane.xlu1 %875  ;;  %v3894_v2 = vpop.eup %3893  ;;  %vm752_vm4 = vcmp.eq.f32.partialorder %v5200_v16, inf  ;;  %v657_v10 = vsel %vm175_vm1, %v643_v4, 0.0  ;;  %v739_v38 = vsel %vm738_vm15, %v5185_v32, %v737_v50  ;;  %3901 = vrsqrt.f32 %v5248_v55 }
  0xed   :  { %v5273_v20 = vpop.xlane.xlu0 %878  ;;  %v3896_v28 = vpop.eup %3895  ;;  %v765_v27 = vmul.f32 %v3894_v2, %v5217_v33  ;;  %v656_v13 = vadd.f32 %v655_v30, %v654_v23  ;;  %v746_v62 = vsel %vm745_vm12, %v5179_v41, %v744_v59  ;;  %v753_v45 = vsel %vm752_vm4, %v5200_v16, %v751_v52 }
  0xee   :  { %vm754_vm5 = vcmp.eq.f32.partialorder %v5200_v16, 0.0  ;;  %3903 = vrsqrt.f32 %v5254_v54  ;;  %v755_v19 = vand.u32 2147483648, %v5200_v16  ;;  %v897_v3 = vand.u32 2147483648, %v5248_v55 }
  0xef   :  { %v3898_v57 = vpop.eup %3897  ;;  %v658_v48 = vadd.f32 %v657_v10, %v656_v13  ;;  %3905 = vrsqrt.f32 %v5268_v31  ;;  %v742_v36 = vsel %vm740_vm2, %v741_v63, %v739_v38  ;;  %v760_v34 = vsel %vm759_vm3, %v5196_v56, %v758_v22 }
  0xf0   :  { %v5285_v5 = vpop.xlane.xlu1 %881  ;;  %v3900_v49 = vpop.eup %3899  ;;  %3907 = vrsqrt.f32 %v5273_v20  ;;  %vm766_vm6 = vcmp.eq.f32.partialorder %v5217_v33, inf  ;;  %v749_v7 = vsel %vm747_vm13, %v748_v18, %v746_v62  ;;  %v756_v15 = vsel %vm754_vm5, %v755_v19, %v753_v45 }
  0xf1   :  { %v5291_v25 = vpop.xlane.xlu0 %884  ;;  %659 = vadd.xlane.f32.xlu1 %v658_v48  ;;  %3909 = vrsqrt.f32 %v5285_v5  ;;  %v767_v32 = vsel %vm766_vm6, %v5217_v33, %v765_v27  ;;  %vm8630_vm7 = vcmp.lt.s32.totalorder %v5037_v11, 62  ;;  %vm761_vm8 = vcmp.eq.f32.partialorder %v5196_v56, 0.0 }
  0xf2   :  { %3911 = vrsqrt.f32 %v5291_v25  ;;  %v769_v24 = vand.u32 2147483648, %v5217_v33  ;;  %v786_v53 = vmul.f32 %v3898_v57, %v5230_v9  ;;  %v763_v51 = vsel %vm761_vm8, %v762_v1, %v760_v34 }
  0xf3   :  { %vm768_vm9 = vcmp.eq.f32.partialorder %v5217_v33, 0.0  ;;  %v772_v41 = vmul.f32 %v3896_v28, %v5212_v12  ;;  %v779_v16 = vmul.f32 %v3900_v49, %v5234_v37  ;;  %vm773_vm10 = vcmp.eq.f32.partialorder %v5212_v12, inf }
  0xf4   :  { %v5304_v6 = vpop.xlane.xlu1 %887  ;;  %v770_v43 = vsel %vm768_vm9, %v769_v24, %v767_v32  ;;  %vm775_vm11 = vcmp.eq.f32.partialorder %v5212_v12, 0.0  ;;  %v776_v26 = vand.u32 2147483648, %v5212_v12  ;;  %vm787_vm12 = vcmp.eq.f32.partialorder %v5230_v9, inf }
  0xf5   :  { %v5311_v61 = vpop.xlane.xlu0 %890  ;;  %v808_v56 = vsel %vm175_vm1, %v742_v36, 0.0  ;;  %v809_v39 = vsel %vm175_vm1, %v749_v7, 0.0  ;;  %v811_v33 = vsel %vm175_vm1, %v756_v15, 0.0  ;;  %vm894_vm13 = vcmp.eq.f32.partialorder %v5248_v55, inf }
  0xf6   :  { %vm780_vm15 = vcmp.eq.f32.partialorder %v5234_v37, inf  ;;  %v788_v50 = vsel %vm787_vm12, %v5230_v9, %v786_v53  ;;  %v810_v4 = vadd.f32 %v809_v39, %v808_v56  ;;  %v3902_v29 = vpop.eup %3901  ;;  %v774_v2 = vsel %vm773_vm10, %v5212_v12, %v772_v41 }
  0xf7   :  { %v781_v59 = vsel %vm780_vm15, %v5234_v37, %v779_v16  ;;  %v790_v52 = vand.u32 2147483648, %v5230_v9  ;;  %v783_v30 = vand.u32 2147483648, %v5234_v37  ;;  %vm789_vm2 = vcmp.eq.f32.partialorder %v5230_v9, 0.0 }
  0xf8   :  { %v5323_v35 = vpop.xlane.xlu1 %1028  ;;  %v3904_v17 = vpop.eup %3903  ;;  %v812_v28 = vadd.f32 %v811_v33, %v810_v4  ;;  %vm896_vm3 = vcmp.eq.f32.partialorder %v5248_v55, 0.0  ;;  %vm782_vm4 = vcmp.eq.f32.partialorder %v5234_v37, 0.0  ;;  %v813_v1 = vsel %vm175_vm1, %v763_v51, 0.0 }
  0xf9   :  { %v5332_v44 = vpop.xlane.xlu0 %1025  ;;  %3913 = vrsqrt.f32 %v5323_v35  ;;  %v3906_v23 = vpop.eup %3905  ;;  %v791_v22 = vsel %vm789_vm2, %v790_v52, %v788_v50  ;;  %v815_v10 = vsel %vm175_vm1, %v770_v43, 0.0  ;;  %vm901_vm5 = vcmp.eq.f32.partialorder %v5254_v54, inf }
  0xfa   :  { %3915 = vrsqrt.f32 %v5304_v6  ;;  %v3908_v27 = vpop.eup %3907  ;;  %v777_v9 = vsel %vm775_vm11, %v776_v26, %v774_v2  ;;  %v784_v13 = vsel %vm782_vm4, %v783_v30, %v781_v59  ;;  %v814_v62 = vadd.f32 %v813_v1, %v812_v28 }
  0xfb   :  { %3917 = vrsqrt.f32 %v5311_v61  ;;  %v3910_v45 = vpop.eup %3909  ;;  %v893_v57 = vmul.f32 %v3902_v29, %v5248_v55  ;;  %v900_v37 = vmul.f32 %v3904_v17, %v5254_v54  ;;  %vm903_vm6 = vcmp.eq.f32.partialorder %v5254_v54, 0.0 }
  0xfc   :  { %v5350_v46 = vpop.xlane.xlu1 %1034  ;;  %v904_v19 = vand.u32 2147483648, %v5254_v54  ;;  %v3912_v48 = vpop.eup %3911  ;;  %v907_v49 = vmul.f32 %v3906_v23, %v5268_v31  ;;  %vm908_vm8 = vcmp.eq.f32.partialorder %v5268_v31, inf  ;;  %v807_v12 = vsel %vm8630_vm7, %v791_v22, 0.0 }
  0xfd   :  { %v5356_v18 = vpop.xlane.xlu0 %1031  ;;  %v816_v36 = vadd.f32 %v815_v10, %v814_v62  ;;  %vm910_vm9 = vcmp.eq.f32.partialorder %v5268_v31, 0.0  ;;  %v914_v7 = vmul.f32 %v3908_v27, %v5273_v20  ;;  %v817_v15 = vsel %vm175_vm1, %v777_v9, 0.0 }
  0xfe   :  { %v819_v32 = vsel %vm175_vm1, %v784_v13, 0.0  ;;  %v911_v53 = vand.u32 2147483648, %v5268_v31  ;;  %vm915_vm10 = vcmp.eq.f32.partialorder %v5273_v20, inf  ;;  %3919 = vrsqrt.f32 %v5332_v44 }
  0xff   :  { %v818_v51 = vadd.f32 %v817_v15, %v816_v36  ;;  %v895_v41 = vsel %vm894_vm13, %v5248_v55, %v893_v57  ;;  %v902_v16 = vsel %vm901_vm5, %v5254_v54, %v900_v37  ;;  %v821_v43 = vsel %vm175_vm1, %v807_v12, 0.0 }
 0x100   :  { %v5371_v63 = vpop.xlane.xlu1 %1040  ;;  %3921 = vrsqrt.f32 %v5350_v46  ;;  %v909_v56 = vsel %vm908_vm8, %v5268_v31, %v907_v49  ;;  %v921_v39 = vmul.f32 %v3910_v45, %v5285_v5  ;;  %v918_v29 = vand.u32 2147483648, %v5273_v20 }
 0x101   :  { %v5377_v38 = vpop.xlane.xlu0 %1037  ;;  %v820_v33 = vadd.f32 %v819_v32, %v818_v51  ;;  %3923 = vrsqrt.f32 %v5356_v18  ;;  %v1060_v2 = vand.u32 2147483648, %v5323_v35  ;;  %v916_v52 = vsel %vm915_vm10, %v5273_v20, %v914_v7 }
 0x102   :  { %3925 = vrsqrt.f32 %v5371_v63  ;;  %v898_v28 = vsel %vm896_vm3, %v897_v3, %v895_v41  ;;  %v905_v23 = vsel %vm903_vm6, %v904_v19, %v902_v16  ;;  %v912_v1 = vsel %vm910_vm9, %v911_v53, %v909_v56 }
 0x103   :  { %v3914_v26 = vpop.eup %3913  ;;  %v822_v30 = vadd.f32 %v821_v43, %v820_v33  ;;  %3927 = vrsqrt.f32 %v5377_v38  ;;  %vm917_vm11 = vcmp.eq.f32.partialorder %v5273_v20, 0.0  ;;  %vm922_vm12 = vcmp.eq.f32.partialorder %v5285_v5, inf }
 0x104   :  { %v5390_v34 = vpop.xlane.xlu1 %1046  ;;  %v3916_v4 = vpop.eup %3915  ;;  %v5432_v22 = vmul.f32 %v3914_v26, %v5323_v35  ;;  %v919_v10 = vsel %vm917_vm11, %v918_v29, %v916_v52  ;;  %v923_v55 = vsel %vm922_vm12, %v5285_v5, %v921_v39  ;;  %vm924_vm13 = vcmp.eq.f32.partialorder %v5285_v5, 0.0 }
 0x105   :  { %v5396_v24 = vpop.xlane.xlu0 %1043  ;;  %v3918_v17 = vpop.eup %3917  ;;  %823 = vadd.xlane.f32.xlu0 %v822_v30  ;;  %3929 = vrsqrt.f32 %v5390_v34  ;;  %v928_v3 = vmul.f32 %v3912_v48, %v5291_v25  ;;  %v935_v31 = vmul.f32 %v3916_v4, %v5304_v6  ;;  %v925_v9 = vand.u32 2147483648, %v5285_v5 }
 0x106   :  { %3931 = vrsqrt.f32 %v5396_v24  ;;  %v942_v20 = vmul.f32 %v3918_v17, %v5311_v61  ;;  %vm929_vm15 = vcmp.eq.f32.partialorder %v5291_v25, inf  ;;  %v956_v13 = vsel %vm175_vm1, %v898_v28, 0.0 }
 0x107   :  { %vm1057_vm2 = vcmp.eq.f32.partialorder %v5323_v35, inf  ;;  %vm1050_vm3 = vcmp.eq.f32.partialorder %v5332_v44, inf  ;;  %vm943_vm4 = vcmp.eq.f32.partialorder %v5311_v61, inf  ;;  %v957_v62 = vsel %vm175_vm1, %v905_v23, 0.0 }
 0x108   :  { %v5414_v50 = vpop.xlane.xlu1 %1181  ;;  %v959_v45 = vsel %vm175_vm1, %v912_v1, 0.0  ;;  %v3920_v57 = vpop.eup %3919  ;;  %v926_v37 = vsel %vm924_vm13, %v925_v9, %v923_v55  ;;  %vm936_vm5 = vcmp.eq.f32.partialorder %v5304_v6, inf  ;;  %v944_v19 = vsel %vm943_vm4, %v5311_v61, %v942_v20 }
 0x109   :  { %v5419_v59 = vpop.xlane.xlu0 %1184  ;;  %3933 = vrsqrt.f32 %v5414_v50  ;;  %v958_v48 = vadd.f32 %v957_v62, %v956_v13  ;;  %v930_v36 = vsel %vm929_vm15, %v5291_v25, %v928_v3  ;;  %vm931_vm6 = vcmp.eq.f32.partialorder %v5291_v25, 0.0 }
 0x10a   :  { %3935 = vrsqrt.f32 %v5419_v59  ;;  %v3922_v12 = vpop.eup %3921  ;;  %v937_v7 = vsel %vm936_vm5, %v5304_v6, %v935_v31  ;;  %v946_v15 = vand.u32 2147483648, %v5311_v61  ;;  %v932_v53 = vand.u32 2147483648, %v5291_v25 }
 0x10b   :  { %v3924_v5 = vpop.eup %3923  ;;  %v939_v51 = vand.u32 2147483648, %v5304_v6  ;;  %vm945_vm8 = vcmp.eq.f32.partialorder %v5311_v61, 0.0  ;;  %v960_v41 = vadd.f32 %v959_v45, %v958_v48  ;;  %vm938_vm9 = vcmp.eq.f32.partialorder %v5304_v6, 0.0 }
 0x10c   :  { %v5441_v54 = vpop.xlane.xlu1 %1187  ;;  %v5474_v16 = vpop.eup %3925  ;;  %v947_v43 = vsel %vm945_vm8, %v946_v15, %v944_v19  ;;  %v961_v26 = vsel %vm175_vm1, %v919_v10, 0.0  ;;  %v963_v56 = vsel %vm175_vm1, %v926_v37, 0.0  ;;  %vm1059_vm10 = vcmp.eq.f32.partialorder %v5323_v35, 0.0 }
 0x10d   :  { %v5447_v27 = vpop.xlane.xlu0 %1190  ;;  %v3928_v39 = vpop.eup %3927  ;;  %v1049_v33 = vmul.f32 %v3920_v57, %v5332_v44  ;;  %v933_v4 = vsel %vm931_vm6, %v932_v53, %v930_v36  ;;  %v940_v29 = vsel %vm938_vm9, %v939_v51, %v937_v7  ;;  %v962_v61 = vadd.f32 %v961_v26, %v960_v41 }
 0x10e   :  { %vm1052_vm11 = vcmp.eq.f32.partialorder %v5332_v44, 0.0  ;;  %v1053_v6 = vand.u32 2147483648, %v5332_v44  ;;  %vm1071_vm12 = vcmp.eq.f32.partialorder %v5350_v46, inf  ;;  %v1074_v17 = vand.u32 2147483648, %v5350_v46 }
 0x10f   :  { %v3930_v28 = vpop.eup %3929  ;;  %vm1064_vm13 = vcmp.eq.f32.partialorder %v5356_v18, inf  ;;  %vm1066_vm15 = vcmp.eq.f32.partialorder %v5356_v18, 0.0  ;;  %v955_v25 = vsel %vm8630_vm7, %v947_v43, 0.0  ;;  %v964_v23 = vadd.f32 %v963_v56, %v962_v61 }
 0x110   :  { %v5463_v49 = vpop.xlane.xlu1 %1193  ;;  %v3932_v1 = vpop.eup %3931  ;;  %v1063_v10 = vmul.f32 %v3924_v5, %v5356_v18  ;;  %v1067_v55 = vand.u32 2147483648, %v5356_v18  ;;  %v965_v3 = vsel %vm175_vm1, %v933_v4, 0.0  ;;  %v967_v31 = vsel %vm175_vm1, %v940_v29, 0.0 }
 0x111   :  { %v5469_v32 = vpop.xlane.xlu0 %1196  ;;  %v1058_v9 = vsel %vm1057_vm2, %v5323_v35, %v5432_v22  ;;  %v1051_v13 = vsel %vm1050_vm3, %v5332_v44, %v1049_v33  ;;  %v966_v62 = vadd.f32 %v965_v3, %v964_v23  ;;  %3937 = vrsqrt.f32 %v5441_v54 }
 0x112   :  { %v1070_v37 = vmul.f32 %v3922_v12, %v5350_v46  ;;  %v1209_v19 = vand.u32 2147483648, %v5414_v50  ;;  %v969_v48 = vsel %vm175_vm1, %v955_v25, 0.0  ;;  %3939 = vrsqrt.f32 %v5447_v27 }
 0x113   :  { %v3934_v20 = vpop.eup %3933  ;;  %v1077_v22 = vmul.f32 %v3928_v39, %v5377_v38  ;;  %v1216_v7 = vand.u32 2147483648, %v5419_v59  ;;  %v968_v15 = vadd.f32 %v967_v31, %v966_v62  ;;  %3941 = vrsqrt.f32 %v5463_v49 }
 0x114   :  { %v5483_v52 = vpop.xlane.xlu1 %1199  ;;  %v3936_v57 = vpop.eup %3935  ;;  %v1065_v5 = vsel %vm1064_vm13, %v5356_v18, %v1063_v10  ;;  %v5522_v12 = vmul.f32 %v3934_v20, %v5414_v50  ;;  %v1223_v53 = vand.u32 2147483648, %v5441_v54  ;;  %3943 = vrsqrt.f32 %v5469_v32 }
 0x115   :  { %v5489_v30 = vpop.xlane.xlu0 %1202  ;;  %v5527_v51 = vmul.f32 %v3936_v57, %v5419_v59  ;;  %v970_v41 = vadd.f32 %v969_v48, %v968_v15  ;;  %v1054_v43 = vsel %vm1052_vm11, %v1053_v6, %v1051_v13  ;;  %v1061_v56 = vsel %vm1059_vm10, %v1060_v2, %v1058_v9 }
 0x116   :  { %v1072_v39 = vsel %vm1071_vm12, %v5350_v46, %v1070_v37  ;;  %vm1078_vm2 = vcmp.eq.f32.partialorder %v5377_v38, inf  ;;  %vm8629_vm3 = vcmp.lt.s32.totalorder %v5037_v11, 61  ;;  %vm1206_vm4 = vcmp.eq.f32.partialorder %v5414_v50, inf }
 0x117   :  { %vm1213_vm5 = vcmp.eq.f32.partialorder %v5419_v59, inf  ;;  %971 = vadd.xlane.f32.xlu1 %v970_v41  ;;  %v1068_v35 = vsel %vm1066_vm15, %v1067_v55, %v1065_v5  ;;  %vm1073_vm6 = vcmp.eq.f32.partialorder %v5350_v46, 0.0  ;;  %v1079_v44 = vsel %vm1078_vm2, %v5377_v38, %v1077_v22 }
 0x118   :  { %v5507_v45 = vpop.xlane.xlu1 %1340  ;;  %v1084_v2 = vmul.f32 %v5474_v16, %v5371_v63  ;;  %v1091_v4 = vmul.f32 %v3932_v1, %v5396_v24  ;;  %v1098_v29 = vmul.f32 %v3930_v28, %v5390_v34  ;;  %v1075_v61 = vsel %vm1073_vm6, %v1074_v17, %v1072_v39 }
 0x119   :  { %v5513_v36 = vpop.xlane.xlu0 %1337  ;;  %3945 = vrsqrt.f32 %v5507_v45  ;;  %vm1080_vm8 = vcmp.eq.f32.partialorder %v5377_v38, 0.0  ;;  %v1081_v6 = vand.u32 2147483648, %v5377_v38  ;;  %v1120_v18 = vsel %vm175_vm1, %v1054_v43, 0.0 }
 0x11a   :  { %3947 = vrsqrt.f32 %v5483_v52  ;;  %vm1085_vm9 = vcmp.eq.f32.partialorder %v5371_v63, inf  ;;  %vm1099_vm10 = vcmp.eq.f32.partialorder %v5390_v34, inf  ;;  %v1121_v46 = vsel %vm175_vm1, %v1061_v56, 0.0 }
 0x11b   :  { %3949 = vrsqrt.f32 %v5489_v30  ;;  %v1123_v16 = vsel %vm175_vm1, %v1068_v35, 0.0  ;;  %v3938_v28 = vpop.eup %3937  ;;  %v1082_v17 = vsel %vm1080_vm8, %v1081_v6, %v1079_v44  ;;  %vm1092_vm11 = vcmp.eq.f32.partialorder %v5396_v24, inf }
 0x11c   :  { %v5532_v26 = vpop.xlane.xlu1 %1346  ;;  %3951 = vrsqrt.f32 %v5513_v36  ;;  %v1100_v38 = vsel %vm1099_vm10, %v5390_v34, %v1098_v29  ;;  %v1122_v1 = vadd.f32 %v1121_v46, %v1120_v18  ;;  %v3940_v10 = vpop.eup %3939  ;;  %vm1220_vm12 = vcmp.eq.f32.partialorder %v5441_v54, inf }
 0x11d   :  { %v5544_v33 = vpop.xlane.xlu0 %1343  ;;  %v1086_v55 = vsel %vm1085_vm9, %v5371_v63, %v1084_v2  ;;  %vm1087_vm13 = vcmp.eq.f32.partialorder %v5371_v63, 0.0  ;;  %v1093_v3 = vsel %vm1092_vm11, %v5396_v24, %v1091_v4  ;;  %v1102_v31 = vand.u32 2147483648, %v5390_v34  ;;  %v3942_v20 = vpop.eup %3941 }
 0x11e   :  { %vm1208_vm15 = vcmp.eq.f32.partialorder %v5414_v50, 0.0  ;;  %v1088_v9 = vand.u32 2147483648, %v5371_v63  ;;  %v1095_v13 = vand.u32 2147483648, %v5396_v24  ;;  %vm1101_vm2 = vcmp.eq.f32.partialorder %v5390_v34, 0.0  ;;  %v3944_v37 = vpop.eup %3943 }
 0x11f   :  { %v1124_v62 = vadd.f32 %v1123_v16, %v1122_v1  ;;  %vm1094_vm6 = vcmp.eq.f32.partialorder %v5396_v24, 0.0  ;;  %v1103_v48 = vsel %vm1101_vm2, %v1102_v31, %v1100_v38  ;;  %v1125_v22 = vsel %vm175_vm1, %v1075_v61, 0.0 }
 0x120   :  { %v5561_v25 = vpop.xlane.xlu1 %1352  ;;  %v1127_v15 = vsel %vm175_vm1, %v1082_v17, 0.0  ;;  %vm1215_vm8 = vcmp.eq.f32.partialorder %v5419_v59, 0.0  ;;  %vm1222_vm9 = vcmp.eq.f32.partialorder %v5441_v54, 0.0  ;;  %vm1227_vm10 = vcmp.eq.f32.partialorder %v5447_v27, inf }
 0x121   :  { %v5567_v23 = vpop.xlane.xlu0 %1349  ;;  %v1089_v34 = vsel %vm1087_vm13, %v1088_v9, %v1086_v55  ;;  %v1096_v43 = vsel %vm1094_vm6, %v1095_v13, %v1093_v3  ;;  %v1126_v56 = vadd.f32 %v1125_v22, %v1124_v62  ;;  %v1207_v39 = vsel %vm1206_vm4, %v5414_v50, %v5522_v12 }
 0x122   :  { %v1214_v35 = vsel %vm1213_vm5, %v5419_v59, %v5527_v51  ;;  %v1230_v44 = vand.u32 2147483648, %v5447_v27  ;;  %vm1369_vm11 = vcmp.eq.f32.partialorder %v5507_v45, inf  ;;  %v1219_v63 = vmul.f32 %v3938_v28, %v5441_v54 }
 0x123   :  { %v3946_v41 = vpop.eup %3945  ;;  %v1119_v4 = vsel %vm8629_vm3, %v1103_v48, 0.0  ;;  %v1128_v29 = vadd.f32 %v1127_v15, %v1126_v56  ;;  %3953 = vrsqrt.f32 %v5544_v33  ;;  %v1129_v6 = vsel %vm175_vm1, %v1089_v34, 0.0 }
 0x124   :  { %v5580_v57 = vpop.xlane.xlu1 %1358  ;;  %v3948_v24 = vpop.eup %3947  ;;  %v1368_v12 = vmul.f32 %v3946_v41, %v5507_v45  ;;  %v1131_v51 = vsel %vm175_vm1, %v1096_v43, 0.0  ;;  %3955 = vrsqrt.f32 %v5532_v26  ;;  %v1226_v46 = vmul.f32 %v3940_v10, %v5447_v27 }
 0x125   :  { %v5585_v5 = vpop.xlane.xlu0 %1355  ;;  %v3950_v2 = vpop.eup %3949  ;;  %v1372_v16 = vand.u32 2147483648, %v5507_v45  ;;  %v1130_v28 = vadd.f32 %v1129_v6, %v1128_v29  ;;  %3957 = vrsqrt.f32 %v5561_v25  ;;  %v1233_v38 = vmul.f32 %v3942_v20, %v5463_v49 }
 0x126   :  { %v3952_v61 = vpop.eup %3951  ;;  %v1365_v1 = vand.u32 2147483648, %v5513_v36  ;;  %v1133_v55 = vsel %vm175_vm1, %v1119_v4, 0.0  ;;  %3959 = vrsqrt.f32 %v5567_v23  ;;  %v1221_v3 = vsel %vm1220_vm12, %v5441_v54, %v1219_v63 }
 0x127   :  { %v5625_v10 = vmul.f32 %v3952_v61, %v5513_v36  ;;  %v1132_v31 = vadd.f32 %v1131_v51, %v1130_v28  ;;  %3961 = vrsqrt.f32 %v5580_v57  ;;  %v5631_v20 = vsel %vm1369_vm11, %v5507_v45, %v1368_v12 }
 0x128   :  { %v5610_v18 = vpop.xlane.xlu1 %1493  ;;  %v1386_v9 = vand.u32 2147483648, %v5532_v26  ;;  %v1210_v13 = vsel %vm1208_vm15, %v1209_v19, %v1207_v39  ;;  %v1228_v48 = vsel %vm1227_vm10, %v5447_v27, %v1226_v46  ;;  %vm1234_vm4 = vcmp.eq.f32.partialorder %v5463_v49, inf }
 0x129   :  { %v5615_v17 = vpop.xlane.xlu0 %1496  ;;  %3963 = vrsqrt.f32 %v5610_v18  ;;  %v1134_v62 = vadd.f32 %v1133_v55, %v1132_v31  ;;  %vm1362_vm5 = vcmp.eq.f32.partialorder %v5513_v36, inf  ;;  %v1217_v22 = vsel %vm1215_vm8, %v1216_v7, %v1214_v35 }
 0x12a   :  { %3965 = vrsqrt.f32 %v5615_v17  ;;  %v1224_v50 = vsel %vm1222_vm9, %v1223_v53, %v1221_v3  ;;  %v1235_v19 = vsel %vm1234_vm4, %v5463_v49, %v1233_v38  ;;  %vm1376_vm12 = vcmp.eq.f32.partialorder %v5544_v33, inf }
 0x12b   :  { %3967 = vrsqrt.f32 %v5585_v5  ;;  %1135 = vadd.xlane.f32.xlu0 %v1134_v62  ;;  %vm1229_vm13 = vcmp.eq.f32.partialorder %v5447_v27, 0.0  ;;  %v1237_v41 = vand.u32 2147483648, %v5463_v49  ;;  %v1240_v34 = vmul.f32 %v3944_v37, %v5469_v32 }
 0x12c   :  { %v5655_v15 = vpop.xlane.xlu1 %1499  ;;  %v1247_v59 = vmul.f32 %v3948_v24, %v5483_v52  ;;  %v1231_v43 = vsel %vm1229_vm13, %v1230_v44, %v1228_v48  ;;  %vm1236_vm15 = vcmp.eq.f32.partialorder %v5463_v49, 0.0  ;;  %vm1241_vm2 = vcmp.eq.f32.partialorder %v5469_v32, inf }
 0x12d   :  { %v5662_v7 = vpop.xlane.xlu0 %1502  ;;  %v1254_v54 = vmul.f32 %v3950_v2, %v5489_v30  ;;  %v3954_v53 = vpop.eup %3953  ;;  %v1238_v56 = vsel %vm1236_vm15, %v1237_v41, %v1235_v19  ;;  %vm1248_vm6 = vcmp.eq.f32.partialorder %v5483_v52, inf  ;;  %vm1255_vm8 = vcmp.eq.f32.partialorder %v5489_v30, inf }
 0x12e   :  { %v1268_v27 = vsel %vm175_vm1, %v1210_v13, 0.0  ;;  %v3956_v37 = vpop.eup %3955  ;;  %vm1364_vm9 = vcmp.eq.f32.partialorder %v5513_v36, 0.0  ;;  %v1258_v39 = vand.u32 2147483648, %v5489_v30  ;;  %v1269_v49 = vsel %vm175_vm1, %v1217_v22, 0.0 }
 0x12f   :  { %v1256_v24 = vsel %vm1255_vm8, %v5489_v30, %v1254_v54  ;;  %v1271_v35 = vsel %vm175_vm1, %v1224_v50, 0.0  ;;  %v3958_v44 = vpop.eup %3957  ;;  %vm1371_vm10 = vcmp.eq.f32.partialorder %v5507_v45, 0.0  ;;  %vm1383_vm11 = vcmp.eq.f32.partialorder %v5532_v26, inf }
 0x130   :  { %vm1378_vm4 = vcmp.eq.f32.partialorder %v5544_v33, 0.0  ;;  %v1242_v2 = vsel %vm1241_vm2, %v5469_v32, %v1240_v34  ;;  %v1249_v63 = vsel %vm1248_vm6, %v5483_v52, %v1247_v59  ;;  %vm1257_vm13 = vcmp.eq.f32.partialorder %v5489_v30, 0.0  ;;  %v3960_v29 = vpop.eup %3959  ;;  %v5686_v46 = vpop.xlane.xlu1 %1505 }
 0x131   :  { %v1270_v4 = vadd.f32 %v1269_v49, %v1268_v27  ;;  %v1375_v61 = vmul.f32 %v3954_v53, %v5544_v33  ;;  %v1244_v12 = vand.u32 2147483648, %v5469_v32  ;;  %v1251_v6 = vand.u32 2147483648, %v5483_v52  ;;  %v3962_v28 = vpop.eup %3961  ;;  %v5691_v30 = vpop.xlane.xlu0 %1508 }
 0x132   :  { %v1259_v51 = vsel %vm1257_vm13, %v1258_v39, %v1256_v24  ;;  %v1379_v38 = vand.u32 2147483648, %v5544_v33  ;;  %vm1243_vm15 = vcmp.eq.f32.partialorder %v5469_v32, 0.0  ;;  %vm1250_vm2 = vcmp.eq.f32.partialorder %v5483_v52, 0.0 }
 0x133   :  { %v1272_v55 = vadd.f32 %v1271_v35, %v1270_v4  ;;  %v3964_v3 = vpop.eup %3963  ;;  %v1245_v31 = vsel %vm1243_vm15, %v1244_v12, %v1242_v2  ;;  %v1252_v13 = vsel %vm1250_vm2, %v1251_v6, %v1249_v63  ;;  %v1273_v62 = vsel %vm175_vm1, %v1231_v43, 0.0 }
 0x134   :  { %v1275_v48 = vsel %vm175_vm1, %v1238_v56, 0.0  ;;  %v3966_v22 = vpop.eup %3965  ;;  %v1363_v50 = vsel %vm1362_vm5, %v5513_v36, %v5625_v10  ;;  %v1267_v32 = vsel %vm8629_vm3, %v1259_v51, 0.0  ;;  %3969 = vrsqrt.f32 %v5655_v15  ;;  %v5719_v39 = vpop.xlane.xlu1 %1511 }
 0x135   :  { %v1274_v52 = vadd.f32 %v1273_v62, %v1272_v55  ;;  %v3968_v19 = vpop.eup %3967  ;;  %v1382_v41 = vmul.f32 %v3956_v37, %v5532_v26  ;;  %v1377_v34 = vsel %vm1376_vm12, %v5544_v33, %v1375_v61  ;;  %v1521_v59 = vand.u32 2147483648, %v5610_v18  ;;  %v5723_v2 = vpop.xlane.xlu0 %1514 }
 0x136   :  { %v1528_v43 = vand.u32 2147483648, %v5615_v17  ;;  %v1389_v54 = vmul.f32 %v3960_v29, %v5567_v23  ;;  %v1277_v53 = vsel %vm175_vm1, %v1245_v31, 0.0  ;;  %v1279_v56 = vsel %vm175_vm1, %v1252_v13, 0.0 }
 0x137   :  { %v1276_v10 = vadd.f32 %v1275_v48, %v1274_v52  ;;  %v5712_v27 = vmul.f32 %v3964_v3, %v5610_v18  ;;  %v5715_v37 = vmul.f32 %v3966_v22, %v5615_v17  ;;  %v1281_v24 = vsel %vm175_vm1, %v1267_v32, 0.0  ;;  %v5780_v32 = vld [vmem:[%s8625_s1 + $0x9] sm:$0xff] }
 0x138   :  { %3971 = vrsqrt.f32 %v5662_v7  ;;  %v1535_v35 = vand.u32 2147483648, %v5655_v15  ;;  %v1366_v63 = vsel %vm1364_vm9, %v1365_v1, %v1363_v50  ;;  %v1373_v4 = vsel %vm1371_vm10, %v1372_v16, %v5631_v20  ;;  %v5775_v50 = vld [vmem:[%s8624_s0 + $0x16] sm:$0xff] }
 0x139   :  { %v1278_v49 = vadd.f32 %v1277_v53, %v1276_v10  ;;  %3973 = vrsqrt.f32 %v5686_v46  ;;  %v1380_v29 = vsel %vm1378_vm4, %v1379_v38, %v1377_v34  ;;  %v1384_v61 = vsel %vm1383_vm11, %v5532_v26, %v1382_v41  ;;  %v5790_v53 = vpop.xlane.xlu0 %1649 }
 0x13a   :  { %3975 = vrsqrt.f32 %v5691_v30  ;;  %vm1390_vm5 = vcmp.eq.f32.partialorder %v5567_v23, inf  ;;  %v1396_v36 = vmul.f32 %v3958_v44, %v5561_v25  ;;  %vm1385_vm12 = vcmp.eq.f32.partialorder %v5532_v26, 0.0 }
 0x13b   :  { %v1280_v12 = vadd.f32 %v1279_v56, %v1278_v49  ;;  %3977 = vrsqrt.f32 %v5719_v39  ;;  %v1391_v45 = vsel %vm1390_vm5, %v5567_v23, %v1389_v54  ;;  %vm1392_vm6 = vcmp.eq.f32.partialorder %v5567_v23, 0.0  ;;  %v4208_v54 = vld [vmem:[%s8624_s0 + $0x15] sm:$0xff]  ;;  %v5795_v56 = vld [vmem:[%s8625_s1 + $0x1] sm:$0xff] }
 0x13c   :  { %3979 = vrsqrt.f32 %v5723_v2  ;;  %v1387_v16 = vsel %vm1385_vm12, %v1386_v9, %v1384_v61  ;;  %v1393_v1 = vand.u32 2147483648, %v5567_v23  ;;  %v1403_v20 = vmul.f32 %v3968_v19, %v5585_v5 }
 0x13d   :  { %v1282_v33 = vadd.f32 %v1281_v24, %v1280_v12  ;;  %vm1397_vm8 = vcmp.eq.f32.partialorder %v5561_v25, inf  ;;  %vm1399_vm9 = vcmp.eq.f32.partialorder %v5561_v25, 0.0  ;;  %v1400_v44 = vand.u32 2147483648, %v5561_v25  ;;  %v5800_v24 = vld [vmem:[%s8625_s1 + $0x2] sm:$0xff]  ;;  %v5812_v12 = vld [vmem:[%s8625_s1 + $0xa] sm:$0xff] }
 0x13e   :  { %v1410_v6 = vmul.f32 %v3962_v28, %v5580_v57  ;;  %v3970_v51 = vpop.eup %3969  ;;  %vm1518_vm10 = vcmp.eq.f32.partialorder %v5610_v18, inf  ;;  %v1394_v38 = vsel %vm1392_vm6, %v1393_v1, %v1391_v45  ;;  %v1398_v26 = vsel %vm1397_vm8, %v5561_v25, %v1396_v36 }
 0x13f   :  { %1283 = vadd.xlane.f32.xlu1 %v1282_v33  ;;  %vm1404_vm11 = vcmp.eq.f32.partialorder %v5585_v5, inf  ;;  %vm1411_vm4 = vcmp.eq.f32.partialorder %v5580_v57, inf  ;;  %vm1525_vm13 = vcmp.eq.f32.partialorder %v5615_v17, inf  ;;  %v1432_v9 = vsel %vm175_vm1, %v1366_v63, 0.0 }
 0x140   :  { %v1412_v23 = vsel %vm1411_vm4, %v5580_v57, %v1410_v6  ;;  %v1433_v55 = vsel %vm175_vm1, %v1373_v4, 0.0  ;;  %v1435_v28 = vsel %vm175_vm1, %v1380_v29, 0.0  ;;  %vm1532_vm15 = vcmp.eq.f32.partialorder %v5655_v15, inf }
 0x141   :  { %v1405_v3 = vsel %vm1404_vm11, %v5585_v5, %v1403_v20  ;;  %vm1406_vm2 = vcmp.eq.f32.partialorder %v5585_v5, 0.0  ;;  %v1414_v31 = vand.u32 2147483648, %v5580_v57  ;;  %v1434_v13 = vadd.f32 %v1433_v55, %v1432_v9 }
 0x142   :  { %v3972_v62 = vpop.eup %3971  ;;  %v1531_v48 = vmul.f32 %v3970_v51, %v5655_v15  ;;  %v1407_v22 = vand.u32 2147483648, %v5585_v5  ;;  %vm1413_vm5 = vcmp.eq.f32.partialorder %v5580_v57, 0.0  ;;  %vm8628_vm12 = vcmp.lt.s32.totalorder %v5037_v11, 60  ;;  %v4207_v57 = vld [vmem:[%s8624_s0 + $0x6] sm:$0xff] }
 0x143   :  { %v3974_v52 = vpop.eup %3973  ;;  %vm1520_vm6 = vcmp.eq.f32.partialorder %v5610_v18, 0.0  ;;  %vm1527_vm8 = vcmp.eq.f32.partialorder %v5615_v17, 0.0  ;;  %v1415_v19 = vsel %vm1413_vm5, %v1414_v31, %v1412_v23  ;;  %v1436_v41 = vadd.f32 %v1435_v28, %v1434_v13 }
 0x144   :  { %v1772_v34 = vmul.f32 0.5, %v4207_v57  ;;  %v1618_v10 = vmul.f32 0.0, %v4208_v54  ;;  %v3976_v49 = vpop.eup %3975  ;;  %vm1534_vm11 = vcmp.eq.f32.partialorder %v5655_v15, 0.0  ;;  %v1401_v63 = vsel %vm1399_vm9, %v1400_v44, %v1398_v26  ;;  %v5830_v26 = vld [vmem:[%s8625_s1 + $0x10] sm:$0xff] }
 0x145   :  { %v1408_v4 = vsel %vm1406_vm2, %v1407_v22, %v1405_v3  ;;  %v1437_v29 = vsel %vm175_vm1, %v1387_v16, 0.0  ;;  %v1439_v61 = vsel %vm175_vm1, %v1394_v38, 0.0  ;;  %v3978_v36 = vpop.eup %3977  ;;  %v1937_v25 = vmul.f32 0.0, %v5780_v32 }
 0x146   :  { %v1438_v45 = vadd.f32 %v1437_v29, %v1436_v41  ;;  %v1780_v33 = vadd.f32 %v1772_v34, %v4852_v8  ;;  %v1626_v1 = vadd.f32 %v1618_v10, %v5775_v50  ;;  %v3980_v20 = vpop.eup %3979  ;;  %v1538_v5 = vmul.f32 %v3972_v62, %v5662_v7  ;;  %v4209_v8 = vld [vmem:[%s8625_s1] sm:$0xff]  ;;  %v5855_v34 = vld [vmem:[%s8624_s0 + $0x8] sm:$0xff] }
 0x147   :  { %v1431_v16 = vsel %vm8628_vm12, %v1415_v19, 0.0  ;;  %v2084_v44 = vmul.f32 0.5, %v5795_v56  ;;  %v5822_v6 = vmul.f32 0.5, %v5800_v24  ;;  %v1945_v9 = vadd.f32 %v1937_v25, %v5812_v12 }
 0x148   :  { %v1440_v51 = vadd.f32 %v1439_v61, %v1438_v45  ;;  %v1788_v38 = vsub.f32 %v1780_v33, %v4209_v8  ;;  %v1634_v23 = vsub.f32 %v1626_v1, %v5830_v26  ;;  %v1519_v55 = vsel %vm1518_vm10, %v5610_v18, %v5712_v27 }
 0x149   :  { %v1441_v28 = vsel %vm175_vm1, %v1401_v63, 0.0  ;;  %v1443_v3 = vsel %vm175_vm1, %v1408_v4, 0.0  ;;  %v2100_v31 = vadd.f32 %v5822_v6, %v2084_v44  ;;  %v1526_v13 = vsel %vm1525_vm13, %v5615_v17, %v5715_v37  ;;  %v192_v19 = vpop.xlane.xlu0 %191 }
 0x14a   :  { %vm1539_vm9 = vcmp.eq.f32.partialorder %v5662_v7, inf  ;;  %v1542_v62 = vand.u32 2147483648, %v5662_v7  ;;  %v1442_v22 = vadd.f32 %v1441_v28, %v1440_v51  ;;  %v1533_v27 = vsel %vm1532_vm15, %v5655_v15, %v1531_v48  ;;  %v5862_v48 = vld [vmem:[%s8624_s0] sm:$0xff] }
 0x14b   :  { %v1545_v41 = vmul.f32 %v3974_v52, %v5686_v46  ;;  %v1445_v57 = vsel %vm175_vm1, %v1431_v16, 0.0  ;;  %v1953_v37 = vsub.f32 %v1945_v9, %v5855_v34  ;;  %v1796_v10 = vmul.f32 %v1788_v38, %v1788_v38 }
 0x14c   :  { %v1444_v54 = vadd.f32 %v1443_v3, %v1442_v22  ;;  %v1642_v63 = vmul.f32 %v1634_v23, %v1634_v23  ;;  %v1540_v4 = vsel %vm1539_vm9, %v5662_v7, %v1538_v5  ;;  %v193_v29 = vrot.slane %v192_v19, 4  ;;  %v5914_v22 = vld [vmem:[%s8625_s1 + $0x3] sm:$0xff] }
 0x14d   :  { %v2108_v52 = vsub.f32 %v2100_v31, %v5862_v48  ;;  %v1522_v61 = vsel %vm1520_vm6, %v1521_v59, %v1519_v55  ;;  %v1529_v45 = vsel %vm1527_vm8, %v1528_v43, %v1526_v13  ;;  %v1536_v1 = vsel %vm1534_vm11, %v1535_v35, %v1533_v27  ;;  %v4213_v13 = vld [vmem:[%s8624_s0 + $0x1d] sm:$0xff] }
 0x14e   :  { %v1446_v33 = vadd.f32 %v1445_v57, %v1444_v54  ;;  %vm1541_vm10 = vcmp.eq.f32.partialorder %v5662_v7, 0.0  ;;  %v1552_v25 = vmul.f32 %v3976_v49, %v5691_v30  ;;  %v1961_v5 = vmul.f32 %v1953_v37, %v1953_v37 }
 0x14f   :  { %v1543_v16 = vsel %vm1541_vm10, %v1542_v62, %v1540_v4  ;;  %vm1546_vm4 = vcmp.eq.f32.partialorder %v5686_v46, inf  ;;  %vm1553_vm13 = vcmp.eq.f32.partialorder %v5691_v30, inf  ;;  %v1804_v18 = vsel %vm78_vm0, %v1796_v10, 0.0  ;;  %v5923_v4 = vpop.xlane.xlu1 %1652 }
 0x150   :  { %1447 = vadd.xlane.f32.xlu0 %v1446_v33  ;;  %v1654_v17 = vsel %vm78_vm0, %v1642_v63, 0.0  ;;  %v1547_v59 = vsel %vm1546_vm4, %v5686_v46, %v1545_v41  ;;  %v1554_v15 = vsel %vm1553_vm13, %v5691_v30, %v1552_v25  ;;  %v5885_v43 = vadd.f32 %v193_v29, %v192_v19  ;;  %v4214_v41 = vld [vmem:[%s8624_s0 + $0xe] sm:$0xff]  ;;  %v4215_v25 = vld [vmem:[%s8625_s1 + $0x18] sm:$0xff] }
 0x151   :  { %v2116_v7 = vmul.f32 %v2108_v52, %v2108_v52  ;;  %v1549_v35 = vand.u32 2147483648, %v5686_v46  ;;  %v1556_v49 = vand.u32 2147483648, %v5691_v30  ;;  %vm1548_vm15 = vcmp.eq.f32.partialorder %v5686_v46, 0.0 }
 0x152   :  { %vm1555_vm2 = vcmp.eq.f32.partialorder %v5691_v30, 0.0  ;;  %v1559_v44 = vmul.f32 %v3978_v36, %v5719_v39  ;;  %v1566_v51 = vmul.f32 %v3980_v20, %v5723_v2  ;;  %v1971_v8 = vsel %vm78_vm0, %v1961_v5, 0.0  ;;  %v1611_v20 = vld [vmem:[%s8624_s0 + $0x1e] sm:$0xff] }
 0x153   :  { %v1550_v38 = vsel %vm1548_vm15, %v1549_v35, %v1547_v59  ;;  %v1557_v23 = vsel %vm1555_vm2, %v1556_v49, %v1554_v15  ;;  %vm1567_vm5 = vcmp.eq.f32.partialorder %v5723_v2, inf  ;;  %v1580_v55 = vsel %vm175_vm1, %v1522_v61, 0.0 }
 0x154   :  { %1805 = vadd.xlane.f32.xlu0 %v1804_v18  ;;  %v1568_v9 = vsel %vm1567_vm5, %v5723_v2, %v1566_v51  ;;  %v1581_v28 = vsel %vm175_vm1, %v1529_v45, 0.0  ;;  %v1583_v46 = vsel %vm175_vm1, %v1536_v1, 0.0  ;;  %vm1560_vm6 = vcmp.eq.f32.partialorder %v5719_v39, inf }
 0x155   :  { %vm1562_vm8 = vcmp.eq.f32.partialorder %v5719_v39, 0.0  ;;  %v1570_v30 = vand.u32 2147483648, %v5723_v2  ;;  %v1582_v36 = vadd.f32 %v1581_v28, %v1580_v55  ;;  %v1561_v3 = vsel %vm1560_vm6, %v5719_v39, %v1559_v44 }
 0x156   :  { %v1563_v31 = vand.u32 2147483648, %v5719_v39  ;;  %vm1569_vm11 = vcmp.eq.f32.partialorder %v5723_v2, 0.0  ;;  %v1619_v62 = vmul.f32 0.0, %v4213_v13  ;;  %v1773_v57 = vmul.f32 0.5, %v4214_v41  ;;  %v4216_v39 = vld [vmem:[%s8625_s1 + $0x8] sm:$0xff] }
 0x157   :  { %v1571_v19 = vsel %vm1569_vm11, %v1570_v30, %v1568_v9  ;;  %v1584_v27 = vadd.f32 %v1583_v46, %v1582_v36  ;;  %v2248_v37 = vmul.f32 0.0, %v5800_v24  ;;  %v1585_v2 = vsel %vm175_vm1, %v1543_v16, 0.0 }
 0x158   :  { %1655 = vadd.xlane.f32.xlu0 %v1654_v17  ;;  %v1587_v54 = vsel %vm175_vm1, %v1550_v38, 0.0  ;;  %v1627_v10 = vadd.f32 %v1619_v62, %v1611_v20  ;;  %v1936_v63 = vmul.f32 0.0, %v5795_v56  ;;  %v1564_v29 = vsel %vm1562_vm8, %v1563_v31, %v1561_v3 }
 0x159   :  { %v1586_v52 = vadd.f32 %v1585_v2, %v1584_v27  ;;  %v1781_v61 = vadd.f32 %v1773_v57, %v4857_v14  ;;  %v2256_v45 = vadd.f32 %v2248_v37, %v5914_v22  ;;  %v1579_v33 = vsel %vm8628_vm12, %v1571_v19, 0.0  ;;  %v5964_v27 = vld [vmem:[%s8624_s0 + $0x26] sm:$0xff]  ;;  %v1930_v2 = vld [vmem:[%s8625_s1 + $0x12] sm:$0xff] }
 0x15a   :  { %v1589_v1 = vsel %vm175_vm1, %v1557_v23, 0.0  ;;  %v1635_v56 = vsub.f32 %v1627_v10, %v4215_v25  ;;  %v1775_v5 = vmul.f32 0.5, %v1611_v20  ;;  %v1944_v14 = vadd.f32 %v1936_v63, %v5800_v24 }
 0x15b   :  { %v1588_v16 = vadd.f32 %v1587_v54, %v1586_v52  ;;  %v1789_v18 = vsub.f32 %v1781_v61, %v4216_v39  ;;  %v1774_v17 = vmul.f32 0.5, %v5775_v50  ;;  %v1591_v59 = vsel %vm175_vm1, %v1564_v29, 0.0  ;;  %v348_v50 = vpop.xlane.xlu1 %347 }
 0x15c   :  { %1972 = vadd.xlane.f32.xlu0 %v1971_v8  ;;  %v1643_v15 = vmul.f32 %v1635_v56, %v1635_v56  ;;  %v2264_v35 = vsub.f32 %v2256_v45, %v5862_v48  ;;  %v195_v49 = vrot.slane %v5885_v43, 2  ;;  %v2124_v44 = vsel %vm78_vm0, %v2116_v7, 0.0  ;;  %v5982_v45 = vld [vmem:[%s8625_s1 + $0x13] sm:$0xff] }
 0x15d   :  { %v1590_v51 = vadd.f32 %v1589_v1, %v1588_v16  ;;  %v1783_v38 = vadd.f32 %v1775_v5, %v4871_v40  ;;  %v1593_v23 = vsel %vm175_vm1, %v1579_v33, 0.0  ;;  %v1782_v9 = vadd.f32 %v1774_v17, %v4863_v47  ;;  %v2241_v5 = vld [vmem:[%s8625_s1 + $0xb] sm:$0xff] }
 0x15e   :  { %v196_v24 = vadd.f32 %v195_v49, %v5885_v43  ;;  %v1797_v55 = vmul.f32 %v1789_v18, %v1789_v18  ;;  %v1952_v28 = vsub.f32 %v1944_v14, %v5862_v48  ;;  %v1657_v46 = vsel %vm78_vm0, %v1643_v15, 0.0  ;;  %v1922_v43 = vld [vmem:[%s8625_s1 + $0x11] sm:$0xff] }
 0x15f   :  { %v1592_v8 = vadd.f32 %v1591_v59, %v1590_v51  ;;  %v2272_v30 = vmul.f32 %v2264_v35, %v2264_v35  ;;  %v349_v7 = vrot.slane %v348_v50, 4  ;;  %v1791_v3 = vsub.f32 %v1783_v38, %v4215_v25  ;;  %v5995_v35 = vld [vmem:[%s8625_s1 + $0x20] sm:$0xff] }
 0x160   :  { %2125 = vadd.xlane.f32.xlu0 %v2124_v44  ;;  %v197_v36 = vrot.slane %v196_v24, 1  ;;  %v5951_v40 = vmul.f32 0.5, %v5914_v22  ;;  %v2085_v47 = vmul.f32 0.5, %v5780_v32  ;;  %v1790_v31 = vsub.f32 %v1782_v9, %v5830_v26  ;;  %v4217_v26 = vld [vmem:[%s8624_s0 + $0x25] sm:$0xff]  ;;  %v1923_v38 = vld [vmem:[%s8625_s1 + $0x19] sm:$0xff] }
 0x161   :  { %v1594_v20 = vadd.f32 %v1593_v23, %v1592_v8  ;;  %v350_v62 = vadd.f32 %v349_v7, %v348_v50  ;;  %v5959_v19 = vmul.f32 0.5, %v5812_v12  ;;  %v1807_v41 = vsel %vm78_vm0, %v1797_v55, 0.0  ;;  %v1931_v23 = vld [vmem:[%s8625_s1 + $0x1a] sm:$0xff] }
 0x162   :  { %v198_v13 = vadd.f32 %v197_v36, %v196_v24  ;;  %v1960_v32 = vmul.f32 %v1952_v28, %v1952_v28  ;;  %v2404_v57 = vadd.f32 %v5951_v40, %v5822_v6  ;;  %v1620_v37 = vmul.f32 0.0, %v4217_v26  ;;  %v6013_v24 = vld [vmem:[%s8624_s0 + $0x10] sm:$0xff] }
 0x163   :  { %1595 = vadd.xlane.f32.xlu1 %v1594_v20  ;;  %v2280_v54 = vsel %vm78_vm0, %v2272_v30, 0.0  ;;  %v2101_v10 = vadd.f32 %v5959_v19, %v2085_v47  ;;  %v1938_v63 = vmul.f32 0.0, %v1922_v43  ;;  %v2250_v29 = vmul.f32 0.0, %v1930_v2 }
 0x164   :  { %1658 = vadd.xlane.f32.xlu0 %v1657_v46  ;;  %3773 = vpush %v198_v13  ;;  %v1799_v52 = vmul.f32 %v1791_v3, %v1791_v3  ;;  %v2412_v6 = vsub.f32 %v2404_v57, %v5862_v48  ;;  %v1628_v61 = vadd.f32 %v1620_v37, %v5964_v27  ;;  %v351_v33 = vrot.slane %v350_v62, 2 }
 0x165   :  { %v1798_v1 = vmul.f32 %v1790_v31, %v1790_v31  ;;  %v2109_v25 = vsub.f32 %v2101_v10, %v5855_v34  ;;  %v1946_v56 = vadd.f32 %v1938_v63, %v1930_v2  ;;  %v2249_v16 = vmul.f32 0.0, %v5812_v12  ;;  %v6001_v12 = vld [vmem:[%s8625_s1 + $0xc] sm:$0xff]  ;;  %v2544_v31 = vld [vmem:[%s8625_s1 + $0x4] sm:$0xff] }
 0x166   :  { %v352_v39 = vadd.f32 %v351_v33, %v350_v62  ;;  %v1968_v18 = vsel %vm78_vm0, %v1960_v32, 0.0  ;;  %v2258_v14 = vadd.f32 %v2250_v29, %v5982_v45  ;;  %v2553_v17 = vmul.f32 0.0, %v2241_v5 }
 0x167   :  { %1808 = vadd.xlane.f32.xlu1 %v1807_v41  ;;  %v1813_v59 = vsel %vm78_vm0, %v1799_v52, 0.0  ;;  %v2420_v15 = vmul.f32 %v2412_v6, %v2412_v6  ;;  %v1636_v49 = vsub.f32 %v1628_v61, %v5995_v35  ;;  %v1810_v51 = vsel %vm78_vm0, %v1798_v1, 0.0 }
 0x168   :  { %2281 = vadd.xlane.f32.xlu0 %v2280_v54  ;;  %v353_v44 = vrot.slane %v352_v39, 1  ;;  %v2117_v9 = vmul.f32 %v2109_v25, %v2109_v25  ;;  %v1954_v50 = vsub.f32 %v1946_v56, %v6013_v24  ;;  %v2257_v8 = vadd.f32 %v2249_v16, %v2241_v5  ;;  %v4220_v56 = vld [vmem:[%s8624_s0 + $0x2d] sm:$0xff] }
 0x169   :  { %v2266_v28 = vsub.f32 %v2258_v14, %v6013_v24  ;;  %v2561_v46 = vadd.f32 %v2553_v17, %v6001_v12  ;;  %v2086_v30 = vmul.f32 0.5, %v1922_v43  ;;  %v6018_v36 = vmul.f32 0.5, %v1930_v2 }
 0x16a   :  { %v354_v55 = vadd.f32 %v353_v44, %v352_v39  ;;  %v2428_v7 = vsel %vm78_vm0, %v2420_v15, 0.0  ;;  %v1644_v20 = vmul.f32 %v1636_v49, %v1636_v49  ;;  %v2087_v3 = vmul.f32 0.5, %v1923_v38  ;;  %v6047_v39 = vld [vmem:[%s8624_s0 + $0x18] sm:$0xff] }
 0x16b   :  { %1969 = vadd.xlane.f32.xlu1 %v1968_v18  ;;  %v6021_v47 = vmul.f32 0.5, %v1931_v23  ;;  %v2127_v13 = vsel %vm78_vm0, %v2117_v9, 0.0  ;;  %v1962_v62 = vmul.f32 %v1954_v50, %v1954_v50  ;;  %v2265_v41 = vsub.f32 %v2257_v8, %v5855_v34  ;;  %v512_v26 = vpop.xlane.xlu0 %511 }
 0x16c   :  { %1814 = vadd.xlane.f32.xlu0 %v1813_v59  ;;  %3775 = vpush %v354_v55  ;;  %v2274_v43 = vmul.f32 %v2266_v28, %v2266_v28  ;;  %v2569_v32 = vsub.f32 %v2561_v46, %v5855_v34  ;;  %v2102_v57 = vadd.f32 %v6018_v36, %v2086_v30  ;;  %v6030_v37 = vmul.f32 0.5, %v2241_v5  ;;  %v6063_v46 = vld [vmem:[%s8625_s1 + $0x1b] sm:$0xff] }
 0x16d   :  { %v1660_v2 = vsel %vm78_vm0, %v1644_v20, 0.0  ;;  %v513_v54 = vrot.slane %v512_v26, 4  ;;  %v2103_v10 = vadd.f32 %v6021_v47, %v2087_v3  ;;  %v6034_v63 = vmul.f32 0.5, %v2544_v31 }
 0x16e   :  { %v1974_v29 = vsel %vm78_vm0, %v1962_v62, 0.0  ;;  %v2273_v52 = vmul.f32 %v2265_v41, %v2265_v41  ;;  %v1939_v61 = vmul.f32 0.0, %v1923_v38  ;;  %v2577_v33 = vmul.f32 %v2569_v32, %v2569_v32 }
 0x16f   :  { %1811 = vadd.xlane.f32.xlu1 %v1810_v51  ;;  %v514_v6 = vadd.f32 %v513_v54, %v512_v26  ;;  %v2110_v1 = vsub.f32 %v2102_v57, %v6013_v24  ;;  %v2405_v25 = vadd.f32 %v6030_v37, %v5959_v19  ;;  %v1621_v5 = vmul.f32 0.0, %v4220_v56  ;;  %v1613_v19 = vld [vmem:[%s8624_s0 + $0x2e] sm:$0xff]  ;;  %v6076_v26 = vld [vmem:[%s8625_s1 + $0x5] sm:$0xff] }
 0x170   :  { %2429 = vadd.xlane.f32.xlu0 %v2428_v7  ;;  %v2286_v16 = vsel %vm78_vm0, %v2274_v43, 0.0  ;;  %v2111_v18 = vsub.f32 %v2103_v10, %v6047_v39  ;;  %v2708_v14 = vadd.f32 %v6034_v63, %v5951_v40  ;;  %v2283_v59 = vsel %vm78_vm0, %v2273_v52, 0.0 }
 0x171   :  { %v515_v17 = vrot.slane %v514_v6, 2  ;;  %v1947_v15 = vadd.f32 %v1939_v61, %v1931_v23  ;;  %v2552_v49 = vmul.f32 0.0, %v5914_v22  ;;  %v2587_v51 = vsel %vm78_vm0, %v2577_v33, 0.0 }
 0x172   :  { %v2118_v38 = vmul.f32 %v2110_v1, %v2110_v1  ;;  %v2413_v9 = vsub.f32 %v2405_v25, %v5855_v34  ;;  %v1629_v50 = vadd.f32 %v1621_v5, %v1613_v19  ;;  %v2119_v40 = vmul.f32 %v2111_v18, %v2111_v18 }
 0x173   :  { %2128 = vadd.xlane.f32.xlu1 %v2127_v13  ;;  %v516_v44 = vadd.f32 %v515_v17, %v514_v6  ;;  %v2716_v8 = vsub.f32 %v2708_v14, %v5862_v48  ;;  %v2251_v28 = vmul.f32 0.0, %v1931_v23  ;;  %v1955_v22 = vsub.f32 %v1947_v15, %v6047_v39  ;;  %v4222_v13 = vld [vmem:[%s8625_s1 + $0x28] sm:$0xff] }
 0x174   :  { %1661 = vadd.xlane.f32.xlu0 %v1660_v2  ;;  %v2560_v30 = vadd.f32 %v2552_v49, %v2544_v31  ;;  %v2130_v20 = vsel %vm78_vm0, %v2118_v38, 0.0  ;;  %v2421_v3 = vmul.f32 %v2413_v9, %v2413_v9  ;;  %v1637_v62 = vsub.f32 %v1629_v50, %v4222_v13  ;;  %v1924_v15 = vld [vmem:[%s8625_s1 + $0x21] sm:$0xff] }
 0x175   :  { %v517_v55 = vrot.slane %v516_v44, 1  ;;  %v1776_v23 = vmul.f32 0.5, %v5964_v27  ;;  %v2133_v41 = vsel %vm78_vm0, %v2119_v40, 0.0  ;;  %v2724_v43 = vmul.f32 %v2716_v8, %v2716_v8 }
 0x176   :  { %v2259_v32 = vadd.f32 %v2251_v28, %v6063_v46  ;;  %v2856_v57 = vmul.f32 0.0, %v2544_v31  ;;  %v2568_v2 = vsub.f32 %v2560_v30, %v5862_v48  ;;  %v6080_v54 = vmul.f32 0.5, %v5982_v45 }
 0x177   :  { %1975 = vadd.xlane.f32.xlu1 %v1974_v29  ;;  %v518_v7 = vadd.f32 %v517_v55, %v516_v44  ;;  %v2431_v27 = vsel %vm78_vm0, %v2421_v3, 0.0  ;;  %v1963_v10 = vmul.f32 %v1955_v22, %v1955_v22  ;;  %v1784_v29 = vadd.f32 %v1776_v23, %v4878_v42  ;;  %v1932_v55 = vld [vmem:[%s8625_s1 + $0x22] sm:$0xff]  ;;  %v2546_v23 = vld [vmem:[%s8625_s1 + $0x14] sm:$0xff] }
 0x178   :  { %2287 = vadd.xlane.f32.xlu0 %v2286_v16  ;;  %v1777_v52 = vmul.f32 0.5, %v1613_v19  ;;  %v2732_v31 = vsel %vm78_vm0, %v2724_v43, 0.0  ;;  %v1645_v6 = vmul.f32 %v1637_v62, %v1637_v62  ;;  %v2267_v61 = vsub.f32 %v2259_v32, %v6047_v39 }
 0x179   :  { %3777 = vpush %v518_v7  ;;  %v2864_v33 = vadd.f32 %v2856_v57, %v6076_v26  ;;  %v2576_v1 = vmul.f32 %v2568_v2, %v2568_v2  ;;  %v2406_v25 = vadd.f32 %v6080_v54, %v6018_v36  ;;  %v6090_v56 = vmul.f32 0.5, %v6001_v12  ;;  %v1614_v2 = vld [vmem:[%s8624_s0 + $0x36] sm:$0xff] }
 0x17a   :  { %v1977_v5 = vsel %vm78_vm0, %v1963_v10, 0.0  ;;  %v1792_v42 = vsub.f32 %v1784_v29, %v5995_v35  ;;  %v1785_v18 = vadd.f32 %v1777_v52, %v4883_v60  ;;  %v6096_v14 = vmul.f32 0.5, %v6063_v46 }
 0x17b   :  { %2284 = vadd.xlane.f32.xlu1 %v2283_v59  ;;  %v1663_v19 = vsel %vm78_vm0, %v1645_v6, 0.0  ;;  %v2275_v17 = vmul.f32 %v2267_v61, %v2267_v61  ;;  %v2872_v36 = vsub.f32 %v2864_v33, %v5862_v48  ;;  %v2584_v49 = vsel %vm78_vm0, %v2576_v1, 0.0  ;;  %v2849_v61 = vld [vmem:[%s8625_s1 + $0xd] sm:$0xff] }
 0x17c   :  { %2588 = vadd.xlane.f32.xlu0 %v2587_v51  ;;  %v2414_v44 = vsub.f32 %v2406_v25, %v6013_v24  ;;  %v2709_v60 = vadd.f32 %v6090_v56, %v6030_v37  ;;  %v1800_v51 = vmul.f32 %v1792_v42, %v1792_v42  ;;  %v1793_v38 = vsub.f32 %v1785_v18, %v4222_v13  ;;  %v6148_v42 = vld [vmem:[%s8625_s1 + $0x23] sm:$0xff] }
 0x17d   :  { %v2407_v9 = vadd.f32 %v6096_v14, %v6021_v47  ;;  %v1940_v50 = vmul.f32 0.0, %v1924_v15  ;;  %v2289_v40 = vsel %vm78_vm0, %v2275_v17, 0.0  ;;  %v2880_v8 = vmul.f32 %v2872_v36, %v2872_v36 }
 0x17e   :  { %v660_v16 = vpop.xlane.xlu1 %659  ;;  %v6114_v22 = vmul.f32 0.5, %v6076_v26  ;;  %v2422_v37 = vmul.f32 %v2414_v44, %v2414_v44  ;;  %v2717_v30 = vsub.f32 %v2709_v60, %v5855_v34  ;;  %v1816_v47 = vsel %vm78_vm0, %v1800_v51, 0.0  ;;  %v4225_v60 = vld [vmem:[%s8625_s1 + $0x30] sm:$0xff] }
 0x17f   :  { %2131 = vadd.xlane.f32.xlu1 %v2130_v20  ;;  %v661_v59 = vrot.slane %v660_v16, 4  ;;  %v2554_v20 = vmul.f32 0.0, %v5982_v45  ;;  %v1801_v3 = vmul.f32 %v1793_v38, %v1793_v38  ;;  %v2415_v13 = vsub.f32 %v2407_v9, %v6047_v39  ;;  %v4223_v45 = vld [vmem:[%s8624_s0 + $0x35] sm:$0xff] }
 0x180   :  { %2134 = vadd.xlane.f32.xlu0 %v2133_v41  ;;  %v1948_v62 = vadd.f32 %v1940_v50, %v1932_v55  ;;  %v2888_v41 = vsel %vm78_vm0, %v2880_v8, 0.0  ;;  %v3012_v32 = vadd.f32 %v6114_v22, %v6034_v63  ;;  %v1622_v57 = vmul.f32 0.0, %v4223_v45  ;;  %v6137_v63 = vld [vmem:[%s8624_s0 + $0x20] sm:$0xff] }
 0x181   :  { %v662_v35 = vadd.f32 %v661_v59, %v660_v16  ;;  %v2562_v10 = vadd.f32 %v2554_v20, %v2546_v23  ;;  %v2857_v29 = vmul.f32 0.0, %v6001_v12  ;;  %v2434_v52 = vsel %vm78_vm0, %v2422_v37, 0.0 }
 0x182   :  { %v1956_v6 = vsub.f32 %v1948_v62, %v6137_v63  ;;  %v2252_v33 = vmul.f32 0.0, %v1932_v55  ;;  %v1819_v1 = vsel %vm78_vm0, %v1801_v3, 0.0  ;;  %v2423_v25 = vmul.f32 %v2415_v13, %v2415_v13  ;;  %v6175_v62 = vld [vmem:[%s8625_s1 + $0xe] sm:$0xff] }
 0x183   :  { %2432 = vadd.xlane.f32.xlu1 %v2431_v27  ;;  %v663_v28 = vrot.slane %v662_v35, 2  ;;  %v3020_v12 = vsub.f32 %v3012_v32, %v5862_v48  ;;  %v2570_v16 = vsub.f32 %v2562_v10, %v6013_v24  ;;  %v2865_v18 = vadd.f32 %v2857_v29, %v2849_v61 }
 0x184   :  { %2733 = vadd.xlane.f32.xlu0 %v2732_v31  ;;  %v2725_v31 = vmul.f32 %v2717_v30, %v2717_v30  ;;  %v6151_v17 = vmul.f32 0.5, %v1932_v55  ;;  %v1964_v36 = vmul.f32 %v1956_v6, %v1956_v6  ;;  %v2858_v38 = vmul.f32 0.0, %v2546_v23 }
 0x185   :  { %v664_v7 = vadd.f32 %v663_v28, %v662_v35  ;;  %v2437_v35 = vsel %vm78_vm0, %v2423_v25, 0.0  ;;  %v3028_v44 = vmul.f32 %v3020_v12, %v3020_v12  ;;  %v2578_v9 = vmul.f32 %v2570_v16, %v2570_v16 }
 0x186   :  { %v2735_v59 = vsel %vm78_vm0, %v2725_v31, 0.0  ;;  %v1980_v55 = vsel %vm78_vm0, %v1964_v36, 0.0  ;;  %v6168_v30 = vmul.f32 0.5, %v2546_v23  ;;  %v3161_v3 = vmul.f32 0.0, %v2849_v61  ;;  %v6182_v23 = vld [vmem:[%s8625_s1 + $0x29] sm:$0xff] }
 0x187   :  { %1978 = vadd.xlane.f32.xlu1 %v1977_v5  ;;  %v665_v43 = vrot.slane %v664_v7, 1  ;;  %v1630_v5 = vadd.f32 %v1622_v57, %v1614_v2  ;;  %v6186_v10 = vmul.f32 0.5, %v2849_v61  ;;  %v1778_v6 = vmul.f32 0.5, %v1614_v2 }
 0x188   :  { %1664 = vadd.xlane.f32.xlu0 %v1663_v19  ;;  %v2088_v19 = vmul.f32 0.5, %v1924_v15  ;;  %v6162_v15 = vld [vmem:[%s8625_s1 + $0x15] sm:$0xff]  ;;  %v2710_v57 = vadd.f32 %v6168_v30, %v6080_v54  ;;  %v3169_v31 = vadd.f32 %v3161_v3, %v6175_v62  ;;  %v6196_v54 = vld [vmem:[%s8625_s1 + $0x2a] sm:$0xff]  ;;  %v6202_v2 = vmul.f32 0.5, %v6148_v42 }
 0x189   :  { %v666_v27 = vadd.f32 %v665_v43, %v664_v7  ;;  %v1638_v51 = vsub.f32 %v1630_v5, %v4225_v60  ;;  %v3036_v7 = vsel %vm78_vm0, %v3028_v44, 0.0  ;;  %v3013_v16 = vadd.f32 %v6186_v10, %v6090_v56 }
 0x18a   :  { %v2104_v8 = vadd.f32 %v6151_v17, %v2088_v19  ;;  %v2718_v61 = vsub.f32 %v2710_v57, %v6013_v24  ;;  %v1786_v36 = vadd.f32 %v1778_v6, %v4889_v58  ;;  %v2555_v44 = vmul.f32 0.0, %v6063_v46  ;;  %v6216_v58 = vld [vmem:[%s8625_s1 + $0x1c] sm:$0xff] }
 0x18b   :  { %2585 = vadd.xlane.f32.xlu1 %v2584_v49  ;;  %3779 = vpush %v666_v27  ;;  %v2260_v49 = vadd.f32 %v2252_v33, %v6148_v42  ;;  %v1646_v20 = vmul.f32 %v1638_v51, %v1638_v51  ;;  %v6220_v46 = vmul.f32 0.5, %v6162_v15  ;;  %3981 = vrsqrt.f32 %v5790_v53 }
 0x18c   :  { %2290 = vadd.xlane.f32.xlu0 %v2289_v40  ;;  %v2873_v40 = vsub.f32 %v2865_v18, %v5855_v34  ;;  %v2112_v32 = vsub.f32 %v2104_v8, %v6137_v63  ;;  %v2726_v56 = vmul.f32 %v2718_v61, %v2718_v61  ;;  %v1794_v8 = vsub.f32 %v1786_v36, %v4225_v60 }
 0x18d   :  { %v2268_v37 = vsub.f32 %v2260_v49, %v6137_v63  ;;  %v1666_v29 = vsel %vm78_vm0, %v1646_v20, 0.0  ;;  %v3160_v60 = vmul.f32 0.0, %v6076_v26  ;;  %3983 = vrsqrt.f32 %v5923_v4 }
 0x18e   :  { %v2881_v43 = vmul.f32 %v2873_v40, %v2873_v40  ;;  %v2120_v12 = vmul.f32 %v2112_v32, %v2112_v32  ;;  %v6241_v32 = vmul.f32 0.5, %v6175_v62  ;;  %vm1674_vm9 = vcmp.eq.f32.partialorder %v5790_v53, inf }
 0x18f   :  { %1817 = vadd.xlane.f32.xlu1 %v1816_v47  ;;  %v2866_v47 = vadd.f32 %v2858_v38, %v6162_v15  ;;  %v2276_v45 = vmul.f32 %v2268_v37, %v2268_v37  ;;  %v3021_v38 = vsub.f32 %v3013_v16, %v5855_v34  ;;  %v2738_v37 = vsel %vm78_vm0, %v2726_v56, 0.0  ;;  %v6267_v16 = vld [vmem:[%s8625_s1 + $0x32] sm:$0xff] }
 0x190   :  { %2889 = vadd.xlane.f32.xlu0 %v2888_v41  ;;  %v2590_v41 = vsel %vm78_vm0, %v2578_v9, 0.0  ;;  %v2891_v25 = vsel %vm78_vm0, %v2881_v43, 0.0  ;;  %v2136_v51 = vsel %vm78_vm0, %v2120_v12, 0.0  ;;  %v2408_v9 = vadd.f32 %v6202_v2, %v6151_v17  ;;  %v6238_v43 = vld [vmem:[%s8625_s1 + $0x6] sm:$0xff] }
 0x191   :  { %v2292_v18 = vsel %vm78_vm0, %v2276_v45, 0.0  ;;  %v2563_v17 = vadd.f32 %v2555_v44, %v6216_v58  ;;  %v6246_v45 = vld [vmem:[%s8625_s1 + $0x31] sm:$0xff]  ;;  %v3168_v6 = vadd.f32 %v3160_v60, %v6238_v43  ;;  %v2556_v56 = vmul.f32 0.0, %v6148_v42 }
 0x192   :  { %v824_v50 = vpop.xlane.xlu0 %823  ;;  %v2416_v20 = vsub.f32 %v2408_v9, %v6137_v63  ;;  %v6299_v60 = vld [vmem:[%s8624_s0 + $0x30] sm:$0xff]  ;;  %vm1676_vm10 = vcmp.eq.f32.partialorder %v5790_v53, 0.0  ;;  %vm1681_vm4 = vcmp.eq.f32.partialorder %v5923_v4, inf  ;;  %vm1683_vm13 = vcmp.eq.f32.partialorder %v5923_v4, 0.0 }
 0x193   :  { %2435 = vadd.xlane.f32.xlu1 %v2434_v52  ;;  %v825_v28 = vrot.slane %v824_v50, 4  ;;  %v2874_v52 = vsub.f32 %v2866_v47, %v6013_v24 }
 0x194   :  { %1820 = vadd.xlane.f32.xlu0 %v1819_v1  ;;  %v1941_v1 = vmul.f32 0.0, %v6182_v23  ;;  %v2424_v12 = vmul.f32 %v2416_v20, %v2416_v20 }
 0x195   :  { %v826_v13 = vadd.f32 %v825_v28, %v824_v50  ;;  %v2882_v19 = vmul.f32 %v2874_v52, %v2874_v52 }
 0x197   :  { %2736 = vadd.xlane.f32.xlu1 %v2735_v59  ;;  %v827_v27 = vrot.slane %v826_v13, 2  ;;  %v3177_v59 = vsub.f32 %v3169_v31, %v5855_v34  ;;  %v2894_v50 = vsel %vm78_vm0, %v2882_v19, 0.0 }
 0x198   :  { %2438 = vadd.xlane.f32.xlu0 %v2437_v35  ;;  %v1949_v35 = vadd.f32 %v1941_v1, %v6196_v54  ;;  %v1942_v1 = vmul.f32 0.0, %v6246_v45 }
 0x199   :  { %v828_v33 = vadd.f32 %v827_v27, %v826_v13  ;;  %v3185_v40 = vmul.f32 %v3177_v59, %v3177_v59  ;;  %v1802_v13 = vmul.f32 %v1794_v8, %v1794_v8  ;;  %v2571_v27 = vsub.f32 %v2563_v17, %v6047_v39 }
 0x19b   :  { %1981 = vadd.xlane.f32.xlu1 %v1980_v55  ;;  %v829_v5 = vrot.slane %v828_v33, 1  ;;  %v6225_v55 = vld [vmem:[%s8624_s0 + $0x28] sm:$0xff]  ;;  %v3195_v47 = vsel %vm78_vm0, %v3185_v40, 0.0  ;;  %v2579_v59 = vmul.f32 %v2571_v27, %v2571_v27 }
 0x19c   :  { %3037 = vadd.xlane.f32.xlu0 %v3036_v7  ;;  %v1957_v28 = vsub.f32 %v1949_v35, %v6225_v55  ;;  %v3029_v7 = vmul.f32 %v3021_v38, %v3021_v38  ;;  %v6273_v35 = vmul.f32 0.5, %v6196_v54  ;;  %v2440_v38 = vsel %vm78_vm0, %v2424_v12, 0.0 }
 0x19d   :  { %v830_v49 = vadd.f32 %v829_v5, %v828_v33  ;;  %v6257_v33 = vld [vmem:[%s8624_s0 + $0x3e] sm:$0xff]  ;;  %v3317_v5 = vadd.f32 %v6241_v32, %v6186_v10  ;;  %v3176_v10 = vsub.f32 %v3168_v6, %v5862_v48  ;;  %v2593_v8 = vsel %vm78_vm0, %v2579_v59, 0.0 }
 0x19e   :  { %v1965_v57 = vmul.f32 %v1957_v28, %v1957_v28  ;;  %v3039_v52 = vsel %vm78_vm0, %v3029_v7, 0.0  ;;  %v6289_v28 = vld [vmem:[%s8625_s1 + $0x38] sm:$0xff]  ;;  %v3465_v12 = vmul.f32 0.0, %v6175_v62  ;;  %v1779_v62 = vmul.f32 0.5, %v6257_v33 }
 0x19f   :  { %2591 = vadd.xlane.f32.xlu1 %v2590_v41  ;;  %3781 = vpush %v830_v49  ;;  %v3014_v41 = vadd.f32 %v6220_v46, %v6168_v30  ;;  %v4227_v30 = vld [vmem:[%s8624_s0 + $0x3d] sm:$0xff]  ;;  %v2089_v49 = vmul.f32 0.5, %v6182_v23  ;;  %v3184_v7 = vmul.f32 %v3176_v10, %v3176_v10 }
 0x1a0   :  { %1667 = vadd.xlane.f32.xlu0 %v1666_v29  ;;  %v1623_v29 = vmul.f32 0.0, %v4227_v30  ;;  %v6283_v23 = vld [vmem:[%s8625_s1 + $0x24] sm:$0xff] }
 0x1a1   :  { %v3022_v61 = vsub.f32 %v3014_v41, %v6013_v24  ;;  %v2105_v17 = vadd.f32 %v6273_v35, %v2089_v49 }
 0x1a2   :  { %v1631_v36 = vadd.f32 %v1623_v29, %v6257_v33  ;;  %v1787_v33 = vadd.f32 %v1779_v62, %v4895_v0 }
 0x1a3   :  { %2892 = vadd.xlane.f32.xlu1 %v2891_v25  ;;  %v1822_v25 = vsel %vm78_vm0, %v1802_v13, 0.0  ;;  %v3030_v9 = vmul.f32 %v3022_v61, %v3022_v61  ;;  %v2113_v30 = vsub.f32 %v2105_v17, %v6225_v55  ;;  %v3457_v61 = vld [vmem:[%s8625_s1 + $0xf] sm:$0xff]  ;;  %v2253_v17 = vmul.f32 0.0, %v6196_v54 }
 0x1a4   :  { %2293 = vadd.xlane.f32.xlu0 %v2292_v18  ;;  %v972_v3 = vpop.xlane.xlu1 %971  ;;  %v1983_v18 = vsel %vm78_vm0, %v1965_v57, 0.0  ;;  %v1639_v42 = vsub.f32 %v1631_v36, %v6289_v28  ;;  %v6308_v57 = vld [vmem:[%s8625_s1 + $0x16] sm:$0xff]  ;;  %v2859_v54 = vmul.f32 0.0, %v6216_v58 }
 0x1a5   :  { %v973_v26 = vrot.slane %v972_v3, 4  ;;  %v3042_v13 = vsel %vm78_vm0, %v3030_v9, 0.0 }
 0x1a6   :  { %v1647_v27 = vmul.f32 %v1639_v42, %v1639_v42 }
 0x1a7   :  { %2137 = vadd.xlane.f32.xlu1 %v2136_v51  ;;  %v974_v31 = vadd.f32 %v973_v26, %v972_v3  ;;  %v1950_v51 = vadd.f32 %v1942_v1, %v6267_v16  ;;  %v2564_v3 = vadd.f32 %v2556_v56, %v6283_v23  ;;  %v3162_v26 = vmul.f32 0.0, %v6162_v15 }
 0x1a8   :  { %2895 = vadd.xlane.f32.xlu0 %v2894_v50  ;;  %v3325_v50 = vsub.f32 %v3317_v5, %v5855_v34  ;;  %v2090_v56 = vmul.f32 0.5, %v6246_v45 }
 0x1a9   :  { %v975_v19 = vrot.slane %v974_v31, 2  ;;  %v2572_v6 = vsub.f32 %v2564_v3, %v6137_v63 }
 0x1aa   :  { %v3333_v41 = vmul.f32 %v3325_v50, %v3325_v50 }
 0x1ab   :  { %2739 = vadd.xlane.f32.xlu1 %v2738_v37  ;;  %v976_v44 = vadd.f32 %v975_v19, %v974_v31  ;;  %v6294_v37 = vmul.f32 0.5, %v6216_v58  ;;  %v3192_v31 = vsel %vm78_vm0, %v3184_v7, 0.0  ;;  %v2580_v10 = vmul.f32 %v2572_v6, %v2572_v6 }
 0x1ac   :  { %3196 = vadd.xlane.f32.xlu0 %v3195_v47  ;;  %v1958_v47 = vsub.f32 %v1950_v51, %v6299_v60  ;;  %v3343_v1 = vsel %vm78_vm0, %v3333_v41, 0.0  ;;  %v3473_v51 = vadd.f32 %v3465_v12, %v3457_v61 }
 0x1ad   :  { %v977_v40 = vrot.slane %v976_v44, 1  ;;  %v2711_v29 = vadd.f32 %v6294_v37, %v6096_v14  ;;  %v1669_v14 = vsel %vm78_vm0, %v1647_v27, 0.0  ;;  %v6357_v27 = vld [vmem:[%s8625_s1 + $0x1d] sm:$0xff] }
 0x1ae   :  { %v1966_v15 = vmul.f32 %v1958_v47, %v1958_v47  ;;  %v3481_v45 = vsub.f32 %v3473_v51, %v5855_v34  ;;  %v6345_v47 = vld [vmem:[%s8625_s1 + $0x2b] sm:$0xff]  ;;  %v1795_v34 = vsub.f32 %v1787_v33, %v6289_v28 }
 0x1af   :  { %3040 = vadd.xlane.f32.xlu1 %v3039_v52  ;;  %v978_v20 = vadd.f32 %v977_v40, %v976_v44  ;;  %v6314_v52 = vmul.f32 0.5, %v6238_v43  ;;  %v2719_v19 = vsub.f32 %v2711_v29, %v6047_v39 }
 0x1b0   :  { %1823 = vadd.xlane.f32.xlu0 %v1822_v25  ;;  %v3170_v25 = vadd.f32 %v3162_v26, %v6308_v57  ;;  %v1986_v49 = vsel %vm78_vm0, %v1966_v15, 0.0  ;;  %v2261_v26 = vadd.f32 %v2253_v17, %v6345_v47 }
 0x1b1   :  { %3783 = vpush %v978_v20  ;;  %v3316_v59 = vadd.f32 %v6314_v52, %v6114_v22  ;;  %v2727_v22 = vmul.f32 %v2719_v19, %v2719_v19 }
 0x1b2   :  { %v3178_v44 = vsub.f32 %v3170_v25, %v6013_v24  ;;  %v1803_v25 = vmul.f32 %v1795_v34, %v1795_v34  ;;  %v2269_v12 = vsub.f32 %v2261_v26, %v6225_v55  ;;  %v2860_v34 = vmul.f32 0.0, %v6283_v23 }
 0x1b3   :  { %1984 = vadd.xlane.f32.xlu1 %v1983_v18  ;;  %v2121_v18 = vmul.f32 %v2113_v30, %v2113_v30  ;;  %v3324_v40 = vsub.f32 %v3316_v59, %v5862_v48  ;;  %v6348_v48 = vmul.f32 0.5, %v6283_v23  ;;  %v6360_v30 = vmul.f32 0.5, %v6308_v57 }
 0x1b4   :  { %2441 = vadd.xlane.f32.xlu0 %v2440_v38  ;;  %v6333_v38 = vmul.f32 0.5, %v6267_v16  ;;  %v3186_v7 = vmul.f32 %v3178_v44, %v3178_v44  ;;  %v2277_v62 = vmul.f32 %v2269_v12, %v2269_v12 }
 0x1b5   :  { %v2139_v50 = vsel %vm78_vm0, %v2121_v18, 0.0  ;;  %v3332_v0 = vmul.f32 %v3324_v40, %v3324_v40  ;;  %v2712_v58 = vadd.f32 %v6348_v48, %v6202_v2  ;;  %v6375_v2 = vld [vmem:[%s8625_s1 + $0x39] sm:$0xff]  ;;  %v2254_v40 = vmul.f32 0.0, %v6267_v16 }
 0x1b6   :  { %v2106_v20 = vadd.f32 %v6333_v38, %v2090_v56  ;;  %v3198_v29 = vsel %vm78_vm0, %v3186_v7, 0.0  ;;  %v6389_v56 = vld [vmem:[%s8625_s1 + $0x3a] sm:$0xff]  ;;  %v6401_v7 = vmul.f32 0.5, %v6345_v47 }
 0x1b7   :  { %2594 = vadd.xlane.f32.xlu1 %v2593_v8  ;;  %v2596_v8 = vsel %vm78_vm0, %v2580_v10, 0.0  ;;  %v3340_v28 = vsel %vm78_vm0, %v3332_v0, 0.0  ;;  %v2720_v59 = vsub.f32 %v2712_v58, %v6137_v63  ;;  %v1825_v10 = vsel %vm78_vm0, %v1803_v25, 0.0  ;;  %v4230_v16 = vld [vmem:[%s8624_s0] sm:$0xff]  ;;  %v4231_v0 = vld [vmem:[%s8624_s0 + $0x8] sm:$0xff] }
 0x1b8   :  { %3043 = vadd.xlane.f32.xlu0 %v3042_v13  ;;  %v1136_v5 = vpop.xlane.xlu0 %1135  ;;  %v2741_v13 = vsel %vm78_vm0, %v2727_v22, 0.0  ;;  %v2114_v15 = vsub.f32 %v2106_v20, %v6299_v60  ;;  %v2295_v20 = vsel %vm78_vm0, %v2277_v62, 0.0  ;;  %v2409_v23 = vadd.f32 %v6401_v7, %v6273_v35  ;;  %v3458_v35 = vld [vmem:[%s8625_s1 + $0x17] sm:$0xff] }
 0x1b9   :  { %v1137_v36 = vrot.slane %v1136_v5, 4  ;;  %v6430_v25 = vmul.f32 0.5, %v6357_v27 }
 0x1ba   :  { %v2122_v19 = vmul.f32 %v2114_v15, %v2114_v15  ;;  %v6423_v15 = vld [vmem:[%s8624_s0 + $0x38] sm:$0xff] }
 0x1bb   :  { %3193 = vadd.xlane.f32.xlu1 %v3192_v31  ;;  %v1138_v9 = vadd.f32 %v1137_v36, %v1136_v5  ;;  %v3489_v31 = vmul.f32 %v3481_v45, %v3481_v45  ;;  %v3464_v5 = vmul.f32 0.0, %v6238_v43  ;;  %v3456_v36 = vld [vmem:[%s8625_s1 + $0x7] sm:$0xff]  ;;  %v1943_v43 = vmul.f32 0.0, %v6375_v2 }
 0x1bc   :  { %3344 = vadd.xlane.f32.xlu0 %v3343_v1  ;;  %v2867_v1 = vadd.f32 %v2859_v54, %v6357_v27  ;;  %v3015_v62 = vadd.f32 %v6430_v25, %v6294_v37  ;;  %v3982_v37 = vpop.eup %3981 }
 0x1bd   :  { %v1139_v42 = vrot.slane %v1138_v9, 2  ;;  %v3499_v18 = vsel %vm78_vm0, %v3489_v31, 0.0  ;;  %v3472_v51 = vadd.f32 %v3464_v5, %v3456_v36  ;;  %v1951_v17 = vadd.f32 %v1943_v43, %v6389_v56 }
 0x1bf   :  { %1670 = vadd.xlane.f32.xlu1 %v1669_v14  ;;  %v1140_v3 = vadd.f32 %v1139_v42, %v1138_v9  ;;  %v3318_v14 = vadd.f32 %v6360_v30, %v6220_v46  ;;  %v2875_v46 = vsub.f32 %v2867_v1, %v6047_v39  ;;  %v6397_v42 = vld [vmem:[%s8625_s1 + $0x33] sm:$0xff]  ;;  %v1959_v58 = vsub.f32 %v1951_v17, %v6423_v15 }
 0x1c0   :  { %1987 = vadd.xlane.f32.xlu0 %v1986_v49  ;;  %v3621_v49 = vmul.f32 0.5, %v3457_v61  ;;  %v2142_v61 = vsel %vm78_vm0, %v2122_v19, 0.0 }
 0x1c1   :  { %v1141_v41 = vrot.slane %v1140_v3, 1  ;;  %v3326_v44 = vsub.f32 %v3318_v14, %v6013_v24  ;;  %v2883_v33 = vmul.f32 %v2875_v46, %v2875_v46  ;;  %v2417_v46 = vsub.f32 %v2409_v23, %v6225_v55 }
 0x1c2   :  { %v3629_v22 = vadd.f32 %v3621_v49, %v6241_v32  ;;  %v1967_v49 = vmul.f32 %v1959_v58, %v1959_v58  ;;  %v3984_v58 = vpop.eup %3983 }
 0x1c3   :  { %2140 = vadd.xlane.f32.xlu1 %v2139_v50  ;;  %v1142_v6 = vadd.f32 %v1141_v41, %v1140_v3  ;;  %v2728_v50 = vmul.f32 %v2720_v59, %v2720_v59  ;;  %v3334_v32 = vmul.f32 %v3326_v44, %v3326_v44  ;;  %v3480_v3 = vsub.f32 %v3472_v51, %v4230_v16 }
 0x1c4   :  { %2597 = vadd.xlane.f32.xlu0 %v2596_v8  ;;  %v3637_v54 = vsub.f32 %v3629_v22, %v4231_v0  ;;  %v2262_v41 = vadd.f32 %v2254_v40, %v6397_v42  ;;  %v2897_v31 = vsel %vm78_vm0, %v2883_v33, 0.0  ;;  %v3620_v59 = vmul.f32 0.5, %v3456_v36 }
 0x1c5   :  { %3785 = vpush %v1142_v6  ;;  %v3346_v6 = vsel %vm78_vm0, %v3334_v32, 0.0  ;;  %v2091_v22 = vmul.f32 0.5, %v6375_v2  ;;  %v6451_v40 = vmul.f32 0.5, %v6389_v56  ;;  %v3023_v33 = vsub.f32 %v3015_v62, %v6047_v39 }
 0x1c6   :  { %v3645_v12 = vmul.f32 %v3637_v54, %v3637_v54  ;;  %v2270_v14 = vsub.f32 %v2262_v41, %v6299_v60  ;;  %v1673_v0 = vmul.f32 %v3982_v37, %v5790_v53 }
 0x1c7   :  { %2742 = vadd.xlane.f32.xlu1 %v2741_v13  ;;  %v2744_v13 = vsel %vm78_vm0, %v2728_v50, 0.0  ;;  %v2425_v50 = vmul.f32 %v2417_v46, %v2417_v46 }
 0x1c8   :  { %3199 = vadd.xlane.f32.xlu0 %v3198_v29  ;;  %v6417_v29 = vld [vmem:[%s8625_s1 + $0x25] sm:$0xff]  ;;  %v3655_v44 = vsel %vm78_vm0, %v3645_v12, 0.0  ;;  %v2278_v51 = vmul.f32 %v2270_v14, %v2270_v14  ;;  %v3622_v12 = vmul.f32 0.5, %v3458_v35  ;;  %v1677_v14 = vand.u32 2147483648, %v5790_v53 }
 0x1c9   :  { %v2868_v5 = vadd.f32 %v2860_v34, %v6417_v29  ;;  %v6460_v2 = vmul.f32 0.5, %v6417_v29  ;;  %v2443_v54 = vsel %vm78_vm0, %v2425_v50, 0.0  ;;  %v3031_v34 = vmul.f32 %v3023_v33, %v3023_v33 }
 0x1cb   :  { %3341 = vadd.xlane.f32.xlu1 %v3340_v28  ;;  %v3488_v28 = vmul.f32 %v3480_v3, %v3480_v3  ;;  %v2876_v36 = vsub.f32 %v2868_v5, %v6137_v63  ;;  %v3163_v5 = vmul.f32 0.0, %v6357_v27  ;;  %v3045_v27 = vsel %vm78_vm0, %v3031_v34, 0.0 }
 0x1cc   :  { %3500 = vadd.xlane.f32.xlu0 %v3499_v18  ;;  %v1284_v9 = vpop.xlane.xlu1 %1283  ;;  %v3466_v18 = vmul.f32 0.0, %v6308_v57  ;;  %v6444_v57 = vmul.f32 0.5, %v6397_v42 }
 0x1cd   :  { %v1285_v8 = vrot.slane %v1284_v9, 4  ;;  %v3496_v43 = vsel %vm78_vm0, %v3488_v28, 0.0  ;;  %v3016_v28 = vadd.f32 %v6460_v2, %v6348_v48 }
 0x1ce   :  { %v2410_v17 = vadd.f32 %v6444_v57, %v6333_v38  ;;  %v2107_v38 = vadd.f32 %v6451_v40, %v2091_v22 }
 0x1cf   :  { %1826 = vadd.xlane.f32.xlu1 %v1825_v10  ;;  %v1286_v45 = vadd.f32 %v1285_v8, %v1284_v9  ;;  %v3474_v9 = vadd.f32 %v3466_v18, %v3458_v35  ;;  %v1989_v8 = vsel %vm78_vm0, %v1967_v49, 0.0  ;;  %v1675_v18 = vsel %vm1674_vm9, %v5790_v53, %v1673_v0 }
 0x1d0   :  { %2143 = vadd.xlane.f32.xlu0 %v2142_v61  ;;  %v3628_v61 = vadd.f32 %v3620_v59, %v6314_v52  ;;  %v2884_v52 = vmul.f32 %v2876_v36, %v2876_v36  ;;  %v2115_v48 = vsub.f32 %v2107_v38, %v6423_v15  ;;  %v6488_v59 = vld [vmem:[%s8625_s1 + $0x1e] sm:$0xff]  ;;  %v2558_v35 = vmul.f32 0.0, %v6397_v42 }
 0x1d1   :  { %v1287_v26 = vrot.slane %v1286_v45, 2  ;;  %v3482_v32 = vsub.f32 %v3474_v9, %v6013_v24  ;;  %v3024_v42 = vsub.f32 %v3016_v28, %v6137_v63  ;;  %v1680_v36 = vmul.f32 %v3984_v58, %v5923_v4 }
 0x1d2   :  { %v2123_v22 = vmul.f32 %v2115_v48, %v2115_v48  ;;  %v3311_v0 = vmul.f32 0.5, %v6488_v59 }
 0x1d3   :  { %2296 = vadd.xlane.f32.xlu1 %v2295_v20  ;;  %v1288_v1 = vadd.f32 %v1287_v26, %v1286_v45  ;;  %v2298_v20 = vsel %vm78_vm0, %v2278_v51, 0.0  ;;  %v2418_v26 = vsub.f32 %v2410_v17, %v6299_v60  ;;  %v3630_v51 = vadd.f32 %v3622_v12, %v6360_v30  ;;  %v2247_v17 = vld [vmem:[%s8625_s1 + $0x3b] sm:$0xff] }
 0x1d4   :  { %2745 = vadd.xlane.f32.xlu0 %v2744_v13  ;;  %v3636_v13 = vsub.f32 %v3628_v61, %v4230_v16  ;;  %v2900_v16 = vsel %vm78_vm0, %v2884_v52, 0.0  ;;  %v3171_v61 = vadd.f32 %v3163_v5, %v6488_v59  ;;  %v6533_v34 = vmul.f32 0.5, %v2247_v17  ;;  %v3459_v5 = vld [vmem:[%s8625_s1 + $0x1f] sm:$0xff] }
 0x1d5   :  { %v1289_v19 = vrot.slane %v1288_v1, 1  ;;  %v2426_v49 = vmul.f32 %v2418_v26, %v2418_v26  ;;  %v2145_v26 = vsel %vm78_vm0, %v2123_v22, 0.0  ;;  %v3467_v22 = vmul.f32 0.0, %v6488_v59 }
 0x1d6   :  { %v3179_v38 = vsub.f32 %v3171_v61, %v6047_v39 }
 0x1d7   :  { %2898 = vadd.xlane.f32.xlu1 %v2897_v31  ;;  %v1290_v10 = vadd.f32 %v1289_v19, %v1288_v1  ;;  %v2557_v31 = vmul.f32 0.0, %v6345_v47  ;;  %v6476_v1 = vld [vmem:[%s8625_s1 + $0x2c] sm:$0xff]  ;;  %v3644_v47 = vmul.f32 %v3636_v13, %v3636_v13  ;;  %v2446_v33 = vsel %vm78_vm0, %v2426_v49, 0.0 }
 0x1d8   :  { %3347 = vadd.xlane.f32.xlu0 %v3346_v6  ;;  %v3490_v6 = vmul.f32 %v3482_v32, %v3482_v32  ;;  %v3638_v13 = vsub.f32 %v3630_v51, %v6013_v24  ;;  %v1682_v24 = vsel %vm1681_vm4, %v5923_v4, %v1680_v36  ;;  %v3187_v49 = vmul.f32 %v3179_v38, %v3179_v38 }
 0x1d9   :  { %3787 = vpush %v1290_v10  ;;  %v2565_v46 = vadd.f32 %v2557_v31, %v6476_v1  ;;  %v3652_v9 = vsel %vm78_vm0, %v3644_v47, 0.0 }
 0x1da   :  { %v3502_v62 = vsel %vm78_vm0, %v3490_v6, 0.0 }
 0x1db   :  { %3497 = vadd.xlane.f32.xlu1 %v3496_v43  ;;  %v6497_v43 = vld [vmem:[%s8625_s1 + $0x34] sm:$0xff]  ;;  %v2573_v30 = vsub.f32 %v2565_v46, %v6225_v55 }
 0x1dc   :  { %3656 = vadd.xlane.f32.xlu0 %v3655_v44  ;;  %v2566_v37 = vadd.f32 %v2558_v35, %v6497_v43 }
 0x1dd   :  { %v1448_v45 = vpop.xlane.xlu0 %1447  ;;  %v2581_v6 = vmul.f32 %v2573_v30, %v2573_v30 }
 0x1de   :  { %v1449_v3 = vrot.slane %v1448_v45, 4  ;;  %v2574_v31 = vsub.f32 %v2566_v37, %v6299_v60  ;;  %v3201_v37 = vsel %vm78_vm0, %v3187_v49, 0.0 }
 0x1df   :  { %1990 = vadd.xlane.f32.xlu1 %v1989_v8  ;;  %v2255_v8 = vmul.f32 0.0, %v6389_v56  ;;  %v6523_v56 = vld [vmem:[%s8625_s1 + $0x26] sm:$0xff] }
 0x1e0   :  { %v1450_v41 = vadd.f32 %v1449_v3, %v1448_v45  ;;  %2299 = vadd.xlane.f32.xlu0 %v2298_v20  ;;  %v2705_v45 = vmul.f32 0.5, %v6476_v1  ;;  %v3164_v20 = vmul.f32 0.0, %v6417_v29  ;;  %v3032_v3 = vmul.f32 %v3024_v42, %v3024_v42 }
 0x1e1   :  { %v6468_v23 = vpop.xlane.xlu0 %1805  ;;  %v1684_v29 = vand.u32 2147483648, %v5923_v4  ;;  %v2263_v58 = vadd.f32 %v2255_v8, %v2247_v17  ;;  %v3623_v42 = vmul.f32 0.5, %v3459_v5 }
 0x1e2   :  { %v1451_v19 = vrot.slane %v1450_v41, 2  ;;  %v2713_v28 = vadd.f32 %v2705_v45, %v6401_v7  ;;  %v3172_v12 = vadd.f32 %v3164_v20, %v6523_v56  ;;  %v3048_v35 = vsel %vm78_vm0, %v3032_v3, 0.0 }
 0x1e3   :  { %2444 = vadd.xlane.f32.xlu1 %v2443_v54  ;;  %v6529_v54 = vld [vmem:[%s8625_s1 + $0x2d] sm:$0xff]  ;;  %v3319_v7 = vadd.f32 %v3311_v0, %v6430_v25  ;;  %v6567_v53 = vsel %vm1683_vm13, %v1684_v29, %v1682_v24  ;;  %v2599_v25 = vsel %vm78_vm0, %v2581_v6, 0.0  ;;  %v2862_v29 = vmul.f32 0.0, %v6497_v43 }
 0x1e4   :  { %2901 = vadd.xlane.f32.xlu0 %v2900_v16  ;;  %v1452_v44 = vadd.f32 %v1451_v19, %v1450_v41  ;;  %v2559_v41 = vmul.f32 0.0, %v2247_v17  ;;  %v6543_v16 = vld [vmem:[%s8625_s1 + $0x3c] sm:$0xff]  ;;  %v6548_v47 = vmul.f32 0.5, %v6529_v54  ;;  %v6555_v19 = vsel %vm1676_vm10, %v1677_v14, %v1675_v18 }
 0x1e5   :  { %v6499_v10 = vpop.xlane.xlu0 %1655  ;;  %v2582_v14 = vmul.f32 %v2574_v31, %v2574_v31  ;;  %v2271_v18 = vsub.f32 %v2263_v58, %v6423_v15  ;;  %v2721_v36 = vsub.f32 %v2713_v28, %v6225_v55  ;;  %v3475_v24 = vadd.f32 %v3467_v22, %v3459_v5 }
 0x1e6   :  { %v1453_v50 = vrot.slane %v1452_v44, 1  ;;  %v2567_v46 = vadd.f32 %v2559_v41, %v6543_v16  ;;  %v2706_v31 = vmul.f32 0.5, %v6497_v43  ;;  %v4233_v43 = vld [vmem:[%s8624_s0 + $0x18] sm:$0xff]  ;;  %3985 = vrsqrt.f32 %v6468_v23 }
 0x1e7   :  { %3046 = vadd.xlane.f32.xlu1 %v3045_v27  ;;  %v3646_v27 = vmul.f32 %v3638_v13, %v3638_v13  ;;  %v2279_v20 = vmul.f32 %v2271_v18, %v2271_v18  ;;  %3987 = vrsqrt.f32 %v6499_v10  ;;  %vm1830_vm15 = vcmp.eq.f32.partialorder %v6468_v23, inf }
 0x1e8   :  { %3503 = vadd.xlane.f32.xlu0 %v3502_v62  ;;  %v1454_v32 = vadd.f32 %v1453_v50, %v1452_v44  ;;  %v2411_v62 = vadd.f32 %v6533_v34, %v6451_v40  ;;  %v2861_v44 = vmul.f32 0.0, %v6476_v1  ;;  %v3017_v40 = vadd.f32 %v6548_v47, %v2705_v45 }
 0x1e9   :  { %v6517_v52 = vpop.xlane.xlu0 %1972  ;;  %v3658_v4 = vsel %vm78_vm0, %v3646_v27, 0.0  ;;  %v3327_v50 = vsub.f32 %v3319_v7, %v6047_v39  ;;  %v2575_v8 = vsub.f32 %v2567_v46, %v6423_v15  ;;  %v2602_v45 = vsel %vm78_vm0, %v2582_v14, 0.0 }
 0x1ea   :  { %3789 = vpush %v1454_v32  ;;  %v2869_v30 = vadd.f32 %v2861_v44, %v6529_v54  ;;  %v3631_v32 = vadd.f32 %v3623_v42, %v3311_v0  ;;  %v2729_v39 = vmul.f32 %v2721_v36, %v2721_v36  ;;  %v3025_v59 = vsub.f32 %v3017_v40, %v6225_v55 }
 0x1eb   :  { %3653 = vadd.xlane.f32.xlu1 %v3652_v9  ;;  %v3180_v9 = vsub.f32 %v3172_v12, %v6137_v63  ;;  %v3335_v41 = vmul.f32 %v3327_v50, %v3327_v50  ;;  %v3468_v0 = vmul.f32 0.0, %v6523_v56  ;;  %v2583_v58 = vmul.f32 %v2575_v8, %v2575_v8  ;;  %v3460_v12 = vld [vmem:[%s8625_s1 + $0x27] sm:$0xff] }
 0x1ec   :  { %2447 = vadd.xlane.f32.xlu0 %v2446_v33  ;;  %v2419_v33 = vsub.f32 %v2411_v62, %v6423_v15  ;;  %v2877_v28 = vsub.f32 %v2869_v30, %v6225_v55  ;;  %v2301_v5 = vsel %vm78_vm0, %v2279_v20, 0.0  ;;  %v3639_v7 = vsub.f32 %v3631_v32, %v4233_v43 }
 0x1ed   :  { %v6557_v48 = vpop.xlane.xlu0 %2125  ;;  %v3188_v13 = vmul.f32 %v3180_v9, %v3180_v9  ;;  %v2747_v62 = vsel %vm78_vm0, %v2729_v39, 0.0  ;;  %v3033_v14 = vmul.f32 %v3025_v59, %v3025_v59  ;;  %v3349_v42 = vsel %vm78_vm0, %v3335_v41, 0.0  ;;  %v6638_v59 = vld [vmem:[%s8625_s1 + $0x2e] sm:$0xff] }
 0x1ee   :  { %v2427_v6 = vmul.f32 %v2419_v33, %v2419_v33  ;;  %v3476_v36 = vadd.f32 %v3468_v0, %v3460_v12  ;;  %v2605_v9 = vsel %vm78_vm0, %v2583_v58, 0.0  ;;  %v3647_v22 = vmul.f32 %v3639_v7, %v3639_v7  ;;  %v6666_v7 = vld [vmem:[%s8625_s1 + $0x2f] sm:$0xff] }
 0x1ef   :  { %2146 = vadd.xlane.f32.xlu1 %v2145_v26  ;;  %v2854_v26 = vld [vmem:[%s8625_s1 + $0x35] sm:$0xff]  ;;  %v3204_v44 = vsel %vm78_vm0, %v3188_v13, 0.0  ;;  %v6621_v8 = vmul.f32 0.5, %v6543_v16  ;;  %v3051_v30 = vsel %vm78_vm0, %v3033_v14, 0.0  ;;  %3989 = vrsqrt.f32 %v6517_v52 }
 0x1f0   :  { %v1596_v51 = vpop.xlane.xlu1 %1595  ;;  %3049 = vadd.xlane.f32.xlu0 %v3048_v35  ;;  %v3312_v35 = vmul.f32 0.5, %v6523_v56  ;;  %v6604_v49 = vmul.f32 0.5, %v2854_v26  ;;  %v2870_v56 = vadd.f32 %v2862_v29, %v2854_v26  ;;  %v6616_v40 = vsel %vm78_vm0, %v2427_v6, 0.0 }
 0x1f1   :  { %v1597_v1 = vrot.slane %v1596_v51, 4  ;;  %v6574_v61 = vpop.xlane.xlu0 %1658  ;;  %v3484_v13 = vsub.f32 %v3476_v36, %v6137_v63  ;;  %v3166_v29 = vmul.f32 0.0, %v2854_v26  ;;  %v3661_v6 = vsel %vm78_vm0, %v3647_v22, 0.0 }
 0x1f2   :  { %v2715_v26 = vadd.f32 %v6621_v8, %v6533_v34  ;;  %vm1832_vm2 = vcmp.eq.f32.partialorder %v6468_v23, 0.0  ;;  %3991 = vrsqrt.f32 %v6574_v61  ;;  %vm1688_vm5 = vcmp.eq.f32.partialorder %v6499_v10, inf }
 0x1f3   :  { %v1598_v17 = vadd.f32 %v1597_v1, %v1596_v51  ;;  %2600 = vadd.xlane.f32.xlu1 %v2599_v25  ;;  %v3483_v51 = vsub.f32 %v3475_v24, %v4233_v43  ;;  %v2714_v25 = vadd.f32 %v2706_v31, %v6444_v57  ;;  %v2885_v1 = vmul.f32 %v2877_v28, %v2877_v28  ;;  %v2855_v57 = vld [vmem:[%s8625_s1 + $0x3d] sm:$0xff] }
 0x1f4   :  { %v6584_v3 = vpop.xlane.xlu1 %1808  ;;  %3659 = vadd.xlane.f32.xlu0 %v3658_v4  ;;  %v3320_v4 = vadd.f32 %v3312_v35, %v6460_v2  ;;  %v3624_v2 = vmul.f32 0.5, %v3460_v12  ;;  %v3167_v0 = vmul.f32 0.0, %v2855_v57  ;;  %v6657_v12 = vld [vmem:[%s8625_s1 + $0x3e] sm:$0xff]  ;;  %v3492_v14 = vmul.f32 %v3484_v13, %v3484_v13 }
 0x1f5   :  { %v6588_v38 = vpop.xlane.xlu0 %2281  ;;  %v1599_v27 = vrot.slane %v1598_v17, 2  ;;  %v3491_v32 = vmul.f32 %v3483_v51, %v3483_v51  ;;  %v2722_v39 = vsub.f32 %v2714_v25, %v6299_v60  ;;  %v6648_v58 = vsel %vm78_vm0, %v2885_v1, 0.0 }
 0x1f6   :  { %v3328_v24 = vsub.f32 %v3320_v4, %v6137_v63  ;;  %v3175_v36 = vadd.f32 %v3167_v0, %v6657_v12  ;;  %v3313_v1 = vmul.f32 0.5, %v6638_v59  ;;  %v3625_v4 = vmul.f32 0.5, %v6666_v7 }
 0x1f7   :  { %3202 = vadd.xlane.f32.xlu1 %v3201_v37  ;;  %v1600_v50 = vadd.f32 %v1599_v27, %v1598_v17  ;;  %v3018_v37 = vadd.f32 %v6604_v49, %v2706_v31  ;;  %v3165_v17 = vmul.f32 0.0, %v6529_v54  ;;  %v6644_v54 = vld [vmem:[%s8625_s1 + $0x36] sm:$0xff]  ;;  %v2863_v31 = vmul.f32 0.0, %v6543_v16 }
 0x1f8   :  { %v6606_v46 = vpop.xlane.xlu1 %1969  ;;  %2603 = vadd.xlane.f32.xlu0 %v2602_v45  ;;  %v2878_v45 = vsub.f32 %v2870_v56, %v6299_v60  ;;  %v3632_v27 = vadd.f32 %v3624_v2, %v3312_v35  ;;  %v3174_v56 = vadd.f32 %v3166_v29, %v6644_v54  ;;  %v6672_v51 = vsel %vm78_vm0, %v3491_v32, 0.0 }
 0x1f9   :  { %v6610_v18 = vpop.xlane.xlu0 %1814  ;;  %v1601_v41 = vrot.slane %v1600_v50, 1  ;;  %v3026_v28 = vsub.f32 %v3018_v37, %v6299_v60  ;;  %v3173_v43 = vadd.f32 %v3165_v17, %v6638_v59  ;;  %v3336_v25 = vmul.f32 %v3328_v24, %v3328_v24 }
 0x1fa   :  { %v2871_v35 = vadd.f32 %v2863_v31, %v2855_v57  ;;  %v2723_v37 = vsub.f32 %v2715_v26, %v6423_v15  ;;  %v3183_v13 = vsub.f32 %v3175_v36, %v6423_v15  ;;  %v3633_v24 = vadd.f32 %v3625_v4, %v3313_v1 }
 0x1fb   :  { %2302 = vadd.xlane.f32.xlu1 %v2301_v5  ;;  %v1602_v16 = vadd.f32 %v1601_v41, %v1600_v50  ;;  %v6677_v50 = vmul.f32 0.5, %v2855_v57  ;;  %v3181_v2 = vsub.f32 %v3173_v43, %v6225_v55  ;;  %v3508_v57 = vsel %vm78_vm0, %v3492_v14, 0.0  ;;  %v3986_v43 = vpop.eup %3985 }
 0x1fc   :  { %v6626_v33 = vpop.xlane.xlu1 %1811  ;;  %3205 = vadd.xlane.f32.xlu0 %v3204_v44  ;;  %v2730_v44 = vmul.f32 %v2722_v39, %v2722_v39  ;;  %v3182_v39 = vsub.f32 %v3174_v56, %v6299_v60  ;;  %v3321_v41 = vadd.f32 %v3313_v1, %v6548_v47  ;;  %v3470_v47 = vmul.f32 0.0, %v6644_v54 }
 0x1fd   :  { %v6631_v20 = vpop.xlane.xlu0 %2429  ;;  %3791 = vpush %v1602_v16  ;;  %v3019_v31 = vadd.f32 %v6677_v50, %v6621_v8  ;;  %v3189_v16 = vmul.f32 %v3181_v2, %v3181_v2  ;;  %3993 = vrsqrt.f32 %v6557_v48  ;;  %v1833_v14 = vand.u32 2147483648, %v6468_v23 }
 0x1fe   :  { %v6689_v32 = vsel %vm78_vm0, %v2730_v44, 0.0  ;;  %v3469_v44 = vmul.f32 0.0, %v6638_v59  ;;  %v3329_v56 = vsub.f32 %v3321_v41, %v6225_v55  ;;  %v1691_v4 = vand.u32 2147483648, %v6499_v10 }
 0x1ff   :  { %2748 = vadd.xlane.f32.xlu1 %v2747_v62  ;;  %v2886_v62 = vmul.f32 %v2878_v45, %v2878_v45  ;;  %v3640_v45 = vsub.f32 %v3632_v27, %v6137_v63  ;;  %v2879_v63 = vsub.f32 %v2871_v35, %v6423_v15  ;;  %v3190_v27 = vmul.f32 %v3182_v39, %v3182_v39 }
 0x200   :  { %v6660_v5 = vpop.xlane.xlu1 %2128  ;;  %2606 = vadd.xlane.f32.xlu0 %v2605_v9  ;;  %v3034_v9 = vmul.f32 %v3026_v28, %v3026_v28  ;;  %v2731_v28 = vmul.f32 %v2723_v37, %v2723_v37  ;;  %v3027_v35 = vsub.f32 %v3019_v31, %v6423_v15  ;;  %v6734_v1 = vsel %vm78_vm0, %v3189_v16, 0.0 }
 0x201   :  { %v6668_v34 = vpop.xlane.xlu0 %1661  ;;  %v3648_v26 = vmul.f32 %v3640_v45, %v3640_v45  ;;  %v2887_v8 = vmul.f32 %v2879_v63, %v2879_v63  ;;  %v6741_v45 = vsel %vm78_vm0, %v3190_v27, 0.0  ;;  %vm2001_vm6 = vcmp.eq.f32.partialorder %v6517_v52, inf }
 0x202   :  { %v6701_v29 = vsel %vm78_vm0, %v3034_v9, 0.0  ;;  %v6728_v9 = vsel %vm78_vm0, %v2731_v28, 0.0  ;;  %vm2003_vm8 = vcmp.eq.f32.partialorder %v6517_v52, 0.0  ;;  %v2004_v41 = vand.u32 2147483648, %v6517_v52 }
 0x203   :  { %3350 = vadd.xlane.f32.xlu1 %v3349_v42  ;;  %v2906_v42 = vsel %vm78_vm0, %v2886_v62, 0.0  ;;  %v3191_v62 = vmul.f32 %v3183_v13, %v3183_v13  ;;  %v6731_v59 = vsel %vm78_vm0, %v3648_v26, 0.0  ;;  %v6745_v39 = vsel %vm78_vm0, %v2887_v8, 0.0 }
 0x204   :  { %v6680_v22 = vpop.xlane.xlu1 %1975  ;;  %3052 = vadd.xlane.f32.xlu0 %v3051_v30  ;;  %v6695_v30 = vsel %vm78_vm0, %v3336_v25, 0.0  ;;  %v3641_v25 = vsub.f32 %v3633_v24, %v6225_v55  ;;  %v3477_v13 = vadd.f32 %v3469_v44, %v6666_v7  ;;  %v3337_v24 = vmul.f32 %v3329_v56, %v3329_v56 }
 0x205   :  { %v6685_v17 = vpop.xlane.xlu0 %2287  ;;  %v6748_v63 = vsel %vm78_vm0, %v3191_v62, 0.0  ;;  %v3035_v28 = vmul.f32 %v3027_v35, %v3027_v35  ;;  %vm1690_vm11 = vcmp.eq.f32.partialorder %v6499_v10, 0.0  ;;  %vm2150_vm9 = vcmp.eq.f32.partialorder %v6557_v48, inf }
 0x206   :  { %v3649_v31 = vmul.f32 %v3641_v25, %v3641_v25  ;;  %v2153_v16 = vand.u32 2147483648, %v6557_v48  ;;  %3995 = vrsqrt.f32 %v6584_v3  ;;  %v3314_v7 = vmul.f32 0.5, %v6644_v54 }
 0x207   :  { %2450 = vadd.xlane.f32.xlu1 %v6616_v40  ;;  %3997 = vrsqrt.f32 %v6588_v38  ;;  %v3485_v44 = vsub.f32 %v3477_v13, %v6225_v55  ;;  %vm2152_vm10 = vcmp.eq.f32.partialorder %v6557_v48, 0.0  ;;  %v6778_v35 = vsel %vm78_vm0, %v3337_v24, 0.0 }
 0x208   :  { %v6707_v0 = vpop.xlane.xlu1 %2284  ;;  %3662 = vadd.xlane.f32.xlu0 %v3661_v6  ;;  %v3462_v6 = vld [vmem:[%s8625_s1 + $0x37] sm:$0xff]  ;;  %v3322_v56 = vadd.f32 %v3314_v7, %v6604_v49  ;;  %v6784_v55 = vsel %vm78_vm0, %v3035_v28, 0.0  ;;  %vm1695_vm4 = vcmp.eq.f32.partialorder %v6574_v61, inf  ;;  %vm1697_vm13 = vcmp.eq.f32.partialorder %v6574_v61, 0.0 }
 0x209   :  { %v6711_v40 = vpop.xlane.xlu0 %2588  ;;  %v3478_v2 = vadd.f32 %v3470_v47, %v3462_v6  ;;  %v3626_v62 = vmul.f32 0.5, %v3462_v6  ;;  %v6781_v6 = vsel %vm78_vm0, %v3649_v31, 0.0  ;;  %3999 = vrsqrt.f32 %v6606_v46 }
 0x20a   :  { %v3493_v31 = vmul.f32 %v3485_v44, %v3485_v44  ;;  %v3330_v28 = vsub.f32 %v3322_v56, %v6299_v60  ;;  %4001 = vrsqrt.f32 %v6610_v18  ;;  %vm1846_vm12 = vcmp.eq.f32.partialorder %v6626_v33, 0.0 }
 0x20b   :  { %2904 = vadd.xlane.f32.xlu1 %v6648_v58  ;;  %v1829_v58 = vmul.f32 %v3986_v43, %v6468_v23  ;;  %v3486_v8 = vsub.f32 %v3478_v2, %v6299_v60  ;;  %4003 = vrsqrt.f32 %v6631_v20  ;;  %vm2619_vm3 = vcmp.eq.f32.partialorder %v6711_v40, 0.0 }
 0x20c   :  { %v6725_v36 = vpop.xlane.xlu1 %2131  ;;  %2907 = vadd.xlane.f32.xlu0 %v2906_v42  ;;  %v3988_v42 = vpop.eup %3987  ;;  %4005 = vrsqrt.f32 %v6626_v33 }
 0x20d   :  { %v6738_v37 = vpop.xlane.xlu0 %2134  ;;  %v3990_v26 = vpop.eup %3989  ;;  %v1687_v47 = vmul.f32 %v3988_v42, %v6499_v10  ;;  %v1698_v42 = vand.u32 2147483648, %v6574_v61  ;;  %4007 = vrsqrt.f32 %v6660_v5 }
 0x20e   :  { %v3992_v54 = vpop.eup %3991  ;;  %v2000_v25 = vmul.f32 %v3990_v26, %v6517_v52  ;;  %4009 = vrsqrt.f32 %v6668_v34 }
 0x20f   :  { %3506 = vadd.xlane.f32.xlu1 %v6672_v51  ;;  %v1831_v51 = vsel %vm1830_vm15, %v6468_v23, %v1829_v58  ;;  %v3994_v49 = vpop.eup %3993  ;;  %v1689_v2 = vsel %vm1688_vm5, %v6499_v10, %v1687_v47  ;;  %v3494_v23 = vmul.f32 %v3486_v8, %v3486_v8  ;;  %v1694_v24 = vmul.f32 %v3992_v54, %v6574_v61 }
 0x210   :  { %v6758_v27 = vpop.xlane.xlu1 %2432  ;;  %3509 = vadd.xlane.f32.xlu0 %v3508_v57  ;;  %v6772_v57 = vmul.f32 0.5, %v6657_v12  ;;  %v6788_v58 = vsel %vm1832_vm2, %v1833_v14, %v1831_v51  ;;  %v3634_v14 = vadd.f32 %v3626_v62, %v3314_v7  ;;  %v2149_v51 = vmul.f32 %v3994_v49, %v6557_v48  ;;  %v3996_v44 = vpop.eup %3995 }
 0x211   :  { %v6765_v43 = vpop.xlane.xlu0 %2733  ;;  %v6813_v7 = vmul.f32 0.0, %v6657_v12  ;;  %vm1837_vm15 = vcmp.eq.f32.partialorder %v6584_v3, inf  ;;  %v1840_v47 = vand.u32 2147483648, %v6584_v3  ;;  %vm2306_vm2 = vcmp.eq.f32.partialorder %v6588_v38, inf  ;;  %v3998_v49 = vpop.eup %3997 }
 0x212   :  { %v3323_v26 = vadd.f32 %v6772_v57, %v6677_v50  ;;  %v2309_v8 = vand.u32 2147483648, %v6588_v38  ;;  %v6827_v12 = vsel %vm78_vm0, %v3494_v23, 0.0  ;;  %v3642_v62 = vsub.f32 %v3634_v14, %v6299_v60 }
 0x213   :  { %2751 = vadd.xlane.f32.xlu1 %v6689_v32  ;;  %v3338_v54 = vmul.f32 %v3330_v28, %v3330_v28  ;;  %vm1839_vm5 = vcmp.eq.f32.partialorder %v6584_v3, 0.0  ;;  %v1997_v60 = vand.u32 2147483648, %v6606_v46  ;;  %v1836_v10 = vmul.f32 %v3996_v44, %v6584_v3  ;;  %v4000_v28 = vpop.eup %3999 }
 0x214   :  { %v6793_v32 = vpop.xlane.xlu1 %1978  ;;  %3055 = vadd.xlane.f32.xlu0 %v6701_v29  ;;  %v2002_v29 = vsel %vm2001_vm6, %v6517_v52, %v2000_v25  ;;  %v2151_v25 = vsel %vm2150_vm9, %v6557_v48, %v2149_v51  ;;  %vm2308_vm6 = vcmp.eq.f32.partialorder %v6588_v38, 0.0  ;;  %v6848_v52 = vsel %vm78_vm0, %v3493_v31, 0.0  ;;  %v3463_v51 = vld [vmem:[%s8625_s1 + $0x3f] sm:$0xff]  ;;  %v4002_v44 = vpop.eup %4001  ;;  %s3774_s1 = spop %3773 }
 0x215   :  { %v6800_v13 = vpop.xlane.xlu0 %1664  ;;  %v6834_v56 = vsel %vm2003_vm8, %v2004_v41, %v2002_v29  ;;  %v1692_v41 = vsel %vm1690_vm11, %v1691_v4, %v1689_v2  ;;  %vm1994_vm8 = vcmp.eq.f32.partialorder %v6606_v46, inf  ;;  %v1745_v31 = vsel %vm175_vm1, %v6567_v53, 0.0  ;;  %s3776_s26 = spop %3775  ;;  %s200_s28 = smul.f32 0.015625, %s3774_s1 }
 0x216   :  { %vm1851_vm11 = vcmp.eq.f32.partialorder %v6610_v18, inf  ;;  %v3650_v2 = vmul.f32 %v3642_v62, %v3642_v62  ;;  %4011 = vrsqrt.f32 %v6680_v22  ;;  %v6879_v53 = vsel %vm78_vm0, %v3338_v54, 0.0  ;;  %s3778_s27 = spop %3777  ;;  %s356_s30 = smul.f32 0.015625, %s3776_s26 }
 0x217   :  { %3353 = vadd.xlane.f32.xlu1 %v6695_v30  ;;  %vm1996_vm9 = vcmp.eq.f32.partialorder %v6606_v46, 0.0  ;;  %v2305_v29 = vmul.f32 %v3998_v49, %v6588_v38  ;;  %4013 = vrsqrt.f32 %v6685_v17  ;;  %v2457_v49 = vand.u32 2147483648, %v6631_v20  ;;  %s3780_s29 = spop %3779  ;;  %s520_s4 = smul.f32 0.015873017, %s3778_s27 }
 0x218   :  { %v6819_v50 = vpop.xlane.xlu1 %2585  ;;  %3665 = vadd.xlane.f32.xlu0 %v6731_v59  ;;  %v1696_v59 = vsel %vm1695_vm4, %v6574_v61, %v1694_v24  ;;  %v3331_v24 = vsub.f32 %v3323_v26, %v6423_v15  ;;  %v1747_v26 = vsel %vm175_vm1, %v1692_v41, 0.0  ;;  %v1847_v61 = vand.u32 2147483648, %v6626_v33  ;;  %v4004_v41 = vpop.eup %4003  ;;  %s3782_s3 = spop %3781  ;;  %s668_s6 = smul.f32 0.015873017, %s3780_s29 }
 0x219   :  { %v6824_v30 = vpop.xlane.xlu0 %2290  ;;  %4015 = vrsqrt.f32 %v6707_v0  ;;  %vm1844_vm4 = vcmp.eq.f32.partialorder %v6626_v33, inf  ;;  %s3784_s5 = spop %3783  ;;  %s832_s8 = smul.f32 0.016129032, %s3782_s3 }
 0x21a   :  { %4017 = vrsqrt.f32 %v6711_v40  ;;  %vm2327_vm7 = vcmp.eq.f32.partialorder %v6824_v30, inf  ;;  %s8567_s7 = spop %3785  ;;  %s980_s10 = smul.f32 0.016129032, %s3784_s5 }
 0x21b   :  { %2754 = vadd.xlane.f32.xlu1 %v6728_v9  ;;  %v1744_v9 = vsel %vm175_vm1, %v6555_v19, 0.0  ;;  %v6875_v19 = vsel %vm2152_vm10, %v2153_v16, %v2151_v25  ;;  %vm2454_vm10 = vcmp.eq.f32.partialorder %v6631_v20, inf  ;;  %v3627_v25 = vmul.f32 0.5, %v3463_v51  ;;  %s8570_s9 = spop %3787  ;;  %s1144_s12 = smul.f32 0.016393442, %s8567_s7 }
 0x21c   :  { %v6856_v14 = vpop.xlane.xlu1 %1817  ;;  %3211 = vadd.xlane.f32.xlu0 %v6741_v45  ;;  %v1699_v45 = vsel %vm1697_vm13, %v1698_v42, %v1696_v59  ;;  %v1746_v48 = vadd.f32 %v1745_v31, %v1744_v9  ;;  %v3339_v42 = vmul.f32 %v3331_v24, %v3331_v24  ;;  %v1993_v59 = vmul.f32 %v4000_v28, %v6606_v46  ;;  %v4006_v9 = vpop.eup %4005  ;;  %s8573_s11 = spop %3789  ;;  %s1292_s13 = smul.f32 0.016393442, %s8570_s9 }
 0x21d   :  { %v6867_v4 = vpop.xlane.xlu0 %2889  ;;  %v1749_v62 = vsel %vm175_vm1, %v1699_v45, 0.0  ;;  %vm2456_vm13 = vcmp.eq.f32.partialorder %v6631_v20, 0.0  ;;  %v3670_v24 = vsel %vm78_vm0, %v3650_v2, 0.0  ;;  %v2307_v31 = vsel %vm2306_vm2, %v6588_v38, %v2305_v29  ;;  %v4008_v28 = vpop.eup %4007  ;;  %s1456_s15 = smul.f32 0.016666668, %s8573_s11 }
 0x21e   :  { %v1850_v2 = vmul.f32 %v4002_v44, %v6610_v18  ;;  %v1705_v29 = vand.u32 2147483648, %v6668_v34  ;;  %vm2159_vm2 = vcmp.eq.f32.partialorder %v6660_v5, 0.0  ;;  %4019 = vrsqrt.f32 %v6725_v36  ;;  %v4010_v44 = vpop.eup %4009 }
 0x21f   :  { %3208 = vadd.xlane.f32.xlu1 %v6734_v1  ;;  %v1838_v1 = vsel %vm1837_vm15, %v6584_v3, %v1836_v10  ;;  %vm2157_vm15 = vcmp.eq.f32.partialorder %v6660_v5, inf  ;;  %v3479_v10 = vadd.f32 %v6813_v7, %v3463_v51  ;;  %v2453_v3 = vmul.f32 %v4004_v41, %v6631_v20 }
 0x220   :  { %v6889_v16 = vpop.xlane.xlu1 %2435  ;;  %3214 = vadd.xlane.f32.xlu0 %v6748_v63  ;;  %v1748_v63 = vadd.f32 %v1747_v26, %v1746_v48  ;;  %v6919_v26 = vsel %vm1839_vm5, %v1840_v47, %v1838_v1  ;;  %v2160_v48 = vand.u32 2147483648, %v6660_v5  ;;  %v6935_v47 = vsel %vm78_vm0, %v3339_v42, 0.0 }
 0x221   :  { %8634 = vst [vmem:[#allocation2_spill] sm:$0xff] %v6889_v16  ;;  %v6901_v54 = vpop.xlane.xlu0 %1820  ;;  %v3635_v51 = vadd.f32 %v3627_v25, %v6772_v57  ;;  %vm2008_vm5 = vcmp.eq.f32.partialorder %v6680_v22, inf  ;;  %v2156_v1 = vmul.f32 %v4008_v28, %v6660_v5  ;;  %4021 = vrsqrt.f32 %v6738_v37  ;;  %v4012_v57 = vpop.eup %4011 }
 0x222   :  { %v6913_v45 = vadd.f32 %v1749_v62, %v1748_v63  ;;  %v1843_v62 = vmul.f32 %v4006_v9, %v6626_v33  ;;  %v3487_v38 = vsub.f32 %v3479_v10, %v6423_v15  ;;  %4023 = vrsqrt.f32 %v6758_v27 }
 0x223   :  { %2910 = vadd.xlane.f32.xlu1 %v6745_v39  ;;  %v1995_v39 = vsel %vm1994_vm8, %v6606_v46, %v1993_v59  ;;  %vm1702_vm8 = vcmp.eq.f32.partialorder %v6668_v34, inf  ;;  %v6962_v59 = vsel %vm1851_vm11, %v6610_v18, %v1850_v2  ;;  %v2455_v46 = vsel %vm2454_vm10, %v6631_v20, %v2453_v3 }
 0x224   :  { %v6924_v21 = vpop.xlane.xlu1 %2736  ;;  %3668 = vadd.xlane.f32.xlu0 %v6781_v6  ;;  %v6942_v6 = vsel %vm2308_vm6, %v2309_v8, %v2307_v31  ;;  %v6957_v8 = vsel %vm1996_vm9, %v1997_v60, %v1995_v39  ;;  %vm2320_vm6 = vcmp.eq.f32.partialorder %v6685_v17, inf  ;;  %4025 = vrsqrt.f32 %v6765_v43 }
 0x225   :  { %v6932_v7 = vpop.xlane.xlu0 %2438  ;;  %v3643_v41 = vsub.f32 %v3635_v51, %v6423_v15  ;;  %vm2313_vm11 = vcmp.eq.f32.partialorder %v6707_v0, inf  ;;  %v2316_v31 = vand.u32 2147483648, %v6707_v0  ;;  %vm2617_vm9 = vcmp.eq.f32.partialorder %v6711_v40, inf }
 0x226   :  { %v2158_v10 = vsel %vm2157_vm15, %v6660_v5, %v2156_v1  ;;  %v2007_v28 = vmul.f32 %v4012_v57, %v6680_v22  ;;  %vm2315_vm10 = vcmp.eq.f32.partialorder %v6707_v0, 0.0  ;;  %4027 = vrsqrt.f32 %v6800_v13 }
 0x227   :  { %3356 = vadd.xlane.f32.xlu1 %v6778_v35  ;;  %v4014_v35 = vpop.eup %4013  ;;  %v3495_v15 = vmul.f32 %v3487_v38, %v3487_v38  ;;  %v6994_v39 = vsel %vm2456_vm13, %v2457_v49, %v2455_v46  ;;  %v2620_v51 = vand.u32 2147483648, %v6711_v40  ;;  %4029 = vrsqrt.f32 %v6793_v32 }
 0x228   :  { %v6966_v25 = vpop.xlane.xlu1 %1981  ;;  %3515 = vadd.xlane.f32.xlu0 %v6827_v12  ;;  %v4016_v9 = vpop.eup %4015  ;;  %v1845_v12 = vsel %vm1844_vm4, %v6626_v33, %v1843_v62  ;;  %8635 = vst [vmem:[#allocation3_spill] sm:$0xff] %v6994_v39  ;;  %v2319_v3 = vmul.f32 %v4014_v35, %v6685_v17  ;;  %v1701_v1 = vmul.f32 %v4010_v44, %v6668_v34  ;;  %4031 = vrsqrt.f32 %v6819_v50 }
 0x229   :  { %v6975_v63 = vpop.xlane.xlu0 %3037  ;;  %v4018_v2 = vpop.eup %4017  ;;  %v2312_v57 = vmul.f32 %v4016_v9, %v6707_v0  ;;  %v3651_v20 = vmul.f32 %v3643_v41, %v3643_v41  ;;  %v7008_v49 = vsel %vm2159_vm2, %v2160_v48, %v2158_v10  ;;  %vm2164_vm4 = vcmp.eq.f32.partialorder %v6725_v36, inf }
 0x22a   :  { %vm2171_vm13 = vcmp.eq.f32.partialorder %v6738_v37, inf  ;;  %v7017_v44 = vsel %vm2008_vm5, %v6680_v22, %v2007_v28  ;;  %v2616_v35 = vmul.f32 %v4018_v2, %v6711_v40  ;;  %4033 = vrsqrt.f32 %v6867_v4  ;;  %v4020_v48 = vpop.eup %4019 }
 0x22b   :  { %3058 = vadd.xlane.f32.xlu1 %v6784_v55  ;;  %v7023_v5 = vsel %vm78_vm0, %v3495_v15, 0.0  ;;  %v7028_v46 = vsel %vm2320_vm6, %v6685_v17, %v2319_v3  ;;  %vm2461_vm15 = vcmp.eq.f32.partialorder %v6758_v27, inf  ;;  %v2464_v41 = vand.u32 2147483648, %v6758_v27 }
 0x22c   :  { %v6999_v62 = vpop.xlane.xlu1 %2591  ;;  %3671 = vadd.xlane.f32.xlu0 %v3670_v24  ;;  %vm2758_vm2 = vcmp.eq.f32.partialorder %v6765_v43, inf  ;;  %4035 = vrsqrt.f32 %v6824_v30  ;;  %v2314_v10 = vsel %vm2313_vm11, %v6707_v0, %v2312_v57  ;;  %v2761_v28 = vand.u32 2147483648, %v6765_v43 }
 0x22d   :  { %v7004_v55 = vpop.xlane.xlu0 %1667  ;;  %v7043_v2 = vsel %vm78_vm0, %v3651_v20, 0.0  ;;  %v1893_v3 = vsel %vm175_vm1, %v6919_v26, 0.0  ;;  %vm2760_vm5 = vcmp.eq.f32.partialorder %v6765_v43, 0.0  ;;  %v1703_v38 = vsel %vm1702_vm8, %v6668_v34, %v1701_v1 }
 0x22e   :  { %vm1704_vm6 = vcmp.eq.f32.partialorder %v6668_v34, 0.0  ;;  %v1848_v57 = vsel %vm1846_vm12, %v1847_v61, %v1845_v12  ;;  %v2163_v42 = vmul.f32 %v4020_v48, %v6725_v36  ;;  %v2618_v26 = vsel %vm2617_vm9, %v6711_v40, %v2616_v35  ;;  %s8577_s0 = spop %3791 }
 0x22f   :  { %3512 = vadd.xlane.f32.xlu1 %v6848_v52  ;;  %v4022_v52 = vpop.eup %4021  ;;  %vm2463_vm0 = vcmp.eq.f32.partialorder %v6758_v27, 0.0  ;;  %vm1709_vm11 = vcmp.eq.f32.partialorder %v6800_v13, inf  ;;  %v1892_v1 = vsel %vm175_vm1, %v6788_v58, 0.0  ;;  %v7068_v33 = vsel %vm2315_vm10, %v2316_v31, %v2314_v10  ;;  %s1604_s17 = smul.f32 0.016666668, %s8577_s0 }
 0x230   :  { %v7034_v9 = vpop.xlane.xlu1 %2892  ;;  %v4024_v60 = vpop.eup %4023  ;;  %vm1711_vm12 = vcmp.eq.f32.partialorder %v6800_v13, 0.0  ;;  %4037 = vrsqrt.f32 %v6856_v14  ;;  %v1894_v12 = vadd.f32 %v1893_v3, %v1892_v1  ;;  %v2170_v24 = vmul.f32 %v4022_v52, %v6738_v37 }
 0x231   :  { %v7040_v15 = vpop.xlane.xlu0 %2293  ;;  %v4026_v20 = vpop.eup %4025  ;;  %v2460_v48 = vmul.f32 %v4024_v60, %v6758_v27  ;;  %vm2015_vm8 = vcmp.eq.f32.partialorder %v6793_v32, inf  ;;  %4039 = vrsqrt.f32 %v6901_v54  ;;  %v1895_v0 = vsel %vm175_vm1, %v1848_v57, 0.0 }
 0x232   :  { %v4028_v35 = vpop.eup %4027  ;;  %v7083_v31 = vsel %vm2619_vm3, %v2620_v51, %v2618_v26  ;;  %v2757_v10 = vmul.f32 %v4026_v20, %v6765_v43  ;;  %v1712_v3 = vand.u32 2147483648, %v6800_v13  ;;  %4041 = vrsqrt.f32 %v6889_v16 }
 0x233   :  { %3359 = vadd.xlane.f32.xlu1 %v6879_v53  ;;  %v4030_v53 = vpop.eup %4029  ;;  %8636 = vst [vmem:[#allocation4_spill] sm:$0xff] %v7083_v31  ;;  %vm1853_vm9 = vcmp.eq.f32.partialorder %v6610_v18, 0.0  ;;  %v7092_v52 = vsel %vm2164_vm4, %v6725_v36, %v2163_v42  ;;  %vm2610_vm10 = vcmp.eq.f32.partialorder %v6819_v50, inf  ;;  %v2613_v40 = vand.u32 2147483648, %v6819_v50 }
 0x234   :  { %v7072_v61 = vpop.xlane.xlu1 %2137  ;;  %v4032_v60 = vpop.eup %4031  ;;  %v1706_v51 = vsel %vm1704_vm6, %v1705_v29, %v1703_v38  ;;  %vm2612_vm3 = vcmp.eq.f32.partialorder %v6819_v50, 0.0  ;;  %v1708_v57 = vmul.f32 %v4028_v35, %v6800_v13  ;;  %4043 = vrsqrt.f32 %v6924_v21 }
 0x235   :  { %v7078_v58 = vpop.xlane.xlu0 %2895  ;;  %v7107_v20 = vadd.f32 %v1895_v0, %v1894_v12  ;;  %v4034_v26 = vpop.eup %4033  ;;  %v7115_v34 = vsel %vm2171_vm13, %v6738_v37, %v2170_v24  ;;  %4045 = vrsqrt.f32 %v6975_v63  ;;  %v2014_v12 = vmul.f32 %v4030_v53, %v6793_v32 }
 0x236   :  { %v4036_v1 = vpop.eup %4035  ;;  %v2759_v35 = vsel %vm2758_vm2, %v6765_v43, %v2757_v10  ;;  %4047 = vrsqrt.f32 %v6932_v7  ;;  %vm2914_vm4 = vcmp.eq.f32.partialorder %v6867_v4, inf  ;;  %vm2916_vm13 = vcmp.eq.f32.partialorder %v6867_v4, 0.0 }
 0x237   :  { %3362 = vadd.xlane.f32.xlu1 %v6935_v47  ;;  %v2462_v47 = vsel %vm2461_vm15, %v6758_v27, %v2460_v48  ;;  %v2609_v48 = vmul.f32 %v4032_v60, %v6819_v50  ;;  %4049 = vrsqrt.f32 %v6966_v25  ;;  %v1710_v53 = vsel %vm1709_vm11, %v6800_v13, %v1708_v57 }
 0x238   :  { %v7105_v42 = vpop.xlane.xlu1 %2739  ;;  %v7136_v0 = vsel %vm2463_vm0, %v2464_v41, %v2462_v47  ;;  %vm1858_vm15 = vcmp.eq.f32.partialorder %v6856_v14, inf  ;;  %v2913_v10 = vmul.f32 %v4034_v26, %v6867_v4  ;;  %4051 = vrsqrt.f32 %v6999_v62 }
 0x239   :  { %v7119_v38 = vpop.xlane.xlu0 %3196  ;;  %8637 = vst [vmem:[#allocation5_spill] sm:$0xff] %v7136_v0  ;;  %v2326_v27 = vmul.f32 %v4036_v1, %v6824_v30  ;;  %v2917_v41 = vand.u32 2147483648, %v6867_v4  ;;  %4053 = vrsqrt.f32 %v7034_v9  ;;  %v7160_v26 = vsel %vm2015_vm8, %v6793_v32, %v2014_v12 }
 0x23a   :  { %v4038_v47 = vpop.eup %4037  ;;  %v2611_v43 = vsel %vm2610_vm10, %v6819_v50, %v2609_v48  ;;  %vm2468_vm2 = vcmp.eq.f32.partialorder %v6889_v16, inf  ;;  %4055 = vrsqrt.f32 %v7004_v55  ;;  %vm1867_vm6 = vcmp.eq.f32.partialorder %v6901_v54, 0.0 }
 0x23b   :  { %3518 = vadd.xlane.f32.xlu1 %v7023_v5  ;;  %v7150_v5 = vsel %vm2760_vm5, %v2761_v28, %v2759_v35  ;;  %v4040_v1 = vpop.eup %4039  ;;  %vm1865_vm5 = vcmp.eq.f32.partialorder %v6901_v54, inf  ;;  %v1713_v12 = vsel %vm1711_vm12, %v1712_v3, %v1710_v53  ;;  %v1751_v35 = vsel %vm175_vm1, %v1706_v51, 0.0 }
 0x23c   :  { %v7144_v60 = vpop.xlane.xlu1 %3040  ;;  %8638 = vst [vmem:[#allocation6_spill] sm:$0xff] %v7150_v5  ;;  %v4042_v29 = vpop.eup %4041  ;;  %v2915_v48 = vsel %vm2914_vm4, %v6867_v4, %v2913_v10  ;;  %vm2765_vm0 = vcmp.eq.f32.partialorder %v6924_v21, inf  ;;  %v1868_v24 = vand.u32 2147483648, %v6901_v54  ;;  %v1857_v13 = vmul.f32 %v4038_v47, %v6856_v14 }
 0x23d   :  { %v7155_v57 = vpop.xlane.xlu0 %1823  ;;  %v7190_v3 = vsel %vm2327_vm7, %v6824_v30, %v2326_v27  ;;  %vm2475_vm11 = vcmp.eq.f32.partialorder %v6932_v7, inf  ;;  %v1864_v28 = vmul.f32 %v4040_v1, %v6901_v54  ;;  %v1752_v50 = vadd.f32 %v1751_v35, %v6913_v45 }
 0x23e   :  { %v4044_v10 = vpop.eup %4043  ;;  %v8640_v47 = vand.u32 2147483648, %v6610_v18  ;;  %v2467_v5 = vmul.f32 %v4042_v29, %v6889_v16  ;;  %v2918_v51 = vsel %vm2916_vm13, %v2917_v41, %v2915_v48  ;;  %vm2767_vm7 = vcmp.eq.f32.partialorder %v6924_v21, 0.0 }
 0x23f   :  { %3674 = vadd.xlane.f32.xlu1 %v7043_v2  ;;  %v7184_v2 = vsel %vm2612_vm3, %v2613_v40, %v2611_v43  ;;  %v1753_v40 = vsel %vm175_vm1, %v1713_v12, 0.0  ;;  %v4046_v43 = vpop.eup %4045  ;;  %4057 = vrsqrt.f32 %v7040_v15  ;;  %vm3062_vm12 = vcmp.eq.f32.partialorder %v6975_v63, inf }
 0x240   :  { %v7180_v23 = vpop.xlane.xlu1 %1984  ;;  %8639 = vst [vmem:[#allocation7_spill] sm:$0xff] %v7184_v2  ;;  %v1855_v27 = vsel %vm1853_vm9, %v8640_v47, %v6962_v59  ;;  %v4048_v45 = vpop.eup %4047  ;;  %vm3064_vm8 = vcmp.eq.f32.partialorder %v6975_v63, 0.0  ;;  %v3065_v18 = vand.u32 2147483648, %v6975_v63  ;;  %4059 = vrsqrt.f32 %v7072_v61 }
 0x241   :  { %v7194_v53 = vpop.xlane.xlu0 %2441  ;;  %v4050_v29 = vpop.eup %4049  ;;  %v2764_v4 = vmul.f32 %v4044_v10, %v6924_v21  ;;  %vm2022_vm9 = vcmp.eq.f32.partialorder %v6966_v25, inf  ;;  %4061 = vrsqrt.f32 %v7078_v58  ;;  %v7221_v12 = vadd.f32 %v1753_v40, %v1752_v50 }
 0x242   :  { %v1859_v35 = vsel %vm1858_vm15, %v6856_v14, %v1857_v13  ;;  %v4052_v48 = vpop.eup %4051  ;;  %v7227_v47 = vsel %vm175_vm1, %v2918_v51, 0.0  ;;  %v1866_v10 = vsel %vm1865_vm5, %v6901_v54, %v1864_v28  ;;  %v3061_v1 = vmul.f32 %v4046_v43, %v6975_v63 }
 0x243   :  { %8641 = vst [vmem:[#allocation8_spill] sm:$0xff] %v7227_v47  ;;  %vm1860_vm10 = vcmp.eq.f32.partialorder %v6856_v14, 0.0  ;;  %v4054_v0 = vpop.eup %4053  ;;  %v7237_v50 = vsel %vm2468_vm2, %v6889_v16, %v2467_v5  ;;  %vm2624_vm3 = vcmp.eq.f32.partialorder %v6999_v62, inf  ;;  %v2627_v13 = vand.u32 2147483648, %v6999_v62 }
 0x244   :  { %v7214_v59 = vpop.xlane.xlu1 %2594  ;;  %8642 = vst [vmem:[#allocation9_spill] sm:$0xff] %v7237_v50  ;;  %vm1716_vm4 = vcmp.eq.f32.partialorder %v7004_v55, inf  ;;  %v4056_v51 = vpop.eup %4055  ;;  %v2474_v40 = vmul.f32 %v4048_v45, %v6932_v7  ;;  %vm2626_vm13 = vcmp.eq.f32.partialorder %v6999_v62, 0.0  ;;  %v1719_v28 = vand.u32 2147483648, %v7004_v55 }
 0x245   :  { %v7219_v41 = vpop.xlane.xlu0 %3043  ;;  %4063 = vrsqrt.f32 %v7119_v38  ;;  %vm1718_vm15 = vcmp.eq.f32.partialorder %v7004_v55, 0.0  ;;  %v2766_v5 = vsel %vm2765_vm0, %v6924_v21, %v2764_v4  ;;  %v2021_v47 = vmul.f32 %v4050_v29, %v6966_v25 }
 0x246   :  { %v8643_v45 = vand.u32 2147483648, %v6856_v14  ;;  %v7261_v31 = vsel %vm1867_vm6, %v1868_v24, %v1866_v10  ;;  %v2623_v2 = vmul.f32 %v4052_v48, %v6999_v62  ;;  %v3063_v16 = vsel %vm3062_vm12, %v6975_v63, %v3061_v1 }
 0x247   :  { %v2920_v4 = vmul.f32 %v4054_v0, %v7034_v9  ;;  %4065 = vrsqrt.f32 %v7105_v42  ;;  %vm2921_vm2 = vcmp.eq.f32.partialorder %v7034_v9, inf  ;;  %vm2923_vm5 = vcmp.eq.f32.partialorder %v7034_v9, 0.0 }
 0x248   :  { %v7246_v43 = vpop.xlane.xlu1 %3193  ;;  %v1862_v50 = vsel %vm1860_vm10, %v8643_v45, %v1859_v35  ;;  %v2924_v14 = vand.u32 2147483648, %v7034_v9  ;;  %v1715_v54 = vmul.f32 %v4056_v51, %v7004_v55  ;;  %v8644_v24 = vand.u32 2147483648, %v6924_v21 }
 0x249   :  { %v7253_v39 = vpop.xlane.xlu0 %3344  ;;  %v7282_v0 = vsel %vm2475_vm11, %v6932_v7, %v2474_v40  ;;  %vm2334_vm6 = vcmp.eq.f32.partialorder %v7040_v15, inf  ;;  %4067 = vrsqrt.f32 %v7144_v60  ;;  %v4058_v35 = vpop.eup %4057  ;;  %v3066_v48 = vsel %vm3064_vm8, %v3065_v18, %v3063_v16 }
 0x24a   :  { %v7277_v29 = vsel %vm2767_vm7, %v8644_v24, %v2766_v5  ;;  %8646 = vst [vmem:[#allocation11_spill] sm:$0xff] %v7282_v0  ;;  %v1897_v51 = vsel %vm175_vm1, %v1855_v27, 0.0  ;;  %v4060_v40 = vpop.eup %4059  ;;  %v7298_v5 = vsel %vm2022_vm9, %v6966_v25, %v2021_v47  ;;  %v2625_v45 = vsel %vm2624_vm3, %v6999_v62, %v2623_v2 }
 0x24b   :  { %8645 = vst [vmem:[#allocation10_spill] sm:$0xff] %v7277_v29  ;;  %v2922_v16 = vsel %vm2921_vm2, %v7034_v9, %v2920_v4  ;;  %vm2178_vm0 = vcmp.eq.f32.partialorder %v7072_v61, inf  ;;  %v4062_v63 = vpop.eup %4061  ;;  %vm2928_vm11 = vcmp.eq.f32.partialorder %v7078_v58, inf  ;;  %v1717_v27 = vsel %vm1716_vm4, %v7004_v55, %v1715_v54 }
 0x24c   :  { %v7286_v1 = vpop.xlane.xlu1 %1670  ;;  %v7314_v47 = vsel %vm175_vm1, %v3066_v48, 0.0  ;;  %v2333_v2 = vmul.f32 %v4058_v35, %v7040_v15  ;;  %vm2930_vm7 = vcmp.eq.f32.partialorder %v7078_v58, 0.0  ;;  %v2931_v4 = vand.u32 2147483648, %v7078_v58 }
 0x24d   :  { %4069 = vrsqrt.f32 %v7286_v1  ;;  %v7292_v21 = vpop.xlane.xlu0 %1987  ;;  %8647 = vst [vmem:[#allocation12_spill] sm:$0xff] %v7314_v47  ;;  %vm2010_vm12 = vcmp.eq.f32.partialorder %v6680_v22, 0.0  ;;  %v7324_v10 = vsel %vm2626_vm13, %v2627_v13, %v2625_v45  ;;  %v2925_v54 = vsel %vm2923_vm5, %v2924_v14, %v2922_v16 }
 0x24e   :  { %4071 = vrsqrt.f32 %v7155_v57  ;;  %vm3225_vm8 = vcmp.eq.f32.partialorder %v7119_v38, inf  ;;  %v2177_v47 = vmul.f32 %v4060_v40, %v7072_v61  ;;  %vm2772_vm9 = vcmp.eq.f32.partialorder %v7105_v42, inf }
 0x24f   :  { %v4064_v18 = vpop.eup %4063  ;;  %v2927_v29 = vmul.f32 %v4062_v63, %v7078_v58  ;;  %vm3227_vm10 = vcmp.eq.f32.partialorder %v7119_v38, 0.0  ;;  %v1720_v62 = vsel %vm1718_vm15, %v1719_v28, %v1717_v27  ;;  %vm8633_vm3 = vcmp.lt.s32.totalorder %v5037_v11, 59 }
 0x250   :  { %v7319_v24 = vpop.xlane.xlu1 %2140  ;;  %v3228_v13 = vand.u32 2147483648, %v7119_v38  ;;  %v1898_v14 = vadd.f32 %v1897_v51, %v7107_v20  ;;  %v1899_v45 = vsel %vm175_vm1, %v1862_v50, 0.0  ;;  %v7344_v16 = vsel %vm175_vm1, %v2925_v54, 0.0 }
 0x251   :  { %v7330_v35 = vpop.xlane.xlu0 %2597  ;;  %v4066_v40 = vpop.eup %4065  ;;  %8648 = vst [vmem:[#allocation13_spill] sm:$0xff] %v7344_v16  ;;  %v7349_v63 = vsel %vm2334_vm6, %v7040_v15, %v2333_v2  ;;  %4073 = vrsqrt.f32 %v7180_v23  ;;  %vm2774_vm4 = vcmp.eq.f32.partialorder %v7105_v42, 0.0  ;;  %vm3069_vm13 = vcmp.eq.f32.partialorder %v7144_v60, inf }
 0x252   :  { %v3224_v20 = vmul.f32 %v4064_v18, %v7119_v38  ;;  %vm1872_vm15 = vcmp.eq.f32.partialorder %v7155_v57, inf  ;;  %4075 = vrsqrt.f32 %v7194_v53  ;;  %v1755_v51 = vsel %vm175_vm1, %v1720_v62, 0.0 }
 0x253   :  { %v2056_v27 = vsel %vm175_vm1, %v6957_v8, 0.0  ;;  %v4068_v2 = vpop.eup %4067  ;;  %v7368_v54 = vsel %vm2178_vm0, %v7072_v61, %v2177_v47  ;;  %v2929_v18 = vsel %vm2928_vm11, %v7078_v58, %v2927_v29  ;;  %4077 = vrsqrt.f32 %v7219_v41 }
 0x254   :  { %v7353_v28 = vpop.xlane.xlu1 %2742  ;;  %vm2017_vm2 = vcmp.eq.f32.partialorder %v6793_v32, 0.0  ;;  %v2771_v62 = vmul.f32 %v4066_v40, %v7105_v42  ;;  %4079 = vrsqrt.f32 %v7214_v59  ;;  %v2057_v47 = vsel %vm175_vm1, %v6834_v56, 0.0 }
 0x255   :  { %v7360_v50 = vpop.xlane.xlu0 %3199  ;;  %vm3071_vm5 = vcmp.eq.f32.partialorder %v7144_v60, 0.0  ;;  %4081 = vrsqrt.f32 %v7246_v43  ;;  %v1756_v48 = vadd.f32 %v1755_v51, %v7221_v12  ;;  %vm1874_vm6 = vcmp.eq.f32.partialorder %v7155_v57, 0.0 }
 0x256   :  { %v2058_v40 = vadd.f32 %v2057_v47, %v2056_v27  ;;  %vm2024_vm0 = vcmp.eq.f32.partialorder %v6966_v25, 0.0  ;;  %v7391_v8 = vsel %vm2930_vm7, %v2931_v4, %v2929_v18  ;;  %v3226_v56 = vsel %vm3225_vm8, %v7119_v38, %v3224_v20 }
 0x257   :  { %v4070_v9 = vpop.eup %4069  ;;  %8649 = vst [vmem:[#allocation14_spill] sm:$0xff] %v7391_v8  ;;  %4083 = vrsqrt.f32 %v7253_v39  ;;  %v1900_v0 = vadd.f32 %v1899_v45, %v1898_v14  ;;  %v3068_v12 = vmul.f32 %v4068_v2, %v7144_v60  ;;  %vm1723_vm11 = vcmp.eq.f32.partialorder %v7286_v1, inf }
 0x258   :  { %v1722_v29 = vmul.f32 %v4070_v9, %v7286_v1  ;;  %v7384_v55 = vpop.xlane.xlu1 %3341  ;;  %v4072_v16 = vpop.eup %4071  ;;  %v1726_v51 = vand.u32 2147483648, %v7286_v1  ;;  %v8650_v58 = vand.u32 2147483648, %v6680_v22  ;;  %v2773_v20 = vsel %vm2772_vm9, %v7105_v42, %v2771_v62 }
 0x259   :  { %v7397_v9 = vpop.xlane.xlu0 %3500  ;;  %vm1725_vm7 = vcmp.eq.f32.partialorder %v7286_v1, 0.0  ;;  %v1901_v14 = vsel %vm175_vm1, %v7261_v31, 0.0  ;;  %v3229_v45 = vsel %vm3227_vm10, %v3228_v13, %v3226_v56  ;;  %vm2029_vm8 = vcmp.eq.f32.partialorder %v7180_v23, inf }
 0x25a   :  { %v2012_v4 = vsel %vm2010_vm12, %v8650_v58, %v7017_v44  ;;  %v1724_v27 = vsel %vm1723_vm11, %v7286_v1, %v1722_v29  ;;  %v1871_v2 = vmul.f32 %v4072_v16, %v7155_v57  ;;  %vm2482_vm12 = vcmp.eq.f32.partialorder %v7194_v53, inf }
 0x25b   :  { %v1727_v18 = vsel %vm1725_vm7, %v1726_v51, %v1724_v27  ;;  %vm3076_vm9 = vcmp.eq.f32.partialorder %v7219_v41, inf  ;;  %v2059_v1 = vsel %vm175_vm1, %v2012_v4, 0.0  ;;  %v4074_v13 = vpop.eup %4073  ;;  %v8651_v16 = vand.u32 2147483648, %v7105_v42 }
 0x25c   :  { %v7420_v44 = vpop.xlane.xlu1 %1826  ;;  %v1743_v31 = vsel %vm8633_vm3, %v1727_v18, 0.0  ;;  %v3070_v47 = vsel %vm3069_vm13, %v7144_v60, %v3068_v12  ;;  %v4076_v51 = vpop.eup %4075  ;;  %v7441_v58 = vsel %vm175_vm1, %v3229_v45, 0.0  ;;  %vm2031_vm10 = vcmp.eq.f32.partialorder %v7180_v23, 0.0 }
 0x25d   :  { %4085 = vrsqrt.f32 %v7420_v44  ;;  %v7426_v38 = vpop.xlane.xlu0 %2143  ;;  %v7433_v62 = vsel %vm2774_vm4, %v8651_v16, %v2773_v20  ;;  %v1757_v56 = vsel %vm175_vm1, %v1743_v31, 0.0  ;;  %8652 = vst [vmem:[#allocation15_spill] sm:$0xff] %v7441_v58  ;;  %vm2631_vm11 = vcmp.eq.f32.partialorder %v7214_v59, inf  ;;  %v4078_v20 = vpop.eup %4077 }
 0x25e   :  { %vm3078_vm7 = vcmp.eq.f32.partialorder %v7219_v41, 0.0  ;;  %4087 = vrsqrt.f32 %v7292_v21  ;;  %v1758_v42 = vadd.f32 %v1757_v56, %v1756_v48  ;;  %v1902_v4 = vadd.f32 %v1901_v14, %v1900_v0  ;;  %v4080_v48 = vpop.eup %4079 }
 0x25f   :  { %vm3218_vm4 = vcmp.eq.f32.partialorder %v7246_v43, inf  ;;  %4089 = vrsqrt.f32 %v7384_v55  ;;  %v1873_v27 = vsel %vm1872_vm15, %v7155_v57, %v1871_v2  ;;  %v8653_v45 = vand.u32 2147483648, %v6793_v32  ;;  %v4082_v22 = vpop.eup %4081 }
 0x260   :  { %v7449_v12 = vpop.xlane.xlu1 %2296  ;;  %v2060_v31 = vadd.f32 %v2059_v1, %v2058_v40  ;;  %v8654_v0 = vand.u32 2147483648, %v7144_v60  ;;  %v2028_v16 = vmul.f32 %v4074_v13, %v7180_v23  ;;  %v3221_v56 = vand.u32 2147483648, %v7246_v43  ;;  %1759 = vadd.xlane.f32.xlu0 %v1758_v42 }
 0x261   :  { %v2019_v18 = vsel %vm2017_vm2, %v8653_v45, %v7160_v26  ;;  %4091 = vrsqrt.f32 %v7397_v9  ;;  %v7466_v2 = vpop.xlane.xlu0 %2745  ;;  %v2481_v32 = vmul.f32 %v4076_v51, %v7194_v53  ;;  %vm3373_vm13 = vcmp.eq.f32.partialorder %v7253_v39, inf  ;;  %v4084_v40 = vpop.eup %4083 }
 0x262   :  { %v3073_v14 = vsel %vm3071_vm5, %v8654_v0, %v3070_v47  ;;  %4093 = vrsqrt.f32 %v7319_v24  ;;  %v8655_v60 = vand.u32 2147483648, %v6966_v25  ;;  %vm3220_vm15 = vcmp.eq.f32.partialorder %v7246_v43, 0.0 }
 0x263   :  { %v3075_v1 = vmul.f32 %v4078_v20, %v7219_v41  ;;  %4095 = vrsqrt.f32 %v7360_v50  ;;  %v8656_v13 = vand.u32 2147483648, %v7155_v57  ;;  %v2061_v51 = vsel %vm175_vm1, %v2019_v18, 0.0 }
 0x264   :  { %v2026_v26 = vsel %vm2024_vm0, %v8655_v60, %v7298_v5  ;;  %v2630_v42 = vmul.f32 %v4080_v48, %v7214_v59  ;;  %vm3375_vm2 = vcmp.eq.f32.partialorder %v7253_v39, 0.0  ;;  %v3376_v25 = vand.u32 2147483648, %v7253_v39  ;;  %v7488_v5 = vpop.xlane.xlu1 %2898 }
 0x265   :  { %v1876_v47 = vsel %vm1874_vm6, %v8656_v13, %v1873_v27  ;;  %4097 = vrsqrt.f32 %v7330_v35  ;;  %v2030_v20 = vsel %vm2029_vm8, %v7180_v23, %v2028_v16  ;;  %v3217_v45 = vmul.f32 %v4082_v22, %v7246_v43  ;;  %v7495_v57 = vpop.xlane.xlu0 %3347 }
 0x266   :  { %4099 = vrsqrt.f32 %v7353_v28  ;;  %v2063_v27 = vsel %vm175_vm1, %v2026_v26, 0.0  ;;  %v7499_v18 = vsel %vm175_vm1, %v3073_v14, 0.0  ;;  %v3372_v48 = vmul.f32 %v4084_v40, %v7253_v39 }
 0x267   :  { %8657 = vst [vmem:[#allocation16_spill] sm:$0xff] %v7499_v18  ;;  %v1903_v0 = vsel %vm175_vm1, %v1876_v47, 0.0  ;;  %v2062_v60 = vadd.f32 %v2061_v51, %v2060_v31  ;;  %v4086_v13 = vpop.eup %4085  ;;  %v7506_v16 = vsel %vm2482_vm12, %v7194_v53, %v2481_v32  ;;  %v3077_v22 = vsel %vm3076_vm9, %v7219_v41, %v3075_v1 }
 0x268   :  { %vm2036_vm5 = vcmp.eq.f32.partialorder %v7292_v21, inf  ;;  %v7516_v26 = vsel %vm2631_vm11, %v7214_v59, %v2630_v42  ;;  %v1878_v31 = vmul.f32 %v4086_v13, %v7420_v44  ;;  %v7519_v40 = vpop.xlane.xlu1 %3497  ;;  %v8658_v32 = vand.u32 2147483648, %v7180_v23  ;;  %v4088_v51 = vpop.eup %4087 }
 0x269   :  { %v7527_v1 = vadd.f32 %v2063_v27, %v2062_v60  ;;  %v3219_v14 = vsel %vm3218_vm4, %v7246_v43, %v3217_v45  ;;  %v7534_v13 = vpop.xlane.xlu0 %3656  ;;  %v1904_v18 = vadd.f32 %v1903_v0, %v1902_v4  ;;  %vm2038_vm6 = vcmp.eq.f32.partialorder %v7292_v21, 0.0  ;;  %v4090_v58 = vpop.eup %4089 }
 0x26a   :  { %v7525_v47 = vsel %vm2031_vm10, %v8658_v32, %v2030_v20  ;;  %v8659_v23 = vand.u32 2147483648, %v7219_v41  ;;  %v3374_v45 = vsel %vm3373_vm13, %v7253_v39, %v3372_v48  ;;  %vm2638_vm0 = vcmp.eq.f32.partialorder %v7330_v35, inf }
 0x26b   :  { %vm1879_vm8 = vcmp.eq.f32.partialorder %v7420_v44, inf  ;;  %v1882_v27 = vand.u32 2147483648, %v7420_v44  ;;  %v4092_v4 = vpop.eup %4091  ;;  %4101 = vrsqrt.f32 %v7426_v38  ;;  %vm1881_vm12 = vcmp.eq.f32.partialorder %v7420_v44, 0.0 }
 0x26c   :  { %v7541_v20 = vsel %vm3078_vm7, %v8659_v23, %v3077_v22  ;;  %v1880_v60 = vsel %vm1879_vm8, %v7420_v44, %v1878_v31  ;;  %v4094_v41 = vpop.eup %4093  ;;  %v3222_v22 = vsel %vm3220_vm15, %v3221_v56, %v3219_v14  ;;  %vm2185_vm9 = vcmp.eq.f32.partialorder %v7319_v24, inf  ;;  %v7558_v48 = vpop.xlane.xlu1 %1990 }
 0x26d   :  { %8660 = vst [vmem:[#allocation17_spill] sm:$0xff] %v7541_v20  ;;  %vm3232_vm10 = vcmp.eq.f32.partialorder %v7360_v50, inf  ;;  %4103 = vrsqrt.f32 %v7449_v12  ;;  %v1883_v32 = vsel %vm1881_vm12, %v1882_v27, %v1880_v60  ;;  %v4096_v23 = vpop.eup %4095  ;;  %v3377_v0 = vsel %vm3375_vm2, %v3376_v25, %v3374_v45  ;;  %v7567_v44 = vpop.xlane.xlu0 %2299 }
 0x26e   :  { %v2035_v31 = vmul.f32 %v4088_v51, %v7292_v21  ;;  %vm2779_vm11 = vcmp.eq.f32.partialorder %v7353_v28, inf  ;;  %4105 = vrsqrt.f32 %v7558_v48  ;;  %v1891_v43 = vsel %vm8633_vm3, %v1883_v32, 0.0 }
 0x26f   :  { %v4098_v56 = vpop.eup %4097  ;;  %v3365_v14 = vmul.f32 %v4090_v58, %v7384_v55  ;;  %v3528_v27 = vmul.f32 %v4092_v4, %v7397_v9  ;;  %4107 = vrsqrt.f32 %v7466_v2  ;;  %v1905_v39 = vsel %vm175_vm1, %v1891_v43, 0.0 }
 0x270   :  { %v4100_v25 = vpop.eup %4099  ;;  %vm3366_vm7 = vcmp.eq.f32.partialorder %v7384_v55, inf  ;;  %vm3529_vm4 = vcmp.eq.f32.partialorder %v7397_v9, inf  ;;  %4109 = vrsqrt.f32 %v7488_v5  ;;  %v1906_v51 = vadd.f32 %v1905_v39, %v1904_v18  ;;  %v7580_v4 = vpop.xlane.xlu1 %2444 }
 0x271   :  { %v3231_v45 = vmul.f32 %v4096_v23, %v7360_v50  ;;  %vm3531_vm13 = vcmp.eq.f32.partialorder %v7397_v9, 0.0  ;;  %v3532_v58 = vand.u32 2147483648, %v7397_v9  ;;  %4111 = vrsqrt.f32 %v7519_v40  ;;  %v7585_v43 = vpop.xlane.xlu0 %2901 }
 0x272   :  { %v2184_v60 = vmul.f32 %v4094_v41, %v7319_v24  ;;  %v2637_v32 = vmul.f32 %v4098_v56, %v7330_v35  ;;  %4113 = vrsqrt.f32 %v7534_v13  ;;  %1907 = vadd.xlane.f32.xlu1 %v1906_v51  ;;  %v2037_v18 = vsel %vm2036_vm5, %v7292_v21, %v2035_v31 }
 0x273   :  { %v2778_v23 = vmul.f32 %v4100_v25, %v7353_v28  ;;  %v3367_v39 = vsel %vm3366_vm7, %v7384_v55, %v3365_v14  ;;  %v3530_v41 = vsel %vm3529_vm4, %v7397_v9, %v3528_v27  ;;  %4115 = vrsqrt.f32 %v7495_v57 }
 0x274   :  { %vm2166_vm15 = vcmp.eq.f32.partialorder %v6725_v36, 0.0  ;;  %v7600_v56 = vsel %vm175_vm1, %v3222_v22, 0.0  ;;  %v3369_v51 = vand.u32 2147483648, %v7384_v55  ;;  %vm3234_vm2 = vcmp.eq.f32.partialorder %v7360_v50, 0.0  ;;  %v7612_v27 = vpop.xlane.xlu1 %3046 }
 0x275   :  { %8661 = vst [vmem:[#allocation18_spill] sm:$0xff] %v7600_v56  ;;  %v3235_v31 = vand.u32 2147483648, %v7360_v50  ;;  %v7606_v25 = vsel %vm175_vm1, %v3377_v0, 0.0  ;;  %vm3368_vm5 = vcmp.eq.f32.partialorder %v7384_v55, 0.0  ;;  %v3233_v14 = vsel %vm3232_vm10, %v7360_v50, %v3231_v45  ;;  %v4102_v42 = vpop.eup %4101 }
 0x276   :  { %8662 = vst [vmem:[#allocation19_spill] sm:$0xff] %v7606_v25  ;;  %v8663_v22 = vand.u32 2147483648, %v7292_v21  ;;  %v7621_v20 = vsel %vm2185_vm9, %v7319_v24, %v2184_v60  ;;  %v7626_v55 = vsel %vm2638_vm0, %v7330_v35, %v2637_v32  ;;  %v3370_v0 = vsel %vm3368_vm5, %v3369_v51, %v3367_v39  ;;  %v7630_v25 = vpop.xlane.xlu0 %3503 }
 0x277   :  { %v3533_v45 = vsel %vm3531_vm13, %v3532_v58, %v3530_v41  ;;  %v4104_v56 = vpop.eup %4103  ;;  %v7636_v21 = vsel %vm2779_vm11, %v7353_v28, %v2778_v23  ;;  %v2065_v32 = vsel %vm175_vm1, %v7525_v47, 0.0  ;;  %v7644_v9 = vsel %vm3234_vm2, %v3235_v31, %v3233_v14 }
 0x278   :  { %v2040_v29 = vsel %vm2038_vm6, %v8663_v22, %v2037_v18  ;;  %vm2173_vm6 = vcmp.eq.f32.partialorder %v6738_v37, 0.0  ;;  %v4106_v39 = vpop.eup %4105  ;;  %8664 = vst [vmem:[#allocation20_spill] sm:$0xff] %v7644_v9  ;;  %vm2786_vm0 = vcmp.eq.f32.partialorder %v7466_v2, inf  ;;  %v7650_v51 = vsel %vm175_vm1, %v3370_v0, 0.0  ;;  %v7659_v31 = vpop.xlane.xlu1 %3653 }
 0x279   :  { %v4108_v23 = vpop.eup %4107  ;;  %8665 = vst [vmem:[#allocation21_spill] sm:$0xff] %v7650_v51  ;;  %v7653_v22 = vsel %vm175_vm1, %v3533_v45, 0.0  ;;  %vm2341_vm8 = vcmp.eq.f32.partialorder %v7449_v12, inf  ;;  %vm3380_vm12 = vcmp.eq.f32.partialorder %v7495_v57, inf  ;;  %v2042_v47 = vmul.f32 %v4106_v39, %v7558_v48 }
 0x27a   :  { %8666 = vst [vmem:[#allocation22_spill] sm:$0xff] %v7653_v22  ;;  %v4110_v14 = vpop.eup %4109  ;;  %v7662_v58 = vmul.f32 %v4102_v42, %v7426_v38  ;;  %vm2192_vm9 = vcmp.eq.f32.partialorder %v7426_v38, inf  ;;  %vm3522_vm10 = vcmp.eq.f32.partialorder %v7519_v40, inf  ;;  %vm3685_vm11 = vcmp.eq.f32.partialorder %v7534_v13, inf  ;;  %v7667_v0 = vpop.xlane.xlu0 %2447 }
 0x27b   :  { %v2066_v45 = vadd.f32 %v2065_v32, %v7527_v1  ;;  %v4112_v41 = vpop.eup %4111  ;;  %vm2180_vm7 = vcmp.eq.f32.partialorder %v7072_v61, 0.0  ;;  %vm2935_vm4 = vcmp.eq.f32.partialorder %v7488_v5, inf  ;;  %4117 = vrsqrt.f32 %v7567_v44 }
 0x27c   :  { %vm2043_vm13 = vcmp.eq.f32.partialorder %v7558_v48, inf  ;;  %v2046_v42 = vand.u32 2147483648, %v7558_v48  ;;  %v2067_v39 = vsel %vm175_vm1, %v2040_v29, 0.0  ;;  %v4114_v60 = vpop.eup %4113  ;;  %v2340_v18 = vmul.f32 %v4104_v56, %v7449_v12  ;;  %v7684_v22 = vpop.xlane.xlu1 %2146 }
 0x27d   :  { %vm3382_vm2 = vcmp.eq.f32.partialorder %v7495_v57, 0.0  ;;  %4119 = vrsqrt.f32 %v7580_v4  ;;  %v2044_v1 = vsel %vm2043_vm13, %v7558_v48, %v2042_v47  ;;  %vm2045_vm5 = vcmp.eq.f32.partialorder %v7558_v48, 0.0  ;;  %v4116_v32 = vpop.eup %4115 }
 0x27e   :  { %v2785_v50 = vmul.f32 %v4108_v23, %v7466_v2  ;;  %vm3524_vm3 = vcmp.eq.f32.partialorder %v7519_v40, 0.0  ;;  %4121 = vrsqrt.f32 %v7585_v43  ;;  %v2047_v29 = vsel %vm2045_vm5, %v2046_v42, %v2044_v1  ;;  %v7695_v47 = vpop.xlane.xlu0 %3049 }
 0x27f   :  { %v8667_v56 = vand.u32 2147483648, %v6725_v36  ;;  %vm2187_vm13 = vcmp.eq.f32.partialorder %v7319_v24, 0.0  ;;  %4123 = vrsqrt.f32 %v7684_v22  ;;  %v2055_v48 = vsel %vm487_vm14, %v2047_v29, 0.0 }
 0x280   :  { %v2068_v23 = vadd.f32 %v2067_v39, %v2066_v45  ;;  %v2213_v9 = vsel %vm175_vm1, %v7008_v49, 0.0  ;;  %v2934_v42 = vmul.f32 %v4110_v14, %v7488_v5  ;;  %v3521_v1 = vmul.f32 %v4112_v41, %v7519_v40  ;;  %v7710_v49 = vpop.xlane.xlu1 %2600 }
 0x281   :  { %v2168_v51 = vsel %vm2166_vm15, %v8667_v56, %v7092_v52  ;;  %v3684_v36 = vmul.f32 %v4114_v60, %v7534_v13  ;;  %v2069_v52 = vsel %vm175_vm1, %v2055_v48, 0.0  ;;  %v3379_v56 = vmul.f32 %v4116_v32, %v7495_v57 }
 0x282   :  { %4125 = vrsqrt.f32 %v7630_v25  ;;  %v2070_v8 = vadd.f32 %v2069_v52, %v2068_v23  ;;  %v2212_v45 = vsel %vm175_vm1, %v6875_v19, 0.0  ;;  %v3525_v39 = vand.u32 2147483648, %v7519_v40  ;;  %v7719_v19 = vpop.xlane.xlu0 %3659 }
 0x283   :  { %vm3687_vm15 = vcmp.eq.f32.partialorder %v7534_v13, 0.0  ;;  %4127 = vrsqrt.f32 %v7612_v27  ;;  %v2214_v41 = vadd.f32 %v2213_v9, %v2212_v45  ;;  %v7715_v60 = vsel %vm2341_vm8, %v7449_v12, %v2340_v18 }
 0x284   :  { %v3688_v14 = vand.u32 2147483648, %v7534_v13  ;;  %4129 = vrsqrt.f32 %v7659_v31  ;;  %2071 = vadd.xlane.f32.xlu0 %v2070_v8  ;;  %v8668_v32 = vand.u32 2147483648, %v6738_v37  ;;  %v7729_v9 = vsel %vm2786_vm0, %v7466_v2, %v2785_v50  ;;  %v7754_v45 = vpop.xlane.xlu1 %3202 }
 0x285   :  { %v3523_v18 = vsel %vm3522_vm10, %v7519_v40, %v3521_v1  ;;  %v3686_v8 = vsel %vm3685_vm11, %v7534_v13, %v3684_v36  ;;  %v2215_v48 = vsel %vm175_vm1, %v2168_v51, 0.0  ;;  %v7741_v37 = vsel %vm2935_vm4, %v7488_v5, %v2934_v42  ;;  %v4118_v36 = vpop.eup %4117 }
 0x286   :  { %v2175_v29 = vsel %vm2173_vm6, %v8668_v32, %v7115_v34  ;;  %v3381_v34 = vsel %vm3380_vm12, %v7495_v57, %v3379_v56  ;;  %v8669_v23 = vand.u32 2147483648, %v7072_v61  ;;  %v2193_v42 = vsel %vm2192_vm9, %v7426_v38, %v7662_v58 }
 0x287   :  { %v2217_v56 = vsel %vm175_vm1, %v2175_v29, 0.0  ;;  %v4120_v32 = vpop.eup %4119  ;;  %v3526_v50 = vsel %vm3524_vm3, %v3525_v39, %v3523_v18  ;;  %v3689_v61 = vsel %vm3687_vm15, %v3688_v14, %v3686_v8  ;;  %vm2942_vm6 = vcmp.eq.f32.partialorder %v7585_v43, inf }
 0x288   :  { %v2182_v1 = vsel %vm2180_vm7, %v8669_v23, %v7368_v54  ;;  %v7766_v54 = vpop.xlane.xlu0 %2603  ;;  %vm2194_vm0 = vcmp.eq.f32.partialorder %v7426_v38, 0.0  ;;  %v2216_v23 = vadd.f32 %v2215_v48, %v2214_v41  ;;  %v4122_v52 = vpop.eup %4121  ;;  %v8670_v51 = vand.u32 2147483648, %v7495_v57 }
 0x289   :  { %vm2489_vm8 = vcmp.eq.f32.partialorder %v7580_v4, inf  ;;  %4131 = vrsqrt.f32 %v7667_v0  ;;  %v8671_v40 = vand.u32 2147483648, %v7319_v24  ;;  %v2219_v39 = vsel %vm175_vm1, %v2182_v1, 0.0  ;;  %v4124_v41 = vpop.eup %4123 }
 0x28a   :  { %v7773_v58 = vsel %vm3382_vm2, %v8670_v51, %v3381_v34  ;;  %vm2322_vm3 = vcmp.eq.f32.partialorder %v6685_v17, 0.0  ;;  %vm3536_vm12 = vcmp.eq.f32.partialorder %v7630_v25, inf  ;;  %v3539_v57 = vand.u32 2147483648, %v7630_v25 }
 0x28b   :  { %v2189_v13 = vsel %vm2187_vm13, %v8671_v40, %v7621_v20  ;;  %v2218_v29 = vadd.f32 %v2217_v56, %v2216_v23  ;;  %v7788_v18 = vsel %vm175_vm1, %v3526_v50, 0.0  ;;  %v7791_v8 = vsel %vm175_vm1, %v3689_v61, 0.0  ;;  %v7796_v20 = vpop.xlane.xlu1 %2302 }
 0x28c   :  { %8672 = vst [vmem:[#allocation23_spill] sm:$0xff] %v7788_v18  ;;  %8673 = vst [vmem:[#allocation24_spill] sm:$0xff] %v7791_v8  ;;  %vm3083_vm9 = vcmp.eq.f32.partialorder %v7612_v27, inf  ;;  %vm3538_vm10 = vcmp.eq.f32.partialorder %v7630_v25, 0.0  ;;  %v2198_v24 = vmul.f32 %v4124_v41, %v7684_v22  ;;  %v8674_v48 = vand.u32 2147483648, %v7426_v38  ;;  %v4126_v1 = vpop.eup %4125  ;;  %v7807_v51 = vpop.xlane.xlu0 %3205 }
 0x28d   :  { %vm2329_vm11 = vcmp.eq.f32.partialorder %v6824_v30, 0.0  ;;  %v7804_v50 = vmul.f32 %v4118_v36, %v7567_v44  ;;  %4133 = vrsqrt.f32 %v7796_v20  ;;  %v2220_v56 = vadd.f32 %v2219_v39, %v2218_v29  ;;  %v4128_v23 = vpop.eup %4127 }
 0x28e   :  { %v2196_v34 = vsel %vm2194_vm0, %v8674_v48, %v2193_v42  ;;  %v2221_v61 = vsel %vm175_vm1, %v2189_v13, 0.0  ;;  %vm2336_vm7 = vcmp.eq.f32.partialorder %v7040_v15, 0.0  ;;  %v2488_v40 = vmul.f32 %v4120_v32, %v7580_v4  ;;  %v4130_v36 = vpop.eup %4129 }
 0x28f   :  { %v2941_v38 = vmul.f32 %v4122_v52, %v7585_v43  ;;  %vm2199_vm4 = vcmp.eq.f32.partialorder %v7684_v22, inf  ;;  %v2202_v42 = vand.u32 2147483648, %v7684_v22  ;;  %vm2348_vm2 = vcmp.eq.f32.partialorder %v7567_v44, inf  ;;  %v7822_v52 = vpop.xlane.xlu1 %2748 }
 0x290   :  { %4135 = vrsqrt.f32 %v7719_v19  ;;  %v2200_v39 = vsel %vm2199_vm4, %v7684_v22, %v2198_v24  ;;  %vm2201_vm5 = vcmp.eq.f32.partialorder %v7684_v22, 0.0  ;;  %v2223_v13 = vsel %vm175_vm1, %v2196_v34, 0.0  ;;  %v7829_v22 = vpop.xlane.xlu0 %2606 }
 0x291   :  { %v3535_v41 = vmul.f32 %v4126_v1, %v7630_v25  ;;  %4137 = vrsqrt.f32 %v7695_v47  ;;  %v2203_v32 = vsel %vm2201_vm5, %v2202_v42, %v2200_v39  ;;  %v2222_v29 = vadd.f32 %v2221_v61, %v2220_v56 }
 0x292   :  { %vm2343_vm13 = vcmp.eq.f32.partialorder %v7449_v12, 0.0  ;;  %v3082_v48 = vmul.f32 %v4128_v23, %v7612_v27  ;;  %vm3678_vm15 = vcmp.eq.f32.partialorder %v7659_v31, inf  ;;  %vm3680_vm0 = vcmp.eq.f32.partialorder %v7659_v31, 0.0 }
 0x293   :  { %4139 = vrsqrt.f32 %v7710_v49  ;;  %v3677_v24 = vmul.f32 %v4130_v36, %v7659_v31  ;;  %v3681_v34 = vand.u32 2147483648, %v7659_v31  ;;  %v2211_v1 = vsel %vm487_vm14, %v2203_v32, 0.0  ;;  %v4132_v39 = vpop.eup %4131 }
 0x294   :  { %v2224_v56 = vadd.f32 %v2223_v13, %v2222_v29  ;;  %v7838_v61 = vsel %vm2489_vm8, %v7580_v4, %v2488_v40  ;;  %4141 = vrsqrt.f32 %v7754_v45  ;;  %v2225_v42 = vsel %vm175_vm1, %v2211_v1, 0.0  ;;  %v7852_v40 = vpop.xlane.xlu1 %3350 }
 0x295   :  { %v7846_v36 = vsel %vm2942_vm6, %v7585_v43, %v2941_v38  ;;  %v3537_v13 = vsel %vm3536_vm12, %v7630_v25, %v3535_v41  ;;  %4143 = vrsqrt.f32 %v7766_v54  ;;  %v7857_v29 = vsel %vm3083_vm9, %v7612_v27, %v3082_v48  ;;  %v7862_v38 = vpop.xlane.xlu0 %3052 }
 0x296   :  { %v2226_v32 = vadd.f32 %v2225_v42, %v2224_v56  ;;  %4145 = vrsqrt.f32 %v7807_v51  ;;  %v3679_v41 = vsel %vm3678_vm15, %v7659_v31, %v3677_v24  ;;  %vm3090_vm14 = vcmp.eq.f32.partialorder %v7695_v47, inf }
 0x297   :  { %vm3692_vm6 = vcmp.eq.f32.partialorder %v7719_v19, inf  ;;  %4147 = vrsqrt.f32 %v7822_v52  ;;  %v8675_v48 = vand.u32 2147483648, %v6685_v17  ;;  %v4134_v42 = vpop.eup %4133  ;;  %v7879_v14 = vsel %vm3538_vm10, %v3539_v57, %v3537_v13 }
 0x298   :  { %2227 = vadd.xlane.f32.xlu1 %v2226_v32  ;;  %8676 = vst [vmem:[#allocation25_spill] sm:$0xff] %v7879_v14  ;;  %v7882_v24 = vmul.f32 %v4132_v39, %v7667_v0  ;;  %4149 = vrsqrt.f32 %v7829_v22  ;;  %vm3694_vm8 = vcmp.eq.f32.partialorder %v7719_v19, 0.0  ;;  %v2354_v32 = vmul.f32 %v4134_v42, %v7796_v20  ;;  %v7888_v17 = vpop.xlane.xlu1 %2450 }
 0x299   :  { %v2324_v56 = vsel %vm2322_vm3, %v8675_v48, %v7028_v46  ;;  %v8677_v46 = vand.u32 2147483648, %v6824_v30  ;;  %v2368_v57 = vsel %vm175_vm1, %v6942_v6, 0.0  ;;  %v2369_v39 = vsel %vm175_vm1, %v7068_v33, 0.0  ;;  %v7902_v42 = vpop.xlane.xlu0 %3662 }
 0x29a   :  { %v4136_v13 = vpop.eup %4135  ;;  %v3682_v48 = vsel %vm3680_vm0, %v3681_v34, %v3679_v41  ;;  %vm2645_vm3 = vcmp.eq.f32.partialorder %v7710_v49, inf  ;;  %v8678_v1 = vand.u32 2147483648, %v7040_v15  ;;  %v2371_v6 = vsel %vm175_vm1, %v2324_v56, 0.0 }
 0x29b   :  { %v2331_v25 = vsel %vm2329_vm11, %v8677_v46, %v7190_v3  ;;  %v2370_v3 = vadd.f32 %v2369_v39, %v2368_v57  ;;  %v4138_v46 = vpop.eup %4137  ;;  %v8679_v33 = vand.u32 2147483648, %v7449_v12  ;;  %v2349_v34 = vsel %vm2348_vm2, %v7567_v44, %v7804_v50 }
 0x29c   :  { %v2338_v30 = vsel %vm2336_vm7, %v8678_v1, %v7349_v63  ;;  %vm2350_vm12 = vcmp.eq.f32.partialorder %v7567_v44, 0.0  ;;  %vm2355_vm9 = vcmp.eq.f32.partialorder %v7796_v20, inf  ;;  %4151 = vrsqrt.f32 %v7852_v40 }
 0x29d   :  { %v2345_v31 = vsel %vm2343_vm13, %v8679_v33, %v7715_v60  ;;  %v4140_v15 = vpop.eup %4139  ;;  %v2356_v63 = vsel %vm2355_vm9, %v7796_v20, %v2354_v32  ;;  %v2358_v1 = vand.u32 2147483648, %v7796_v20  ;;  %v2373_v41 = vsel %vm175_vm1, %v2331_v25, 0.0  ;;  %v7928_v60 = vpop.xlane.xlu1 %2904 }
 0x29e   :  { %vm3239_vm10 = vcmp.eq.f32.partialorder %v7754_v45, inf  ;;  %v3691_v12 = vmul.f32 %v4136_v13, %v7719_v19  ;;  %4153 = vrsqrt.f32 %v7862_v38  ;;  %vm2357_vm11 = vcmp.eq.f32.partialorder %v7796_v20, 0.0  ;;  %v4142_v56 = vpop.eup %4141  ;;  %v7934_v25 = vpop.xlane.xlu0 %2907 }
 0x29f   :  { %v2372_v50 = vadd.f32 %v2371_v6, %v2370_v3  ;;  %v3089_v57 = vmul.f32 %v4138_v46, %v7695_v47  ;;  %v2359_v39 = vsel %vm2357_vm11, %v2358_v1, %v2356_v63  ;;  %v2375_v33 = vsel %vm175_vm1, %v2338_v30, 0.0  ;;  %v4144_v23 = vpop.eup %4143 }
 0x2a0   :  { %vm2633_vm7 = vcmp.eq.f32.partialorder %v7214_v59, 0.0  ;;  %v2644_v13 = vmul.f32 %v4140_v15, %v7710_v49  ;;  %v8680_v20 = vand.u32 2147483648, %v7567_v44  ;;  %v4146_v46 = vpop.eup %4145  ;;  %vm2640_vm4 = vcmp.eq.f32.partialorder %v7330_v35, 0.0 }
 0x2a1   :  { %v2374_v6 = vadd.f32 %v2373_v41, %v2372_v50  ;;  %v7945_v30 = vsel %vm175_vm1, %v3682_v48, 0.0  ;;  %vm2652_vm2 = vcmp.eq.f32.partialorder %v7766_v54, inf  ;;  %vm3246_vm5 = vcmp.eq.f32.partialorder %v7807_v51, inf  ;;  %v4148_v1 = vpop.eup %4147 }
 0x2a2   :  { %v2352_v3 = vsel %vm2350_vm12, %v8680_v20, %v2349_v34  ;;  %8681 = vst [vmem:[#allocation26_spill] sm:$0xff] %v7945_v30  ;;  %v2377_v63 = vsel %vm175_vm1, %v2345_v31, 0.0  ;;  %v3693_v44 = vsel %vm3692_vm6, %v7719_v19, %v3691_v12  ;;  %4155 = vrsqrt.f32 %v7902_v42  ;;  %v7955_v34 = vpop.xlane.xlu1 %3506  ;;  %v4150_v50 = vpop.eup %4149 }
 0x2a3   :  { %vm8682_vm13 = vcmp.lt.s32.totalorder %v5037_v11, 62  ;;  %v2376_v41 = vadd.f32 %v2375_v33, %v2374_v6  ;;  %v7962_v20 = vsel %vm3090_vm14, %v7695_v47, %v3089_v57  ;;  %v3238_v31 = vmul.f32 %v4142_v56, %v7754_v45  ;;  %v7967_v15 = vpop.xlane.xlu0 %3509 }
 0x2a4   :  { %v2367_v48 = vsel %vm8682_vm13, %v2359_v39, 0.0  ;;  %vm2793_vm15 = vcmp.eq.f32.partialorder %v7822_v52, inf  ;;  %v2379_v12 = vsel %vm175_vm1, %v2352_v3, 0.0  ;;  %v2646_v32 = vsel %vm2645_vm3, %v7710_v49, %v2644_v13 }
 0x2a5   :  { %v3245_v33 = vmul.f32 %v4146_v46, %v7807_v51  ;;  %v2378_v6 = vadd.f32 %v2377_v63, %v2376_v41  ;;  %vm2647_vm0 = vcmp.eq.f32.partialorder %v7710_v49, 0.0  ;;  %v8683_v57 = vand.u32 2147483648, %v7719_v19 }
 0x2a6   :  { %v2792_v3 = vmul.f32 %v4148_v1, %v7822_v52  ;;  %4157 = vrsqrt.f32 %v7888_v17  ;;  %v2381_v8 = vsel %vm175_vm1, %v2367_v48, 0.0  ;;  %v2651_v13 = vmul.f32 %v4144_v23, %v7766_v54  ;;  %v7987_v41 = vpop.xlane.xlu1 %2751  ;;  %v4152_v39 = vpop.eup %4151 }
 0x2a7   :  { %v7979_v56 = vsel %vm3694_vm8, %v8683_v57, %v3693_v44  ;;  %vm3387_vm14 = vcmp.eq.f32.partialorder %v7852_v40, inf  ;;  %v2658_v46 = vmul.f32 %v4150_v50, %v7829_v22  ;;  %v2380_v63 = vadd.f32 %v2379_v12, %v2378_v6  ;;  %v7997_v23 = vpop.xlane.xlu0 %3055  ;;  %v8685_v6 = vld [vmem:[#allocation2_spill] sm:$0xff]  ;;  %v8687_v44 = vld [vmem:[#allocation7_spill] sm:$0xff] }
 0x2a8   :  { %8684 = vst [vmem:[#allocation27_spill] sm:$0xff] %v7979_v56  ;;  %v7992_v19 = vsel %vm3239_vm10, %v7754_v45, %v3238_v31  ;;  %vm3097_vm6 = vcmp.eq.f32.partialorder %v7862_v38, inf  ;;  %v4154_v48 = vpop.eup %4153  ;;  %v8002_v50 = vsel %vm3246_vm5, %v7807_v51, %v3245_v33  ;;  %vm3699_vm8 = vcmp.eq.f32.partialorder %v7902_v42, inf }
 0x2a9   :  { %v2382_v31 = vadd.f32 %v2381_v8, %v2380_v63  ;;  %vm2659_vm3 = vcmp.eq.f32.partialorder %v7829_v22, inf  ;;  %vm2470_vm12 = vcmp.eq.f32.partialorder %v8685_v6, 0.0  ;;  %vm2477_vm9 = vcmp.eq.f32.partialorder %v6932_v7, 0.0 }
 0x2aa   :  { %vm2484_vm10 = vcmp.eq.f32.partialorder %v7194_v53, 0.0  ;;  %v8013_v57 = vsel %vm2793_vm15, %v7822_v52, %v2792_v3  ;;  %4159 = vrsqrt.f32 %v7928_v60  ;;  %v8686_v8 = vand.u32 2147483648, %v7214_v59  ;;  %v8022_v12 = vpop.xlane.xlu1 %3353  ;;  %v8688_v59 = vld [vmem:[#allocation4_spill] sm:$0xff] }
 0x2ab   :  { %2383 = vadd.xlane.f32.xlu0 %v2382_v31  ;;  %v2660_v1 = vsel %vm2659_vm3, %v7829_v22, %v2658_v46  ;;  %vm2661_vm11 = vcmp.eq.f32.partialorder %v7829_v22, 0.0  ;;  %v2662_v3 = vand.u32 2147483648, %v7829_v22  ;;  %v2672_v56 = vsel %vm175_vm1, %v8687_v44, 0.0  ;;  %v8034_v31 = vpop.xlane.xlu0 %3665 }
 0x2ac   :  { %v2635_v63 = vsel %vm2633_vm7, %v8686_v8, %v7516_v26  ;;  %v3386_v33 = vmul.f32 %v4152_v39, %v7852_v40  ;;  %v3096_v30 = vmul.f32 %v4154_v48, %v7862_v38  ;;  %4161 = vrsqrt.f32 %v7934_v25  ;;  %v4156_v8 = vpop.eup %4155 }
 0x2ad   :  { %v2673_v26 = vsel %vm175_vm1, %v8688_v59, 0.0  ;;  %vm2496_vm7 = vcmp.eq.f32.partialorder %v7667_v0, inf  ;;  %4163 = vrsqrt.f32 %v7955_v34  ;;  %v8689_v46 = vand.u32 2147483648, %v7330_v35 }
 0x2ae   :  { %v2653_v44 = vsel %vm2652_vm2, %v7766_v54, %v2651_v13  ;;  %v2674_v48 = vadd.f32 %v2673_v26, %v2672_v56  ;;  %vm2491_vm5 = vcmp.eq.f32.partialorder %v7580_v4, 0.0  ;;  %vm2654_vm13 = vcmp.eq.f32.partialorder %v7766_v54, 0.0  ;;  %v8059_v26 = vpop.xlane.xlu1 %2754 }
 0x2af   :  { %v2642_v39 = vsel %vm2640_vm4, %v8689_v46, %v7626_v55  ;;  %v2663_v59 = vsel %vm2661_vm11, %v2662_v3, %v2660_v1  ;;  %v2675_v14 = vsel %vm175_vm1, %v7324_v10, 0.0  ;;  %v2677_v18 = vsel %vm175_vm1, %v2635_v63, 0.0 }
 0x2b0   :  { %4165 = vrsqrt.f32 %v7967_v15  ;;  %v8690_v55 = vand.u32 2147483648, %v7710_v49  ;;  %v2676_v13 = vadd.f32 %v2675_v14, %v2674_v48  ;;  %v4158_v46 = vpop.eup %4157  ;;  %v8064_v22 = vsel %vm3387_vm14, %v7852_v40, %v3386_v33  ;;  %v8074_v48 = vpop.xlane.xlu0 %3211 }
 0x2b1   :  { %v3698_v10 = vmul.f32 %v4156_v8, %v7902_v42  ;;  %4167 = vrsqrt.f32 %v8022_v12  ;;  %v2679_v1 = vsel %vm175_vm1, %v2642_v39, 0.0  ;;  %v8691_v49 = vand.u32 2147483648, %v7766_v54  ;;  %v8700_v8 = vld [vmem:[#allocation5_spill] sm:$0xff] }
 0x2b2   :  { %v2649_v56 = vsel %vm2647_vm0, %v8690_v55, %v2646_v32  ;;  %vm8692_vm4 = vcmp.lt.s32.totalorder %v5037_v11, 61  ;;  %v2678_v3 = vadd.f32 %v2677_v18, %v2676_v13  ;;  %v8079_v33 = vsel %vm3097_vm6, %v7862_v38, %v3096_v30  ;;  %v8091_v13 = vpop.xlane.xlu1 %3208 }
 0x2b3   :  { %v2656_v32 = vsel %vm2654_vm13, %v8691_v49, %v2653_v44  ;;  %v2671_v14 = vsel %vm8692_vm4, %v2663_v59, 0.0  ;;  %4169 = vrsqrt.f32 %v7987_v41  ;;  %v2681_v39 = vsel %vm175_vm1, %v2649_v56, 0.0  ;;  %v8693_v59 = vld [vmem:[#allocation9_spill] sm:$0xff] }
 0x2b4   :  { %v2502_v54 = vmul.f32 %v4158_v46, %v7888_v17  ;;  %v2680_v44 = vadd.f32 %v2679_v1, %v2678_v3  ;;  %4171 = vrsqrt.f32 %v8059_v26  ;;  %v8694_v18 = vand.u32 2147483648, %v8685_v6  ;;  %v4160_v30 = vpop.eup %4159  ;;  %v8696_v3 = vld [vmem:[#allocation11_spill] sm:$0xff] }
 0x2b5   :  { %v8096_v49 = vsel %vm3699_vm8, %v7902_v42, %v3698_v10  ;;  %v2683_v46 = vsel %vm175_vm1, %v2656_v32, 0.0  ;;  %v2685_v1 = vsel %vm175_vm1, %v2671_v14, 0.0  ;;  %vm2949_vm2 = vcmp.eq.f32.partialorder %v7928_v60, inf }
 0x2b6   :  { %v2472_v55 = vsel %vm2470_vm12, %v8694_v18, %v8693_v59  ;;  %8695 = vst [vmem:[#allocation2_spill] sm:$0xff] %v8096_v49  ;;  %vm3550_vm15 = vcmp.eq.f32.partialorder %v7967_v15, inf  ;;  %v2682_v6 = vadd.f32 %v2681_v39, %v2680_v44  ;;  %4173 = vrsqrt.f32 %v7997_v23  ;;  %v4162_v14 = vpop.eup %4161  ;;  %v8699_v39 = vld [vmem:[#allocation3_spill] sm:$0xff]  ;;  %v8127_v56 = vpop.xlane.xlu1 %2910 }
 0x2b7   :  { %v8697_v59 = vand.u32 2147483648, %v6932_v7  ;;  %v8698_v18 = vand.u32 2147483648, %v7194_v53  ;;  %vm3543_vm0 = vcmp.eq.f32.partialorder %v7955_v34, inf  ;;  %vm2503_vm14 = vcmp.eq.f32.partialorder %v7888_v17, inf  ;;  %v8129_v49 = vpop.xlane.xlu0 %3214 }
 0x2b8   :  { %v2516_v44 = vsel %vm175_vm1, %v8699_v39, 0.0  ;;  %v2517_v63 = vsel %vm175_vm1, %v8700_v8, 0.0  ;;  %v2519_v7 = vsel %vm175_vm1, %v2472_v55, 0.0  ;;  %v8701_v35 = vand.u32 2147483648, %v7580_v4 }
 0x2b9   :  { %v2479_v10 = vsel %vm2477_vm9, %v8697_v59, %v8696_v3  ;;  %v2486_v32 = vsel %vm2484_vm10, %v8698_v18, %v7506_v16  ;;  %v4164_v3 = vpop.eup %4163  ;;  %v2684_v59 = vadd.f32 %v2683_v46, %v2682_v6  ;;  %v2504_v16 = vsel %vm2503_vm14, %v7888_v17, %v2502_v54 }
 0x2ba   :  { %v2493_v53 = vsel %vm2491_vm5, %v8701_v35, %v7838_v61  ;;  %v2518_v18 = vadd.f32 %v2517_v63, %v2516_v44  ;;  %v2497_v8 = vsel %vm2496_vm7, %v7667_v0, %v7882_v24  ;;  %vm2498_vm6 = vcmp.eq.f32.partialorder %v7667_v0, 0.0  ;;  %v4166_v4 = vpop.eup %4165  ;;  %v8151_v44 = vpop.xlane.xlu1 %3356 }
 0x2bb   :  { %v2506_v55 = vand.u32 2147483648, %v7888_v17  ;;  %v2521_v46 = vsel %vm175_vm1, %v2479_v10, 0.0  ;;  %v2686_v61 = vadd.f32 %v2685_v1, %v2684_v59  ;;  %vm2505_vm8 = vcmp.eq.f32.partialorder %v7888_v17, 0.0  ;;  %v4168_v63 = vpop.eup %4167 }
 0x2bc   :  { %v2520_v35 = vadd.f32 %v2519_v7, %v2518_v18  ;;  %4175 = vrsqrt.f32 %v8034_v31  ;;  %vm2788_vm3 = vcmp.eq.f32.partialorder %v7466_v2, 0.0  ;;  %v2948_v54 = vmul.f32 %v4160_v30, %v7928_v60 }
 0x2bd   :  { %v2507_v6 = vsel %vm2505_vm8, %v2506_v55, %v2504_v16  ;;  %v2523_v24 = vsel %vm175_vm1, %v2486_v32, 0.0  ;;  %4177 = vrsqrt.f32 %v8091_v13  ;;  %vm2781_vm12 = vcmp.eq.f32.partialorder %v7353_v28, 0.0  ;;  %2687 = vadd.xlane.f32.xlu0 %v2686_v61  ;;  %v4170_v30 = vpop.eup %4169 }
 0x2be   :  { %v3542_v10 = vmul.f32 %v4164_v3, %v7955_v34  ;;  %vm3394_vm9 = vcmp.eq.f32.partialorder %v8022_v12, inf  ;;  %v8702_v17 = vand.u32 2147483648, %v7667_v0  ;;  %v2522_v39 = vadd.f32 %v2521_v46, %v2520_v35  ;;  %v4172_v59 = vpop.eup %4171  ;;  %v8709_v35 = vld [vmem:[#allocation10_spill] sm:$0xff] }
 0x2bf   :  { %vm2800_vm10 = vcmp.eq.f32.partialorder %v7987_v41, inf  ;;  %v3549_v32 = vmul.f32 %v4166_v4, %v7967_v15  ;;  %v2525_v3 = vsel %vm175_vm1, %v2493_v53, 0.0  ;;  %4179 = vrsqrt.f32 %v8074_v48 }
 0x2c0   :  { %v2500_v1 = vsel %vm2498_vm6, %v8702_v17, %v2497_v8  ;;  %v3393_v16 = vmul.f32 %v4168_v63, %v8022_v12  ;;  %vm8703_vm11 = vcmp.lt.s32.totalorder %v5037_v11, 62  ;;  %v2524_v18 = vadd.f32 %v2523_v24, %v2522_v39  ;;  %v8162_v8 = vpop.xlane.xlu0 %3668  ;;  %v4174_v4 = vpop.eup %4173 }
 0x2c1   :  { %v2515_v0 = vsel %vm8703_vm11, %v2507_v6, 0.0  ;;  %4181 = vrsqrt.f32 %v8127_v56  ;;  %v8167_v55 = vsel %vm2949_vm2, %v7928_v60, %v2948_v54  ;;  %v8170_v53 = vmul.f32 %v4162_v14, %v7934_v25  ;;  %v8181_v54 = vpop.xlane.xlu1 %3058 }
 0x2c2   :  { %v2527_v46 = vsel %vm175_vm1, %v2500_v1, 0.0  ;;  %4183 = vrsqrt.f32 %v8129_v49  ;;  %v8177_v61 = vsel %vm3543_vm0, %v7955_v34, %v3542_v10  ;;  %v2526_v63 = vadd.f32 %v2525_v3, %v2524_v18 }
 0x2c3   :  { %8704 = vst [vmem:[#allocation7_spill] sm:$0xff] %v8177_v61  ;;  %4185 = vrsqrt.f32 %v8151_v44  ;;  %vm2795_vm7 = vcmp.eq.f32.partialorder %v7822_v52, 0.0  ;;  %v8187_v14 = vsel %vm3550_vm15, %v7967_v15, %v3549_v32  ;;  %v2806_v6 = vmul.f32 %v4172_v59, %v8059_v26 }
 0x2c4   :  { %8705 = vst [vmem:[#allocation4_spill] sm:$0xff] %v8187_v14  ;;  %v2529_v24 = vsel %vm175_vm1, %v2515_v0, 0.0  ;;  %4187 = vrsqrt.f32 %v8162_v8  ;;  %v2799_v10 = vmul.f32 %v4170_v30, %v7987_v41  ;;  %v8196_v17 = vsel %vm3394_vm9, %v8022_v12, %v3393_v16  ;;  %v8208_v16 = vpop.xlane.xlu0 %3515 }
 0x2c5   :  { %v2528_v1 = vadd.f32 %v2527_v46, %v2526_v63  ;;  %vm3706_vm5 = vcmp.eq.f32.partialorder %v8034_v31, inf  ;;  %v8200_v39 = vmul.f32 %v4174_v4, %v7997_v23  ;;  %vm3253_vm13 = vcmp.eq.f32.partialorder %v8091_v13, inf  ;;  %v8210_v18 = vpop.xlane.xlu1 %3512 }
 0x2c6   :  { %v4176_v59 = vpop.eup %4175  ;;  %vm2944_vm4 = vcmp.eq.f32.partialorder %v7585_v43, 0.0  ;;  %4189 = vrsqrt.f32 %v8181_v54  ;;  %vm2807_vm2 = vcmp.eq.f32.partialorder %v8059_v26, inf  ;;  %vm2956_vm15 = vcmp.eq.f32.partialorder %v7934_v25, inf }
 0x2c7   :  { %v2530_v30 = vadd.f32 %v2529_v24, %v2528_v1  ;;  %v4178_v46 = vpop.eup %4177  ;;  %4191 = vrsqrt.f32 %v8210_v18  ;;  %v8706_v63 = vand.u32 2147483648, %v7353_v28  ;;  %v2808_v1 = vsel %vm2807_vm2, %v8059_v26, %v2806_v6 }
 0x2c8   :  { %vm2937_vm0 = vcmp.eq.f32.partialorder %v7488_v5, 0.0  ;;  %vm2951_vm14 = vcmp.eq.f32.partialorder %v7928_v60, 0.0  ;;  %vm3401_vm6 = vcmp.eq.f32.partialorder %v8151_v44, inf  ;;  %v8707_v32 = vand.u32 2147483648, %v7466_v2 }
 0x2c9   :  { %v2783_v24 = vsel %vm2781_vm12, %v8706_v63, %v7636_v21  ;;  %2531 = vadd.xlane.f32.xlu1 %v2530_v30  ;;  %v2801_v28 = vsel %vm2800_vm10, %v7987_v41, %v2799_v10  ;;  %vm2809_vm8 = vcmp.eq.f32.partialorder %v8059_v26, 0.0  ;;  %v2810_v21 = vand.u32 2147483648, %v8059_v26  ;;  %v4180_v6 = vpop.eup %4179  ;;  %v8708_v30 = vld [vmem:[#allocation6_spill] sm:$0xff] }
 0x2ca   :  { %v2790_v4 = vsel %vm2788_vm3, %v8707_v32, %v7729_v9  ;;  %v3705_v63 = vmul.f32 %v4176_v59, %v8034_v31  ;;  %v2820_v7 = vsel %vm175_vm1, %v8708_v30, 0.0  ;;  %v2821_v0 = vsel %vm175_vm1, %v8709_v35, 0.0 }
 0x2cb   :  { %v2823_v2 = vsel %vm175_vm1, %v7433_v62, 0.0  ;;  %v4182_v9 = vpop.eup %4181  ;;  %v3252_v32 = vmul.f32 %v4178_v46, %v8091_v13  ;;  %4193 = vrsqrt.f32 %v8208_v16  ;;  %v2811_v10 = vsel %vm2809_vm8, %v2810_v21, %v2808_v1  ;;  %v8256_v21 = vpop.xlane.xlu0 %3671 }
 0x2cc   :  { %v2822_v3 = vadd.f32 %v2821_v0, %v2820_v7  ;;  %v4184_v26 = vpop.eup %4183  ;;  %vm2802_vm3 = vcmp.eq.f32.partialorder %v7987_v41, 0.0  ;;  %v2825_v30 = vsel %vm175_vm1, %v2783_v24, 0.0  ;;  %v3560_v61 = vand.u32 2147483648, %v8210_v18 }
 0x2cd   :  { %v4186_v35 = vpop.eup %4185  ;;  %v8710_v62 = vand.u32 2147483648, %v7822_v52  ;;  %v8711_v7 = vand.u32 2147483648, %v7987_v41  ;;  %v8261_v24 = vsel %vm3706_vm5, %v8034_v31, %v3705_v63  ;;  %vm3260_vm12 = vcmp.eq.f32.partialorder %v8074_v48, inf  ;;  %v8268_v41 = vpop.xlane.xlu1 %3359 }
 0x2ce   :  { %v2824_v1 = vadd.f32 %v2823_v2, %v2822_v3  ;;  %v4188_v14 = vpop.eup %4187  ;;  %v3400_v59 = vmul.f32 %v4186_v35, %v8151_v44  ;;  %vm8712_vm9 = vcmp.lt.s32.totalorder %v5037_v11, 61  ;;  %vm3248_vm10 = vcmp.eq.f32.partialorder %v7807_v51, 0.0 }
 0x2cf   :  { %v2797_v46 = vsel %vm2795_vm7, %v8710_v62, %v8013_v57  ;;  %v2804_v0 = vsel %vm2802_vm3, %v8711_v7, %v2801_v28  ;;  %v2819_v52 = vsel %vm8712_vm9, %v2811_v10, 0.0  ;;  %v2827_v57 = vsel %vm175_vm1, %v2790_v4, 0.0 }
 0x2d0   :  { %v8274_v3 = vsel %vm3253_vm13, %v8091_v13, %v3252_v32  ;;  %v3259_v28 = vmul.f32 %v4180_v6, %v8074_v48  ;;  %v2962_v63 = vmul.f32 %v4182_v9, %v8127_v56  ;;  %vm3557_vm11 = vcmp.eq.f32.partialorder %v8210_v18, inf  ;;  %v4190_v62 = vpop.eup %4189 }
 0x2d1   :  { %v2826_v2 = vadd.f32 %v2825_v30, %v2824_v1  ;;  %v3266_v10 = vmul.f32 %v4184_v26, %v8129_v49  ;;  %v2829_v4 = vsel %vm175_vm1, %v2797_v46, 0.0  ;;  %v2831_v35 = vsel %vm175_vm1, %v2804_v0, 0.0  ;;  %v4192_v30 = vpop.eup %4191 }
 0x2d2   :  { %4195 = vrsqrt.f32 %v8256_v21  ;;  %vm3241_vm7 = vcmp.eq.f32.partialorder %v7754_v45, 0.0  ;;  %v8285_v32 = vmul.f32 %v4188_v14, %v8162_v8  ;;  %v2833_v9 = vsel %vm175_vm1, %v2819_v52, 0.0 }
 0x2d3   :  { %v2828_v6 = vadd.f32 %v2827_v57, %v2826_v2  ;;  %4197 = vrsqrt.f32 %v8268_v41  ;;  %vm3255_vm5 = vcmp.eq.f32.partialorder %v8091_v13, 0.0  ;;  %v8293_v26 = vsel %vm3401_vm6, %v8151_v44, %v3400_v59 }
 0x2d4   :  { %v8713_v46 = vand.u32 2147483648, %v7488_v5  ;;  %v8714_v7 = vand.u32 2147483648, %v7585_v43  ;;  %v8715_v1 = vand.u32 2147483648, %v7928_v60  ;;  %v2957_v57 = vsel %vm2956_vm15, %v7934_v25, %v8170_v53  ;;  %v8317_v43 = vpop.xlane.xlu1 %3362  ;;  %v8716_v60 = vld [vmem:[#allocation8_spill] sm:$0xff]  ;;  %v8718_v53 = vld [vmem:[#allocation14_spill] sm:$0xff] }
 0x2d5   :  { %v2830_v59 = vadd.f32 %v2829_v4, %v2828_v6  ;;  %vm2958_vm13 = vcmp.eq.f32.partialorder %v7934_v25, 0.0  ;;  %vm2963_vm2 = vcmp.eq.f32.partialorder %v8127_v56, inf  ;;  %v3556_v5 = vmul.f32 %v4192_v30, %v8210_v18  ;;  %v4194_v4 = vpop.eup %4193 }
 0x2d6   :  { %v2939_v14 = vsel %vm2937_vm0, %v8713_v46, %v7741_v37  ;;  %v2946_v0 = vsel %vm2944_vm4, %v8714_v7, %v7846_v36  ;;  %v2953_v52 = vsel %vm2951_vm14, %v8715_v1, %v8167_v55  ;;  %v2964_v37 = vsel %vm2963_vm2, %v8127_v56, %v2962_v63  ;;  %v8717_v55 = vld [vmem:[#allocation13_spill] sm:$0xff] }
 0x2d7   :  { %v2966_v36 = vand.u32 2147483648, %v8127_v56  ;;  %v2978_v2 = vadd.f32 %v8717_v55, %v8716_v60  ;;  %vm3104_vm4 = vcmp.eq.f32.partialorder %v7997_v23, inf  ;;  %v2832_v6 = vadd.f32 %v2831_v35, %v2830_v59 }
 0x2d8   :  { %vm2965_vm15 = vcmp.eq.f32.partialorder %v8127_v56, 0.0  ;;  %v2979_v46 = vsel %vm175_vm1, %v8718_v53, 0.0  ;;  %v2981_v30 = vsel %vm175_vm1, %v2939_v14, 0.0  ;;  %vm3085_vm0 = vcmp.eq.f32.partialorder %v7612_v27, 0.0 }
 0x2d9   :  { %vm3092_vm14 = vcmp.eq.f32.partialorder %v7695_v47, 0.0  ;;  %vm3099_vm6 = vcmp.eq.f32.partialorder %v7862_v38, 0.0  ;;  %v3110_v63 = vmul.f32 %v4190_v62, %v8181_v54  ;;  %v8719_v7 = vand.u32 2147483648, %v7934_v25 }
 0x2da   :  { %v2967_v1 = vsel %vm2965_vm15, %v2966_v36, %v2964_v37  ;;  %v2980_v56 = vadd.f32 %v2979_v46, %v2978_v2  ;;  %v2834_v59 = vadd.f32 %v2833_v9, %v2832_v6  ;;  %v3411_v60 = vand.u32 2147483648, %v8268_v41 }
 0x2db   :  { %v2960_v35 = vsel %vm2958_vm13, %v8719_v7, %v2957_v57  ;;  %4199 = vrsqrt.f32 %v8317_v43  ;;  %v2983_v14 = vsel %vm175_vm1, %v2946_v0, 0.0  ;;  %v8340_v55 = vmul.f32 %v4194_v4, %v8208_v16 }
 0x2dc   :  { %v8345_v62 = vsel %vm3557_vm11, %v8210_v18, %v3556_v5  ;;  %v2982_v53 = vadd.f32 %v2981_v30, %v2980_v56  ;;  %v2985_v25 = vsel %vm175_vm1, %v2953_v52, 0.0  ;;  %2835 = vadd.xlane.f32.xlu1 %v2834_v59  ;;  %vm8720_vm8 = vcmp.lt.s32.totalorder %v5037_v11, 60  ;;  %v8355_v37 = vpop.eup %4195  ;;  %v8357_v5 = vpop.xlane.xlu1 %3518  ;;  %v8727_v59 = vld [vmem:[#allocation20_spill] sm:$0xff] }
 0x2dd   :  { %v2975_v9 = vsel %vm8720_vm8, %v2967_v1, 0.0  ;;  %v2987_v57 = vsel %vm175_vm1, %v2960_v35, 0.0  ;;  %v3261_v0 = vsel %vm3260_vm12, %v8074_v48, %v3259_v28  ;;  %vm3262_vm3 = vcmp.eq.f32.partialorder %v8074_v48, 0.0  ;;  %v4198_v28 = vpop.eup %4197  ;;  %v8726_v1 = vld [vmem:[#allocation15_spill] sm:$0xff] }
 0x2de   :  { %v2984_v36 = vadd.f32 %v2983_v14, %v2982_v53  ;;  %v8721_v52 = vand.u32 2147483648, %v7754_v45  ;;  %v8722_v4 = vand.u32 2147483648, %v7807_v51  ;;  %vm3267_vm12 = vcmp.eq.f32.partialorder %v8129_v49, inf }
 0x2df   :  { %v8723_v46 = vand.u32 2147483648, %v8091_v13  ;;  %v3268_v7 = vsel %vm3267_vm12, %v8129_v49, %v3266_v10  ;;  %vm3269_vm9 = vcmp.eq.f32.partialorder %v8129_v49, 0.0  ;;  %v3270_v45 = vand.u32 2147483648, %v8129_v49 }
 0x2e0   :  { %v3243_v2 = vsel %vm3241_vm7, %v8721_v52, %v7992_v19  ;;  %v3250_v6 = vsel %vm3248_vm10, %v8722_v4, %v8002_v50  ;;  %v2986_v19 = vadd.f32 %v2985_v25, %v2984_v36  ;;  %v8724_v35 = vand.u32 2147483648, %v8074_v48  ;;  %v8725_v50 = vld [vmem:[#allocation18_spill] sm:$0xff] }
 0x2e1   :  { %v3257_v30 = vsel %vm3255_vm5, %v8723_v46, %v8274_v3  ;;  %v3282_v56 = vadd.f32 %v8726_v1, %v8725_v50  ;;  %v3283_v14 = vsel %vm175_vm1, %v8727_v59, 0.0  ;;  %vm3389_vm10 = vcmp.eq.f32.partialorder %v7852_v40, 0.0  ;;  %v8407_v46 = vpop.xlane.xlu1 %3674  ;;  %v8735_v50 = vld [vmem:[#allocation17_spill] sm:$0xff] }
 0x2e2   :  { %v3264_v51 = vsel %vm3262_vm3, %v8724_v35, %v3261_v0  ;;  %v2989_v13 = vsel %vm175_vm1, %v2975_v9, 0.0  ;;  %4201 = vrsqrt.f32 %v8357_v5  ;;  %v3271_v3 = vsel %vm3269_vm9, %v3270_v45, %v3268_v7 }
 0x2e3   :  { %v3285_v10 = vsel %vm175_vm1, %v3243_v2, 0.0  ;;  %vm3396_vm11 = vcmp.eq.f32.partialorder %v8022_v12, 0.0  ;;  %v3407_v48 = vmul.f32 %v4198_v28, %v8268_v41  ;;  %vm3408_vm7 = vcmp.eq.f32.partialorder %v8268_v41, inf }
 0x2e4   :  { %v2988_v49 = vadd.f32 %v2987_v57, %v2986_v19  ;;  %v3284_v53 = vadd.f32 %v3283_v14, %v3282_v56  ;;  %v3287_v25 = vsel %vm175_vm1, %v3250_v6, 0.0  ;;  %vm8728_vm5 = vcmp.lt.s32.totalorder %v5037_v11, 59 }
 0x2e5   :  { %v3279_v0 = vsel %vm8728_vm5, %v3271_v3, 0.0  ;;  %v3289_v9 = vsel %vm175_vm1, %v3257_v30, 0.0  ;;  %v3291_v36 = vsel %vm175_vm1, %v3264_v51, 0.0  ;;  %v8729_v52 = vand.u32 2147483648, %v7612_v27  ;;  %v4200_v28 = vpop.eup %4199 }
 0x2e6   :  { %vm3403_vm13 = vcmp.eq.f32.partialorder %v8151_v44, 0.0  ;;  %v2990_v4 = vadd.f32 %v2989_v13, %v2988_v49  ;;  %v3286_v57 = vadd.f32 %v3285_v10, %v3284_v53  ;;  %v3105_v6 = vsel %vm3104_vm4, %v7997_v23, %v8200_v39 }
 0x2e7   :  { %v3087_v2 = vsel %vm3085_vm0, %v8729_v52, %v7857_v29  ;;  %vm3106_vm2 = vcmp.eq.f32.partialorder %v7997_v23, 0.0  ;;  %v8730_v30 = vand.u32 2147483648, %v7695_v47  ;;  %v8731_v29 = vand.u32 2147483648, %v7862_v38  ;;  %v8732_v47 = vld [vmem:[#allocation12_spill] sm:$0xff] }
 0x2e8   :  { %vm3111_vm15 = vcmp.eq.f32.partialorder %v8181_v54, inf  ;;  %v3114_v39 = vand.u32 2147483648, %v8181_v54  ;;  %vm3564_vm4 = vcmp.eq.f32.partialorder %v8208_v16, inf  ;;  %2991 = vadd.xlane.f32.xlu0 %v2990_v4  ;;  %v3288_v45 = vadd.f32 %v3287_v25, %v3286_v57 }
 0x2e9   :  { %v3094_v27 = vsel %vm3092_vm14, %v8730_v30, %v7962_v20  ;;  %v3101_v7 = vsel %vm3099_vm6, %v8731_v29, %v8079_v33  ;;  %v3112_v19 = vsel %vm3111_vm15, %v8181_v54, %v3110_v63  ;;  %vm3113_vm0 = vcmp.eq.f32.partialorder %v8181_v54, 0.0  ;;  %v8733_v20 = vld [vmem:[#allocation16_spill] sm:$0xff] }
 0x2ea   :  { %v3126_v35 = vadd.f32 %v8733_v20, %v8732_v47  ;;  %vm3545_vm14 = vcmp.eq.f32.partialorder %v7955_v34, 0.0  ;;  %vm3552_vm8 = vcmp.eq.f32.partialorder %v7967_v15, 0.0  ;;  %v8734_v38 = vand.u32 2147483648, %v7997_v23  ;;  %v8743_v20 = vld [vmem:[#allocation7_spill] sm:$0xff] }
 0x2eb   :  { %v3115_v51 = vsel %vm3113_vm0, %v3114_v39, %v3112_v19  ;;  %v3127_v1 = vsel %vm175_vm1, %v8735_v50, 0.0  ;;  %v3129_v56 = vsel %vm175_vm1, %v3087_v2, 0.0  ;;  %v3414_v63 = vmul.f32 %v4200_v28, %v8317_v43  ;;  %v8741_v28 = vld [vmem:[#allocation19_spill] sm:$0xff] }
 0x2ec   :  { %v3108_v33 = vsel %vm3106_vm2, %v8734_v38, %v3105_v6  ;;  %v3290_v59 = vadd.f32 %v3289_v9, %v3288_v45  ;;  %4203 = vrsqrt.f32 %v8407_v46  ;;  %v3128_v54 = vadd.f32 %v3127_v1, %v3126_v35  ;;  %v8740_v6 = vld [vmem:[#allocation21_spill] sm:$0xff]  ;;  %v8745_v1 = vld [vmem:[#allocation4_spill] sm:$0xff] }
 0x2ed   :  { %v3293_v14 = vsel %vm175_vm1, %v3279_v0, 0.0  ;;  %vm8736_vm6 = vcmp.lt.s32.totalorder %v5037_v11, 60  ;;  %v3131_v23 = vsel %vm175_vm1, %v3094_v27, 0.0  ;;  %v3133_v3 = vsel %vm175_vm1, %v3101_v7, 0.0  ;;  %v4202_v0 = vpop.eup %4201 }
 0x2ee   :  { %v3123_v13 = vsel %vm8736_vm6, %v3115_v51, 0.0  ;;  %vm3559_vm3 = vcmp.eq.f32.partialorder %v8210_v18, 0.0  ;;  %v3292_v10 = vadd.f32 %v3291_v36, %v3290_v59  ;;  %v3130_v49 = vadd.f32 %v3129_v56, %v3128_v54 }
 0x2ef   :  { %v3135_v53 = vsel %vm175_vm1, %v3108_v33, 0.0  ;;  %v8737_v25 = vand.u32 2147483648, %v7852_v40  ;;  %v8738_v52 = vand.u32 2147483648, %v8022_v12  ;;  %v3409_v36 = vsel %vm3408_vm7, %v8268_v41, %v3407_v48 }
 0x2f0   :  { %vm3415_vm12 = vcmp.eq.f32.partialorder %v8317_v43, inf  ;;  %v3418_v4 = vand.u32 2147483648, %v8317_v43  ;;  %vm3713_vm9 = vcmp.eq.f32.partialorder %v8162_v8, inf  ;;  %v3294_v57 = vadd.f32 %v3293_v14, %v3292_v10  ;;  %v8747_v14 = vld [vmem:[#allocation23_spill] sm:$0xff] }
 0x2f1   :  { %v3391_v9 = vsel %vm3389_vm10, %v8737_v25, %v8064_v22  ;;  %v3398_v2 = vsel %vm3396_vm11, %v8738_v52, %v8196_v17  ;;  %v3132_v40 = vadd.f32 %v3131_v23, %v3130_v49  ;;  %v3416_v22 = vsel %vm3415_vm12, %v8317_v43, %v3414_v63 }
 0x2f2   :  { %vm3417_vm10 = vcmp.eq.f32.partialorder %v8317_v43, 0.0  ;;  %vm3701_vm5 = vcmp.eq.f32.partialorder %v7902_v42, 0.0  ;;  %v8739_v12 = vand.u32 2147483648, %v8151_v44  ;;  %v3430_v30 = vadd.f32 %v8741_v28, %v8740_v6  ;;  %3295 = vadd.xlane.f32.xlu0 %v3294_v57 }
 0x2f3   :  { %v3419_v48 = vsel %vm3417_vm10, %v3418_v4, %v3416_v22  ;;  %v3431_v27 = vsel %vm175_vm1, %v7773_v58, 0.0  ;;  %vm3708_vm11 = vcmp.eq.f32.partialorder %v8034_v31, 0.0  ;;  %v3570_v29 = vmul.f32 %v4202_v0, %v8357_v5 }
 0x2f4   :  { %v3405_v17 = vsel %vm3403_vm13, %v8739_v12, %v8293_v26  ;;  %v3134_v43 = vadd.f32 %v3133_v3, %v3132_v40  ;;  %vm3410_vm7 = vcmp.eq.f32.partialorder %v8268_v41, 0.0  ;;  %v3433_v7 = vsel %vm175_vm1, %v3391_v9, 0.0  ;;  %v8751_v40 = vld [vmem:[#allocation2_spill] sm:$0xff] }
 0x2f5   :  { %vm3720_vm2 = vcmp.eq.f32.partialorder %v8256_v21, inf  ;;  %v3137_v44 = vsel %vm175_vm1, %v3123_v13, 0.0  ;;  %v3412_v26 = vsel %vm3410_vm7, %v3411_v60, %v3409_v36  ;;  %vm8742_vm13 = vcmp.lt.s32.totalorder %v5037_v11, 59  ;;  %v8748_v13 = vld [vmem:[#allocation22_spill] sm:$0xff] }
 0x2f6   :  { %v3427_v58 = vsel %vm8742_vm13, %v3419_v48, 0.0  ;;  %v3432_v39 = vadd.f32 %v3431_v27, %v3430_v30  ;;  %v3136_v45 = vadd.f32 %v3135_v53, %v3134_v43  ;;  %v3435_v19 = vsel %vm175_vm1, %v3398_v2, 0.0  ;;  %v4204_v60 = vpop.eup %4203  ;;  %v8754_v27 = vld [vmem:[#allocation26_spill] sm:$0xff]  ;;  %v8756_v43 = vld [vmem:[#allocation27_spill] sm:$0xff] }
 0x2f7   :  { %v3437_v47 = vsel %vm175_vm1, %v3405_v17, 0.0  ;;  %v8744_v35 = vand.u32 2147483648, %v7955_v34  ;;  %vm3715_vm15 = vcmp.eq.f32.partialorder %v8162_v8, 0.0  ;;  %v3565_v41 = vsel %vm3564_vm4, %v8208_v16, %v8340_v55 }
 0x2f8   :  { %v3434_v33 = vadd.f32 %v3433_v7, %v3432_v39  ;;  %vm3566_vm0 = vcmp.eq.f32.partialorder %v8208_v16, 0.0  ;;  %vm3571_vm6 = vcmp.eq.f32.partialorder %v8357_v5, inf  ;;  %v3138_v51 = vadd.f32 %v3137_v44, %v3136_v45 }
 0x2f9   :  { %v3547_v38 = vsel %vm3545_vm14, %v8744_v35, %v8743_v20  ;;  %v3439_v50 = vsel %vm175_vm1, %v3412_v26, 0.0  ;;  %v8746_v34 = vand.u32 2147483648, %v7967_v15  ;;  %v3572_v63 = vsel %vm3571_vm6, %v8357_v5, %v3570_v29  ;;  %v8750_v15 = vld [vmem:[#allocation25_spill] sm:$0xff]  ;;  %v8755_v29 = vld [vmem:[#allocation24_spill] sm:$0xff]  ;;  %v1760_v35 = vpop.xlane.xlu0 %1759 }
 0x2fa   :  { %v3436_v59 = vadd.f32 %v3435_v19, %v3434_v33  ;;  %v3561_v55 = vsel %vm3559_vm3, %v3560_v61, %v8345_v62  ;;  %v3574_v54 = vand.u32 2147483648, %v8357_v5  ;;  %v3594_v23 = vadd.f32 %v8748_v13, %v8747_v14  ;;  %3139 = vadd.xlane.f32.xlu1 %v3138_v51 }
 0x2fb   :  { %v3554_v56 = vsel %vm3552_vm8, %v8746_v34, %v8745_v1  ;;  %v8749_v3 = vand.u32 2147483648, %v8208_v16  ;;  %vm3573_vm4 = vcmp.eq.f32.partialorder %v8357_v5, 0.0  ;;  %v3595_v49 = vsel %vm175_vm1, %v8750_v15, 0.0 }
 0x2fc   :  { %v3597_v53 = vsel %vm175_vm1, %v3547_v38, 0.0  ;;  %v3438_v25 = vadd.f32 %v3437_v47, %v3436_v59  ;;  %v3575_v9 = vsel %vm3573_vm4, %v3574_v54, %v3572_v63  ;;  %vm3583_vm14 = vcmp.lt.s32.totalorder %v5037_v11, 58 }
 0x2fd   :  { %v3568_v10 = vsel %vm3566_vm0, %v8749_v3, %v3565_v41  ;;  %v3596_v61 = vadd.f32 %v3595_v49, %v3594_v23  ;;  %v3719_v18 = vmul.f32 %v8355_v37, %v8256_v21  ;;  %v3726_v62 = vmul.f32 %v4204_v60, %v8407_v46 }
 0x2fe   :  { %v3441_v16 = vsel %vm175_vm1, %v3427_v58, 0.0  ;;  %v3599_v0 = vsel %vm175_vm1, %v3554_v56, 0.0  ;;  %v3714_v5 = vsel %vm3713_vm9, %v8162_v8, %v8285_v32  ;;  %v3723_v52 = vand.u32 2147483648, %v8256_v21 }
 0x2ff   :  { %v3440_v2 = vadd.f32 %v3439_v50, %v3438_v25  ;;  %v3598_v36 = vadd.f32 %v3597_v53, %v3596_v61  ;;  %v3591_v4 = vsel %vm3583_vm14, %v3575_v9, 0.0  ;;  %v3601_v37 = vsel %vm175_vm1, %v3561_v55, 0.0  ;;  %v1908_v13 = vpop.xlane.xlu1 %1907 }
 0x300   :  { %v3603_v57 = vsel %vm175_vm1, %v3568_v10, 0.0  ;;  %v8752_v22 = vand.u32 2147483648, %v7902_v42  ;;  %v8753_v32 = vand.u32 2147483648, %v8034_v31  ;;  %vm3727_vm8 = vcmp.eq.f32.partialorder %v8407_v46, inf }
 0x301   :  { %v3442_v17 = vadd.f32 %v3441_v16, %v3440_v2  ;;  %v3600_v48 = vadd.f32 %v3599_v0, %v3598_v36  ;;  %v3721_v28 = vsel %vm3720_vm2, %v8256_v21, %v3719_v18  ;;  %v3728_v30 = vsel %vm3727_vm8, %v8407_v46, %v3726_v62 }
 0x302   :  { %v3703_v12 = vsel %vm3701_vm5, %v8752_v22, %v8751_v40  ;;  %v3710_v6 = vsel %vm3708_vm11, %v8753_v32, %v8261_v24  ;;  %v3742_v42 = vadd.f32 %v8755_v29, %v8754_v27  ;;  %v3743_v7 = vsel %vm175_vm1, %v8756_v43, 0.0 }
 0x303   :  { %3443 = vadd.xlane.f32.xlu1 %v3442_v17  ;;  %v3602_v44 = vadd.f32 %v3601_v37, %v3600_v48  ;;  %vm3722_vm3 = vcmp.eq.f32.partialorder %v8256_v21, 0.0  ;;  %v3730_v31 = vand.u32 2147483648, %v8407_v46  ;;  %v3745_v24 = vsel %vm175_vm1, %v3703_v12, 0.0 }
 0x304   :  { %v3605_v26 = vsel %vm175_vm1, %v3591_v4, 0.0  ;;  %v8757_v58 = vand.u32 2147483648, %v8162_v8  ;;  %vm3729_vm12 = vcmp.eq.f32.partialorder %v8407_v46, 0.0  ;;  %v3744_v45 = vadd.f32 %v3743_v7, %v3742_v42 }
 0x305   :  { %v3604_v19 = vadd.f32 %v3603_v57, %v3602_v44  ;;  %v3731_v47 = vsel %vm3729_vm12, %v3730_v31, %v3728_v30  ;;  %v3747_v20 = vsel %vm175_vm1, %v3710_v6, 0.0  ;;  %v3724_v21 = vsel %vm3722_vm3, %v3723_v52, %v3721_v28 }
 0x306   :  { %v3717_v39 = vsel %vm3715_vm15, %v8757_v58, %v3714_v5  ;;  %v3746_v38 = vadd.f32 %v3745_v24, %v3744_v45  ;;  %v1761_v33 = vrot.slane %v1760_v35, 4  ;;  %v3739_v51 = vsel %vm3583_vm14, %v3731_v47, 0.0 }
 0x307   :  { %v3606_v41 = vadd.f32 %v3605_v26, %v3604_v19  ;;  %v3749_v60 = vsel %vm175_vm1, %v3717_v39, 0.0  ;;  %v3751_v46 = vsel %vm175_vm1, %v3724_v21, 0.0  ;;  %v3753_v56 = vsel %vm175_vm1, %v3739_v51, 0.0 }
 0x308   :  { %v3748_v50 = vadd.f32 %v3747_v20, %v3746_v38  ;;  %v1762_v8 = vadd.f32 %v1761_v33, %v1760_v35  ;;  %v1909_v23 = vrot.slane %v1908_v13, 4 }
 0x309   :  { %3607 = vadd.xlane.f32.xlu0 %v3606_v41 }
 0x30a   :  { %v3750_v1 = vadd.f32 %v3749_v60, %v3748_v50  ;;  %v1763_v34 = vrot.slane %v1762_v8, 2  ;;  %v1910_v11 = vadd.f32 %v1909_v23, %v1908_v13 }
 0x30c   :  { %v3752_v63 = vadd.f32 %v3751_v46, %v3750_v1  ;;  %v1764_v59 = vadd.f32 %v1763_v34, %v1762_v8  ;;  %v1911_v3 = vrot.slane %v1910_v11, 2 }
 0x30e   :  { %v3754_v55 = vadd.f32 %v3753_v56, %v3752_v63  ;;  %v1765_v54 = vrot.slane %v1764_v59, 1  ;;  %v1912_v10 = vadd.f32 %v1911_v3, %v1910_v11 }
 0x310   :  { %3755 = vadd.xlane.f32.xlu1 %v3754_v55  ;;  %v1766_v14 = vadd.f32 %v1765_v54, %v1764_v59  ;;  %v1913_v15 = vrot.slane %v1912_v10, 1 }
 0x311   :  { %v2072_v53 = vpop.xlane.xlu0 %2071 }
 0x312   :  { %3793 = vpush %v1766_v14  ;;  %v1914_v49 = vadd.f32 %v1913_v15, %v1912_v10  ;;  %v2073_v25 = vrot.slane %v2072_v53, 4 }
 0x314   :  { %3795 = vpush %v1914_v49  ;;  %v2074_v9 = vadd.f32 %v2073_v25, %v2072_v53 }
 0x316   :  { %v2075_v61 = vrot.slane %v2074_v9, 2 }
 0x318   :  { %v2076_v18 = vadd.f32 %v2075_v61, %v2074_v9 }
 0x31a   :  { %v2077_v62 = vrot.slane %v2076_v18, 1 }
 0x31c   :  { %v2078_v16 = vadd.f32 %v2077_v62, %v2076_v18 }
 0x31e   :  { %3797 = vpush %v2078_v16 }
 0x325   :  { %v2228_v0 = vpop.xlane.xlu1 %2227 }
 0x326   :  { %v2229_v5 = vrot.slane %v2228_v0, 4 }
 0x328   :  { %v2230_v52 = vadd.f32 %v2229_v5, %v2228_v0 }
 0x32a   :  { %v2231_v2 = vrot.slane %v2230_v52, 2 }
 0x32c   :  { %v2232_v36 = vadd.f32 %v2231_v2, %v2230_v52 }
 0x32e   :  { %v2233_v4 = vrot.slane %v2232_v36, 1 }
 0x330   :  { %v2234_v37 = vadd.f32 %v2233_v4, %v2232_v36 }
 0x332   :  { %3799 = vpush %v2234_v37 }
 0x338   :  { %v2384_v57 = vpop.xlane.xlu0 %2383 }
 0x339   :  { %v2385_v40 = vrot.slane %v2384_v57, 4 }
 0x33b   :  { %v2386_v22 = vadd.f32 %v2385_v40, %v2384_v57 }
 0x33d   :  { %v2387_v12 = vrot.slane %v2386_v22, 2 }
 0x33f   :  { %v2388_v17 = vadd.f32 %v2387_v12, %v2386_v22 }
 0x341   :  { %v2389_v48 = vrot.slane %v2388_v17, 1 }
 0x343   :  { %v2390_v32 = vadd.f32 %v2389_v48, %v2388_v17  ;;  %s8581_s14 = spop %3793 }
 0x344   :  { %s1768_s19 = smul.f32 0.016949153, %s8581_s14 }
 0x345   :  { %3801 = vpush %v2390_v32  ;;  %v8758_v32 = vlaneseq  ;;  %s8585_s16 = spop %3795 }
 0x346   :  { %s1916_s21 = smul.f32 0.016949153, %s8585_s16 }
 0x34a   :  { %v2688_v6 = vpop.xlane.xlu0 %2687 }
 0x34b   :  { %v2689_v28 = vrot.slane %v2688_v6, 4 }
 0x34d   :  { %v2690_v30 = vadd.f32 %v2689_v28, %v2688_v6  ;;  %v8565_v6 = vand.u32 127, %v8758_v32  ;;  %v202_v28 = vstv %s200_s28 }
 0x34f   :  { %v2691_v27 = vrot.slane %v2690_v30, 2  ;;  %vm201_vm1 = vcmp.eq.s32.totalorder %v8565_v6, 0  ;;  %vm357_vm9 = vcmp.eq.s32.totalorder %v8565_v6, 1  ;;  %vm521_vm10 = vcmp.eq.s32.totalorder %v8565_v6, 2  ;;  %s8589_s18 = spop %3797 }
 0x350   :  { %vm669_vm5 = vcmp.eq.s32.totalorder %v8565_v6, 3  ;;  %vm833_vm11 = vcmp.eq.s32.totalorder %v8565_v6, 4  ;;  %vm981_vm7 = vcmp.eq.s32.totalorder %v8565_v6, 5  ;;  %vm1145_vm2 = vcmp.eq.s32.totalorder %v8565_v6, 6  ;;  %s2080_s23 = smul.f32 0.015873017, %s8589_s18 }
 0x351   :  { %v2692_v7 = vadd.f32 %v2691_v27, %v2690_v30  ;;  %v358_v30 = vstv %s356_s30  ;;  %v522_v27 = vstv %s520_s4  ;;  %vm1293_vm13 = vcmp.eq.s32.totalorder %v8565_v6, 7 }
 0x352   :  { %vm1457_vm15 = vcmp.eq.s32.totalorder %v8565_v6, 8  ;;  %vm1605_vm0 = vcmp.eq.s32.totalorder %v8565_v6, 9  ;;  %vm1769_vm6 = vcmp.eq.s32.totalorder %v8565_v6, 10  ;;  %vm1917_vm4 = vcmp.eq.s32.totalorder %v8565_v6, 11 }
 0x353   :  { %v2693_v24 = vrot.slane %v2692_v7, 1  ;;  %vm2081_vm14 = vcmp.eq.s32.totalorder %v8565_v6, 12  ;;  %vm2237_vm8 = vcmp.eq.s32.totalorder %v8565_v6, 13  ;;  %vm2393_vm3 = vcmp.eq.s32.totalorder %v8565_v6, 14 }
 0x354   :  { %vm2541_vm12 = vcmp.eq.s32.totalorder %v8565_v6, 15 }
 0x355   :  { %v2694_v39 = vadd.f32 %v2693_v24, %v2692_v7  ;;  %v834_v7 = vstv %s832_s8 }
 0x356   :  { %v2532_v29 = vpop.xlane.xlu1 %2531 }
 0x357   :  { %v2533_v42 = vrot.slane %v2532_v29, 4 }
 0x359   :  { %v2534_v43 = vadd.f32 %v2533_v42, %v2532_v29  ;;  %v203_v29 = vsel %vm201_vm1, %v202_v28, 0.0  ;;  %v670_v42 = vstv %s668_s6  ;;  %vm2697_vm1 = vcmp.eq.s32.totalorder %v8565_v6, 16 }
 0x35b   :  { %v2535_v44 = vrot.slane %v2534_v43, 2 }
 0x35d   :  { %v2536_v31 = vadd.f32 %v2535_v44, %v2534_v43  ;;  %v359_v43 = vsel %vm357_vm9, %v358_v30, %v203_v29  ;;  %vm2845_vm9 = vcmp.eq.s32.totalorder %v8565_v6, 17 }
 0x35e   :  { %v523_v44 = vsel %vm521_vm10, %v522_v27, %v359_v43  ;;  %vm3001_vm10 = vcmp.eq.s32.totalorder %v8565_v6, 18 }
 0x35f   :  { %v2537_v26 = vrot.slane %v2536_v31, 1  ;;  %v671_v24 = vsel %vm669_vm5, %v670_v42, %v523_v44  ;;  %vm3149_vm5 = vcmp.eq.s32.totalorder %v8565_v6, 19 }
 0x361   :  { %v2538_v58 = vadd.f32 %v2537_v26, %v2536_v31  ;;  %v982_v31 = vstv %s980_s10  ;;  %v1146_v26 = vstv %s1144_s12 }
 0x363   :  { %3803 = vpush %v2538_v58  ;;  %s8593_s20 = spop %3799  ;;  %v835_v58 = vsel %vm833_vm11, %v834_v7, %v671_v24  ;;  %vm3305_vm11 = vcmp.eq.s32.totalorder %v8565_v6, 20 }
 0x364   :  { %3805 = vpush %v2694_v39  ;;  %v1294_v39 = vstv %s1292_s13  ;;  %s2236_s25 = smul.f32 0.015873017, %s8593_s20 }
 0x369   :  { %v2836_v45 = vpop.xlane.xlu1 %2835 }
 0x36a   :  { %v2837_v19 = vrot.slane %v2836_v45, 4 }
 0x36c   :  { %v2838_v47 = vadd.f32 %v2837_v19, %v2836_v45  ;;  %v983_v45 = vsel %vm981_vm7, %v982_v31, %v835_v58  ;;  %v1458_v19 = vstv %s1456_s15  ;;  %vm3453_vm7 = vcmp.eq.s32.totalorder %v8565_v6, 21 }
 0x36e   :  { %v2839_v20 = vrot.slane %v2838_v47, 2 }
 0x370   :  { %v2840_v35 = vadd.f32 %v2839_v20, %v2838_v47  ;;  %v1147_v47 = vsel %vm1145_vm2, %v1146_v26, %v983_v45  ;;  %v1606_v20 = vstv %s1604_s17  ;;  %vm3617_vm2 = vcmp.eq.s32.totalorder %v8565_v6, 22 }
 0x372   :  { %v2841_v38 = vrot.slane %v2840_v35, 1 }
 0x374   :  { %v2842_v41 = vadd.f32 %v2841_v38, %v2840_v35  ;;  %v1295_v35 = vsel %vm1293_vm13, %v1294_v39, %v1147_v47  ;;  %vm3765_vm13 = vcmp.eq.s32.totalorder %v8565_v6, 23 }
 0x375   :  { %v2992_v21 = vpop.xlane.xlu0 %2991  ;;  %v1459_v38 = vsel %vm1457_vm15, %v1458_v19, %v1295_v35 }
 0x376   :  { %v2993_v33 = vrot.slane %v2992_v21, 4  ;;  %3807 = vpush %v2842_v41  ;;  %s8597_s22 = spop %3801  ;;  %v1607_v41 = vsel %vm1605_vm0, %v1606_v20, %v1459_v38 }
 0x377   :  { %s2392_s1 = smul.f32 0.016129032, %s8597_s22 }
 0x378   :  { %v2994_v60 = vadd.f32 %v2993_v33, %v2992_v21  ;;  %v1770_v21 = vstv %s1768_s19  ;;  %v1918_v33 = vstv %s1916_s21 }
 0x37a   :  { %v2995_v51 = vrot.slane %v2994_v60, 2 }
 0x37c   :  { %v2996_v50 = vadd.f32 %v2995_v51, %v2994_v60  ;;  %v2082_v60 = vstv %s2080_s23  ;;  %v1771_v51 = vsel %vm1769_vm6, %v1770_v21, %v1607_v41 }
 0x37e   :  { %v2997_v1 = vrot.slane %v2996_v50, 1 }
 0x37f   :  { %v3296_v8 = vpop.xlane.xlu0 %3295 }
 0x380   :  { %v3297_v46 = vrot.slane %v3296_v8, 4  ;;  %v2998_v56 = vadd.f32 %v2997_v1, %v2996_v50  ;;  %v2238_v50 = vstv %s2236_s25 }
 0x382   :  { %v3298_v34 = vadd.f32 %v3297_v46, %v3296_v8  ;;  %3809 = vpush %v2998_v56  ;;  %v1919_v8 = vsel %vm1917_vm4, %v1918_v33, %v1771_v51  ;;  %v2394_v46 = vstv %s2392_s1 }
 0x383   :  { %v2083_v1 = vsel %vm2081_vm14, %v2082_v60, %v1919_v8 }
 0x384   :  { %v3299_v63 = vrot.slane %v3298_v34, 2  ;;  %v2239_v56 = vsel %vm2237_vm8, %v2238_v50, %v2083_v1 }
 0x386   :  { %v3300_v14 = vadd.f32 %v3299_v63, %v3298_v34  ;;  %v2395_v63 = vsel %vm2393_vm3, %v2394_v46, %v2239_v56 }
 0x387   :  { %v3140_v59 = vpop.xlane.xlu1 %3139 }
 0x388   :  { %v3141_v55 = vrot.slane %v3140_v59, 4  ;;  %v3301_v10 = vrot.slane %v3300_v14, 1 }
 0x38a   :  { %v3142_v54 = vadd.f32 %v3141_v55, %v3140_v59  ;;  %v3302_v9 = vadd.f32 %v3301_v10, %v3300_v14 }
 0x38c   :  { %v3143_v13 = vrot.slane %v3142_v54, 2 }
 0x38e   :  { %v3144_v11 = vadd.f32 %v3143_v13, %v3142_v54 }
 0x390   :  { %v3444_v23 = vpop.xlane.xlu1 %3443  ;;  %v3145_v15 = vrot.slane %v3144_v11, 1 }
 0x391   :  { %v3445_v3 = vrot.slane %v3444_v23, 4 }
 0x392   :  { %v3146_v53 = vadd.f32 %v3145_v15, %v3144_v11 }
 0x393   :  { %v3446_v49 = vadd.f32 %v3445_v3, %v3444_v23 }
 0x394   :  { %3811 = vpush %v3146_v53  ;;  %s8601_s24 = spop %3803 }
 0x395   :  { %v3447_v25 = vrot.slane %v3446_v49, 2  ;;  %3813 = vpush %v3302_v9  ;;  %s2540_s26 = smul.f32 0.016129032, %s8601_s24  ;;  %s3806_s27 = spop %3805 }
 0x396   :  { %v3608_v61 = vpop.xlane.xlu0 %3607  ;;  %s2696_s30 = smul.f32 0.016393442, %s3806_s27 }
 0x397   :  { %v3609_v18 = vrot.slane %v3608_v61, 4  ;;  %v3448_v62 = vadd.f32 %v3447_v25, %v3446_v49  ;;  %v2542_v34 = vstv %s2540_s26 }
 0x398   :  { %v2543_v59 = vsel %vm2541_vm12, %v2542_v34, %v2395_v63  ;;  %v2698_v55 = vstv %s2696_s30 }
 0x399   :  { %v3610_v16 = vadd.f32 %v3609_v18, %v3608_v61  ;;  %v3449_v0 = vrot.slane %v3448_v62, 1  ;;  %v2699_v13 = vsel %vm2697_vm1, %v2698_v55, %v2543_v59 }
 0x39b   :  { %v3611_v5 = vrot.slane %v3610_v16, 2  ;;  %v3450_v52 = vadd.f32 %v3449_v0, %v3448_v62 }
 0x39d   :  { %v3612_v2 = vadd.f32 %v3611_v5, %v3610_v16  ;;  %v3756_v36 = vpop.xlane.xlu1 %3755  ;;  %3815 = vpush %v3450_v52 }
 0x39e   :  { %v3757_v4 = vrot.slane %v3756_v36, 4 }
 0x39f   :  { %v3613_v37 = vrot.slane %v3612_v2, 1 }
 0x3a0   :  { %v3758_v57 = vadd.f32 %v3757_v4, %v3756_v36 }
 0x3a1   :  { %v3614_v40 = vadd.f32 %v3613_v37, %v3612_v2 }
 0x3a2   :  { %v3759_v22 = vrot.slane %v3758_v57, 2 }
 0x3a3   :  { %3817 = vpush %v3614_v40 }
 0x3a4   :  { %v3760_v12 = vadd.f32 %v3759_v22, %v3758_v57 }
 0x3a6   :  { %v3761_v17 = vrot.slane %v3760_v12, 1 }
 0x3a7   :  { %s3808_s28 = spop %3807 }
 0x3a8   :  { %v3762_v48 = vadd.f32 %v3761_v17, %v3760_v12  ;;  %s2844_s4 = smul.f32 0.016393442, %s3808_s28 }
 0x3aa   :  { %3819 = vpush %v3762_v48  ;;  %v2846_v54 = vstv %s2844_s4 }
 0x3ab   :  { %v2847_v11 = vsel %vm2845_vm9, %v2846_v54, %v2699_v13 }
 0x3b3   :  { %s3810_s29 = spop %3809 }
 0x3b4   :  { %s3000_s5 = smul.f32 0.016666668, %s3810_s29 }
 0x3b6   :  { %v3002_v14 = vstv %s3000_s5 }
 0x3b7   :  { %v3003_v3 = vsel %vm3001_vm10, %v3002_v14, %v2847_v11 }
 0x3c5   :  { %s3812_s3 = spop %3811 }
 0x3c6   :  { %s3148_s6 = smul.f32 0.016666668, %s3812_s3  ;;  %s3814_s7 = spop %3813 }
 0x3c7   :  { %s3304_s10 = smul.f32 0.016949153, %s3814_s7 }
 0x3c8   :  { %v3150_v23 = vstv %s3148_s6 }
 0x3c9   :  { %v3151_v10 = vsel %vm3149_vm5, %v3150_v23, %v3003_v3  ;;  %v3306_v15 = vstv %s3304_s10 }
 0x3ca   :  { %v3307_v25 = vsel %vm3305_vm11, %v3306_v15, %v3151_v10 }
 0x3ce   :  { %s3816_s8 = spop %3815 }
 0x3cf   :  { %s3452_s11 = smul.f32 0.016949153, %s3816_s8 }
 0x3d1   :  { %v3454_v49 = vstv %s3452_s11 }
 0x3d2   :  { %v3455_v9 = vsel %vm3453_vm7, %v3454_v49, %v3307_v25 }
 0x3d4   :  { %s3818_s9 = spop %3817 }
 0x3d5   :  { %s3616_s12 = smul.f32 0.01724138, %s3818_s9 }
 0x3d7   :  { %v3618_v53 = vstv %s3616_s12 }
 0x3d8   :  { %v3619_v61 = vsel %vm3617_vm2, %v3618_v53, %v3455_v9 }
 0x3db   :  { %s3820_s0 = spop %3819 }
 0x3dc   :  { %s3764_s13 = smul.f32 0.01724138, %s3820_s0 }
 0x3de   :  { %v3766_v18 = vstv %s3764_s13 }
 0x3df   :  { %v3767_v62 = vsel %vm3765_vm13, %v3766_v18, %v3619_v61 }
 0x3e0   :  { %3768 = vst [vmem:[%s8626_s2] sm:$0x1] %v3767_v62 }

</bundles_post_ra>
